<compile_context>
chip_gen: v7x
topology: tpu7x:2x2x1
jax: 0.10.0
libtpu: 0.0.40
codegen_flags: <defaults>
</compile_context>

<pallas_src>
import math

import jax
import jax.numpy as jnp
from jax import lax
from jax.experimental import pallas as pl
from jax.experimental.pallas import tpu as pltpu


# --------------------------------------------------------------------------- #
# Fused bidirectional LSTM kernel (input projection + recurrence)
#   emb_ref  : (T, bb, E)  bf16  time-major embeddings
#   wih_ref  : (E, 8H)     bf16  [W_ih_f^T | W_ih_b^T]
#   b_ref    : (1, 8H)     f32   [b_ih_f + b_hh_f | b_ih_b + b_hh_b]
#   whh_*    : (H, 4H)     bf16  W_hh^T per direction
#   len_ref  : (bb, 1)     int32 caption lengths
#   out_ref  : (T, bb, 2H) f32   per-step hidden [h_f ; h_b], zeroed past length
#   hs_ref   : (bb, 2H)    f32   final hidden [h_f ; h_b]  (== sent_emb block)
# --------------------------------------------------------------------------- #
def _bilstm_kernel(emb_ref, wih_ref, b_ref, whh_f_ref, whh_b_ref, len_ref,
                   out_ref, hs_ref,
                   gx_sc, hf_sc, cf_sc, hb_sc, cb_sc):
    T = emb_ref.shape[0]
    H = whh_f_ref.shape[0]

    # --- fused input projection for the whole (T, bb) block -------------- #
    w_ih = wih_ref[...]                   # bf16 (E, 8H), loaded once
    bias = b_ref[...]                     # f32  (1, 8H)
    for t in range(T):
        gx_sc[t] = jnp.dot(emb_ref[t], w_ih,
                           preferred_element_type=jnp.float32) + bias

    # --- recurrence state ------------------------------------------------- #
    hf_sc[...] = jnp.zeros_like(hf_sc)
    cf_sc[...] = jnp.zeros_like(cf_sc)
    hb_sc[...] = jnp.zeros_like(hb_sc)
    cb_sc[...] = jnp.zeros_like(cb_sc)

    whh_f = whh_f_ref[...]                # bf16, loaded once, reused each step
    whh_b = whh_b_ref[...]
    lens = len_ref[...]                   # (bb, 1) int32

    def sigmoid(x):                       # 1 EUP push (tanh) instead of exp+rcp
        return 0.5 * jnp.tanh(0.5 * x) + 0.5

    def cell(gates, c_prev):              # PyTorch gate order (i, f, g, o)
        i = sigmoid(gates[:, 0 * H:1 * H])
        f = sigmoid(gates[:, 1 * H:2 * H])
        g = jnp.tanh(gates[:, 2 * H:3 * H])
        o = sigmoid(gates[:, 3 * H:4 * H])
        c_new = f * c_prev + i * g
        h_new = o * jnp.tanh(c_new)
        return h_new, c_new

    # T is small and static: fully unrolled -> static ref indices, scheduler
    # visibility.  State lives in VMEM scratch; big gate intermediates spill
    # to VMEM as needed (inherent at bb=128, independent of loop form).
    for t in range(T):
        tr = T - 1 - t                                    # backward time index
        hf_prev = hf_sc[...]
        cf_prev = cf_sc[...]
        hb_prev = hb_sc[...]
        cb_prev = cb_sc[...]

        gates_f = gx_sc[t, :, 0:4 * H] + jnp.dot(
            hf_prev.astype(jnp.bfloat16), whh_f,
            preferred_element_type=jnp.float32)
        gates_b = gx_sc[tr, :, 4 * H:8 * H] + jnp.dot(
            hb_prev.astype(jnp.bfloat16), whh_b,
            preferred_element_type=jnp.float32)

        h_new_f, c_new_f = cell(gates_f, cf_prev)
        h_new_b, c_new_b = cell(gates_b, cb_prev)

        m_f = t < lens                                    # (bb, 1) bool
        m_b = tr < lens

        cf_sc[...] = jnp.where(m_f, c_new_f, cf_prev)     # state frozen past len
        hf_sc[...] = jnp.where(m_f, h_new_f, hf_prev)
        cb_sc[...] = jnp.where(m_b, c_new_b, cb_prev)
        hb_sc[...] = jnp.where(m_b, h_new_b, hb_prev)

        out_ref[t, :, 0:H] = jnp.where(m_f, h_new_f, 0.0)        # pad_packed zero
        out_ref[tr, :, H:2 * H] = jnp.where(m_b, h_new_b, 0.0)

    hs_ref[:, 0:H] = hf_sc[...]
    hs_ref[:, H:2 * H] = hb_sc[...]


def bidirectional_lstm(emb_tm, w_ih_all, b_all, whh_f_t, whh_b_t, cap_lens, *,
                       batch_block=128):
    """emb_tm: (T, B, E) bf16.  Returns ((T, B, 2H) f32, (B, 2H) f32)."""
    T, B, E = emb_tm.shape
    G = w_ih_all.shape[1]                 # 8H
    H = G // 8
    bb = B if B <= batch_block else batch_block   # full-extent or mult-of-8
    grid = (pl.cdiv(B, bb),)
    lens2d = cap_lens.astype(jnp.int32).reshape(B, 1)
    return pl.pallas_call(
        _bilstm_kernel,
        out_shape=(
            jax.ShapeDtypeStruct((T, B, 2 * H), jnp.float32),
            jax.ShapeDtypeStruct((B, 2 * H), jnp.float32),
        ),
        grid=grid,
        in_specs=[
            pl.BlockSpec((T, bb, E), lambda i: (0, i, 0)),
            pl.BlockSpec((E, G), lambda i: (0, 0)),
            pl.BlockSpec((1, G), lambda i: (0, 0)),
            pl.BlockSpec((H, 4 * H), lambda i: (0, 0)),
            pl.BlockSpec((H, 4 * H), lambda i: (0, 0)),
            pl.BlockSpec((bb, 1), lambda i: (i, 0)),
        ],
        out_specs=(
            pl.BlockSpec((T, bb, 2 * H), lambda i: (0, i, 0)),
            pl.BlockSpec((bb, 2 * H), lambda i: (i, 0)),
        ),
        scratch_shapes=[
            pltpu.VMEM((T, bb, G), jnp.float32),   # gx (fused input projection)
            pltpu.VMEM((bb, H), jnp.float32),      # h fwd
            pltpu.VMEM((bb, H), jnp.float32),      # c fwd
            pltpu.VMEM((bb, H), jnp.float32),      # h bwd
            pltpu.VMEM((bb, H), jnp.float32),      # c bwd
        ],
        compiler_params=pltpu.CompilerParams(
            dimension_semantics=("parallel",),
            vmem_limit_bytes=32 * 1024 * 1024),
    )(emb_tm, w_ih_all, b_all, whh_f_t, whh_b_t, lens2d)


# --------------------------------------------------------------------------- #
# Module wrapper (parameter setup + glue in plain JAX)
# --------------------------------------------------------------------------- #
class RNNEncoderPallas:
    def __init__(self, ntoken, ninput, nhidden, maxlen, key, *,
                 batch_block=128):
        self.ntoken = ntoken
        self.ninput = ninput
        self.num_directions = 2                        # bidirectional=True
        self.nhidden = nhidden // self.num_directions  # per-direction hidden
        self.n_steps = maxlen - 1
        self.batch_block = batch_block
        H, E = self.nhidden, ninput
        k = 1.0 / math.sqrt(H)
        ks = jax.random.split(key, 9)
        u = lambda kk, shape, lo, hi: jax.random.uniform(
            kk, shape, jnp.float32, lo, hi)
        # nn.Embedding weight: uniform(-0.1, 0.1) (init_weights)
        self.emb_table = u(ks[0], (ntoken, E), -0.1, 0.1)
        # nn.LSTM default init: uniform(-1/sqrt(H), 1/sqrt(H)), gates (i,f,g,o)
        self.w_ih_f = u(ks[1], (4 * H, E), -k, k)
        self.w_hh_f = u(ks[2], (4 * H, H), -k, k)
        self.b_ih_f = u(ks[3], (4 * H,), -k, k)
        self.b_hh_f = u(ks[4], (4 * H,), -k, k)
        self.w_ih_b = u(ks[5], (4 * H, E), -k, k)
        self.w_hh_b = u(ks[6], (4 * H, H), -k, k)
        self.b_ih_b = u(ks[7], (4 * H,), -k, k)
        self.b_hh_b = u(ks[8], (4 * H,), -k, k)

        # Kernel-ready weights precomputed ONCE (no per-call transpose /
        # concat / cast XLA passes).  bf16 only on MXU operands.
        self.w_ih_all_bf16 = jnp.concatenate(
            [self.w_ih_f.T, self.w_ih_b.T], axis=1).astype(jnp.bfloat16)
        self.b_all = jnp.concatenate(
            [self.b_ih_f + self.b_hh_f, self.b_ih_b + self.b_hh_b])[None, :]
        self.whh_f_bf16 = self.w_hh_f.T.astype(jnp.bfloat16)
        self.whh_b_bf16 = self.w_hh_b.T.astype(jnp.bfloat16)

    def __call__(self, captions, cap_lens, hidden=None):
        B, T = captions.shape
        H = self.nhidden

        # Embedding lookup, gathered time-major (T, B, E) and cast to bf16
        # (MXU-native); self.drop is identity at inference.
        # TODO(synk): training-mode dropout (drop_prob=0.5) not modeled.
        # TODO(synk): non-zero initial hidden state not modeled (init_hidden zeros).
        emb_tm = self.emb_table[captions.T].astype(jnp.bfloat16)     # (T, B, E)

        # Single fused kernel: input projection + bidirectional recurrence;
        # pack/pad emulated by in-kernel length masking; backward time reversal
        # handled by in-kernel indexing.
        output, sent_emb = bidirectional_lstm(
            emb_tm, self.w_ih_all_bf16, self.b_all,
            self.whh_f_bf16, self.whh_b_bf16, cap_lens,
            batch_block=self.batch_block)               # (T,B,2H), (B,2H)

        # Spec-mandated layout (B, nhidden, n_steps).  NOTE: this puts T(=8)
        # on the lane dim; downstream consumers should prefer the lane-dense
        # (T, B, 2H) kernel output directly when possible.
        words_emb = output.transpose(1, 2, 0)                        # (B, 2H, T)
        if words_emb.shape[2] < self.n_steps:
            pad = jnp.zeros((B, 2 * H, self.n_steps - words_emb.shape[2]),
                            jnp.float32)
            words_emb = jnp.concatenate([words_emb, pad], axis=2)

        return words_emb, sent_emb


# --------------------------------------------------------------------------- #
# Pure-JAX reference (lax.scan, f32) for correctness checking
# --------------------------------------------------------------------------- #
def _ref_forward(model, captions, cap_lens):
    B, T = captions.shape
    H = model.nhidden
    emb = model.emb_table[captions]                             # (B, T, E)
    xs = emb.transpose(1, 0, 2)                                 # (T, B, E)
    mask = (jnp.arange(T)[:, None] < cap_lens[None, :]).astype(jnp.float32)

    def run(xs, ms, w_ih, w_hh, b):
        def step(carry, inp):
            h, c = carry
            x_t, m_t = inp
            gates = x_t @ w_ih.T + h @ w_hh.T + b
            i = jax.nn.sigmoid(gates[:, :H])
            f = jax.nn.sigmoid(gates[:, H:2 * H])
            g = jnp.tanh(gates[:, 2 * H:3 * H])
            o = jax.nn.sigmoid(gates[:, 3 * H:])
            c_new = f * c + i * g
            h_new = o * jnp.tanh(c_new)
            m = m_t[:, None]
            return (m * h_new + (1 - m) * h,
                    m * c_new + (1 - m) * c), m * h_new
        init = (jnp.zeros((B, H), jnp.float32), jnp.zeros((B, H), jnp.float32))
        (hT, _), outs = lax.scan(step, init, (xs, ms))
        return outs, hT

    out_f, h_f = run(xs, mask, model.w_ih_f, model.w_hh_f,
                     model.b_ih_f + model.b_hh_f)
    out_b_rev, h_b = run(xs[::-1], mask[::-1], model.w_ih_b, model.w_hh_b,
                         model.b_ih_b + model.b_hh_b)
    out_b = out_b_rev[::-1]
    output = jnp.concatenate([out_f, out_b], -1).transpose(1, 0, 2)
    words_emb = output.transpose(0, 2, 1)
    sent_emb = jnp.concatenate([h_f, h_b], axis=1)
    return words_emb, sent_emb


if __name__ == "__main__":
    # nhidden=256 (module default) -> per-direction H=128: lane-aligned gate
    # slices and stores.  ninput=128 keeps shapes small and lane-friendly.
    NTOKEN, NINPUT, NHIDDEN, MAXLEN, B = 50, 128, 256, 9, 2
    T = MAXLEN - 1

    key = jax.random.PRNGKey(0)
    k_model, k_cap = jax.random.split(key)

    model = RNNEncoderPallas(NTOKEN, NINPUT, NHIDDEN, MAXLEN, k_model)

    captions = jax.random.randint(k_cap, (B, T), 0, NTOKEN, dtype=jnp.int32)
    # pack_padded_sequence expects lengths sorted descending.
    cap_lens = jnp.array([T, 5], dtype=jnp.int32)

    words_emb, sent_emb = model(captions, cap_lens)
    jax.block_until_ready((words_emb, sent_emb))

    assert words_emb.shape == (B, NHIDDEN, MAXLEN - 1), words_emb.shape
    assert sent_emb.shape == (B, NHIDDEN), sent_emb.shape

    # Tolerance covers bf16 MXU operands (embeddings, W_ih, W_hh, h) vs the
    # f32 reference; the recurrence accumulates bf16 rounding over T steps.
    ref_words, ref_sent = _ref_forward(model, captions, cap_lens)
    assert jnp.allclose(words_emb, ref_words, atol=2e-2, rtol=2e-2), (
        float(jnp.max(jnp.abs(words_emb - ref_words))))
    assert jnp.allclose(sent_emb, ref_sent, atol=2e-2, rtol=2e-2), (
        float(jnp.max(jnp.abs(sent_emb - ref_sent))))

    print("KERNEL_OK")
</pallas_src>

<mosaic_0001>
module attributes {stable_mosaic.version = 11 : i64} {
  func.func @_bilstm_kernel(%arg0: i32, %arg1: memref<8x2x128xbf16, #tpu.memory_space<vmem>>, %arg2: memref<128x1024xbf16, #tpu.memory_space<vmem>>, %arg3: memref<1x1024xf32, #tpu.memory_space<vmem>>, %arg4: memref<128x512xbf16, #tpu.memory_space<vmem>>, %arg5: memref<128x512xbf16, #tpu.memory_space<vmem>>, %arg6: memref<2x1xi32, #tpu.memory_space<vmem>>, %arg7: memref<8x2x256xf32, #tpu.memory_space<vmem>>, %arg8: memref<2x256xf32, #tpu.memory_space<vmem>>, %arg9: memref<8x2x1024xf32, #tpu.memory_space<vmem>>, %arg10: memref<2x128xf32, #tpu.memory_space<vmem>>, %arg11: memref<2x128xf32, #tpu.memory_space<vmem>>, %arg12: memref<2x128xf32, #tpu.memory_space<vmem>>, %arg13: memref<2x128xf32, #tpu.memory_space<vmem>>) attributes {dimension_semantics = [#tpu.dimension_semantics<parallel>], iteration_bounds = array<i64: 1>, scalar_prefetch = 0 : i64, scratch_operands = 5 : i64, tpu.core_type = #tpu.core_type<tc>, window_params = [{transform_indices = @transform_0, window_bounds = array<i64: 8, 2, 128>}, {pipeline_mode = #tpu.pipeline_mode<synchronous>, transform_indices = @transform_1, window_bounds = array<i64: 128, 1024>}, {pipeline_mode = #tpu.pipeline_mode<synchronous>, transform_indices = @transform_2, window_bounds = array<i64: 1, 1024>}, {pipeline_mode = #tpu.pipeline_mode<synchronous>, transform_indices = @transform_3, window_bounds = array<i64: 128, 512>}, {pipeline_mode = #tpu.pipeline_mode<synchronous>, transform_indices = @transform_4, window_bounds = array<i64: 128, 512>}, {transform_indices = @transform_5, window_bounds = array<i64: 2, 1>}, {transform_indices = @transform_6, window_bounds = array<i64: 8, 2, 256>}, {transform_indices = @transform_7, window_bounds = array<i64: 2, 256>}]} {
    %c0 = arith.constant 0 : index
    %c0_0 = arith.constant 0 : index
    %0 = vector.load %arg2[%c0, %c0_0] : memref<128x1024xbf16, #tpu.memory_space<vmem>>, vector<128x1024xbf16>
    %c0_1 = arith.constant 0 : index
    %c0_2 = arith.constant 0 : index
    %1 = vector.load %arg3[%c0_1, %c0_2] : memref<1x1024xf32, #tpu.memory_space<vmem>>, vector<1x1024xf32>
    %c0_3 = arith.constant 0 : index
    %c0_4 = arith.constant 0 : index
    %c0_5 = arith.constant 0 : index
    %2 = vector.load %arg1[%c0_3, %c0_4, %c0_5] : memref<8x2x128xbf16, #tpu.memory_space<vmem>>, vector<1x2x128xbf16>
    %3 = vector.shape_cast %2 : vector<1x2x128xbf16> to vector<2x128xbf16>
    %cst = arith.constant dense<0.000000e+00> : vector<2x1024xf32>
    %4 = tpu.matmul %3, %0, %cst {dimension_numbers = #tpu.dot_dimension_numbers<[1], [0], [0], [1], [0, 0, 1, 1], [], []>} : vector<2x128xbf16>, vector<128x1024xbf16>, vector<2x1024xf32> -> vector<2x1024xf32>
    %5 = vector.broadcast %1 : vector<1x1024xf32> to vector<2x1024xf32>
    %6 = arith.addf %4, %5 : vector<2x1024xf32>
    %c0_6 = arith.constant 0 : index
    %c0_7 = arith.constant 0 : index
    %c0_8 = arith.constant 0 : index
    %7 = vector.load %arg9[%c0_6, %c0_7, %c0_8] : memref<8x2x1024xf32, #tpu.memory_space<vmem>>, vector<1x2x1024xf32>
    %8 = vector.shape_cast %7 : vector<1x2x1024xf32> to vector<2x1024xf32>
    %9 = vector.shape_cast %6 : vector<2x1024xf32> to vector<1x2x1024xf32>
    tpu.vector_store %arg9[%c0_6, %c0_7, %c0_8], %9 {strides = array<i32>} : memref<8x2x1024xf32, #tpu.memory_space<vmem>>, vector<1x2x1024xf32>,
    %c1 = arith.constant 1 : index
    %c0_9 = arith.constant 0 : index
    %c0_10 = arith.constant 0 : index
    %10 = vector.load %arg1[%c1, %c0_9, %c0_10] : memref<8x2x128xbf16, #tpu.memory_space<vmem>>, vector<1x2x128xbf16>
    %11 = vector.shape_cast %10 : vector<1x2x128xbf16> to vector<2x128xbf16>
    %cst_11 = arith.constant dense<0.000000e+00> : vector<2x1024xf32>
    %12 = tpu.matmul %11, %0, %cst_11 {dimension_numbers = #tpu.dot_dimension_numbers<[1], [0], [0], [1], [0, 0, 1, 1], [], []>} : vector<2x128xbf16>, vector<128x1024xbf16>, vector<2x1024xf32> -> vector<2x1024xf32>
    %13 = vector.broadcast %1 : vector<1x1024xf32> to vector<2x1024xf32>
    %14 = arith.addf %12, %13 : vector<2x1024xf32>
    %c1_12 = arith.constant 1 : index
    %c0_13 = arith.constant 0 : index
    %c0_14 = arith.constant 0 : index
    %15 = vector.load %arg9[%c1_12, %c0_13, %c0_14] : memref<8x2x1024xf32, #tpu.memory_space<vmem>>, vector<1x2x1024xf32>
    %16 = vector.shape_cast %15 : vector<1x2x1024xf32> to vector<2x1024xf32>
    %17 = vector.shape_cast %14 : vector<2x1024xf32> to vector<1x2x1024xf32>
    tpu.vector_store %arg9[%c1_12, %c0_13, %c0_14], %17 {strides = array<i32>} : memref<8x2x1024xf32, #tpu.memory_space<vmem>>, vector<1x2x1024xf32>,
    %c2 = arith.constant 2 : index
    %c0_15 = arith.constant 0 : index
    %c0_16 = arith.constant 0 : index
    %18 = vector.load %arg1[%c2, %c0_15, %c0_16] : memref<8x2x128xbf16, #tpu.memory_space<vmem>>, vector<1x2x128xbf16>
    %19 = vector.shape_cast %18 : vector<1x2x128xbf16> to vector<2x128xbf16>
    %cst_17 = arith.constant dense<0.000000e+00> : vector<2x1024xf32>
    %20 = tpu.matmul %19, %0, %cst_17 {dimension_numbers = #tpu.dot_dimension_numbers<[1], [0], [0], [1], [0, 0, 1, 1], [], []>} : vector<2x128xbf16>, vector<128x1024xbf16>, vector<2x1024xf32> -> vector<2x1024xf32>
    %21 = vector.broadcast %1 : vector<1x1024xf32> to vector<2x1024xf32>
    %22 = arith.addf %20, %21 : vector<2x1024xf32>
    %c2_18 = arith.constant 2 : index
    %c0_19 = arith.constant 0 : index
    %c0_20 = arith.constant 0 : index
    %23 = vector.load %arg9[%c2_18, %c0_19, %c0_20] : memref<8x2x1024xf32, #tpu.memory_space<vmem>>, vector<1x2x1024xf32>
    %24 = vector.shape_cast %23 : vector<1x2x1024xf32> to vector<2x1024xf32>
    %25 = vector.shape_cast %22 : vector<2x1024xf32> to vector<1x2x1024xf32>
    tpu.vector_store %arg9[%c2_18, %c0_19, %c0_20], %25 {strides = array<i32>} : memref<8x2x1024xf32, #tpu.memory_space<vmem>>, vector<1x2x1024xf32>,
    %c3 = arith.constant 3 : index
    %c0_21 = arith.constant 0 : index
    %c0_22 = arith.constant 0 : index
    %26 = vector.load %arg1[%c3, %c0_21, %c0_22] : memref<8x2x128xbf16, #tpu.memory_space<vmem>>, vector<1x2x128xbf16>
    %27 = vector.shape_cast %26 : vector<1x2x128xbf16> to vector<2x128xbf16>
    %cst_23 = arith.constant dense<0.000000e+00> : vector<2x1024xf32>
    %28 = tpu.matmul %27, %0, %cst_23 {dimension_numbers = #tpu.dot_dimension_numbers<[1], [0], [0], [1], [0, 0, 1, 1], [], []>} : vector<2x128xbf16>, vector<128x1024xbf16>, vector<2x1024xf32> -> vector<2x1024xf32>
    %29 = vector.broadcast %1 : vector<1x1024xf32> to vector<2x1024xf32>
    %30 = arith.addf %28, %29 : vector<2x1024xf32>
    %c3_24 = arith.constant 3 : index
    %c0_25 = arith.constant 0 : index
    %c0_26 = arith.constant 0 : index
    %31 = vector.load %arg9[%c3_24, %c0_25, %c0_26] : memref<8x2x1024xf32, #tpu.memory_space<vmem>>, vector<1x2x1024xf32>
    %32 = vector.shape_cast %31 : vector<1x2x1024xf32> to vector<2x1024xf32>
    %33 = vector.shape_cast %30 : vector<2x1024xf32> to vector<1x2x1024xf32>
    tpu.vector_store %arg9[%c3_24, %c0_25, %c0_26], %33 {strides = array<i32>} : memref<8x2x1024xf32, #tpu.memory_space<vmem>>, vector<1x2x1024xf32>,
    %c4 = arith.constant 4 : index
    %c0_27 = arith.constant 0 : index
    %c0_28 = arith.constant 0 : index
    %34 = vector.load %arg1[%c4, %c0_27, %c0_28] : memref<8x2x128xbf16, #tpu.memory_space<vmem>>, vector<1x2x128xbf16>
    %35 = vector.shape_cast %34 : vector<1x2x128xbf16> to vector<2x128xbf16>
    %cst_29 = arith.constant dense<0.000000e+00> : vector<2x1024xf32>
    %36 = tpu.matmul %35, %0, %cst_29 {dimension_numbers = #tpu.dot_dimension_numbers<[1], [0], [0], [1], [0, 0, 1, 1], [], []>} : vector<2x128xbf16>, vector<128x1024xbf16>, vector<2x1024xf32> -> vector<2x1024xf32>
    %37 = vector.broadcast %1 : vector<1x1024xf32> to vector<2x1024xf32>
    %38 = arith.addf %36, %37 : vector<2x1024xf32>
    %c4_30 = arith.constant 4 : index
    %c0_31 = arith.constant 0 : index
    %c0_32 = arith.constant 0 : index
    %39 = vector.load %arg9[%c4_30, %c0_31, %c0_32] : memref<8x2x1024xf32, #tpu.memory_space<vmem>>, vector<1x2x1024xf32>
    %40 = vector.shape_cast %39 : vector<1x2x1024xf32> to vector<2x1024xf32>
    %41 = vector.shape_cast %38 : vector<2x1024xf32> to vector<1x2x1024xf32>
    tpu.vector_store %arg9[%c4_30, %c0_31, %c0_32], %41 {strides = array<i32>} : memref<8x2x1024xf32, #tpu.memory_space<vmem>>, vector<1x2x1024xf32>,
    %c5 = arith.constant 5 : index
    %c0_33 = arith.constant 0 : index
    %c0_34 = arith.constant 0 : index
    %42 = vector.load %arg1[%c5, %c0_33, %c0_34] : memref<8x2x128xbf16, #tpu.memory_space<vmem>>, vector<1x2x128xbf16>
    %43 = vector.shape_cast %42 : vector<1x2x128xbf16> to vector<2x128xbf16>
    %cst_35 = arith.constant dense<0.000000e+00> : vector<2x1024xf32>
    %44 = tpu.matmul %43, %0, %cst_35 {dimension_numbers = #tpu.dot_dimension_numbers<[1], [0], [0], [1], [0, 0, 1, 1], [], []>} : vector<2x128xbf16>, vector<128x1024xbf16>, vector<2x1024xf32> -> vector<2x1024xf32>
    %45 = vector.broadcast %1 : vector<1x1024xf32> to vector<2x1024xf32>
    %46 = arith.addf %44, %45 : vector<2x1024xf32>
    %c5_36 = arith.constant 5 : index
    %c0_37 = arith.constant 0 : index
    %c0_38 = arith.constant 0 : index
    %47 = vector.load %arg9[%c5_36, %c0_37, %c0_38] : memref<8x2x1024xf32, #tpu.memory_space<vmem>>, vector<1x2x1024xf32>
    %48 = vector.shape_cast %47 : vector<1x2x1024xf32> to vector<2x1024xf32>
    %49 = vector.shape_cast %46 : vector<2x1024xf32> to vector<1x2x1024xf32>
    tpu.vector_store %arg9[%c5_36, %c0_37, %c0_38], %49 {strides = array<i32>} : memref<8x2x1024xf32, #tpu.memory_space<vmem>>, vector<1x2x1024xf32>,
    %c6 = arith.constant 6 : index
    %c0_39 = arith.constant 0 : index
    %c0_40 = arith.constant 0 : index
    %50 = vector.load %arg1[%c6, %c0_39, %c0_40] : memref<8x2x128xbf16, #tpu.memory_space<vmem>>, vector<1x2x128xbf16>
    %51 = vector.shape_cast %50 : vector<1x2x128xbf16> to vector<2x128xbf16>
    %cst_41 = arith.constant dense<0.000000e+00> : vector<2x1024xf32>
    %52 = tpu.matmul %51, %0, %cst_41 {dimension_numbers = #tpu.dot_dimension_numbers<[1], [0], [0], [1], [0, 0, 1, 1], [], []>} : vector<2x128xbf16>, vector<128x1024xbf16>, vector<2x1024xf32> -> vector<2x1024xf32>
    %53 = vector.broadcast %1 : vector<1x1024xf32> to vector<2x1024xf32>
    %54 = arith.addf %52, %53 : vector<2x1024xf32>
    %c6_42 = arith.constant 6 : index
    %c0_43 = arith.constant 0 : index
    %c0_44 = arith.constant 0 : index
    %55 = vector.load %arg9[%c6_42, %c0_43, %c0_44] : memref<8x2x1024xf32, #tpu.memory_space<vmem>>, vector<1x2x1024xf32>
    %56 = vector.shape_cast %55 : vector<1x2x1024xf32> to vector<2x1024xf32>
    %57 = vector.shape_cast %54 : vector<2x1024xf32> to vector<1x2x1024xf32>
    tpu.vector_store %arg9[%c6_42, %c0_43, %c0_44], %57 {strides = array<i32>} : memref<8x2x1024xf32, #tpu.memory_space<vmem>>, vector<1x2x1024xf32>,
    %c7 = arith.constant 7 : index
    %c0_45 = arith.constant 0 : index
    %c0_46 = arith.constant 0 : index
    %58 = vector.load %arg1[%c7, %c0_45, %c0_46] : memref<8x2x128xbf16, #tpu.memory_space<vmem>>, vector<1x2x128xbf16>
    %59 = vector.shape_cast %58 : vector<1x2x128xbf16> to vector<2x128xbf16>
    %cst_47 = arith.constant dense<0.000000e+00> : vector<2x1024xf32>
    %60 = tpu.matmul %59, %0, %cst_47 {dimension_numbers = #tpu.dot_dimension_numbers<[1], [0], [0], [1], [0, 0, 1, 1], [], []>} : vector<2x128xbf16>, vector<128x1024xbf16>, vector<2x1024xf32> -> vector<2x1024xf32>
    %61 = vector.broadcast %1 : vector<1x1024xf32> to vector<2x1024xf32>
    %62 = arith.addf %60, %61 : vector<2x1024xf32>
    %c7_48 = arith.constant 7 : index
    %c0_49 = arith.constant 0 : index
    %c0_50 = arith.constant 0 : index
    %63 = vector.load %arg9[%c7_48, %c0_49, %c0_50] : memref<8x2x1024xf32, #tpu.memory_space<vmem>>, vector<1x2x1024xf32>
    %64 = vector.shape_cast %63 : vector<1x2x1024xf32> to vector<2x1024xf32>
    %65 = vector.shape_cast %62 : vector<2x1024xf32> to vector<1x2x1024xf32>
    tpu.vector_store %arg9[%c7_48, %c0_49, %c0_50], %65 {strides = array<i32>} : memref<8x2x1024xf32, #tpu.memory_space<vmem>>, vector<1x2x1024xf32>,
    %cst_51 = arith.constant 0.000000e+00 : f32
    %66 = vector.broadcast %cst_51 : f32 to vector<2x128xf32>
    %c0_52 = arith.constant 0 : index
    %c0_53 = arith.constant 0 : index
    %67 = vector.load %arg10[%c0_52, %c0_53] : memref<2x128xf32, #tpu.memory_space<vmem>>, vector<2x128xf32>
    tpu.vector_store %arg10[%c0_52, %c0_53], %66 {strides = array<i32>} : memref<2x128xf32, #tpu.memory_space<vmem>>, vector<2x128xf32>,
    %cst_54 = arith.constant 0.000000e+00 : f32
    %68 = vector.broadcast %cst_54 : f32 to vector<2x128xf32>
    %c0_55 = arith.constant 0 : index
    %c0_56 = arith.constant 0 : index
    %69 = vector.load %arg11[%c0_55, %c0_56] : memref<2x128xf32, #tpu.memory_space<vmem>>, vector<2x128xf32>
    tpu.vector_store %arg11[%c0_55, %c0_56], %68 {strides = array<i32>} : memref<2x128xf32, #tpu.memory_space<vmem>>, vector<2x128xf32>,
    %cst_57 = arith.constant 0.000000e+00 : f32
    %70 = vector.broadcast %cst_57 : f32 to vector<2x128xf32>
    %c0_58 = arith.constant 0 : index
    %c0_59 = arith.constant 0 : index
    %71 = vector.load %arg12[%c0_58, %c0_59] : memref<2x128xf32, #tpu.memory_space<vmem>>, vector<2x128xf32>
    tpu.vector_store %arg12[%c0_58, %c0_59], %70 {strides = array<i32>} : memref<2x128xf32, #tpu.memory_space<vmem>>, vector<2x128xf32>,
    %cst_60 = arith.constant 0.000000e+00 : f32
    %72 = vector.broadcast %cst_60 : f32 to vector<2x128xf32>
    %c0_61 = arith.constant 0 : index
    %c0_62 = arith.constant 0 : index
    %73 = vector.load %arg13[%c0_61, %c0_62] : memref<2x128xf32, #tpu.memory_space<vmem>>, vector<2x128xf32>
    tpu.vector_store %arg13[%c0_61, %c0_62], %72 {strides = array<i32>} : memref<2x128xf32, #tpu.memory_space<vmem>>, vector<2x128xf32>,
    %c0_63 = arith.constant 0 : index
    %c0_64 = arith.constant 0 : index
    %74 = vector.load %arg4[%c0_63, %c0_64] : memref<128x512xbf16, #tpu.memory_space<vmem>>, vector<128x512xbf16>
    %c0_65 = arith.constant 0 : index
    %c0_66 = arith.constant 0 : index
    %75 = vector.load %arg5[%c0_65, %c0_66] : memref<128x512xbf16, #tpu.memory_space<vmem>>, vector<128x512xbf16>
    %c0_67 = arith.constant 0 : index
    %c0_68 = arith.constant 0 : index
    %76 = vector.load %arg6[%c0_67, %c0_68] : memref<2x1xi32, #tpu.memory_space<vmem>>, vector<2x1xi32>
    %c0_69 = arith.constant 0 : index
    %c0_70 = arith.constant 0 : index
    %77 = vector.load %arg10[%c0_69, %c0_70] : memref<2x128xf32, #tpu.memory_space<vmem>>, vector<2x128xf32>
    %c0_71 = arith.constant 0 : index
    %c0_72 = arith.constant 0 : index
    %78 = vector.load %arg11[%c0_71, %c0_72] : memref<2x128xf32, #tpu.memory_space<vmem>>, vector<2x128xf32>
    %c0_73 = arith.constant 0 : index
    %c0_74 = arith.constant 0 : index
    %79 = vector.load %arg12[%c0_73, %c0_74] : memref<2x128xf32, #tpu.memory_space<vmem>>, vector<2x128xf32>
    %c0_75 = arith.constant 0 : index
    %c0_76 = arith.constant 0 : index
    %80 = vector.load %arg13[%c0_75, %c0_76] : memref<2x128xf32, #tpu.memory_space<vmem>>, vector<2x128xf32>
    %c0_77 = arith.constant 0 : index
    %c0_78 = arith.constant 0 : index
    %c0_79 = arith.constant 0 : index
    %81 = vector.load %arg9[%c0_77, %c0_78, %c0_79] : memref<8x2x1024xf32, #tpu.memory_space<vmem>>, vector<1x2x512xf32>
    %82 = vector.shape_cast %81 : vector<1x2x512xf32> to vector<2x512xf32>
    %83 = arith.truncf %77 : vector<2x128xf32> to vector<2x128xbf16>
    %cst_80 = arith.constant dense<0.000000e+00> : vector<2x512xf32>
    %84 = tpu.matmul %83, %74, %cst_80 {dimension_numbers = #tpu.dot_dimension_numbers<[1], [0], [0], [1], [0, 0, 1, 1], [], []>} : vector<2x128xbf16>, vector<128x512xbf16>, vector<2x512xf32> -> vector<2x512xf32>
    %85 = arith.addf %82, %84 : vector<2x512xf32>
    %c7_81 = arith.constant 7 : index
    %c0_82 = arith.constant 0 : index
    %c512 = arith.constant 512 : index
    %86 = vector.load %arg9[%c7_81, %c0_82, %c512] : memref<8x2x1024xf32, #tpu.memory_space<vmem>>, vector<1x2x512xf32>
    %87 = vector.shape_cast %86 : vector<1x2x512xf32> to vector<2x512xf32>
    %88 = arith.truncf %79 : vector<2x128xf32> to vector<2x128xbf16>
    %cst_83 = arith.constant dense<0.000000e+00> : vector<2x512xf32>
    %89 = tpu.matmul %88, %75, %cst_83 {dimension_numbers = #tpu.dot_dimension_numbers<[1], [0], [0], [1], [0, 0, 1, 1], [], []>} : vector<2x128xbf16>, vector<128x512xbf16>, vector<2x512xf32> -> vector<2x512xf32>
    %90 = arith.addf %87, %89 : vector<2x512xf32>
    %91 = vector.extract_strided_slice %85 {offsets = [0, 0], sizes = [2, 128], strides = [1, 1]} : vector<2x512xf32> to vector<2x128xf32>
    %cst_84 = arith.constant 5.000000e-01 : f32
    %92 = vector.broadcast %cst_84 : f32 to vector<2x128xf32>
    %93 = arith.mulf %92, %91 : vector<2x128xf32>
    %94 = math.tanh %93 : vector<2x128xf32>
    %cst_85 = arith.constant 5.000000e-01 : f32
    %95 = vector.broadcast %cst_85 : f32 to vector<2x128xf32>
    %96 = arith.mulf %95, %94 : vector<2x128xf32>
    %cst_86 = arith.constant 5.000000e-01 : f32
    %97 = vector.broadcast %cst_86 : f32 to vector<2x128xf32>
    %98 = arith.addf %96, %97 : vector<2x128xf32>
    %99 = vector.extract_strided_slice %85 {offsets = [0, 128], sizes = [2, 128], strides = [1, 1]} : vector<2x512xf32> to vector<2x128xf32>
    %cst_87 = arith.constant 5.000000e-01 : f32
    %100 = vector.broadcast %cst_87 : f32 to vector<2x128xf32>
    %101 = arith.mulf %100, %99 : vector<2x128xf32>
    %102 = math.tanh %101 : vector<2x128xf32>
    %cst_88 = arith.constant 5.000000e-01 : f32
    %103 = vector.broadcast %cst_88 : f32 to vector<2x128xf32>
    %104 = arith.mulf %103, %102 : vector<2x128xf32>
    %cst_89 = arith.constant 5.000000e-01 : f32
    %105 = vector.broadcast %cst_89 : f32 to vector<2x128xf32>
    %106 = arith.addf %104, %105 : vector<2x128xf32>
    %107 = vector.extract_strided_slice %85 {offsets = [0, 256], sizes = [2, 128], strides = [1, 1]} : vector<2x512xf32> to vector<2x128xf32>
    %108 = math.tanh %107 : vector<2x128xf32>
    %109 = vector.extract_strided_slice %85 {offsets = [0, 384], sizes = [2, 128], strides = [1, 1]} : vector<2x512xf32> to vector<2x128xf32>
    %cst_90 = arith.constant 5.000000e-01 : f32
    %110 = vector.broadcast %cst_90 : f32 to vector<2x128xf32>
    %111 = arith.mulf %110, %109 : vector<2x128xf32>
    %112 = math.tanh %111 : vector<2x128xf32>
    %cst_91 = arith.constant 5.000000e-01 : f32
    %113 = vector.broadcast %cst_91 : f32 to vector<2x128xf32>
    %114 = arith.mulf %113, %112 : vector<2x128xf32>
    %cst_92 = arith.constant 5.000000e-01 : f32
    %115 = vector.broadcast %cst_92 : f32 to vector<2x128xf32>
    %116 = arith.addf %114, %115 : vector<2x128xf32>
    %117 = arith.mulf %106, %78 : vector<2x128xf32>
    %118 = arith.mulf %98, %108 : vector<2x128xf32>
    %119 = arith.addf %117, %118 : vector<2x128xf32>
    %120 = math.tanh %119 : vector<2x128xf32>
    %121 = arith.mulf %116, %120 : vector<2x128xf32>
    %122 = vector.extract_strided_slice %90 {offsets = [0, 0], sizes = [2, 128], strides = [1, 1]} : vector<2x512xf32> to vector<2x128xf32>
    %cst_93 = arith.constant 5.000000e-01 : f32
    %123 = vector.broadcast %cst_93 : f32 to vector<2x128xf32>
    %124 = arith.mulf %123, %122 : vector<2x128xf32>
    %125 = math.tanh %124 : vector<2x128xf32>
    %cst_94 = arith.constant 5.000000e-01 : f32
    %126 = vector.broadcast %cst_94 : f32 to vector<2x128xf32>
    %127 = arith.mulf %126, %125 : vector<2x128xf32>
    %cst_95 = arith.constant 5.000000e-01 : f32
    %128 = vector.broadcast %cst_95 : f32 to vector<2x128xf32>
    %129 = arith.addf %127, %128 : vector<2x128xf32>
    %130 = vector.extract_strided_slice %90 {offsets = [0, 128], sizes = [2, 128], strides = [1, 1]} : vector<2x512xf32> to vector<2x128xf32>
    %cst_96 = arith.constant 5.000000e-01 : f32
    %131 = vector.broadcast %cst_96 : f32 to vector<2x128xf32>
    %132 = arith.mulf %131, %130 : vector<2x128xf32>
    %133 = math.tanh %132 : vector<2x128xf32>
    %cst_97 = arith.constant 5.000000e-01 : f32
    %134 = vector.broadcast %cst_97 : f32 to vector<2x128xf32>
    %135 = arith.mulf %134, %133 : vector<2x128xf32>
    %cst_98 = arith.constant 5.000000e-01 : f32
    %136 = vector.broadcast %cst_98 : f32 to vector<2x128xf32>
    %137 = arith.addf %135, %136 : vector<2x128xf32>
    %138 = vector.extract_strided_slice %90 {offsets = [0, 256], sizes = [2, 128], strides = [1, 1]} : vector<2x512xf32> to vector<2x128xf32>
    %139 = math.tanh %138 : vector<2x128xf32>
    %140 = vector.extract_strided_slice %90 {offsets = [0, 384], sizes = [2, 128], strides = [1, 1]} : vector<2x512xf32> to vector<2x128xf32>
    %cst_99 = arith.constant 5.000000e-01 : f32
    %141 = vector.broadcast %cst_99 : f32 to vector<2x128xf32>
    %142 = arith.mulf %141, %140 : vector<2x128xf32>
    %143 = math.tanh %142 : vector<2x128xf32>
    %cst_100 = arith.constant 5.000000e-01 : f32
    %144 = vector.broadcast %cst_100 : f32 to vector<2x128xf32>
    %145 = arith.mulf %144, %143 : vector<2x128xf32>
    %cst_101 = arith.constant 5.000000e-01 : f32
    %146 = vector.broadcast %cst_101 : f32 to vector<2x128xf32>
    %147 = arith.addf %145, %146 : vector<2x128xf32>
    %148 = arith.mulf %137, %80 : vector<2x128xf32>
    %149 = arith.mulf %129, %139 : vector<2x128xf32>
    %150 = arith.addf %148, %149 : vector<2x128xf32>
    %151 = math.tanh %150 : vector<2x128xf32>
    %152 = arith.mulf %147, %151 : vector<2x128xf32>
    %c0_i32 = arith.constant 0 : i32
    %153 = vector.broadcast %c0_i32 : i32 to vector<2x1xi32>
    %154 = arith.cmpi sgt, %76, %153 : vector<2x1xi32>
    %c7_i32 = arith.constant 7 : i32
    %155 = vector.broadcast %c7_i32 : i32 to vector<2x1xi32>
    %156 = arith.cmpi sgt, %76, %155 : vector<2x1xi32>
    %157 = vector.shape_cast %154 : vector<2x1xi1> to vector<2x1xi1>
    %158 = vector.broadcast %157 : vector<2x1xi1> to vector<2x128xi1>
    %159 = arith.select %158, %119, %78 : vector<2x128xi1>, vector<2x128xf32>
    %c0_102 = arith.constant 0 : index
    %c0_103 = arith.constant 0 : index
    %160 = vector.load %arg11[%c0_102, %c0_103] : memref<2x128xf32, #tpu.memory_space<vmem>>, vector<2x128xf32>
    tpu.vector_store %arg11[%c0_102, %c0_103], %159 {strides = array<i32>} : memref<2x128xf32, #tpu.memory_space<vmem>>, vector<2x128xf32>,
    %161 = vector.shape_cast %154 : vector<2x1xi1> to vector<2x1xi1>
    %162 = vector.broadcast %161 : vector<2x1xi1> to vector<2x128xi1>
    %163 = arith.select %162, %121, %77 : vector<2x128xi1>, vector<2x128xf32>
    %c0_104 = arith.constant 0 : index
    %c0_105 = arith.constant 0 : index
    %164 = vector.load %arg10[%c0_104, %c0_105] : memref<2x128xf32, #tpu.memory_space<vmem>>, vector<2x128xf32>
    tpu.vector_store %arg10[%c0_104, %c0_105], %163 {strides = array<i32>} : memref<2x128xf32, #tpu.memory_space<vmem>>, vector<2x128xf32>,
    %165 = vector.shape_cast %156 : vector<2x1xi1> to vector<2x1xi1>
    %166 = vector.broadcast %165 : vector<2x1xi1> to vector<2x128xi1>
    %167 = arith.select %166, %150, %80 : vector<2x128xi1>, vector<2x128xf32>
    %c0_106 = arith.constant 0 : index
    %c0_107 = arith.constant 0 : index
    %168 = vector.load %arg13[%c0_106, %c0_107] : memref<2x128xf32, #tpu.memory_space<vmem>>, vector<2x128xf32>
    tpu.vector_store %arg13[%c0_106, %c0_107], %167 {strides = array<i32>} : memref<2x128xf32, #tpu.memory_space<vmem>>, vector<2x128xf32>,
    %169 = vector.shape_cast %156 : vector<2x1xi1> to vector<2x1xi1>
    %170 = vector.broadcast %169 : vector<2x1xi1> to vector<2x128xi1>
    %171 = arith.select %170, %152, %79 : vector<2x128xi1>, vector<2x128xf32>
    %c0_108 = arith.constant 0 : index
    %c0_109 = arith.constant 0 : index
    %172 = vector.load %arg12[%c0_108, %c0_109] : memref<2x128xf32, #tpu.memory_space<vmem>>, vector<2x128xf32>
    tpu.vector_store %arg12[%c0_108, %c0_109], %171 {strides = array<i32>} : memref<2x128xf32, #tpu.memory_space<vmem>>, vector<2x128xf32>,
    %cst_110 = arith.constant 0.000000e+00 : f32
    %173 = vector.shape_cast %154 : vector<2x1xi1> to vector<2x1xi1>
    %174 = vector.broadcast %173 : vector<2x1xi1> to vector<2x128xi1>
    %175 = vector.broadcast %cst_110 : f32 to vector<2x128xf32>
    %176 = arith.select %174, %121, %175 : vector<2x128xi1>, vector<2x128xf32>
    %c0_111 = arith.constant 0 : index
    %c0_112 = arith.constant 0 : index
    %c0_113 = arith.constant 0 : index
    %177 = vector.load %arg7[%c0_111, %c0_112, %c0_113] : memref<8x2x256xf32, #tpu.memory_space<vmem>>, vector<1x2x128xf32>
    %178 = vector.shape_cast %177 : vector<1x2x128xf32> to vector<2x128xf32>
    %179 = vector.shape_cast %176 : vector<2x128xf32> to vector<1x2x128xf32>
    tpu.vector_store %arg7[%c0_111, %c0_112, %c0_113], %179 {strides = array<i32>} : memref<8x2x256xf32, #tpu.memory_space<vmem>>, vector<1x2x128xf32>,
    %cst_114 = arith.constant 0.000000e+00 : f32
    %180 = vector.shape_cast %156 : vector<2x1xi1> to vector<2x1xi1>
    %181 = vector.broadcast %180 : vector<2x1xi1> to vector<2x128xi1>
    %182 = vector.broadcast %cst_114 : f32 to vector<2x128xf32>
    %183 = arith.select %181, %152, %182 : vector<2x128xi1>, vector<2x128xf32>
    %c7_115 = arith.constant 7 : index
    %c0_116 = arith.constant 0 : index
    %c128 = arith.constant 128 : index
    %184 = vector.load %arg7[%c7_115, %c0_116, %c128] : memref<8x2x256xf32, #tpu.memory_space<vmem>>, vector<1x2x128xf32>
    %185 = vector.shape_cast %184 : vector<1x2x128xf32> to vector<2x128xf32>
    %186 = vector.shape_cast %183 : vector<2x128xf32> to vector<1x2x128xf32>
    tpu.vector_store %arg7[%c7_115, %c0_116, %c128], %186 {strides = array<i32>} : memref<8x2x256xf32, #tpu.memory_space<vmem>>, vector<1x2x128xf32>,
    %c0_117 = arith.constant 0 : index
    %c0_118 = arith.constant 0 : index
    %187 = vector.load %arg10[%c0_117, %c0_118] : memref<2x128xf32, #tpu.memory_space<vmem>>, vector<2x128xf32>
    %c0_119 = arith.constant 0 : index
    %c0_120 = arith.constant 0 : index
    %188 = vector.load %arg11[%c0_119, %c0_120] : memref<2x128xf32, #tpu.memory_space<vmem>>, vector<2x128xf32>
    %c0_121 = arith.constant 0 : index
    %c0_122 = arith.constant 0 : index
    %189 = vector.load %arg12[%c0_121, %c0_122] : memref<2x128xf32, #tpu.memory_space<vmem>>, vector<2x128xf32>
    %c0_123 = arith.constant 0 : index
    %c0_124 = arith.constant 0 : index
    %190 = vector.load %arg13[%c0_123, %c0_124] : memref<2x128xf32, #tpu.memory_space<vmem>>, vector<2x128xf32>
    %c1_125 = arith.constant 1 : index
    %c0_126 = arith.constant 0 : index
    %c0_127 = arith.constant 0 : index
    %191 = vector.load %arg9[%c1_125, %c0_126, %c0_127] : memref<8x2x1024xf32, #tpu.memory_space<vmem>>, vector<1x2x512xf32>
    %192 = vector.shape_cast %191 : vector<1x2x512xf32> to vector<2x512xf32>
    %193 = arith.truncf %187 : vector<2x128xf32> to vector<2x128xbf16>
    %cst_128 = arith.constant dense<0.000000e+00> : vector<2x512xf32>
    %194 = tpu.matmul %193, %74, %cst_128 {dimension_numbers = #tpu.dot_dimension_numbers<[1], [0], [0], [1], [0, 0, 1, 1], [], []>} : vector<2x128xbf16>, vector<128x512xbf16>, vector<2x512xf32> -> vector<2x512xf32>
    %195 = arith.addf %192, %194 : vector<2x512xf32>
    %c6_129 = arith.constant 6 : index
    %c0_130 = arith.constant 0 : index
    %c512_131 = arith.constant 512 : index
    %196 = vector.load %arg9[%c6_129, %c0_130, %c512_131] : memref<8x2x1024xf32, #tpu.memory_space<vmem>>, vector<1x2x512xf32>
    %197 = vector.shape_cast %196 : vector<1x2x512xf32> to vector<2x512xf32>
    %198 = arith.truncf %189 : vector<2x128xf32> to vector<2x128xbf16>
    %cst_132 = arith.constant dense<0.000000e+00> : vector<2x512xf32>
    %199 = tpu.matmul %198, %75, %cst_132 {dimension_numbers = #tpu.dot_dimension_numbers<[1], [0], [0], [1], [0, 0, 1, 1], [], []>} : vector<2x128xbf16>, vector<128x512xbf16>, vector<2x512xf32> -> vector<2x512xf32>
    %200 = arith.addf %197, %199 : vector<2x512xf32>
    %201 = vector.extract_strided_slice %195 {offsets = [0, 0], sizes = [2, 128], strides = [1, 1]} : vector<2x512xf32> to vector<2x128xf32>
    %cst_133 = arith.constant 5.000000e-01 : f32
    %202 = vector.broadcast %cst_133 : f32 to vector<2x128xf32>
    %203 = arith.mulf %202, %201 : vector<2x128xf32>
    %204 = math.tanh %203 : vector<2x128xf32>
    %cst_134 = arith.constant 5.000000e-01 : f32
    %205 = vector.broadcast %cst_134 : f32 to vector<2x128xf32>
    %206 = arith.mulf %205, %204 : vector<2x128xf32>
    %cst_135 = arith.constant 5.000000e-01 : f32
    %207 = vector.broadcast %cst_135 : f32 to vector<2x128xf32>
    %208 = arith.addf %206, %207 : vector<2x128xf32>
    %209 = vector.extract_strided_slice %195 {offsets = [0, 128], sizes = [2, 128], strides = [1, 1]} : vector<2x512xf32> to vector<2x128xf32>
    %cst_136 = arith.constant 5.000000e-01 : f32
    %210 = vector.broadcast %cst_136 : f32 to vector<2x128xf32>
    %211 = arith.mulf %210, %209 : vector<2x128xf32>
    %212 = math.tanh %211 : vector<2x128xf32>
    %cst_137 = arith.constant 5.000000e-01 : f32
    %213 = vector.broadcast %cst_137 : f32 to vector<2x128xf32>
    %214 = arith.mulf %213, %212 : vector<2x128xf32>
    %cst_138 = arith.constant 5.000000e-01 : f32
    %215 = vector.broadcast %cst_138 : f32 to vector<2x128xf32>
    %216 = arith.addf %214, %215 : vector<2x128xf32>
    %217 = vector.extract_strided_slice %195 {offsets = [0, 256], sizes = [2, 128], strides = [1, 1]} : vector<2x512xf32> to vector<2x128xf32>
    %218 = math.tanh %217 : vector<2x128xf32>
    %219 = vector.extract_strided_slice %195 {offsets = [0, 384], sizes = [2, 128], strides = [1, 1]} : vector<2x512xf32> to vector<2x128xf32>
    %cst_139 = arith.constant 5.000000e-01 : f32
    %220 = vector.broadcast %cst_139 : f32 to vector<2x128xf32>
    %221 = arith.mulf %220, %219 : vector<2x128xf32>
    %222 = math.tanh %221 : vector<2x128xf32>
    %cst_140 = arith.constant 5.000000e-01 : f32
    %223 = vector.broadcast %cst_140 : f32 to vector<2x128xf32>
    %224 = arith.mulf %223, %222 : vector<2x128xf32>
    %cst_141 = arith.constant 5.000000e-01 : f32
    %225 = vector.broadcast %cst_141 : f32 to vector<2x128xf32>
    %226 = arith.addf %224, %225 : vector<2x128xf32>
    %227 = arith.mulf %216, %188 : vector<2x128xf32>
    %228 = arith.mulf %208, %218 : vector<2x128xf32>
    %229 = arith.addf %227, %228 : vector<2x128xf32>
    %230 = math.tanh %229 : vector<2x128xf32>
    %231 = arith.mulf %226, %230 : vector<2x128xf32>
    %232 = vector.extract_strided_slice %200 {offsets = [0, 0], sizes = [2, 128], strides = [1, 1]} : vector<2x512xf32> to vector<2x128xf32>
    %cst_142 = arith.constant 5.000000e-01 : f32
    %233 = vector.broadcast %cst_142 : f32 to vector<2x128xf32>
    %234 = arith.mulf %233, %232 : vector<2x128xf32>
    %235 = math.tanh %234 : vector<2x128xf32>
    %cst_143 = arith.constant 5.000000e-01 : f32
    %236 = vector.broadcast %cst_143 : f32 to vector<2x128xf32>
    %237 = arith.mulf %236, %235 : vector<2x128xf32>
    %cst_144 = arith.constant 5.000000e-01 : f32
    %238 = vector.broadcast %cst_144 : f32 to vector<2x128xf32>
    %239 = arith.addf %237, %238 : vector<2x128xf32>
    %240 = vector.extract_strided_slice %200 {offsets = [0, 128], sizes = [2, 128], strides = [1, 1]} : vector<2x512xf32> to vector<2x128xf32>
    %cst_145 = arith.constant 5.000000e-01 : f32
    %241 = vector.broadcast %cst_145 : f32 to vector<2x128xf32>
    %242 = arith.mulf %241, %240 : vector<2x128xf32>
    %243 = math.tanh %242 : vector<2x128xf32>
    %cst_146 = arith.constant 5.000000e-01 : f32
    %244 = vector.broadcast %cst_146 : f32 to vector<2x128xf32>
    %245 = arith.mulf %244, %243 : vector<2x128xf32>
    %cst_147 = arith.constant 5.000000e-01 : f32
    %246 = vector.broadcast %cst_147 : f32 to vector<2x128xf32>
    %247 = arith.addf %245, %246 : vector<2x128xf32>
    %248 = vector.extract_strided_slice %200 {offsets = [0, 256], sizes = [2, 128], strides = [1, 1]} : vector<2x512xf32> to vector<2x128xf32>
    %249 = math.tanh %248 : vector<2x128xf32>
    %250 = vector.extract_strided_slice %200 {offsets = [0, 384], sizes = [2, 128], strides = [1, 1]} : vector<2x512xf32> to vector<2x128xf32>
    %cst_148 = arith.constant 5.000000e-01 : f32
    %251 = vector.broadcast %cst_148 : f32 to vector<2x128xf32>
    %252 = arith.mulf %251, %250 : vector<2x128xf32>
    %253 = math.tanh %252 : vector<2x128xf32>
    %cst_149 = arith.constant 5.000000e-01 : f32
    %254 = vector.broadcast %cst_149 : f32 to vector<2x128xf32>
    %255 = arith.mulf %254, %253 : vector<2x128xf32>
    %cst_150 = arith.constant 5.000000e-01 : f32
    %256 = vector.broadcast %cst_150 : f32 to vector<2x128xf32>
    %257 = arith.addf %255, %256 : vector<2x128xf32>
    %258 = arith.mulf %247, %190 : vector<2x128xf32>
    %259 = arith.mulf %239, %249 : vector<2x128xf32>
    %260 = arith.addf %258, %259 : vector<2x128xf32>
    %261 = math.tanh %260 : vector<2x128xf32>
    %262 = arith.mulf %257, %261 : vector<2x128xf32>
    %c1_i32 = arith.constant 1 : i32
    %263 = vector.broadcast %c1_i32 : i32 to vector<2x1xi32>
    %264 = arith.cmpi sgt, %76, %263 : vector<2x1xi32>
    %c6_i32 = arith.constant 6 : i32
    %265 = vector.broadcast %c6_i32 : i32 to vector<2x1xi32>
    %266 = arith.cmpi sgt, %76, %265 : vector<2x1xi32>
    %267 = vector.shape_cast %264 : vector<2x1xi1> to vector<2x1xi1>
    %268 = vector.broadcast %267 : vector<2x1xi1> to vector<2x128xi1>
    %269 = arith.select %268, %229, %188 : vector<2x128xi1>, vector<2x128xf32>
    %c0_151 = arith.constant 0 : index
    %c0_152 = arith.constant 0 : index
    %270 = vector.load %arg11[%c0_151, %c0_152] : memref<2x128xf32, #tpu.memory_space<vmem>>, vector<2x128xf32>
    tpu.vector_store %arg11[%c0_151, %c0_152], %269 {strides = array<i32>} : memref<2x128xf32, #tpu.memory_space<vmem>>, vector<2x128xf32>,
    %271 = vector.shape_cast %264 : vector<2x1xi1> to vector<2x1xi1>
    %272 = vector.broadcast %271 : vector<2x1xi1> to vector<2x128xi1>
    %273 = arith.select %272, %231, %187 : vector<2x128xi1>, vector<2x128xf32>
    %c0_153 = arith.constant 0 : index
    %c0_154 = arith.constant 0 : index
    %274 = vector.load %arg10[%c0_153, %c0_154] : memref<2x128xf32, #tpu.memory_space<vmem>>, vector<2x128xf32>
    tpu.vector_store %arg10[%c0_153, %c0_154], %273 {strides = array<i32>} : memref<2x128xf32, #tpu.memory_space<vmem>>, vector<2x128xf32>,
    %275 = vector.shape_cast %266 : vector<2x1xi1> to vector<2x1xi1>
    %276 = vector.broadcast %275 : vector<2x1xi1> to vector<2x128xi1>
    %277 = arith.select %276, %260, %190 : vector<2x128xi1>, vector<2x128xf32>
    %c0_155 = arith.constant 0 : index
    %c0_156 = arith.constant 0 : index
    %278 = vector.load %arg13[%c0_155, %c0_156] : memref<2x128xf32, #tpu.memory_space<vmem>>, vector<2x128xf32>
    tpu.vector_store %arg13[%c0_155, %c0_156], %277 {strides = array<i32>} : memref<2x128xf32, #tpu.memory_space<vmem>>, vector<2x128xf32>,
    %279 = vector.shape_cast %266 : vector<2x1xi1> to vector<2x1xi1>
    %280 = vector.broadcast %279 : vector<2x1xi1> to vector<2x128xi1>
    %281 = arith.select %280, %262, %189 : vector<2x128xi1>, vector<2x128xf32>
    %c0_157 = arith.constant 0 : index
    %c0_158 = arith.constant 0 : index
    %282 = vector.load %arg12[%c0_157, %c0_158] : memref<2x128xf32, #tpu.memory_space<vmem>>, vector<2x128xf32>
    tpu.vector_store %arg12[%c0_157, %c0_158], %281 {strides = array<i32>} : memref<2x128xf32, #tpu.memory_space<vmem>>, vector<2x128xf32>,
    %cst_159 = arith.constant 0.000000e+00 : f32
    %283 = vector.shape_cast %264 : vector<2x1xi1> to vector<2x1xi1>
    %284 = vector.broadcast %283 : vector<2x1xi1> to vector<2x128xi1>
    %285 = vector.broadcast %cst_159 : f32 to vector<2x128xf32>
    %286 = arith.select %284, %231, %285 : vector<2x128xi1>, vector<2x128xf32>
    %c1_160 = arith.constant 1 : index
    %c0_161 = arith.constant 0 : index
    %c0_162 = arith.constant 0 : index
    %287 = vector.load %arg7[%c1_160, %c0_161, %c0_162] : memref<8x2x256xf32, #tpu.memory_space<vmem>>, vector<1x2x128xf32>
    %288 = vector.shape_cast %287 : vector<1x2x128xf32> to vector<2x128xf32>
    %289 = vector.shape_cast %286 : vector<2x128xf32> to vector<1x2x128xf32>
    tpu.vector_store %arg7[%c1_160, %c0_161, %c0_162], %289 {strides = array<i32>} : memref<8x2x256xf32, #tpu.memory_space<vmem>>, vector<1x2x128xf32>,
    %cst_163 = arith.constant 0.000000e+00 : f32
    %290 = vector.shape_cast %266 : vector<2x1xi1> to vector<2x1xi1>
    %291 = vector.broadcast %290 : vector<2x1xi1> to vector<2x128xi1>
    %292 = vector.broadcast %cst_163 : f32 to vector<2x128xf32>
    %293 = arith.select %291, %262, %292 : vector<2x128xi1>, vector<2x128xf32>
    %c6_164 = arith.constant 6 : index
    %c0_165 = arith.constant 0 : index
    %c128_166 = arith.constant 128 : index
    %294 = vector.load %arg7[%c6_164, %c0_165, %c128_166] : memref<8x2x256xf32, #tpu.memory_space<vmem>>, vector<1x2x128xf32>
    %295 = vector.shape_cast %294 : vector<1x2x128xf32> to vector<2x128xf32>
    %296 = vector.shape_cast %293 : vector<2x128xf32> to vector<1x2x128xf32>
    tpu.vector_store %arg7[%c6_164, %c0_165, %c128_166], %296 {strides = array<i32>} : memref<8x2x256xf32, #tpu.memory_space<vmem>>, vector<1x2x128xf32>,
    %c0_167 = arith.constant 0 : index
    %c0_168 = arith.constant 0 : index
    %297 = vector.load %arg10[%c0_167, %c0_168] : memref<2x128xf32, #tpu.memory_space<vmem>>, vector<2x128xf32>
    %c0_169 = arith.constant 0 : index
    %c0_170 = arith.constant 0 : index
    %298 = vector.load %arg11[%c0_169, %c0_170] : memref<2x128xf32, #tpu.memory_space<vmem>>, vector<2x128xf32>
    %c0_171 = arith.constant 0 : index
    %c0_172 = arith.constant 0 : index
    %299 = vector.load %arg12[%c0_171, %c0_172] : memref<2x128xf32, #tpu.memory_space<vmem>>, vector<2x128xf32>
    %c0_173 = arith.constant 0 : index
    %c0_174 = arith.constant 0 : index
    %300 = vector.load %arg13[%c0_173, %c0_174] : memref<2x128xf32, #tpu.memory_space<vmem>>, vector<2x128xf32>
    %c2_175 = arith.constant 2 : index
    %c0_176 = arith.constant 0 : index
    %c0_177 = arith.constant 0 : index
    %301 = vector.load %arg9[%c2_175, %c0_176, %c0_177] : memref<8x2x1024xf32, #tpu.memory_space<vmem>>, vector<1x2x512xf32>
    %302 = vector.shape_cast %301 : vector<1x2x512xf32> to vector<2x512xf32>
    %303 = arith.truncf %297 : vector<2x128xf32> to vector<2x128xbf16>
    %cst_178 = arith.constant dense<0.000000e+00> : vector<2x512xf32>
    %304 = tpu.matmul %303, %74, %cst_178 {dimension_numbers = #tpu.dot_dimension_numbers<[1], [0], [0], [1], [0, 0, 1, 1], [], []>} : vector<2x128xbf16>, vector<128x512xbf16>, vector<2x512xf32> -> vector<2x512xf32>
    %305 = arith.addf %302, %304 : vector<2x512xf32>
    %c5_179 = arith.constant 5 : index
    %c0_180 = arith.constant 0 : index
    %c512_181 = arith.constant 512 : index
    %306 = vector.load %arg9[%c5_179, %c0_180, %c512_181] : memref<8x2x1024xf32, #tpu.memory_space<vmem>>, vector<1x2x512xf32>
    %307 = vector.shape_cast %306 : vector<1x2x512xf32> to vector<2x512xf32>
    %308 = arith.truncf %299 : vector<2x128xf32> to vector<2x128xbf16>
    %cst_182 = arith.constant dense<0.000000e+00> : vector<2x512xf32>
    %309 = tpu.matmul %308, %75, %cst_182 {dimension_numbers = #tpu.dot_dimension_numbers<[1], [0], [0], [1], [0, 0, 1, 1], [], []>} : vector<2x128xbf16>, vector<128x512xbf16>, vector<2x512xf32> -> vector<2x512xf32>
    %310 = arith.addf %307, %309 : vector<2x512xf32>
    %311 = vector.extract_strided_slice %305 {offsets = [0, 0], sizes = [2, 128], strides = [1, 1]} : vector<2x512xf32> to vector<2x128xf32>
    %cst_183 = arith.constant 5.000000e-01 : f32
    %312 = vector.broadcast %cst_183 : f32 to vector<2x128xf32>
    %313 = arith.mulf %312, %311 : vector<2x128xf32>
    %314 = math.tanh %313 : vector<2x128xf32>
    %cst_184 = arith.constant 5.000000e-01 : f32
    %315 = vector.broadcast %cst_184 : f32 to vector<2x128xf32>
    %316 = arith.mulf %315, %314 : vector<2x128xf32>
    %cst_185 = arith.constant 5.000000e-01 : f32
    %317 = vector.broadcast %cst_185 : f32 to vector<2x128xf32>
    %318 = arith.addf %316, %317 : vector<2x128xf32>
    %319 = vector.extract_strided_slice %305 {offsets = [0, 128], sizes = [2, 128], strides = [1, 1]} : vector<2x512xf32> to vector<2x128xf32>
    %cst_186 = arith.constant 5.000000e-01 : f32
    %320 = vector.broadcast %cst_186 : f32 to vector<2x128xf32>
    %321 = arith.mulf %320, %319 : vector<2x128xf32>
    %322 = math.tanh %321 : vector<2x128xf32>
    %cst_187 = arith.constant 5.000000e-01 : f32
    %323 = vector.broadcast %cst_187 : f32 to vector<2x128xf32>
    %324 = arith.mulf %323, %322 : vector<2x128xf32>
    %cst_188 = arith.constant 5.000000e-01 : f32
    %325 = vector.broadcast %cst_188 : f32 to vector<2x128xf32>
    %326 = arith.addf %324, %325 : vector<2x128xf32>
    %327 = vector.extract_strided_slice %305 {offsets = [0, 256], sizes = [2, 128], strides = [1, 1]} : vector<2x512xf32> to vector<2x128xf32>
    %328 = math.tanh %327 : vector<2x128xf32>
    %329 = vector.extract_strided_slice %305 {offsets = [0, 384], sizes = [2, 128], strides = [1, 1]} : vector<2x512xf32> to vector<2x128xf32>
    %cst_189 = arith.constant 5.000000e-01 : f32
    %330 = vector.broadcast %cst_189 : f32 to vector<2x128xf32>
    %331 = arith.mulf %330, %329 : vector<2x128xf32>
    %332 = math.tanh %331 : vector<2x128xf32>
    %cst_190 = arith.constant 5.000000e-01 : f32
    %333 = vector.broadcast %cst_190 : f32 to vector<2x128xf32>
    %334 = arith.mulf %333, %332 : vector<2x128xf32>
    %cst_191 = arith.constant 5.000000e-01 : f32
    %335 = vector.broadcast %cst_191 : f32 to vector<2x128xf32>
    %336 = arith.addf %334, %335 : vector<2x128xf32>
    %337 = arith.mulf %326, %298 : vector<2x128xf32>
    %338 = arith.mulf %318, %328 : vector<2x128xf32>
    %339 = arith.addf %337, %338 : vector<2x128xf32>
    %340 = math.tanh %339 : vector<2x128xf32>
    %341 = arith.mulf %336, %340 : vector<2x128xf32>
    %342 = vector.extract_strided_slice %310 {offsets = [0, 0], sizes = [2, 128], strides = [1, 1]} : vector<2x512xf32> to vector<2x128xf32>
    %cst_192 = arith.constant 5.000000e-01 : f32
    %343 = vector.broadcast %cst_192 : f32 to vector<2x128xf32>
    %344 = arith.mulf %343, %342 : vector<2x128xf32>
    %345 = math.tanh %344 : vector<2x128xf32>
    %cst_193 = arith.constant 5.000000e-01 : f32
    %346 = vector.broadcast %cst_193 : f32 to vector<2x128xf32>
    %347 = arith.mulf %346, %345 : vector<2x128xf32>
    %cst_194 = arith.constant 5.000000e-01 : f32
    %348 = vector.broadcast %cst_194 : f32 to vector<2x128xf32>
    %349 = arith.addf %347, %348 : vector<2x128xf32>
    %350 = vector.extract_strided_slice %310 {offsets = [0, 128], sizes = [2, 128], strides = [1, 1]} : vector<2x512xf32> to vector<2x128xf32>
    %cst_195 = arith.constant 5.000000e-01 : f32
    %351 = vector.broadcast %cst_195 : f32 to vector<2x128xf32>
    %352 = arith.mulf %351, %350 : vector<2x128xf32>
    %353 = math.tanh %352 : vector<2x128xf32>
    %cst_196 = arith.constant 5.000000e-01 : f32
    %354 = vector.broadcast %cst_196 : f32 to vector<2x128xf32>
    %355 = arith.mulf %354, %353 : vector<2x128xf32>
    %cst_197 = arith.constant 5.000000e-01 : f32
    %356 = vector.broadcast %cst_197 : f32 to vector<2x128xf32>
    %357 = arith.addf %355, %356 : vector<2x128xf32>
    %358 = vector.extract_strided_slice %310 {offsets = [0, 256], sizes = [2, 128], strides = [1, 1]} : vector<2x512xf32> to vector<2x128xf32>
    %359 = math.tanh %358 : vector<2x128xf32>
    %360 = vector.extract_strided_slice %310 {offsets = [0, 384], sizes = [2, 128], strides = [1, 1]} : vector<2x512xf32> to vector<2x128xf32>
    %cst_198 = arith.constant 5.000000e-01 : f32
    %361 = vector.broadcast %cst_198 : f32 to vector<2x128xf32>
    %362 = arith.mulf %361, %360 : vector<2x128xf32>
    %363 = math.tanh %362 : vector<2x128xf32>
    %cst_199 = arith.constant 5.000000e-01 : f32
    %364 = vector.broadcast %cst_199 : f32 to vector<2x128xf32>
    %365 = arith.mulf %364, %363 : vector<2x128xf32>
    %cst_200 = arith.constant 5.000000e-01 : f32
    %366 = vector.broadcast %cst_200 : f32 to vector<2x128xf32>
    %367 = arith.addf %365, %366 : vector<2x128xf32>
    %368 = arith.mulf %357, %300 : vector<2x128xf32>
    %369 = arith.mulf %349, %359 : vector<2x128xf32>
    %370 = arith.addf %368, %369 : vector<2x128xf32>
    %371 = math.tanh %370 : vector<2x128xf32>
    %372 = arith.mulf %367, %371 : vector<2x128xf32>
    %c2_i32 = arith.constant 2 : i32
    %373 = vector.broadcast %c2_i32 : i32 to vector<2x1xi32>
    %374 = arith.cmpi sgt, %76, %373 : vector<2x1xi32>
    %c5_i32 = arith.constant 5 : i32
    %375 = vector.broadcast %c5_i32 : i32 to vector<2x1xi32>
    %376 = arith.cmpi sgt, %76, %375 : vector<2x1xi32>
    %377 = vector.shape_cast %374 : vector<2x1xi1> to vector<2x1xi1>
    %378 = vector.broadcast %377 : vector<2x1xi1> to vector<2x128xi1>
    %379 = arith.select %378, %339, %298 : vector<2x128xi1>, vector<2x128xf32>
    %c0_201 = arith.constant 0 : index
    %c0_202 = arith.constant 0 : index
    %380 = vector.load %arg11[%c0_201, %c0_202] : memref<2x128xf32, #tpu.memory_space<vmem>>, vector<2x128xf32>
    tpu.vector_store %arg11[%c0_201, %c0_202], %379 {strides = array<i32>} : memref<2x128xf32, #tpu.memory_space<vmem>>, vector<2x128xf32>,
    %381 = vector.shape_cast %374 : vector<2x1xi1> to vector<2x1xi1>
    %382 = vector.broadcast %381 : vector<2x1xi1> to vector<2x128xi1>
    %383 = arith.select %382, %341, %297 : vector<2x128xi1>, vector<2x128xf32>
    %c0_203 = arith.constant 0 : index
    %c0_204 = arith.constant 0 : index
    %384 = vector.load %arg10[%c0_203, %c0_204] : memref<2x128xf32, #tpu.memory_space<vmem>>, vector<2x128xf32>
    tpu.vector_store %arg10[%c0_203, %c0_204], %383 {strides = array<i32>} : memref<2x128xf32, #tpu.memory_space<vmem>>, vector<2x128xf32>,
    %385 = vector.shape_cast %376 : vector<2x1xi1> to vector<2x1xi1>
    %386 = vector.broadcast %385 : vector<2x1xi1> to vector<2x128xi1>
    %387 = arith.select %386, %370, %300 : vector<2x128xi1>, vector<2x128xf32>
    %c0_205 = arith.constant 0 : index
    %c0_206 = arith.constant 0 : index
    %388 = vector.load %arg13[%c0_205, %c0_206] : memref<2x128xf32, #tpu.memory_space<vmem>>, vector<2x128xf32>
    tpu.vector_store %arg13[%c0_205, %c0_206], %387 {strides = array<i32>} : memref<2x128xf32, #tpu.memory_space<vmem>>, vector<2x128xf32>,
    %389 = vector.shape_cast %376 : vector<2x1xi1> to vector<2x1xi1>
    %390 = vector.broadcast %389 : vector<2x1xi1> to vector<2x128xi1>
    %391 = arith.select %390, %372, %299 : vector<2x128xi1>, vector<2x128xf32>
    %c0_207 = arith.constant 0 : index
    %c0_208 = arith.constant 0 : index
    %392 = vector.load %arg12[%c0_207, %c0_208] : memref<2x128xf32, #tpu.memory_space<vmem>>, vector<2x128xf32>
    tpu.vector_store %arg12[%c0_207, %c0_208], %391 {strides = array<i32>} : memref<2x128xf32, #tpu.memory_space<vmem>>, vector<2x128xf32>,
    %cst_209 = arith.constant 0.000000e+00 : f32
    %393 = vector.shape_cast %374 : vector<2x1xi1> to vector<2x1xi1>
    %394 = vector.broadcast %393 : vector<2x1xi1> to vector<2x128xi1>
    %395 = vector.broadcast %cst_209 : f32 to vector<2x128xf32>
    %396 = arith.select %394, %341, %395 : vector<2x128xi1>, vector<2x128xf32>
    %c2_210 = arith.constant 2 : index
    %c0_211 = arith.constant 0 : index
    %c0_212 = arith.constant 0 : index
    %397 = vector.load %arg7[%c2_210, %c0_211, %c0_212] : memref<8x2x256xf32, #tpu.memory_space<vmem>>, vector<1x2x128xf32>
    %398 = vector.shape_cast %397 : vector<1x2x128xf32> to vector<2x128xf32>
    %399 = vector.shape_cast %396 : vector<2x128xf32> to vector<1x2x128xf32>
    tpu.vector_store %arg7[%c2_210, %c0_211, %c0_212], %399 {strides = array<i32>} : memref<8x2x256xf32, #tpu.memory_space<vmem>>, vector<1x2x128xf32>,
    %cst_213 = arith.constant 0.000000e+00 : f32
    %400 = vector.shape_cast %376 : vector<2x1xi1> to vector<2x1xi1>
    %401 = vector.broadcast %400 : vector<2x1xi1> to vector<2x128xi1>
    %402 = vector.broadcast %cst_213 : f32 to vector<2x128xf32>
    %403 = arith.select %401, %372, %402 : vector<2x128xi1>, vector<2x128xf32>
    %c5_214 = arith.constant 5 : index
    %c0_215 = arith.constant 0 : index
    %c128_216 = arith.constant 128 : index
    %404 = vector.load %arg7[%c5_214, %c0_215, %c128_216] : memref<8x2x256xf32, #tpu.memory_space<vmem>>, vector<1x2x128xf32>
    %405 = vector.shape_cast %404 : vector<1x2x128xf32> to vector<2x128xf32>
    %406 = vector.shape_cast %403 : vector<2x128xf32> to vector<1x2x128xf32>
    tpu.vector_store %arg7[%c5_214, %c0_215, %c128_216], %406 {strides = array<i32>} : memref<8x2x256xf32, #tpu.memory_space<vmem>>, vector<1x2x128xf32>,
    %c0_217 = arith.constant 0 : index
    %c0_218 = arith.constant 0 : index
    %407 = vector.load %arg10[%c0_217, %c0_218] : memref<2x128xf32, #tpu.memory_space<vmem>>, vector<2x128xf32>
    %c0_219 = arith.constant 0 : index
    %c0_220 = arith.constant 0 : index
    %408 = vector.load %arg11[%c0_219, %c0_220] : memref<2x128xf32, #tpu.memory_space<vmem>>, vector<2x128xf32>
    %c0_221 = arith.constant 0 : index
    %c0_222 = arith.constant 0 : index
    %409 = vector.load %arg12[%c0_221, %c0_222] : memref<2x128xf32, #tpu.memory_space<vmem>>, vector<2x128xf32>
    %c0_223 = arith.constant 0 : index
    %c0_224 = arith.constant 0 : index
    %410 = vector.load %arg13[%c0_223, %c0_224] : memref<2x128xf32, #tpu.memory_space<vmem>>, vector<2x128xf32>
    %c3_225 = arith.constant 3 : index
    %c0_226 = arith.constant 0 : index
    %c0_227 = arith.constant 0 : index
    %411 = vector.load %arg9[%c3_225, %c0_226, %c0_227] : memref<8x2x1024xf32, #tpu.memory_space<vmem>>, vector<1x2x512xf32>
    %412 = vector.shape_cast %411 : vector<1x2x512xf32> to vector<2x512xf32>
    %413 = arith.truncf %407 : vector<2x128xf32> to vector<2x128xbf16>
    %cst_228 = arith.constant dense<0.000000e+00> : vector<2x512xf32>
    %414 = tpu.matmul %413, %74, %cst_228 {dimension_numbers = #tpu.dot_dimension_numbers<[1], [0], [0], [1], [0, 0, 1, 1], [], []>} : vector<2x128xbf16>, vector<128x512xbf16>, vector<2x512xf32> -> vector<2x512xf32>
    %415 = arith.addf %412, %414 : vector<2x512xf32>
    %c4_229 = arith.constant 4 : index
    %c0_230 = arith.constant 0 : index
    %c512_231 = arith.constant 512 : index
    %416 = vector.load %arg9[%c4_229, %c0_230, %c512_231] : memref<8x2x1024xf32, #tpu.memory_space<vmem>>, vector<1x2x512xf32>
    %417 = vector.shape_cast %416 : vector<1x2x512xf32> to vector<2x512xf32>
    %418 = arith.truncf %409 : vector<2x128xf32> to vector<2x128xbf16>
    %cst_232 = arith.constant dense<0.000000e+00> : vector<2x512xf32>
    %419 = tpu.matmul %418, %75, %cst_232 {dimension_numbers = #tpu.dot_dimension_numbers<[1], [0], [0], [1], [0, 0, 1, 1], [], []>} : vector<2x128xbf16>, vector<128x512xbf16>, vector<2x512xf32> -> vector<2x512xf32>
    %420 = arith.addf %417, %419 : vector<2x512xf32>
    %421 = vector.extract_strided_slice %415 {offsets = [0, 0], sizes = [2, 128], strides = [1, 1]} : vector<2x512xf32> to vector<2x128xf32>
    %cst_233 = arith.constant 5.000000e-01 : f32
    %422 = vector.broadcast %cst_233 : f32 to vector<2x128xf32>
    %423 = arith.mulf %422, %421 : vector<2x128xf32>
    %424 = math.tanh %423 : vector<2x128xf32>
    %cst_234 = arith.constant 5.000000e-01 : f32
    %425 = vector.broadcast %cst_234 : f32 to vector<2x128xf32>
    %426 = arith.mulf %425, %424 : vector<2x128xf32>
    %cst_235 = arith.constant 5.000000e-01 : f32
    %427 = vector.broadcast %cst_235 : f32 to vector<2x128xf32>
    %428 = arith.addf %426, %427 : vector<2x128xf32>
    %429 = vector.extract_strided_slice %415 {offsets = [0, 128], sizes = [2, 128], strides = [1, 1]} : vector<2x512xf32> to vector<2x128xf32>
    %cst_236 = arith.constant 5.000000e-01 : f32
    %430 = vector.broadcast %cst_236 : f32 to vector<2x128xf32>
    %431 = arith.mulf %430, %429 : vector<2x128xf32>
    %432 = math.tanh %431 : vector<2x128xf32>
    %cst_237 = arith.constant 5.000000e-01 : f32
    %433 = vector.broadcast %cst_237 : f32 to vector<2x128xf32>
    %434 = arith.mulf %433, %432 : vector<2x128xf32>
    %cst_238 = arith.constant 5.000000e-01 : f32
    %435 = vector.broadcast %cst_238 : f32 to vector<2x128xf32>
    %436 = arith.addf %434, %435 : vector<2x128xf32>
    %437 = vector.extract_strided_slice %415 {offsets = [0, 256], sizes = [2, 128], strides = [1, 1]} : vector<2x512xf32> to vector<2x128xf32>
    %438 = math.tanh %437 : vector<2x128xf32>
    %439 = vector.extract_strided_slice %415 {offsets = [0, 384], sizes = [2, 128], strides = [1, 1]} : vector<2x512xf32> to vector<2x128xf32>
    %cst_239 = arith.constant 5.000000e-01 : f32
    %440 = vector.broadcast %cst_239 : f32 to vector<2x128xf32>
    %441 = arith.mulf %440, %439 : vector<2x128xf32>
    %442 = math.tanh %441 : vector<2x128xf32>
    %cst_240 = arith.constant 5.000000e-01 : f32
    %443 = vector.broadcast %cst_240 : f32 to vector<2x128xf32>
    %444 = arith.mulf %443, %442 : vector<2x128xf32>
    %cst_241 = arith.constant 5.000000e-01 : f32
    %445 = vector.broadcast %cst_241 : f32 to vector<2x128xf32>
    %446 = arith.addf %444, %445 : vector<2x128xf32>
    %447 = arith.mulf %436, %408 : vector<2x128xf32>
    %448 = arith.mulf %428, %438 : vector<2x128xf32>
    %449 = arith.addf %447, %448 : vector<2x128xf32>
    %450 = math.tanh %449 : vector<2x128xf32>
    %451 = arith.mulf %446, %450 : vector<2x128xf32>
    %452 = vector.extract_strided_slice %420 {offsets = [0, 0], sizes = [2, 128], strides = [1, 1]} : vector<2x512xf32> to vector<2x128xf32>
    %cst_242 = arith.constant 5.000000e-01 : f32
    %453 = vector.broadcast %cst_242 : f32 to vector<2x128xf32>
    %454 = arith.mulf %453, %452 : vector<2x128xf32>
    %455 = math.tanh %454 : vector<2x128xf32>
    %cst_243 = arith.constant 5.000000e-01 : f32
    %456 = vector.broadcast %cst_243 : f32 to vector<2x128xf32>
    %457 = arith.mulf %456, %455 : vector<2x128xf32>
    %cst_244 = arith.constant 5.000000e-01 : f32
    %458 = vector.broadcast %cst_244 : f32 to vector<2x128xf32>
    %459 = arith.addf %457, %458 : vector<2x128xf32>
    %460 = vector.extract_strided_slice %420 {offsets = [0, 128], sizes = [2, 128], strides = [1, 1]} : vector<2x512xf32> to vector<2x128xf32>
    %cst_245 = arith.constant 5.000000e-01 : f32
    %461 = vector.broadcast %cst_245 : f32 to vector<2x128xf32>
    %462 = arith.mulf %461, %460 : vector<2x128xf32>
    %463 = math.tanh %462 : vector<2x128xf32>
    %cst_246 = arith.constant 5.000000e-01 : f32
    %464 = vector.broadcast %cst_246 : f32 to vector<2x128xf32>
    %465 = arith.mulf %464, %463 : vector<2x128xf32>
    %cst_247 = arith.constant 5.000000e-01 : f32
    %466 = vector.broadcast %cst_247 : f32 to vector<2x128xf32>
    %467 = arith.addf %465, %466 : vector<2x128xf32>
    %468 = vector.extract_strided_slice %420 {offsets = [0, 256], sizes = [2, 128], strides = [1, 1]} : vector<2x512xf32> to vector<2x128xf32>
    %469 = math.tanh %468 : vector<2x128xf32>
    %470 = vector.extract_strided_slice %420 {offsets = [0, 384], sizes = [2, 128], strides = [1, 1]} : vector<2x512xf32> to vector<2x128xf32>
    %cst_248 = arith.constant 5.000000e-01 : f32
    %471 = vector.broadcast %cst_248 : f32 to vector<2x128xf32>
    %472 = arith.mulf %471, %470 : vector<2x128xf32>
    %473 = math.tanh %472 : vector<2x128xf32>
    %cst_249 = arith.constant 5.000000e-01 : f32
    %474 = vector.broadcast %cst_249 : f32 to vector<2x128xf32>
    %475 = arith.mulf %474, %473 : vector<2x128xf32>
    %cst_250 = arith.constant 5.000000e-01 : f32
    %476 = vector.broadcast %cst_250 : f32 to vector<2x128xf32>
    %477 = arith.addf %475, %476 : vector<2x128xf32>
    %478 = arith.mulf %467, %410 : vector<2x128xf32>
    %479 = arith.mulf %459, %469 : vector<2x128xf32>
    %480 = arith.addf %478, %479 : vector<2x128xf32>
    %481 = math.tanh %480 : vector<2x128xf32>
    %482 = arith.mulf %477, %481 : vector<2x128xf32>
    %c3_i32 = arith.constant 3 : i32
    %483 = vector.broadcast %c3_i32 : i32 to vector<2x1xi32>
    %484 = arith.cmpi sgt, %76, %483 : vector<2x1xi32>
    %c4_i32 = arith.constant 4 : i32
    %485 = vector.broadcast %c4_i32 : i32 to vector<2x1xi32>
    %486 = arith.cmpi sgt, %76, %485 : vector<2x1xi32>
    %487 = vector.shape_cast %484 : vector<2x1xi1> to vector<2x1xi1>
    %488 = vector.broadcast %487 : vector<2x1xi1> to vector<2x128xi1>
    %489 = arith.select %488, %449, %408 : vector<2x128xi1>, vector<2x128xf32>
    %c0_251 = arith.constant 0 : index
    %c0_252 = arith.constant 0 : index
    %490 = vector.load %arg11[%c0_251, %c0_252] : memref<2x128xf32, #tpu.memory_space<vmem>>, vector<2x128xf32>
    tpu.vector_store %arg11[%c0_251, %c0_252], %489 {strides = array<i32>} : memref<2x128xf32, #tpu.memory_space<vmem>>, vector<2x128xf32>,
    %491 = vector.shape_cast %484 : vector<2x1xi1> to vector<2x1xi1>
    %492 = vector.broadcast %491 : vector<2x1xi1> to vector<2x128xi1>
    %493 = arith.select %492, %451, %407 : vector<2x128xi1>, vector<2x128xf32>
    %c0_253 = arith.constant 0 : index
    %c0_254 = arith.constant 0 : index
    %494 = vector.load %arg10[%c0_253, %c0_254] : memref<2x128xf32, #tpu.memory_space<vmem>>, vector<2x128xf32>
    tpu.vector_store %arg10[%c0_253, %c0_254], %493 {strides = array<i32>} : memref<2x128xf32, #tpu.memory_space<vmem>>, vector<2x128xf32>,
    %495 = vector.shape_cast %486 : vector<2x1xi1> to vector<2x1xi1>
    %496 = vector.broadcast %495 : vector<2x1xi1> to vector<2x128xi1>
    %497 = arith.select %496, %480, %410 : vector<2x128xi1>, vector<2x128xf32>
    %c0_255 = arith.constant 0 : index
    %c0_256 = arith.constant 0 : index
    %498 = vector.load %arg13[%c0_255, %c0_256] : memref<2x128xf32, #tpu.memory_space<vmem>>, vector<2x128xf32>
    tpu.vector_store %arg13[%c0_255, %c0_256], %497 {strides = array<i32>} : memref<2x128xf32, #tpu.memory_space<vmem>>, vector<2x128xf32>,
    %499 = vector.shape_cast %486 : vector<2x1xi1> to vector<2x1xi1>
    %500 = vector.broadcast %499 : vector<2x1xi1> to vector<2x128xi1>
    %501 = arith.select %500, %482, %409 : vector<2x128xi1>, vector<2x128xf32>
    %c0_257 = arith.constant 0 : index
    %c0_258 = arith.constant 0 : index
    %502 = vector.load %arg12[%c0_257, %c0_258] : memref<2x128xf32, #tpu.memory_space<vmem>>, vector<2x128xf32>
    tpu.vector_store %arg12[%c0_257, %c0_258], %501 {strides = array<i32>} : memref<2x128xf32, #tpu.memory_space<vmem>>, vector<2x128xf32>,
    %cst_259 = arith.constant 0.000000e+00 : f32
    %503 = vector.shape_cast %484 : vector<2x1xi1> to vector<2x1xi1>
    %504 = vector.broadcast %503 : vector<2x1xi1> to vector<2x128xi1>
    %505 = vector.broadcast %cst_259 : f32 to vector<2x128xf32>
    %506 = arith.select %504, %451, %505 : vector<2x128xi1>, vector<2x128xf32>
    %c3_260 = arith.constant 3 : index
    %c0_261 = arith.constant 0 : index
    %c0_262 = arith.constant 0 : index
    %507 = vector.load %arg7[%c3_260, %c0_261, %c0_262] : memref<8x2x256xf32, #tpu.memory_space<vmem>>, vector<1x2x128xf32>
    %508 = vector.shape_cast %507 : vector<1x2x128xf32> to vector<2x128xf32>
    %509 = vector.shape_cast %506 : vector<2x128xf32> to vector<1x2x128xf32>
    tpu.vector_store %arg7[%c3_260, %c0_261, %c0_262], %509 {strides = array<i32>} : memref<8x2x256xf32, #tpu.memory_space<vmem>>, vector<1x2x128xf32>,
    %cst_263 = arith.constant 0.000000e+00 : f32
    %510 = vector.shape_cast %486 : vector<2x1xi1> to vector<2x1xi1>
    %511 = vector.broadcast %510 : vector<2x1xi1> to vector<2x128xi1>
    %512 = vector.broadcast %cst_263 : f32 to vector<2x128xf32>
    %513 = arith.select %511, %482, %512 : vector<2x128xi1>, vector<2x128xf32>
    %c4_264 = arith.constant 4 : index
    %c0_265 = arith.constant 0 : index
    %c128_266 = arith.constant 128 : index
    %514 = vector.load %arg7[%c4_264, %c0_265, %c128_266] : memref<8x2x256xf32, #tpu.memory_space<vmem>>, vector<1x2x128xf32>
    %515 = vector.shape_cast %514 : vector<1x2x128xf32> to vector<2x128xf32>
    %516 = vector.shape_cast %513 : vector<2x128xf32> to vector<1x2x128xf32>
    tpu.vector_store %arg7[%c4_264, %c0_265, %c128_266], %516 {strides = array<i32>} : memref<8x2x256xf32, #tpu.memory_space<vmem>>, vector<1x2x128xf32>,
    %c0_267 = arith.constant 0 : index
    %c0_268 = arith.constant 0 : index
    %517 = vector.load %arg10[%c0_267, %c0_268] : memref<2x128xf32, #tpu.memory_space<vmem>>, vector<2x128xf32>
    %c0_269 = arith.constant 0 : index
    %c0_270 = arith.constant 0 : index
    %518 = vector.load %arg11[%c0_269, %c0_270] : memref<2x128xf32, #tpu.memory_space<vmem>>, vector<2x128xf32>
    %c0_271 = arith.constant 0 : index
    %c0_272 = arith.constant 0 : index
    %519 = vector.load %arg12[%c0_271, %c0_272] : memref<2x128xf32, #tpu.memory_space<vmem>>, vector<2x128xf32>
    %c0_273 = arith.constant 0 : index
    %c0_274 = arith.constant 0 : index
    %520 = vector.load %arg13[%c0_273, %c0_274] : memref<2x128xf32, #tpu.memory_space<vmem>>, vector<2x128xf32>
    %c4_275 = arith.constant 4 : index
    %c0_276 = arith.constant 0 : index
    %c0_277 = arith.constant 0 : index
    %521 = vector.load %arg9[%c4_275, %c0_276, %c0_277] : memref<8x2x1024xf32, #tpu.memory_space<vmem>>, vector<1x2x512xf32>
    %522 = vector.shape_cast %521 : vector<1x2x512xf32> to vector<2x512xf32>
    %523 = arith.truncf %517 : vector<2x128xf32> to vector<2x128xbf16>
    %cst_278 = arith.constant dense<0.000000e+00> : vector<2x512xf32>
    %524 = tpu.matmul %523, %74, %cst_278 {dimension_numbers = #tpu.dot_dimension_numbers<[1], [0], [0], [1], [0, 0, 1, 1], [], []>} : vector<2x128xbf16>, vector<128x512xbf16>, vector<2x512xf32> -> vector<2x512xf32>
    %525 = arith.addf %522, %524 : vector<2x512xf32>
    %c3_279 = arith.constant 3 : index
    %c0_280 = arith.constant 0 : index
    %c512_281 = arith.constant 512 : index
    %526 = vector.load %arg9[%c3_279, %c0_280, %c512_281] : memref<8x2x1024xf32, #tpu.memory_space<vmem>>, vector<1x2x512xf32>
    %527 = vector.shape_cast %526 : vector<1x2x512xf32> to vector<2x512xf32>
    %528 = arith.truncf %519 : vector<2x128xf32> to vector<2x128xbf16>
    %cst_282 = arith.constant dense<0.000000e+00> : vector<2x512xf32>
    %529 = tpu.matmul %528, %75, %cst_282 {dimension_numbers = #tpu.dot_dimension_numbers<[1], [0], [0], [1], [0, 0, 1, 1], [], []>} : vector<2x128xbf16>, vector<128x512xbf16>, vector<2x512xf32> -> vector<2x512xf32>
    %530 = arith.addf %527, %529 : vector<2x512xf32>
    %531 = vector.extract_strided_slice %525 {offsets = [0, 0], sizes = [2, 128], strides = [1, 1]} : vector<2x512xf32> to vector<2x128xf32>
    %cst_283 = arith.constant 5.000000e-01 : f32
    %532 = vector.broadcast %cst_283 : f32 to vector<2x128xf32>
    %533 = arith.mulf %532, %531 : vector<2x128xf32>
    %534 = math.tanh %533 : vector<2x128xf32>
    %cst_284 = arith.constant 5.000000e-01 : f32
    %535 = vector.broadcast %cst_284 : f32 to vector<2x128xf32>
    %536 = arith.mulf %535, %534 : vector<2x128xf32>
    %cst_285 = arith.constant 5.000000e-01 : f32
    %537 = vector.broadcast %cst_285 : f32 to vector<2x128xf32>
    %538 = arith.addf %536, %537 : vector<2x128xf32>
    %539 = vector.extract_strided_slice %525 {offsets = [0, 128], sizes = [2, 128], strides = [1, 1]} : vector<2x512xf32> to vector<2x128xf32>
    %cst_286 = arith.constant 5.000000e-01 : f32
    %540 = vector.broadcast %cst_286 : f32 to vector<2x128xf32>
    %541 = arith.mulf %540, %539 : vector<2x128xf32>
    %542 = math.tanh %541 : vector<2x128xf32>
    %cst_287 = arith.constant 5.000000e-01 : f32
    %543 = vector.broadcast %cst_287 : f32 to vector<2x128xf32>
    %544 = arith.mulf %543, %542 : vector<2x128xf32>
    %cst_288 = arith.constant 5.000000e-01 : f32
    %545 = vector.broadcast %cst_288 : f32 to vector<2x128xf32>
    %546 = arith.addf %544, %545 : vector<2x128xf32>
    %547 = vector.extract_strided_slice %525 {offsets = [0, 256], sizes = [2, 128], strides = [1, 1]} : vector<2x512xf32> to vector<2x128xf32>
    %548 = math.tanh %547 : vector<2x128xf32>
    %549 = vector.extract_strided_slice %525 {offsets = [0, 384], sizes = [2, 128], strides = [1, 1]} : vector<2x512xf32> to vector<2x128xf32>
    %cst_289 = arith.constant 5.000000e-01 : f32
    %550 = vector.broadcast %cst_289 : f32 to vector<2x128xf32>
    %551 = arith.mulf %550, %549 : vector<2x128xf32>
    %552 = math.tanh %551 : vector<2x128xf32>
    %cst_290 = arith.constant 5.000000e-01 : f32
    %553 = vector.broadcast %cst_290 : f32 to vector<2x128xf32>
    %554 = arith.mulf %553, %552 : vector<2x128xf32>
    %cst_291 = arith.constant 5.000000e-01 : f32
    %555 = vector.broadcast %cst_291 : f32 to vector<2x128xf32>
    %556 = arith.addf %554, %555 : vector<2x128xf32>
    %557 = arith.mulf %546, %518 : vector<2x128xf32>
    %558 = arith.mulf %538, %548 : vector<2x128xf32>
    %559 = arith.addf %557, %558 : vector<2x128xf32>
    %560 = math.tanh %559 : vector<2x128xf32>
    %561 = arith.mulf %556, %560 : vector<2x128xf32>
    %562 = vector.extract_strided_slice %530 {offsets = [0, 0], sizes = [2, 128], strides = [1, 1]} : vector<2x512xf32> to vector<2x128xf32>
    %cst_292 = arith.constant 5.000000e-01 : f32
    %563 = vector.broadcast %cst_292 : f32 to vector<2x128xf32>
    %564 = arith.mulf %563, %562 : vector<2x128xf32>
    %565 = math.tanh %564 : vector<2x128xf32>
    %cst_293 = arith.constant 5.000000e-01 : f32
    %566 = vector.broadcast %cst_293 : f32 to vector<2x128xf32>
    %567 = arith.mulf %566, %565 : vector<2x128xf32>
    %cst_294 = arith.constant 5.000000e-01 : f32
    %568 = vector.broadcast %cst_294 : f32 to vector<2x128xf32>
    %569 = arith.addf %567, %568 : vector<2x128xf32>
    %570 = vector.extract_strided_slice %530 {offsets = [0, 128], sizes = [2, 128], strides = [1, 1]} : vector<2x512xf32> to vector<2x128xf32>
    %cst_295 = arith.constant 5.000000e-01 : f32
    %571 = vector.broadcast %cst_295 : f32 to vector<2x128xf32>
    %572 = arith.mulf %571, %570 : vector<2x128xf32>
    %573 = math.tanh %572 : vector<2x128xf32>
    %cst_296 = arith.constant 5.000000e-01 : f32
    %574 = vector.broadcast %cst_296 : f32 to vector<2x128xf32>
    %575 = arith.mulf %574, %573 : vector<2x128xf32>
    %cst_297 = arith.constant 5.000000e-01 : f32
    %576 = vector.broadcast %cst_297 : f32 to vector<2x128xf32>
    %577 = arith.addf %575, %576 : vector<2x128xf32>
    %578 = vector.extract_strided_slice %530 {offsets = [0, 256], sizes = [2, 128], strides = [1, 1]} : vector<2x512xf32> to vector<2x128xf32>
    %579 = math.tanh %578 : vector<2x128xf32>
    %580 = vector.extract_strided_slice %530 {offsets = [0, 384], sizes = [2, 128], strides = [1, 1]} : vector<2x512xf32> to vector<2x128xf32>
    %cst_298 = arith.constant 5.000000e-01 : f32
    %581 = vector.broadcast %cst_298 : f32 to vector<2x128xf32>
    %582 = arith.mulf %581, %580 : vector<2x128xf32>
    %583 = math.tanh %582 : vector<2x128xf32>
    %cst_299 = arith.constant 5.000000e-01 : f32
    %584 = vector.broadcast %cst_299 : f32 to vector<2x128xf32>
    %585 = arith.mulf %584, %583 : vector<2x128xf32>
    %cst_300 = arith.constant 5.000000e-01 : f32
    %586 = vector.broadcast %cst_300 : f32 to vector<2x128xf32>
    %587 = arith.addf %585, %586 : vector<2x128xf32>
    %588 = arith.mulf %577, %520 : vector<2x128xf32>
    %589 = arith.mulf %569, %579 : vector<2x128xf32>
    %590 = arith.addf %588, %589 : vector<2x128xf32>
    %591 = math.tanh %590 : vector<2x128xf32>
    %592 = arith.mulf %587, %591 : vector<2x128xf32>
    %c4_i32_301 = arith.constant 4 : i32
    %593 = vector.broadcast %c4_i32_301 : i32 to vector<2x1xi32>
    %594 = arith.cmpi sgt, %76, %593 : vector<2x1xi32>
    %c3_i32_302 = arith.constant 3 : i32
    %595 = vector.broadcast %c3_i32_302 : i32 to vector<2x1xi32>
    %596 = arith.cmpi sgt, %76, %595 : vector<2x1xi32>
    %597 = vector.shape_cast %594 : vector<2x1xi1> to vector<2x1xi1>
    %598 = vector.broadcast %597 : vector<2x1xi1> to vector<2x128xi1>
    %599 = arith.select %598, %559, %518 : vector<2x128xi1>, vector<2x128xf32>
    %c0_303 = arith.constant 0 : index
    %c0_304 = arith.constant 0 : index
    %600 = vector.load %arg11[%c0_303, %c0_304] : memref<2x128xf32, #tpu.memory_space<vmem>>, vector<2x128xf32>
    tpu.vector_store %arg11[%c0_303, %c0_304], %599 {strides = array<i32>} : memref<2x128xf32, #tpu.memory_space<vmem>>, vector<2x128xf32>,
    %601 = vector.shape_cast %594 : vector<2x1xi1> to vector<2x1xi1>
    %602 = vector.broadcast %601 : vector<2x1xi1> to vector<2x128xi1>
    %603 = arith.select %602, %561, %517 : vector<2x128xi1>, vector<2x128xf32>
    %c0_305 = arith.constant 0 : index
    %c0_306 = arith.constant 0 : index
    %604 = vector.load %arg10[%c0_305, %c0_306] : memref<2x128xf32, #tpu.memory_space<vmem>>, vector<2x128xf32>
    tpu.vector_store %arg10[%c0_305, %c0_306], %603 {strides = array<i32>} : memref<2x128xf32, #tpu.memory_space<vmem>>, vector<2x128xf32>,
    %605 = vector.shape_cast %596 : vector<2x1xi1> to vector<2x1xi1>
    %606 = vector.broadcast %605 : vector<2x1xi1> to vector<2x128xi1>
    %607 = arith.select %606, %590, %520 : vector<2x128xi1>, vector<2x128xf32>
    %c0_307 = arith.constant 0 : index
    %c0_308 = arith.constant 0 : index
    %608 = vector.load %arg13[%c0_307, %c0_308] : memref<2x128xf32, #tpu.memory_space<vmem>>, vector<2x128xf32>
    tpu.vector_store %arg13[%c0_307, %c0_308], %607 {strides = array<i32>} : memref<2x128xf32, #tpu.memory_space<vmem>>, vector<2x128xf32>,
    %609 = vector.shape_cast %596 : vector<2x1xi1> to vector<2x1xi1>
    %610 = vector.broadcast %609 : vector<2x1xi1> to vector<2x128xi1>
    %611 = arith.select %610, %592, %519 : vector<2x128xi1>, vector<2x128xf32>
    %c0_309 = arith.constant 0 : index
    %c0_310 = arith.constant 0 : index
    %612 = vector.load %arg12[%c0_309, %c0_310] : memref<2x128xf32, #tpu.memory_space<vmem>>, vector<2x128xf32>
    tpu.vector_store %arg12[%c0_309, %c0_310], %611 {strides = array<i32>} : memref<2x128xf32, #tpu.memory_space<vmem>>, vector<2x128xf32>,
    %cst_311 = arith.constant 0.000000e+00 : f32
    %613 = vector.shape_cast %594 : vector<2x1xi1> to vector<2x1xi1>
    %614 = vector.broadcast %613 : vector<2x1xi1> to vector<2x128xi1>
    %615 = vector.broadcast %cst_311 : f32 to vector<2x128xf32>
    %616 = arith.select %614, %561, %615 : vector<2x128xi1>, vector<2x128xf32>
    %c4_312 = arith.constant 4 : index
    %c0_313 = arith.constant 0 : index
    %c0_314 = arith.constant 0 : index
    %617 = vector.load %arg7[%c4_312, %c0_313, %c0_314] : memref<8x2x256xf32, #tpu.memory_space<vmem>>, vector<1x2x128xf32>
    %618 = vector.shape_cast %617 : vector<1x2x128xf32> to vector<2x128xf32>
    %619 = vector.shape_cast %616 : vector<2x128xf32> to vector<1x2x128xf32>
    tpu.vector_store %arg7[%c4_312, %c0_313, %c0_314], %619 {strides = array<i32>} : memref<8x2x256xf32, #tpu.memory_space<vmem>>, vector<1x2x128xf32>,
    %cst_315 = arith.constant 0.000000e+00 : f32
    %620 = vector.shape_cast %596 : vector<2x1xi1> to vector<2x1xi1>
    %621 = vector.broadcast %620 : vector<2x1xi1> to vector<2x128xi1>
    %622 = vector.broadcast %cst_315 : f32 to vector<2x128xf32>
    %623 = arith.select %621, %592, %622 : vector<2x128xi1>, vector<2x128xf32>
    %c3_316 = arith.constant 3 : index
    %c0_317 = arith.constant 0 : index
    %c128_318 = arith.constant 128 : index
    %624 = vector.load %arg7[%c3_316, %c0_317, %c128_318] : memref<8x2x256xf32, #tpu.memory_space<vmem>>, vector<1x2x128xf32>
    %625 = vector.shape_cast %624 : vector<1x2x128xf32> to vector<2x128xf32>
    %626 = vector.shape_cast %623 : vector<2x128xf32> to vector<1x2x128xf32>
    tpu.vector_store %arg7[%c3_316, %c0_317, %c128_318], %626 {strides = array<i32>} : memref<8x2x256xf32, #tpu.memory_space<vmem>>, vector<1x2x128xf32>,
    %c0_319 = arith.constant 0 : index
    %c0_320 = arith.constant 0 : index
    %627 = vector.load %arg10[%c0_319, %c0_320] : memref<2x128xf32, #tpu.memory_space<vmem>>, vector<2x128xf32>
    %c0_321 = arith.constant 0 : index
    %c0_322 = arith.constant 0 : index
    %628 = vector.load %arg11[%c0_321, %c0_322] : memref<2x128xf32, #tpu.memory_space<vmem>>, vector<2x128xf32>
    %c0_323 = arith.constant 0 : index
    %c0_324 = arith.constant 0 : index
    %629 = vector.load %arg12[%c0_323, %c0_324] : memref<2x128xf32, #tpu.memory_space<vmem>>, vector<2x128xf32>
    %c0_325 = arith.constant 0 : index
    %c0_326 = arith.constant 0 : index
    %630 = vector.load %arg13[%c0_325, %c0_326] : memref<2x128xf32, #tpu.memory_space<vmem>>, vector<2x128xf32>
    %c5_327 = arith.constant 5 : index
    %c0_328 = arith.constant 0 : index
    %c0_329 = arith.constant 0 : index
    %631 = vector.load %arg9[%c5_327, %c0_328, %c0_329] : memref<8x2x1024xf32, #tpu.memory_space<vmem>>, vector<1x2x512xf32>
    %632 = vector.shape_cast %631 : vector<1x2x512xf32> to vector<2x512xf32>
    %633 = arith.truncf %627 : vector<2x128xf32> to vector<2x128xbf16>
    %cst_330 = arith.constant dense<0.000000e+00> : vector<2x512xf32>
    %634 = tpu.matmul %633, %74, %cst_330 {dimension_numbers = #tpu.dot_dimension_numbers<[1], [0], [0], [1], [0, 0, 1, 1], [], []>} : vector<2x128xbf16>, vector<128x512xbf16>, vector<2x512xf32> -> vector<2x512xf32>
    %635 = arith.addf %632, %634 : vector<2x512xf32>
    %c2_331 = arith.constant 2 : index
    %c0_332 = arith.constant 0 : index
    %c512_333 = arith.constant 512 : index
    %636 = vector.load %arg9[%c2_331, %c0_332, %c512_333] : memref<8x2x1024xf32, #tpu.memory_space<vmem>>, vector<1x2x512xf32>
    %637 = vector.shape_cast %636 : vector<1x2x512xf32> to vector<2x512xf32>
    %638 = arith.truncf %629 : vector<2x128xf32> to vector<2x128xbf16>
    %cst_334 = arith.constant dense<0.000000e+00> : vector<2x512xf32>
    %639 = tpu.matmul %638, %75, %cst_334 {dimension_numbers = #tpu.dot_dimension_numbers<[1], [0], [0], [1], [0, 0, 1, 1], [], []>} : vector<2x128xbf16>, vector<128x512xbf16>, vector<2x512xf32> -> vector<2x512xf32>
    %640 = arith.addf %637, %639 : vector<2x512xf32>
    %641 = vector.extract_strided_slice %635 {offsets = [0, 0], sizes = [2, 128], strides = [1, 1]} : vector<2x512xf32> to vector<2x128xf32>
    %cst_335 = arith.constant 5.000000e-01 : f32
    %642 = vector.broadcast %cst_335 : f32 to vector<2x128xf32>
    %643 = arith.mulf %642, %641 : vector<2x128xf32>
    %644 = math.tanh %643 : vector<2x128xf32>
    %cst_336 = arith.constant 5.000000e-01 : f32
    %645 = vector.broadcast %cst_336 : f32 to vector<2x128xf32>
    %646 = arith.mulf %645, %644 : vector<2x128xf32>
    %cst_337 = arith.constant 5.000000e-01 : f32
    %647 = vector.broadcast %cst_337 : f32 to vector<2x128xf32>
    %648 = arith.addf %646, %647 : vector<2x128xf32>
    %649 = vector.extract_strided_slice %635 {offsets = [0, 128], sizes = [2, 128], strides = [1, 1]} : vector<2x512xf32> to vector<2x128xf32>
    %cst_338 = arith.constant 5.000000e-01 : f32
    %650 = vector.broadcast %cst_338 : f32 to vector<2x128xf32>
    %651 = arith.mulf %650, %649 : vector<2x128xf32>
    %652 = math.tanh %651 : vector<2x128xf32>
    %cst_339 = arith.constant 5.000000e-01 : f32
    %653 = vector.broadcast %cst_339 : f32 to vector<2x128xf32>
    %654 = arith.mulf %653, %652 : vector<2x128xf32>
    %cst_340 = arith.constant 5.000000e-01 : f32
    %655 = vector.broadcast %cst_340 : f32 to vector<2x128xf32>
    %656 = arith.addf %654, %655 : vector<2x128xf32>
    %657 = vector.extract_strided_slice %635 {offsets = [0, 256], sizes = [2, 128], strides = [1, 1]} : vector<2x512xf32> to vector<2x128xf32>
    %658 = math.tanh %657 : vector<2x128xf32>
    %659 = vector.extract_strided_slice %635 {offsets = [0, 384], sizes = [2, 128], strides = [1, 1]} : vector<2x512xf32> to vector<2x128xf32>
    %cst_341 = arith.constant 5.000000e-01 : f32
    %660 = vector.broadcast %cst_341 : f32 to vector<2x128xf32>
    %661 = arith.mulf %660, %659 : vector<2x128xf32>
    %662 = math.tanh %661 : vector<2x128xf32>
    %cst_342 = arith.constant 5.000000e-01 : f32
    %663 = vector.broadcast %cst_342 : f32 to vector<2x128xf32>
    %664 = arith.mulf %663, %662 : vector<2x128xf32>
    %cst_343 = arith.constant 5.000000e-01 : f32
    %665 = vector.broadcast %cst_343 : f32 to vector<2x128xf32>
    %666 = arith.addf %664, %665 : vector<2x128xf32>
    %667 = arith.mulf %656, %628 : vector<2x128xf32>
    %668 = arith.mulf %648, %658 : vector<2x128xf32>
    %669 = arith.addf %667, %668 : vector<2x128xf32>
    %670 = math.tanh %669 : vector<2x128xf32>
    %671 = arith.mulf %666, %670 : vector<2x128xf32>
    %672 = vector.extract_strided_slice %640 {offsets = [0, 0], sizes = [2, 128], strides = [1, 1]} : vector<2x512xf32> to vector<2x128xf32>
    %cst_344 = arith.constant 5.000000e-01 : f32
    %673 = vector.broadcast %cst_344 : f32 to vector<2x128xf32>
    %674 = arith.mulf %673, %672 : vector<2x128xf32>
    %675 = math.tanh %674 : vector<2x128xf32>
    %cst_345 = arith.constant 5.000000e-01 : f32
    %676 = vector.broadcast %cst_345 : f32 to vector<2x128xf32>
    %677 = arith.mulf %676, %675 : vector<2x128xf32>
    %cst_346 = arith.constant 5.000000e-01 : f32
    %678 = vector.broadcast %cst_346 : f32 to vector<2x128xf32>
    %679 = arith.addf %677, %678 : vector<2x128xf32>
    %680 = vector.extract_strided_slice %640 {offsets = [0, 128], sizes = [2, 128], strides = [1, 1]} : vector<2x512xf32> to vector<2x128xf32>
    %cst_347 = arith.constant 5.000000e-01 : f32
    %681 = vector.broadcast %cst_347 : f32 to vector<2x128xf32>
    %682 = arith.mulf %681, %680 : vector<2x128xf32>
    %683 = math.tanh %682 : vector<2x128xf32>
    %cst_348 = arith.constant 5.000000e-01 : f32
    %684 = vector.broadcast %cst_348 : f32 to vector<2x128xf32>
    %685 = arith.mulf %684, %683 : vector<2x128xf32>
    %cst_349 = arith.constant 5.000000e-01 : f32
    %686 = vector.broadcast %cst_349 : f32 to vector<2x128xf32>
    %687 = arith.addf %685, %686 : vector<2x128xf32>
    %688 = vector.extract_strided_slice %640 {offsets = [0, 256], sizes = [2, 128], strides = [1, 1]} : vector<2x512xf32> to vector<2x128xf32>
    %689 = math.tanh %688 : vector<2x128xf32>
    %690 = vector.extract_strided_slice %640 {offsets = [0, 384], sizes = [2, 128], strides = [1, 1]} : vector<2x512xf32> to vector<2x128xf32>
    %cst_350 = arith.constant 5.000000e-01 : f32
    %691 = vector.broadcast %cst_350 : f32 to vector<2x128xf32>
    %692 = arith.mulf %691, %690 : vector<2x128xf32>
    %693 = math.tanh %692 : vector<2x128xf32>
    %cst_351 = arith.constant 5.000000e-01 : f32
    %694 = vector.broadcast %cst_351 : f32 to vector<2x128xf32>
    %695 = arith.mulf %694, %693 : vector<2x128xf32>
    %cst_352 = arith.constant 5.000000e-01 : f32
    %696 = vector.broadcast %cst_352 : f32 to vector<2x128xf32>
    %697 = arith.addf %695, %696 : vector<2x128xf32>
    %698 = arith.mulf %687, %630 : vector<2x128xf32>
    %699 = arith.mulf %679, %689 : vector<2x128xf32>
    %700 = arith.addf %698, %699 : vector<2x128xf32>
    %701 = math.tanh %700 : vector<2x128xf32>
    %702 = arith.mulf %697, %701 : vector<2x128xf32>
    %c5_i32_353 = arith.constant 5 : i32
    %703 = vector.broadcast %c5_i32_353 : i32 to vector<2x1xi32>
    %704 = arith.cmpi sgt, %76, %703 : vector<2x1xi32>
    %c2_i32_354 = arith.constant 2 : i32
    %705 = vector.broadcast %c2_i32_354 : i32 to vector<2x1xi32>
    %706 = arith.cmpi sgt, %76, %705 : vector<2x1xi32>
    %707 = vector.shape_cast %704 : vector<2x1xi1> to vector<2x1xi1>
    %708 = vector.broadcast %707 : vector<2x1xi1> to vector<2x128xi1>
    %709 = arith.select %708, %669, %628 : vector<2x128xi1>, vector<2x128xf32>
    %c0_355 = arith.constant 0 : index
    %c0_356 = arith.constant 0 : index
    %710 = vector.load %arg11[%c0_355, %c0_356] : memref<2x128xf32, #tpu.memory_space<vmem>>, vector<2x128xf32>
    tpu.vector_store %arg11[%c0_355, %c0_356], %709 {strides = array<i32>} : memref<2x128xf32, #tpu.memory_space<vmem>>, vector<2x128xf32>,
    %711 = vector.shape_cast %704 : vector<2x1xi1> to vector<2x1xi1>
    %712 = vector.broadcast %711 : vector<2x1xi1> to vector<2x128xi1>
    %713 = arith.select %712, %671, %627 : vector<2x128xi1>, vector<2x128xf32>
    %c0_357 = arith.constant 0 : index
    %c0_358 = arith.constant 0 : index
    %714 = vector.load %arg10[%c0_357, %c0_358] : memref<2x128xf32, #tpu.memory_space<vmem>>, vector<2x128xf32>
    tpu.vector_store %arg10[%c0_357, %c0_358], %713 {strides = array<i32>} : memref<2x128xf32, #tpu.memory_space<vmem>>, vector<2x128xf32>,
    %715 = vector.shape_cast %706 : vector<2x1xi1> to vector<2x1xi1>
    %716 = vector.broadcast %715 : vector<2x1xi1> to vector<2x128xi1>
    %717 = arith.select %716, %700, %630 : vector<2x128xi1>, vector<2x128xf32>
    %c0_359 = arith.constant 0 : index
    %c0_360 = arith.constant 0 : index
    %718 = vector.load %arg13[%c0_359, %c0_360] : memref<2x128xf32, #tpu.memory_space<vmem>>, vector<2x128xf32>
    tpu.vector_store %arg13[%c0_359, %c0_360], %717 {strides = array<i32>} : memref<2x128xf32, #tpu.memory_space<vmem>>, vector<2x128xf32>,
    %719 = vector.shape_cast %706 : vector<2x1xi1> to vector<2x1xi1>
    %720 = vector.broadcast %719 : vector<2x1xi1> to vector<2x128xi1>
    %721 = arith.select %720, %702, %629 : vector<2x128xi1>, vector<2x128xf32>
    %c0_361 = arith.constant 0 : index
    %c0_362 = arith.constant 0 : index
    %722 = vector.load %arg12[%c0_361, %c0_362] : memref<2x128xf32, #tpu.memory_space<vmem>>, vector<2x128xf32>
    tpu.vector_store %arg12[%c0_361, %c0_362], %721 {strides = array<i32>} : memref<2x128xf32, #tpu.memory_space<vmem>>, vector<2x128xf32>,
    %cst_363 = arith.constant 0.000000e+00 : f32
    %723 = vector.shape_cast %704 : vector<2x1xi1> to vector<2x1xi1>
    %724 = vector.broadcast %723 : vector<2x1xi1> to vector<2x128xi1>
    %725 = vector.broadcast %cst_363 : f32 to vector<2x128xf32>
    %726 = arith.select %724, %671, %725 : vector<2x128xi1>, vector<2x128xf32>
    %c5_364 = arith.constant 5 : index
    %c0_365 = arith.constant 0 : index
    %c0_366 = arith.constant 0 : index
    %727 = vector.load %arg7[%c5_364, %c0_365, %c0_366] : memref<8x2x256xf32, #tpu.memory_space<vmem>>, vector<1x2x128xf32>
    %728 = vector.shape_cast %727 : vector<1x2x128xf32> to vector<2x128xf32>
    %729 = vector.shape_cast %726 : vector<2x128xf32> to vector<1x2x128xf32>
    tpu.vector_store %arg7[%c5_364, %c0_365, %c0_366], %729 {strides = array<i32>} : memref<8x2x256xf32, #tpu.memory_space<vmem>>, vector<1x2x128xf32>,
    %cst_367 = arith.constant 0.000000e+00 : f32
    %730 = vector.shape_cast %706 : vector<2x1xi1> to vector<2x1xi1>
    %731 = vector.broadcast %730 : vector<2x1xi1> to vector<2x128xi1>
    %732 = vector.broadcast %cst_367 : f32 to vector<2x128xf32>
    %733 = arith.select %731, %702, %732 : vector<2x128xi1>, vector<2x128xf32>
    %c2_368 = arith.constant 2 : index
    %c0_369 = arith.constant 0 : index
    %c128_370 = arith.constant 128 : index
    %734 = vector.load %arg7[%c2_368, %c0_369, %c128_370] : memref<8x2x256xf32, #tpu.memory_space<vmem>>, vector<1x2x128xf32>
    %735 = vector.shape_cast %734 : vector<1x2x128xf32> to vector<2x128xf32>
    %736 = vector.shape_cast %733 : vector<2x128xf32> to vector<1x2x128xf32>
    tpu.vector_store %arg7[%c2_368, %c0_369, %c128_370], %736 {strides = array<i32>} : memref<8x2x256xf32, #tpu.memory_space<vmem>>, vector<1x2x128xf32>,
    %c0_371 = arith.constant 0 : index
    %c0_372 = arith.constant 0 : index
    %737 = vector.load %arg10[%c0_371, %c0_372] : memref<2x128xf32, #tpu.memory_space<vmem>>, vector<2x128xf32>
    %c0_373 = arith.constant 0 : index
    %c0_374 = arith.constant 0 : index
    %738 = vector.load %arg11[%c0_373, %c0_374] : memref<2x128xf32, #tpu.memory_space<vmem>>, vector<2x128xf32>
    %c0_375 = arith.constant 0 : index
    %c0_376 = arith.constant 0 : index
    %739 = vector.load %arg12[%c0_375, %c0_376] : memref<2x128xf32, #tpu.memory_space<vmem>>, vector<2x128xf32>
    %c0_377 = arith.constant 0 : index
    %c0_378 = arith.constant 0 : index
    %740 = vector.load %arg13[%c0_377, %c0_378] : memref<2x128xf32, #tpu.memory_space<vmem>>, vector<2x128xf32>
    %c6_379 = arith.constant 6 : index
    %c0_380 = arith.constant 0 : index
    %c0_381 = arith.constant 0 : index
    %741 = vector.load %arg9[%c6_379, %c0_380, %c0_381] : memref<8x2x1024xf32, #tpu.memory_space<vmem>>, vector<1x2x512xf32>
    %742 = vector.shape_cast %741 : vector<1x2x512xf32> to vector<2x512xf32>
    %743 = arith.truncf %737 : vector<2x128xf32> to vector<2x128xbf16>
    %cst_382 = arith.constant dense<0.000000e+00> : vector<2x512xf32>
    %744 = tpu.matmul %743, %74, %cst_382 {dimension_numbers = #tpu.dot_dimension_numbers<[1], [0], [0], [1], [0, 0, 1, 1], [], []>} : vector<2x128xbf16>, vector<128x512xbf16>, vector<2x512xf32> -> vector<2x512xf32>
    %745 = arith.addf %742, %744 : vector<2x512xf32>
    %c1_383 = arith.constant 1 : index
    %c0_384 = arith.constant 0 : index
    %c512_385 = arith.constant 512 : index
    %746 = vector.load %arg9[%c1_383, %c0_384, %c512_385] : memref<8x2x1024xf32, #tpu.memory_space<vmem>>, vector<1x2x512xf32>
    %747 = vector.shape_cast %746 : vector<1x2x512xf32> to vector<2x512xf32>
    %748 = arith.truncf %739 : vector<2x128xf32> to vector<2x128xbf16>
    %cst_386 = arith.constant dense<0.000000e+00> : vector<2x512xf32>
    %749 = tpu.matmul %748, %75, %cst_386 {dimension_numbers = #tpu.dot_dimension_numbers<[1], [0], [0], [1], [0, 0, 1, 1], [], []>} : vector<2x128xbf16>, vector<128x512xbf16>, vector<2x512xf32> -> vector<2x512xf32>
    %750 = arith.addf %747, %749 : vector<2x512xf32>
    %751 = vector.extract_strided_slice %745 {offsets = [0, 0], sizes = [2, 128], strides = [1, 1]} : vector<2x512xf32> to vector<2x128xf32>
    %cst_387 = arith.constant 5.000000e-01 : f32
    %752 = vector.broadcast %cst_387 : f32 to vector<2x128xf32>
    %753 = arith.mulf %752, %751 : vector<2x128xf32>
    %754 = math.tanh %753 : vector<2x128xf32>
    %cst_388 = arith.constant 5.000000e-01 : f32
    %755 = vector.broadcast %cst_388 : f32 to vector<2x128xf32>
    %756 = arith.mulf %755, %754 : vector<2x128xf32>
    %cst_389 = arith.constant 5.000000e-01 : f32
    %757 = vector.broadcast %cst_389 : f32 to vector<2x128xf32>
    %758 = arith.addf %756, %757 : vector<2x128xf32>
    %759 = vector.extract_strided_slice %745 {offsets = [0, 128], sizes = [2, 128], strides = [1, 1]} : vector<2x512xf32> to vector<2x128xf32>
    %cst_390 = arith.constant 5.000000e-01 : f32
    %760 = vector.broadcast %cst_390 : f32 to vector<2x128xf32>
    %761 = arith.mulf %760, %759 : vector<2x128xf32>
    %762 = math.tanh %761 : vector<2x128xf32>
    %cst_391 = arith.constant 5.000000e-01 : f32
    %763 = vector.broadcast %cst_391 : f32 to vector<2x128xf32>
    %764 = arith.mulf %763, %762 : vector<2x128xf32>
    %cst_392 = arith.constant 5.000000e-01 : f32
    %765 = vector.broadcast %cst_392 : f32 to vector<2x128xf32>
    %766 = arith.addf %764, %765 : vector<2x128xf32>
    %767 = vector.extract_strided_slice %745 {offsets = [0, 256], sizes = [2, 128], strides = [1, 1]} : vector<2x512xf32> to vector<2x128xf32>
    %768 = math.tanh %767 : vector<2x128xf32>
    %769 = vector.extract_strided_slice %745 {offsets = [0, 384], sizes = [2, 128], strides = [1, 1]} : vector<2x512xf32> to vector<2x128xf32>
    %cst_393 = arith.constant 5.000000e-01 : f32
    %770 = vector.broadcast %cst_393 : f32 to vector<2x128xf32>
    %771 = arith.mulf %770, %769 : vector<2x128xf32>
    %772 = math.tanh %771 : vector<2x128xf32>
    %cst_394 = arith.constant 5.000000e-01 : f32
    %773 = vector.broadcast %cst_394 : f32 to vector<2x128xf32>
    %774 = arith.mulf %773, %772 : vector<2x128xf32>
    %cst_395 = arith.constant 5.000000e-01 : f32
    %775 = vector.broadcast %cst_395 : f32 to vector<2x128xf32>
    %776 = arith.addf %774, %775 : vector<2x128xf32>
    %777 = arith.mulf %766, %738 : vector<2x128xf32>
    %778 = arith.mulf %758, %768 : vector<2x128xf32>
    %779 = arith.addf %777, %778 : vector<2x128xf32>
    %780 = math.tanh %779 : vector<2x128xf32>
    %781 = arith.mulf %776, %780 : vector<2x128xf32>
    %782 = vector.extract_strided_slice %750 {offsets = [0, 0], sizes = [2, 128], strides = [1, 1]} : vector<2x512xf32> to vector<2x128xf32>
    %cst_396 = arith.constant 5.000000e-01 : f32
    %783 = vector.broadcast %cst_396 : f32 to vector<2x128xf32>
    %784 = arith.mulf %783, %782 : vector<2x128xf32>
    %785 = math.tanh %784 : vector<2x128xf32>
    %cst_397 = arith.constant 5.000000e-01 : f32
    %786 = vector.broadcast %cst_397 : f32 to vector<2x128xf32>
    %787 = arith.mulf %786, %785 : vector<2x128xf32>
    %cst_398 = arith.constant 5.000000e-01 : f32
    %788 = vector.broadcast %cst_398 : f32 to vector<2x128xf32>
    %789 = arith.addf %787, %788 : vector<2x128xf32>
    %790 = vector.extract_strided_slice %750 {offsets = [0, 128], sizes = [2, 128], strides = [1, 1]} : vector<2x512xf32> to vector<2x128xf32>
    %cst_399 = arith.constant 5.000000e-01 : f32
    %791 = vector.broadcast %cst_399 : f32 to vector<2x128xf32>
    %792 = arith.mulf %791, %790 : vector<2x128xf32>
    %793 = math.tanh %792 : vector<2x128xf32>
    %cst_400 = arith.constant 5.000000e-01 : f32
    %794 = vector.broadcast %cst_400 : f32 to vector<2x128xf32>
    %795 = arith.mulf %794, %793 : vector<2x128xf32>
    %cst_401 = arith.constant 5.000000e-01 : f32
    %796 = vector.broadcast %cst_401 : f32 to vector<2x128xf32>
    %797 = arith.addf %795, %796 : vector<2x128xf32>
    %798 = vector.extract_strided_slice %750 {offsets = [0, 256], sizes = [2, 128], strides = [1, 1]} : vector<2x512xf32> to vector<2x128xf32>
    %799 = math.tanh %798 : vector<2x128xf32>
    %800 = vector.extract_strided_slice %750 {offsets = [0, 384], sizes = [2, 128], strides = [1, 1]} : vector<2x512xf32> to vector<2x128xf32>
    %cst_402 = arith.constant 5.000000e-01 : f32
    %801 = vector.broadcast %cst_402 : f32 to vector<2x128xf32>
    %802 = arith.mulf %801, %800 : vector<2x128xf32>
    %803 = math.tanh %802 : vector<2x128xf32>
    %cst_403 = arith.constant 5.000000e-01 : f32
    %804 = vector.broadcast %cst_403 : f32 to vector<2x128xf32>
    %805 = arith.mulf %804, %803 : vector<2x128xf32>
    %cst_404 = arith.constant 5.000000e-01 : f32
    %806 = vector.broadcast %cst_404 : f32 to vector<2x128xf32>
    %807 = arith.addf %805, %806 : vector<2x128xf32>
    %808 = arith.mulf %797, %740 : vector<2x128xf32>
    %809 = arith.mulf %789, %799 : vector<2x128xf32>
    %810 = arith.addf %808, %809 : vector<2x128xf32>
    %811 = math.tanh %810 : vector<2x128xf32>
    %812 = arith.mulf %807, %811 : vector<2x128xf32>
    %c6_i32_405 = arith.constant 6 : i32
    %813 = vector.broadcast %c6_i32_405 : i32 to vector<2x1xi32>
    %814 = arith.cmpi sgt, %76, %813 : vector<2x1xi32>
    %c1_i32_406 = arith.constant 1 : i32
    %815 = vector.broadcast %c1_i32_406 : i32 to vector<2x1xi32>
    %816 = arith.cmpi sgt, %76, %815 : vector<2x1xi32>
    %817 = vector.shape_cast %814 : vector<2x1xi1> to vector<2x1xi1>
    %818 = vector.broadcast %817 : vector<2x1xi1> to vector<2x128xi1>
    %819 = arith.select %818, %779, %738 : vector<2x128xi1>, vector<2x128xf32>
    %c0_407 = arith.constant 0 : index
    %c0_408 = arith.constant 0 : index
    %820 = vector.load %arg11[%c0_407, %c0_408] : memref<2x128xf32, #tpu.memory_space<vmem>>, vector<2x128xf32>
    tpu.vector_store %arg11[%c0_407, %c0_408], %819 {strides = array<i32>} : memref<2x128xf32, #tpu.memory_space<vmem>>, vector<2x128xf32>,
    %821 = vector.shape_cast %814 : vector<2x1xi1> to vector<2x1xi1>
    %822 = vector.broadcast %821 : vector<2x1xi1> to vector<2x128xi1>
    %823 = arith.select %822, %781, %737 : vector<2x128xi1>, vector<2x128xf32>
    %c0_409 = arith.constant 0 : index
    %c0_410 = arith.constant 0 : index
    %824 = vector.load %arg10[%c0_409, %c0_410] : memref<2x128xf32, #tpu.memory_space<vmem>>, vector<2x128xf32>
    tpu.vector_store %arg10[%c0_409, %c0_410], %823 {strides = array<i32>} : memref<2x128xf32, #tpu.memory_space<vmem>>, vector<2x128xf32>,
    %825 = vector.shape_cast %816 : vector<2x1xi1> to vector<2x1xi1>
    %826 = vector.broadcast %825 : vector<2x1xi1> to vector<2x128xi1>
    %827 = arith.select %826, %810, %740 : vector<2x128xi1>, vector<2x128xf32>
    %c0_411 = arith.constant 0 : index
    %c0_412 = arith.constant 0 : index
    %828 = vector.load %arg13[%c0_411, %c0_412] : memref<2x128xf32, #tpu.memory_space<vmem>>, vector<2x128xf32>
    tpu.vector_store %arg13[%c0_411, %c0_412], %827 {strides = array<i32>} : memref<2x128xf32, #tpu.memory_space<vmem>>, vector<2x128xf32>,
    %829 = vector.shape_cast %816 : vector<2x1xi1> to vector<2x1xi1>
    %830 = vector.broadcast %829 : vector<2x1xi1> to vector<2x128xi1>
    %831 = arith.select %830, %812, %739 : vector<2x128xi1>, vector<2x128xf32>
    %c0_413 = arith.constant 0 : index
    %c0_414 = arith.constant 0 : index
    %832 = vector.load %arg12[%c0_413, %c0_414] : memref<2x128xf32, #tpu.memory_space<vmem>>, vector<2x128xf32>
    tpu.vector_store %arg12[%c0_413, %c0_414], %831 {strides = array<i32>} : memref<2x128xf32, #tpu.memory_space<vmem>>, vector<2x128xf32>,
    %cst_415 = arith.constant 0.000000e+00 : f32
    %833 = vector.shape_cast %814 : vector<2x1xi1> to vector<2x1xi1>
    %834 = vector.broadcast %833 : vector<2x1xi1> to vector<2x128xi1>
    %835 = vector.broadcast %cst_415 : f32 to vector<2x128xf32>
    %836 = arith.select %834, %781, %835 : vector<2x128xi1>, vector<2x128xf32>
    %c6_416 = arith.constant 6 : index
    %c0_417 = arith.constant 0 : index
    %c0_418 = arith.constant 0 : index
    %837 = vector.load %arg7[%c6_416, %c0_417, %c0_418] : memref<8x2x256xf32, #tpu.memory_space<vmem>>, vector<1x2x128xf32>
    %838 = vector.shape_cast %837 : vector<1x2x128xf32> to vector<2x128xf32>
    %839 = vector.shape_cast %836 : vector<2x128xf32> to vector<1x2x128xf32>
    tpu.vector_store %arg7[%c6_416, %c0_417, %c0_418], %839 {strides = array<i32>} : memref<8x2x256xf32, #tpu.memory_space<vmem>>, vector<1x2x128xf32>,
    %cst_419 = arith.constant 0.000000e+00 : f32
    %840 = vector.shape_cast %816 : vector<2x1xi1> to vector<2x1xi1>
    %841 = vector.broadcast %840 : vector<2x1xi1> to vector<2x128xi1>
    %842 = vector.broadcast %cst_419 : f32 to vector<2x128xf32>
    %843 = arith.select %841, %812, %842 : vector<2x128xi1>, vector<2x128xf32>
    %c1_420 = arith.constant 1 : index
    %c0_421 = arith.constant 0 : index
    %c128_422 = arith.constant 128 : index
    %844 = vector.load %arg7[%c1_420, %c0_421, %c128_422] : memref<8x2x256xf32, #tpu.memory_space<vmem>>, vector<1x2x128xf32>
    %845 = vector.shape_cast %844 : vector<1x2x128xf32> to vector<2x128xf32>
    %846 = vector.shape_cast %843 : vector<2x128xf32> to vector<1x2x128xf32>
    tpu.vector_store %arg7[%c1_420, %c0_421, %c128_422], %846 {strides = array<i32>} : memref<8x2x256xf32, #tpu.memory_space<vmem>>, vector<1x2x128xf32>,
    %c0_423 = arith.constant 0 : index
    %c0_424 = arith.constant 0 : index
    %847 = vector.load %arg10[%c0_423, %c0_424] : memref<2x128xf32, #tpu.memory_space<vmem>>, vector<2x128xf32>
    %c0_425 = arith.constant 0 : index
    %c0_426 = arith.constant 0 : index
    %848 = vector.load %arg11[%c0_425, %c0_426] : memref<2x128xf32, #tpu.memory_space<vmem>>, vector<2x128xf32>
    %c0_427 = arith.constant 0 : index
    %c0_428 = arith.constant 0 : index
    %849 = vector.load %arg12[%c0_427, %c0_428] : memref<2x128xf32, #tpu.memory_space<vmem>>, vector<2x128xf32>
    %c0_429 = arith.constant 0 : index
    %c0_430 = arith.constant 0 : index
    %850 = vector.load %arg13[%c0_429, %c0_430] : memref<2x128xf32, #tpu.memory_space<vmem>>, vector<2x128xf32>
    %c7_431 = arith.constant 7 : index
    %c0_432 = arith.constant 0 : index
    %c0_433 = arith.constant 0 : index
    %851 = vector.load %arg9[%c7_431, %c0_432, %c0_433] : memref<8x2x1024xf32, #tpu.memory_space<vmem>>, vector<1x2x512xf32>
    %852 = vector.shape_cast %851 : vector<1x2x512xf32> to vector<2x512xf32>
    %853 = arith.truncf %847 : vector<2x128xf32> to vector<2x128xbf16>
    %cst_434 = arith.constant dense<0.000000e+00> : vector<2x512xf32>
    %854 = tpu.matmul %853, %74, %cst_434 {dimension_numbers = #tpu.dot_dimension_numbers<[1], [0], [0], [1], [0, 0, 1, 1], [], []>} : vector<2x128xbf16>, vector<128x512xbf16>, vector<2x512xf32> -> vector<2x512xf32>
    %855 = arith.addf %852, %854 : vector<2x512xf32>
    %c0_435 = arith.constant 0 : index
    %c0_436 = arith.constant 0 : index
    %c512_437 = arith.constant 512 : index
    %856 = vector.load %arg9[%c0_435, %c0_436, %c512_437] : memref<8x2x1024xf32, #tpu.memory_space<vmem>>, vector<1x2x512xf32>
    %857 = vector.shape_cast %856 : vector<1x2x512xf32> to vector<2x512xf32>
    %858 = arith.truncf %849 : vector<2x128xf32> to vector<2x128xbf16>
    %cst_438 = arith.constant dense<0.000000e+00> : vector<2x512xf32>
    %859 = tpu.matmul %858, %75, %cst_438 {dimension_numbers = #tpu.dot_dimension_numbers<[1], [0], [0], [1], [0, 0, 1, 1], [], []>} : vector<2x128xbf16>, vector<128x512xbf16>, vector<2x512xf32> -> vector<2x512xf32>
    %860 = arith.addf %857, %859 : vector<2x512xf32>
    %861 = vector.extract_strided_slice %855 {offsets = [0, 0], sizes = [2, 128], strides = [1, 1]} : vector<2x512xf32> to vector<2x128xf32>
    %cst_439 = arith.constant 5.000000e-01 : f32
    %862 = vector.broadcast %cst_439 : f32 to vector<2x128xf32>
    %863 = arith.mulf %862, %861 : vector<2x128xf32>
    %864 = math.tanh %863 : vector<2x128xf32>
    %cst_440 = arith.constant 5.000000e-01 : f32
    %865 = vector.broadcast %cst_440 : f32 to vector<2x128xf32>
    %866 = arith.mulf %865, %864 : vector<2x128xf32>
    %cst_441 = arith.constant 5.000000e-01 : f32
    %867 = vector.broadcast %cst_441 : f32 to vector<2x128xf32>
    %868 = arith.addf %866, %867 : vector<2x128xf32>
    %869 = vector.extract_strided_slice %855 {offsets = [0, 128], sizes = [2, 128], strides = [1, 1]} : vector<2x512xf32> to vector<2x128xf32>
    %cst_442 = arith.constant 5.000000e-01 : f32
    %870 = vector.broadcast %cst_442 : f32 to vector<2x128xf32>
    %871 = arith.mulf %870, %869 : vector<2x128xf32>
    %872 = math.tanh %871 : vector<2x128xf32>
    %cst_443 = arith.constant 5.000000e-01 : f32
    %873 = vector.broadcast %cst_443 : f32 to vector<2x128xf32>
    %874 = arith.mulf %873, %872 : vector<2x128xf32>
    %cst_444 = arith.constant 5.000000e-01 : f32
    %875 = vector.broadcast %cst_444 : f32 to vector<2x128xf32>
    %876 = arith.addf %874, %875 : vector<2x128xf32>
    %877 = vector.extract_strided_slice %855 {offsets = [0, 256], sizes = [2, 128], strides = [1, 1]} : vector<2x512xf32> to vector<2x128xf32>
    %878 = math.tanh %877 : vector<2x128xf32>
    %879 = vector.extract_strided_slice %855 {offsets = [0, 384], sizes = [2, 128], strides = [1, 1]} : vector<2x512xf32> to vector<2x128xf32>
    %cst_445 = arith.constant 5.000000e-01 : f32
    %880 = vector.broadcast %cst_445 : f32 to vector<2x128xf32>
    %881 = arith.mulf %880, %879 : vector<2x128xf32>
    %882 = math.tanh %881 : vector<2x128xf32>
    %cst_446 = arith.constant 5.000000e-01 : f32
    %883 = vector.broadcast %cst_446 : f32 to vector<2x128xf32>
    %884 = arith.mulf %883, %882 : vector<2x128xf32>
    %cst_447 = arith.constant 5.000000e-01 : f32
    %885 = vector.broadcast %cst_447 : f32 to vector<2x128xf32>
    %886 = arith.addf %884, %885 : vector<2x128xf32>
    %887 = arith.mulf %876, %848 : vector<2x128xf32>
    %888 = arith.mulf %868, %878 : vector<2x128xf32>
    %889 = arith.addf %887, %888 : vector<2x128xf32>
    %890 = math.tanh %889 : vector<2x128xf32>
    %891 = arith.mulf %886, %890 : vector<2x128xf32>
    %892 = vector.extract_strided_slice %860 {offsets = [0, 0], sizes = [2, 128], strides = [1, 1]} : vector<2x512xf32> to vector<2x128xf32>
    %cst_448 = arith.constant 5.000000e-01 : f32
    %893 = vector.broadcast %cst_448 : f32 to vector<2x128xf32>
    %894 = arith.mulf %893, %892 : vector<2x128xf32>
    %895 = math.tanh %894 : vector<2x128xf32>
    %cst_449 = arith.constant 5.000000e-01 : f32
    %896 = vector.broadcast %cst_449 : f32 to vector<2x128xf32>
    %897 = arith.mulf %896, %895 : vector<2x128xf32>
    %cst_450 = arith.constant 5.000000e-01 : f32
    %898 = vector.broadcast %cst_450 : f32 to vector<2x128xf32>
    %899 = arith.addf %897, %898 : vector<2x128xf32>
    %900 = vector.extract_strided_slice %860 {offsets = [0, 128], sizes = [2, 128], strides = [1, 1]} : vector<2x512xf32> to vector<2x128xf32>
    %cst_451 = arith.constant 5.000000e-01 : f32
    %901 = vector.broadcast %cst_451 : f32 to vector<2x128xf32>
    %902 = arith.mulf %901, %900 : vector<2x128xf32>
    %903 = math.tanh %902 : vector<2x128xf32>
    %cst_452 = arith.constant 5.000000e-01 : f32
    %904 = vector.broadcast %cst_452 : f32 to vector<2x128xf32>
    %905 = arith.mulf %904, %903 : vector<2x128xf32>
    %cst_453 = arith.constant 5.000000e-01 : f32
    %906 = vector.broadcast %cst_453 : f32 to vector<2x128xf32>
    %907 = arith.addf %905, %906 : vector<2x128xf32>
    %908 = vector.extract_strided_slice %860 {offsets = [0, 256], sizes = [2, 128], strides = [1, 1]} : vector<2x512xf32> to vector<2x128xf32>
    %909 = math.tanh %908 : vector<2x128xf32>
    %910 = vector.extract_strided_slice %860 {offsets = [0, 384], sizes = [2, 128], strides = [1, 1]} : vector<2x512xf32> to vector<2x128xf32>
    %cst_454 = arith.constant 5.000000e-01 : f32
    %911 = vector.broadcast %cst_454 : f32 to vector<2x128xf32>
    %912 = arith.mulf %911, %910 : vector<2x128xf32>
    %913 = math.tanh %912 : vector<2x128xf32>
    %cst_455 = arith.constant 5.000000e-01 : f32
    %914 = vector.broadcast %cst_455 : f32 to vector<2x128xf32>
    %915 = arith.mulf %914, %913 : vector<2x128xf32>
    %cst_456 = arith.constant 5.000000e-01 : f32
    %916 = vector.broadcast %cst_456 : f32 to vector<2x128xf32>
    %917 = arith.addf %915, %916 : vector<2x128xf32>
    %918 = arith.mulf %907, %850 : vector<2x128xf32>
    %919 = arith.mulf %899, %909 : vector<2x128xf32>
    %920 = arith.addf %918, %919 : vector<2x128xf32>
    %921 = math.tanh %920 : vector<2x128xf32>
    %922 = arith.mulf %917, %921 : vector<2x128xf32>
    %c7_i32_457 = arith.constant 7 : i32
    %923 = vector.broadcast %c7_i32_457 : i32 to vector<2x1xi32>
    %924 = arith.cmpi sgt, %76, %923 : vector<2x1xi32>
    %c0_i32_458 = arith.constant 0 : i32
    %925 = vector.broadcast %c0_i32_458 : i32 to vector<2x1xi32>
    %926 = arith.cmpi sgt, %76, %925 : vector<2x1xi32>
    %927 = vector.shape_cast %924 : vector<2x1xi1> to vector<2x1xi1>
    %928 = vector.broadcast %927 : vector<2x1xi1> to vector<2x128xi1>
    %929 = arith.select %928, %889, %848 : vector<2x128xi1>, vector<2x128xf32>
    %c0_459 = arith.constant 0 : index
    %c0_460 = arith.constant 0 : index
    %930 = vector.load %arg11[%c0_459, %c0_460] : memref<2x128xf32, #tpu.memory_space<vmem>>, vector<2x128xf32>
    tpu.vector_store %arg11[%c0_459, %c0_460], %929 {strides = array<i32>} : memref<2x128xf32, #tpu.memory_space<vmem>>, vector<2x128xf32>,
    %931 = vector.shape_cast %924 : vector<2x1xi1> to vector<2x1xi1>
    %932 = vector.broadcast %931 : vector<2x1xi1> to vector<2x128xi1>
    %933 = arith.select %932, %891, %847 : vector<2x128xi1>, vector<2x128xf32>
    %c0_461 = arith.constant 0 : index
    %c0_462 = arith.constant 0 : index
    %934 = vector.load %arg10[%c0_461, %c0_462] : memref<2x128xf32, #tpu.memory_space<vmem>>, vector<2x128xf32>
    tpu.vector_store %arg10[%c0_461, %c0_462], %933 {strides = array<i32>} : memref<2x128xf32, #tpu.memory_space<vmem>>, vector<2x128xf32>,
    %935 = vector.shape_cast %926 : vector<2x1xi1> to vector<2x1xi1>
    %936 = vector.broadcast %935 : vector<2x1xi1> to vector<2x128xi1>
    %937 = arith.select %936, %920, %850 : vector<2x128xi1>, vector<2x128xf32>
    %c0_463 = arith.constant 0 : index
    %c0_464 = arith.constant 0 : index
    %938 = vector.load %arg13[%c0_463, %c0_464] : memref<2x128xf32, #tpu.memory_space<vmem>>, vector<2x128xf32>
    tpu.vector_store %arg13[%c0_463, %c0_464], %937 {strides = array<i32>} : memref<2x128xf32, #tpu.memory_space<vmem>>, vector<2x128xf32>,
    %939 = vector.shape_cast %926 : vector<2x1xi1> to vector<2x1xi1>
    %940 = vector.broadcast %939 : vector<2x1xi1> to vector<2x128xi1>
    %941 = arith.select %940, %922, %849 : vector<2x128xi1>, vector<2x128xf32>
    %c0_465 = arith.constant 0 : index
    %c0_466 = arith.constant 0 : index
    %942 = vector.load %arg12[%c0_465, %c0_466] : memref<2x128xf32, #tpu.memory_space<vmem>>, vector<2x128xf32>
    tpu.vector_store %arg12[%c0_465, %c0_466], %941 {strides = array<i32>} : memref<2x128xf32, #tpu.memory_space<vmem>>, vector<2x128xf32>,
    %cst_467 = arith.constant 0.000000e+00 : f32
    %943 = vector.shape_cast %924 : vector<2x1xi1> to vector<2x1xi1>
    %944 = vector.broadcast %943 : vector<2x1xi1> to vector<2x128xi1>
    %945 = vector.broadcast %cst_467 : f32 to vector<2x128xf32>
    %946 = arith.select %944, %891, %945 : vector<2x128xi1>, vector<2x128xf32>
    %c7_468 = arith.constant 7 : index
    %c0_469 = arith.constant 0 : index
    %c0_470 = arith.constant 0 : index
    %947 = vector.load %arg7[%c7_468, %c0_469, %c0_470] : memref<8x2x256xf32, #tpu.memory_space<vmem>>, vector<1x2x128xf32>
    %948 = vector.shape_cast %947 : vector<1x2x128xf32> to vector<2x128xf32>
    %949 = vector.shape_cast %946 : vector<2x128xf32> to vector<1x2x128xf32>
    tpu.vector_store %arg7[%c7_468, %c0_469, %c0_470], %949 {strides = array<i32>} : memref<8x2x256xf32, #tpu.memory_space<vmem>>, vector<1x2x128xf32>,
    %cst_471 = arith.constant 0.000000e+00 : f32
    %950 = vector.shape_cast %926 : vector<2x1xi1> to vector<2x1xi1>
    %951 = vector.broadcast %950 : vector<2x1xi1> to vector<2x128xi1>
    %952 = vector.broadcast %cst_471 : f32 to vector<2x128xf32>
    %953 = arith.select %951, %922, %952 : vector<2x128xi1>, vector<2x128xf32>
    %c0_472 = arith.constant 0 : index
    %c0_473 = arith.constant 0 : index
    %c128_474 = arith.constant 128 : index
    %954 = vector.load %arg7[%c0_472, %c0_473, %c128_474] : memref<8x2x256xf32, #tpu.memory_space<vmem>>, vector<1x2x128xf32>
    %955 = vector.shape_cast %954 : vector<1x2x128xf32> to vector<2x128xf32>
    %956 = vector.shape_cast %953 : vector<2x128xf32> to vector<1x2x128xf32>
    tpu.vector_store %arg7[%c0_472, %c0_473, %c128_474], %956 {strides = array<i32>} : memref<8x2x256xf32, #tpu.memory_space<vmem>>, vector<1x2x128xf32>,
    %c0_475 = arith.constant 0 : index
    %c0_476 = arith.constant 0 : index
    %957 = vector.load %arg10[%c0_475, %c0_476] : memref<2x128xf32, #tpu.memory_space<vmem>>, vector<2x128xf32>
    %c0_477 = arith.constant 0 : index
    %c0_478 = arith.constant 0 : index
    %958 = vector.load %arg8[%c0_477, %c0_478] : memref<2x256xf32, #tpu.memory_space<vmem>>, vector<2x128xf32>
    tpu.vector_store %arg8[%c0_477, %c0_478], %957 {strides = array<i32>} : memref<2x256xf32, #tpu.memory_space<vmem>>, vector<2x128xf32>,
    %c0_479 = arith.constant 0 : index
    %c0_480 = arith.constant 0 : index
    %959 = vector.load %arg12[%c0_479, %c0_480] : memref<2x128xf32, #tpu.memory_space<vmem>>, vector<2x128xf32>
    %c0_481 = arith.constant 0 : index
    %c128_482 = arith.constant 128 : index
    %960 = vector.load %arg8[%c0_481, %c128_482] : memref<2x256xf32, #tpu.memory_space<vmem>>, vector<2x128xf32>
    tpu.vector_store %arg8[%c0_481, %c128_482], %959 {strides = array<i32>} : memref<2x256xf32, #tpu.memory_space<vmem>>, vector<2x128xf32>,
    return
  }
  func.func @transform_0(%arg0: i32) -> (i32, i32, i32) {
    %c0_i32 = arith.constant 0 : i32
    %c0_i32_0 = arith.constant 0 : i32
    %c0_i32_1 = arith.constant 0 : i32
    return %c0_i32, %arg0, %c0_i32_0 : i32, i32, i32
  }
  func.func @transform_1(%arg0: i32) -> (i32, i32) {
    %c0_i32 = arith.constant 0 : i32
    %c0_i32_0 = arith.constant 0 : i32
    %c0_i32_1 = arith.constant 0 : i32
    return %c0_i32, %c0_i32_0 : i32, i32
  }
  func.func @transform_2(%arg0: i32) -> (i32, i32) {
    %c0_i32 = arith.constant 0 : i32
    %c0_i32_0 = arith.constant 0 : i32
    %c0_i32_1 = arith.constant 0 : i32
    return %c0_i32, %c0_i32_0 : i32, i32
  }
  func.func @transform_3(%arg0: i32) -> (i32, i32) {
    %c0_i32 = arith.constant 0 : i32
    %c0_i32_0 = arith.constant 0 : i32
    %c0_i32_1 = arith.constant 0 : i32
    return %c0_i32, %c0_i32_0 : i32, i32
  }
  func.func @transform_4(%arg0: i32) -> (i32, i32) {
    %c0_i32 = arith.constant 0 : i32
    %c0_i32_0 = arith.constant 0 : i32
    %c0_i32_1 = arith.constant 0 : i32
    return %c0_i32, %c0_i32_0 : i32, i32
  }
  func.func @transform_5(%arg0: i32) -> (i32, i32) {
    %c0_i32 = arith.constant 0 : i32
    %c0_i32_0 = arith.constant 0 : i32
    return %arg0, %c0_i32 : i32, i32
  }
  func.func @transform_6(%arg0: i32) -> (i32, i32, i32) {
    %c0_i32 = arith.constant 0 : i32
    %c0_i32_0 = arith.constant 0 : i32
    %c0_i32_1 = arith.constant 0 : i32
    return %c0_i32, %arg0, %c0_i32_0 : i32, i32, i32
  }
  func.func @transform_7(%arg0: i32) -> (i32, i32) {
    %c0_i32 = arith.constant 0 : i32
    %c0_i32_0 = arith.constant 0 : i32
    return %arg0, %c0_i32 : i32, i32
  }
}

</mosaic_0001>

<bundles_post_ra>
// kernel: tpu_custom_call.1
= control target key start
LH: loop header
LB: loop body
LE: loop exit
PB: predicated region body
PF: predicated region fallthrough
CT: control target
= control target key end

     0   :  { %13 = vsyncpa [#allocation8], 0  ;;  %s7882_s0 = inlined_call_operand.hbm [shape: bf16[8,2,128], index: 0, kind: input, shape index: {}]   ;;  %s7883_s1 = inlined_call_operand.hbm [shape: bf16[128,1024], index: 1, kind: input, shape index: {}]   ;;  %s7884_s2 = inlined_call_operand.vmem [shape: f32[1,1024], index: 2, kind: input, shape index: {}]   ;;  %s7885_s3 = inlined_call_operand.hbm [shape: bf16[128,512], index: 3, kind: input, shape index: {}]   ;;  %s7886_s4 = inlined_call_operand.hbm [shape: bf16[128,512], index: 4, kind: input, shape index: {}]   ;;  %s7887_s5 = inlined_call_operand.vmem [shape: s32[2,1], index: 5, kind: input, shape index: {}]   ;;  %s7888_s6 = inlined_call_operand.hbm [shape: f32[8,2,256], index: 6, kind: output, shape index: {0}]   ;;  %s7889_s7 = inlined_call_operand.hbm [shape: f32[2,256], index: 7, kind: output, shape index: {1}]  }
   0x1   :  { %14 = vsyncpa [#allocation11], 0 }
   0x2   :  { %15 = vsyncpa [#allocation14], 0 }
   0x3   :  { %16 = vsyncpa [#allocation9], 0 }
   0x4   :  { %17 = vsyncpa [#allocation17], 0  ;;  %s5604_s24 = smov [#allocation10]   ;;  %s5462_s28 = scalar_lea.hbm %s7883_s1, 8192 }
   0x5   :  { %s35_s25 = sshll.u32 %s5604_s24, 4  ;;  %p5463_p0 = scmp.ne.s32.totalorder %s7883_s1, %s5462_s28  ;;  %s36_s25 = int_to_ptr.vmem [resolvable:$true] %s35_s25 }
   0x6   :  { %p5466_p1 = scmp.lt.u32.totalorder %s5462_s28, %s7883_s1 }
   0x8   :  { %p5468_p2 = pnand %p5466_p1, %p5463_p0 }
   0xa   :  { %5471 = shalt.err (!%p5468_p2)
}
   0xb   :  { %s5472_s10 = scalar_lea.vmem %s36_s25, 8192  ;;  %p5477_p4 = scmp.lt.s32.totalorder %s36_s25, %s36_s25 }
   0xc   :  { %p5473_p3 = scmp.ne.s32.totalorder %s36_s25, %s5472_s10  ;;  %p5478_p5 = scmp.lt.s32.totalorder %s5472_s10, %s5472_s10 }
   0xe   :  { %p5479_p6 = por %p5478_p5, %p5477_p4 }
  0x10   :  { %p5480_p7 = pnand %p5479_p6, %p5473_p3 }
  0x12   :  { %5483 = shalt.err (!%p5480_p7)
}
  0x13   :  { %s5605_s11 = smov 512   ;;  %s5606_s12 = smov 32  }
  0x14   :  { %41 = dma.hbm_to_vmem [thread:$0]  %s7883_s1, 8192, %s36_s25, [#allocation11], %s5605_s11, %s5605_s11, %s5606_s12  }
  0x15   :  { %s5607_s15 = smov [#allocation7]   ;;  %s5484_s19 = scalar_lea.hbm %s7882_s0, 128 }
  0x16   :  { %s23_s16 = sshll.u32 %s5607_s15, 4  ;;  %p5485_p8 = scmp.ne.s32.totalorder %s7882_s0, %s5484_s19  ;;  %s24_s16 = int_to_ptr.vmem [resolvable:$true] %s23_s16 }
  0x17   :  { %p5488_p9 = scmp.lt.u32.totalorder %s5484_s19, %s7882_s0 }
  0x19   :  { %p5490_p10 = pnand %p5488_p9, %p5485_p8 }
  0x1b   :  { %5493 = shalt.err (!%p5490_p10)
}
  0x1c   :  { %s5494_s24 = scalar_lea.vmem %s24_s16, 128  ;;  %p5499_p12 = scmp.lt.s32.totalorder %s24_s16, %s24_s16 }
  0x1d   :  { %p5495_p11 = scmp.ne.s32.totalorder %s24_s16, %s5494_s24  ;;  %p5500_p13 = scmp.lt.s32.totalorder %s5494_s24, %s5494_s24 }
  0x1f   :  { %p5501_p0 = por %p5500_p13, %p5499_p12 }
  0x21   :  { %p5502_p1 = pnand %p5501_p0, %p5495_p11 }
  0x23   :  { %5505 = shalt.err (!%p5502_p1)
}
  0x24   :  { %s5608_s1 = smov 16   ;;  %s5609_s25 = smov 1  }
  0x25   :  { %29 = dma.hbm_to_vmem [thread:$0]  %s7882_s0, 128, %s24_s16, [#allocation8], %s5608_s1, %s5608_s1, %s5609_s25  }
  0x26   :  { %s5610_s28 = smov [#allocation12]   ;;  %s5611_s30 = smov [#allocation13]  }
  0x27   :  { %s49_s29 = sshll.u32 %s5610_s28, 4  ;;  %s61_s8 = sshll.u32 %s5611_s30, 4  ;;  %s50_s29 = int_to_ptr.vmem [resolvable:$true] %s49_s29  ;;  %s62_s8 = int_to_ptr.vmem [resolvable:$true] %s61_s8 }
  0x28   :  { %s5506_s11 = scalar_lea.hbm %s7885_s3, 4096 }
  0x29   :  { %p5507_p2 = scmp.ne.s32.totalorder %s7885_s3, %s5506_s11  ;;  %p5510_p3 = scmp.lt.u32.totalorder %s5506_s11, %s7885_s3 }
  0x2b   :  { %p5512_p4 = pnand %p5510_p3, %p5507_p2 }
  0x2d   :  { %5515 = shalt.err (!%p5512_p4)
}
  0x2e   :  { %s5516_s0 = scalar_lea.vmem %s50_s29, 4096  ;;  %p5521_p6 = scmp.lt.s32.totalorder %s50_s29, %s50_s29 }
  0x2f   :  { %p5517_p5 = scmp.ne.s32.totalorder %s50_s29, %s5516_s0  ;;  %p5522_p7 = scmp.lt.s32.totalorder %s5516_s0, %s5516_s0 }
  0x31   :  { %p5523_p8 = por %p5522_p7, %p5521_p6 }
  0x33   :  { %p5524_p9 = pnand %p5523_p8, %p5517_p5 }
  0x35   :  { %5527 = shalt.err (!%p5524_p9)
}
  0x36   :  { %s5612_s16 = smov 256   ;;  %s5528_s21 = scalar_lea.hbm %s7886_s4, 4096 }
  0x37   :  { %55 = dma.hbm_to_vmem [thread:$0]  %s7885_s3, 4096, %s50_s29, [#allocation11], %s5612_s16, %s5612_s16, %s5608_s1  }
  0x38   :  { %p5529_p10 = scmp.ne.s32.totalorder %s7886_s4, %s5528_s21  ;;  %p5532_p11 = scmp.lt.u32.totalorder %s5528_s21, %s7886_s4 }
  0x3a   :  { %p5534_p12 = pnand %p5532_p11, %p5529_p10 }
  0x3c   :  { %5537 = shalt.err (!%p5534_p12)
}
  0x3d   :  { %s5538_s26 = scalar_lea.vmem %s62_s8, 4096  ;;  %p5543_p0 = scmp.lt.s32.totalorder %s62_s8, %s62_s8 }
  0x3e   :  { %p5539_p13 = scmp.ne.s32.totalorder %s62_s8, %s5538_s26  ;;  %p5544_p1 = scmp.lt.s32.totalorder %s5538_s26, %s5538_s26 }
  0x40   :  { %p5545_p2 = por %p5544_p1, %p5543_p0 }
  0x42   :  { %p5546_p3 = pnand %p5545_p2, %p5539_p13 }
  0x44   :  { %5549 = shalt.err (!%p5546_p3)
}
  0x45   :  { %67 = dma.hbm_to_vmem [thread:$0]  %s7886_s4, 4096, %s62_s8, [#allocation14], %s5612_s16, %s5612_s16, %s5608_s1  }
  0x46   :  { %5594 = dma.done.wait [#allocation8], 128  }
  0x47   :  { %5595 = vsyncadd [#allocation8], 4294967168 }
  0x48   :  { %5596 = dma.done.wait [#allocation11], 12288  }
  0x49   :  { %5597 = vsyncadd [#allocation11], 4294955008 }
  0x4a   :  { %5598 = dma.done.wait [#allocation14], 4096  }
  0x4b   :  { %5599 = vsyncadd [#allocation14], 4294963200  ;;  %v7890_v0 = vmov 0   ;;  %v83_v1 = vld [vmem:[#allocation10] sm:$0xff]  ;;  %v84_v3 = vld [vmem:[#allocation10 + $0x8] sm:$0xff] }
  0x4c   :  { %542 = vmatprep.mubr.bf16.mxu0 %v7890_v0  ;;  %583 = vmatprep.mubr.bf16.mxu1 %v7890_v0  ;;  %v87_v2 = vld [vmem:[#allocation10 + $0x20] sm:$0xff]  ;;  %v88_v5 = vld [vmem:[#allocation10 + $0x28] sm:$0xff]  ;;  %v85_v60 = vld [vmem:[#allocation10 + $0x10] sm:$0xff] }
  0x4d   :  { %5076 = vset.pattern.permute.xlu0 %v7890_v0  ;;  %5077 = vset.pattern.permute.xlu1 %v7890_v0  ;;  %v5716_v4 = vcombine.high %v83_v1, %v87_v2  ;;  %v5718_v6 = vcombine.low %v83_v1, %v87_v2  ;;  %v91_v7 = vld [vmem:[#allocation10 + $0x40] sm:$0xff]  ;;  %v5720_v9 = vcombine.high %v84_v3, %v88_v5  ;;  %v92_v12 = vld [vmem:[#allocation10 + $0x48] sm:$0xff]  ;;  %v89_v61 = vld [vmem:[#allocation10 + $0x30] sm:$0xff] }
  0x4e   :  { %v95_v8 = vld [vmem:[#allocation10 + $0x60] sm:$0xff]  ;;  %v5722_v10 = vcombine.low %v84_v3, %v88_v5  ;;  %v96_v13 = vld [vmem:[#allocation10 + $0x68] sm:$0xff]  ;;  %v86_v1 = vld [vmem:[#allocation10 + $0x18] sm:$0xff] }
  0x4f   :  { %v5724_v11 = vcombine.high %v91_v7, %v95_v8  ;;  %v99_v14 = vld [vmem:[#allocation10 + $0x80] sm:$0xff]  ;;  %510 = vmatprep.subr.bf16.mxu0 %v5716_v4  ;;  %v5727_v15 = vcombine.high %v92_v12, %v96_v13  ;;  %v100_v17 = vld [vmem:[#allocation10 + $0x88] sm:$0xff]  ;;  %551 = vmatprep.subr.bf16.mxu1 %v5720_v9  ;;  %v5731_v19 = vcombine.low %v91_v7, %v95_v8  ;;  %v90_v2 = vld [vmem:[#allocation10 + $0x38] sm:$0xff] }
  0x50   :  { %v103_v16 = vld [vmem:[#allocation10 + $0xa0] sm:$0xff]  ;;  %v104_v18 = vld [vmem:[#allocation10 + $0xa8] sm:$0xff]  ;;  %511 = vmatpush1.bf16.msra.mxu0 %v5718_v6  ;;  %552 = vmatpush1.bf16.msra.mxu1 %v5722_v10  ;;  %v5735_v20 = vcombine.low %v92_v12, %v96_v13  ;;  %v93_v7 = vld [vmem:[#allocation10 + $0x50] sm:$0xff]  ;;  %v5809_v13 = vcombine.high %v85_v60, %v89_v61 }
  0x51   :  { %512 = vmatprep.subr.bf16.mxu0 %v5724_v11  ;;  %v5737_v21 = vcombine.high %v99_v14, %v103_v16  ;;  %553 = vmatprep.subr.bf16.mxu1 %v5727_v15  ;;  %v5740_v22 = vcombine.high %v100_v17, %v104_v18  ;;  %v107_v23 = vld [vmem:[#allocation10 + $0xc0] sm:$0xff]  ;;  %v108_v25 = vld [vmem:[#allocation10 + $0xc8] sm:$0xff]  ;;  %v5743_v27 = vcombine.low %v99_v14, %v103_v16  ;;  %v97_v8 = vld [vmem:[#allocation10 + $0x70] sm:$0xff] }
  0x52   :  { %v111_v24 = vld [vmem:[#allocation10 + $0xe0] sm:$0xff]  ;;  %v112_v26 = vld [vmem:[#allocation10 + $0xe8] sm:$0xff]  ;;  %v5747_v28 = vcombine.low %v100_v17, %v104_v18  ;;  %8093 = vst [vmem:[#allocation28_spill] sm:$0xff] %v5809_v13  ;;  %v94_v14 = vld [vmem:[#allocation10 + $0x58] sm:$0xff]  ;;  %v5814_v18 = vcombine.high %v86_v1, %v90_v2 }
  0x53   :  { %v5749_v29 = vcombine.high %v107_v23, %v111_v24  ;;  %v5752_v30 = vcombine.high %v108_v25, %v112_v26  ;;  %v115_v31 = vld [vmem:[#allocation10 + $0x100] sm:$0xff]  ;;  %v116_v33 = vld [vmem:[#allocation10 + $0x108] sm:$0xff]  ;;  %v5755_v35 = vcombine.low %v107_v23, %v111_v24  ;;  %v5759_v36 = vcombine.low %v108_v25, %v112_v26  ;;  %v98_v16 = vld [vmem:[#allocation10 + $0x78] sm:$0xff] }
  0x54   :  { %513 = vmatpush1.bf16.msra.mxu0 %v5731_v19  ;;  %554 = vmatpush1.bf16.msra.mxu1 %v5735_v20  ;;  %v119_v32 = vld [vmem:[#allocation10 + $0x120] sm:$0xff]  ;;  %v120_v34 = vld [vmem:[#allocation10 + $0x128] sm:$0xff]  ;;  %v5812_v17 = vld [vmem:[#allocation7] sm:$0x1]  ;;  %8094 = vst [vmem:[#allocation29_spill] sm:$0xff] %v5814_v18  ;;  %v5817_v23 = vcombine.low %v85_v60, %v89_v61  ;;  %v5821_v26 = vcombine.low %v86_v1, %v90_v2 }
  0x55   :  { %514 = vmatprep.subr.bf16.mxu0 %v5737_v21  ;;  %555 = vmatprep.subr.bf16.mxu1 %v5740_v22  ;;  %v5761_v37 = vcombine.high %v115_v31, %v119_v32  ;;  %v5764_v38 = vcombine.high %v116_v33, %v120_v34  ;;  %v123_v39 = vld [vmem:[#allocation10 + $0x140] sm:$0xff]  ;;  %v124_v41 = vld [vmem:[#allocation10 + $0x148] sm:$0xff]  ;;  %v5767_v43 = vcombine.low %v115_v31, %v119_v32  ;;  %v101_v24 = vld [vmem:[#allocation10 + $0x90] sm:$0xff] }
  0x56   :  { %v127_v40 = vld [vmem:[#allocation10 + $0x160] sm:$0xff]  ;;  %v128_v42 = vld [vmem:[#allocation10 + $0x168] sm:$0xff]  ;;  %v5771_v44 = vcombine.low %v116_v33, %v120_v34  ;;  %8095 = vst [vmem:[#allocation30_spill] sm:$0xff] %v5817_v23  ;;  %v105_v25 = vld [vmem:[#allocation10 + $0xb0] sm:$0xff]  ;;  %v5823_v31 = vcombine.high %v93_v7, %v97_v8  ;;  %v5826_v34 = vcombine.high %v94_v14, %v98_v16 }
  0x57   :  { %v5773_v45 = vcombine.high %v123_v39, %v127_v40  ;;  %v5776_v46 = vcombine.high %v124_v41, %v128_v42  ;;  %v131_v47 = vld [vmem:[#allocation10 + $0x180] sm:$0xff]  ;;  %v132_v49 = vld [vmem:[#allocation10 + $0x188] sm:$0xff]  ;;  %v5779_v51 = vcombine.low %v123_v39, %v127_v40  ;;  %v5783_v53 = vcombine.low %v124_v41, %v128_v42  ;;  %8096 = vst [vmem:[#allocation31_spill] sm:$0xff] %v5821_v26  ;;  %v102_v32 = vld [vmem:[#allocation10 + $0x98] sm:$0xff] }
  0x58   :  { %515 = vmatpush1.bf16.msra.mxu0 %v5743_v27  ;;  %556 = vmatpush1.bf16.msra.mxu1 %v5747_v28  ;;  %v135_v48 = vld [vmem:[#allocation10 + $0x1a0] sm:$0xff]  ;;  %v136_v50 = vld [vmem:[#allocation10 + $0x1a8] sm:$0xff]  ;;  %8097 = vst [vmem:[#allocation32_spill] sm:$0xff] %v5823_v31  ;;  %v106_v33 = vld [vmem:[#allocation10 + $0xb8] sm:$0xff]  ;;  %v5831_v39 = vcombine.low %v93_v7, %v97_v8  ;;  %v5835_v42 = vcombine.low %v94_v14, %v98_v16 }
  0x59   :  { %516 = vmatprep.subr.bf16.mxu0 %v5749_v29  ;;  %557 = vmatprep.subr.bf16.mxu1 %v5752_v30  ;;  %8088 = vst [vmem:[#allocation23_spill] sm:$0xff] %v5773_v45  ;;  %8089 = vst [vmem:[#allocation24_spill] sm:$0xff] %v5776_v46  ;;  %v139_v52 = vld [vmem:[#allocation10 + $0x1c0] sm:$0xff]  ;;  %v5785_v54 = vcombine.high %v131_v47, %v135_v48  ;;  %v140_v56 = vld [vmem:[#allocation10 + $0x1c8] sm:$0xff]  ;;  %v5788_v58 = vcombine.high %v132_v49, %v136_v50 }
  0x5a   :  { %8090 = vst [vmem:[#allocation25_spill] sm:$0xff] %v5783_v53  ;;  %v143_v55 = vld [vmem:[#allocation10 + $0x1e0] sm:$0xff]  ;;  %v144_v57 = vld [vmem:[#allocation10 + $0x1e8] sm:$0xff]  ;;  %v5791_v59 = vcombine.low %v131_v47, %v135_v48  ;;  %v5795_v62 = vcombine.low %v132_v49, %v136_v50  ;;  %8098 = vst [vmem:[#allocation33_spill] sm:$0xff] %v5826_v34  ;;  %v5837_v47 = vcombine.high %v101_v24, %v105_v25 }
  0x5b   :  { %v5797_v63 = vcombine.high %v139_v52, %v143_v55  ;;  %v5800_v3 = vcombine.high %v140_v56, %v144_v57  ;;  %v5803_v5 = vcombine.low %v139_v52, %v143_v55  ;;  %v5807_v12 = vcombine.low %v140_v56, %v144_v57  ;;  %8099 = vst [vmem:[#allocation34_spill] sm:$0xff] %v5831_v39  ;;  %v109_v40 = vld [vmem:[#allocation10 + $0xd0] sm:$0xff]  ;;  %v110_v48 = vld [vmem:[#allocation10 + $0xd8] sm:$0xff] }
  0x5c   :  { %517 = vmatpush1.bf16.msra.mxu0 %v5755_v35  ;;  %558 = vmatpush1.bf16.msra.mxu1 %v5759_v36  ;;  %v113_v41 = vld [vmem:[#allocation10 + $0xf0] sm:$0xff]  ;;  %8100 = vst [vmem:[#allocation35_spill] sm:$0xff] %v5835_v42  ;;  %8101 = vst [vmem:[#allocation36_spill] sm:$0xff] %v5837_v47  ;;  %v114_v49 = vld [vmem:[#allocation10 + $0xf8] sm:$0xff]  ;;  %v5840_v50 = vcombine.high %v102_v32, %v106_v33  ;;  %v5845_v52 = vcombine.low %v101_v24, %v105_v25 }
  0x5d   :  { %518 = vmatprep.subr.bf16.mxu0 %v5761_v37  ;;  %559 = vmatprep.subr.bf16.mxu1 %v5764_v38  ;;  %8091 = vst [vmem:[#allocation26_spill] sm:$0xff] %v5803_v5  ;;  %8092 = vst [vmem:[#allocation27_spill] sm:$0xff] %v5807_v12  ;;  %v117_v55 = vld [vmem:[#allocation10 + $0x110] sm:$0xff]  ;;  %v5849_v57 = vcombine.low %v102_v32, %v106_v33  ;;  %v5851_v60 = vcombine.high %v109_v40, %v113_v41  ;;  %v118_v61 = vld [vmem:[#allocation10 + $0x118] sm:$0xff] }
  0x5e   :  { %8102 = vst [vmem:[#allocation37_spill] sm:$0xff] %v5840_v50  ;;  %8103 = vst [vmem:[#allocation38_spill] sm:$0xff] %v5845_v52  ;;  %v121_v56 = vld [vmem:[#allocation10 + $0x130] sm:$0xff]  ;;  %v5854_v1 = vcombine.high %v110_v48, %v114_v49  ;;  %v122_v2 = vld [vmem:[#allocation10 + $0x138] sm:$0xff]  ;;  %v5857_v7 = vcombine.low %v109_v40, %v113_v41  ;;  %v5861_v8 = vcombine.low %v110_v48, %v114_v49 }
  0x5f   :  { %8104 = vst [vmem:[#allocation39_spill] sm:$0xff] %v5849_v57  ;;  %8105 = vst [vmem:[#allocation40_spill] sm:$0xff] %v5851_v60  ;;  %v5863_v14 = vcombine.high %v117_v55, %v121_v56  ;;  %v5866_v16 = vcombine.high %v118_v61, %v122_v2  ;;  %v125_v24 = vld [vmem:[#allocation10 + $0x150] sm:$0xff]  ;;  %v126_v32 = vld [vmem:[#allocation10 + $0x158] sm:$0xff]  ;;  %v5869_v40 = vcombine.low %v117_v55, %v121_v56 }
  0x60   :  { %519 = vmatpush1.bf16.msra.mxu0 %v5767_v43  ;;  %560 = vmatpush1.bf16.msra.mxu1 %v5771_v44  ;;  %8106 = vst [vmem:[#allocation41_spill] sm:$0xff] %v5854_v1  ;;  %8107 = vst [vmem:[#allocation42_spill] sm:$0xff] %v5857_v7  ;;  %v129_v25 = vld [vmem:[#allocation10 + $0x170] sm:$0xff]  ;;  %v130_v33 = vld [vmem:[#allocation10 + $0x178] sm:$0xff]  ;;  %v5873_v41 = vcombine.low %v118_v61, %v122_v2 }
  0x61   :  { %520 = vmatprep.subr.bf16.mxu0 %v5773_v45  ;;  %561 = vmatprep.subr.bf16.mxu1 %v5776_v46  ;;  %8108 = vst [vmem:[#allocation43_spill] sm:$0xff] %v5861_v8  ;;  %8109 = vst [vmem:[#allocation44_spill] sm:$0xff] %v5863_v14  ;;  %v5875_v48 = vcombine.high %v125_v24, %v129_v25  ;;  %v5878_v49 = vcombine.high %v126_v32, %v130_v33 }
  0x62   :  { %8110 = vst [vmem:[#allocation45_spill] sm:$0xff] %v5866_v16  ;;  %8111 = vst [vmem:[#allocation46_spill] sm:$0xff] %v5869_v40  ;;  %v5881_v55 = vcombine.low %v125_v24, %v129_v25  ;;  %v5885_v56 = vcombine.low %v126_v32, %v130_v33 }
  0x63   :  { %8112 = vst [vmem:[#allocation47_spill] sm:$0xff] %v5873_v41  ;;  %8113 = vst [vmem:[#allocation48_spill] sm:$0xff] %v5875_v48 }
  0x64   :  { %521 = vmatpush1.bf16.msra.mxu0 %v5779_v51  ;;  %562 = vmatpush1.bf16.msra.mxu1 %v5783_v53  ;;  %8114 = vst [vmem:[#allocation49_spill] sm:$0xff] %v5878_v49 }
  0x65   :  { %522 = vmatprep.subr.bf16.mxu0 %v5785_v54  ;;  %563 = vmatprep.subr.bf16.mxu1 %v5788_v58 }
  0x68   :  { %523 = vmatpush1.bf16.msra.mxu0 %v5791_v59  ;;  %564 = vmatpush1.bf16.msra.mxu1 %v5795_v62 }
  0x69   :  { %524 = vmatprep.subr.bf16.mxu0 %v5797_v63  ;;  %565 = vmatprep.subr.bf16.mxu1 %v5800_v3 }
  0x6c   :  { %525 = vmatpush1.bf16.msra.mxu0 %v5803_v5  ;;  %566 = vmatpush1.bf16.msra.mxu1 %v5807_v12 }
  0x6d   :  { %592 = vmatprep.subr.bf16.mxu0 %v5809_v13  ;;  %633 = vmatprep.subr.bf16.mxu1 %v5814_v18 }
  0x6f   :  { %543 = vmatmul.mubr.bf16.vlgmr.msra.gmra.mrb[0].mxu0 %v5812_v17  ;;  %584 = vmatmul.mubr.bf16.vlgmr.msra.gmra.mrb[0].mxu1 %v5812_v17 }
  0x70   :  { %593 = vmatpush1.bf16.msra.mxu0 %v5817_v23  ;;  %634 = vmatpush1.bf16.msra.mxu1 %v5821_v26 }
  0x71   :  { %594 = vmatprep.subr.bf16.mxu0 %v5823_v31  ;;  %635 = vmatprep.subr.bf16.mxu1 %v5826_v34 }
  0x72   :  { %624 = vmatprep.mubr.bf16.mxu0 %v7890_v0  ;;  %665 = vmatprep.mubr.bf16.mxu1 %v7890_v0  ;;  %v133_v0 = vld [vmem:[#allocation10 + $0x190] sm:$0xff] }
  0x74   :  { %595 = vmatpush1.bf16.msra.mxu0 %v5831_v39  ;;  %636 = vmatpush1.bf16.msra.mxu1 %v5835_v42 }
  0x75   :  { %596 = vmatprep.subr.bf16.mxu0 %v5837_v47  ;;  %637 = vmatprep.subr.bf16.mxu1 %v5840_v50 }
  0x78   :  { %597 = vmatpush1.bf16.msra.mxu0 %v5845_v52  ;;  %638 = vmatpush1.bf16.msra.mxu1 %v5849_v57  ;;  %v138_v57 = vld [vmem:[#allocation10 + $0x1b8] sm:$0xff] }
  0x79   :  { %598 = vmatprep.subr.bf16.mxu0 %v5851_v60  ;;  %639 = vmatprep.subr.bf16.mxu1 %v5854_v1  ;;  %v137_v1 = vld [vmem:[#allocation10 + $0x1b0] sm:$0xff]  ;;  %v134_v60 = vld [vmem:[#allocation10 + $0x198] sm:$0xff] }
  0x7a   :  { %v5887_v61 = vcombine.high %v133_v0, %v137_v1  ;;  %v5890_v2 = vcombine.high %v134_v60, %v138_v57  ;;  %v5893_v24 = vcombine.low %v133_v0, %v137_v1  ;;  %v5897_v25 = vcombine.low %v134_v60, %v138_v57  ;;  %v8116_v60 = vld [vmem:[#allocation39_spill] sm:$0xff]  ;;  %v8117_v1 = vld [vmem:[#allocation40_spill] sm:$0xff] }
  0x7b   :  { %v8115_v57 = vmov 0  }
  0x7c   :  { %599 = vmatpush1.bf16.msra.mxu0 %v5857_v7  ;;  %640 = vmatpush1.bf16.msra.mxu1 %v5861_v8  ;;  %v142_v8 = vld [vmem:[#allocation10 + $0x1d8] sm:$0xff] }
  0x7d   :  { %600 = vmatprep.subr.bf16.mxu0 %v5863_v14  ;;  %641 = vmatprep.subr.bf16.mxu1 %v5866_v16  ;;  %v141_v16 = vld [vmem:[#allocation10 + $0x1d0] sm:$0xff]  ;;  %v146_v7 = vld [vmem:[#allocation10 + $0x1f8] sm:$0xff] }
  0x7e   :  { %v145_v14 = vld [vmem:[#allocation10 + $0x1f0] sm:$0xff]  ;;  %v5902_v33 = vcombine.high %v142_v8, %v146_v7  ;;  %v5909_v0 = vcombine.low %v142_v8, %v146_v7  ;;  %v8119_v8 = vld [vmem:[#allocation42_spill] sm:$0xff] }
  0x7f   :  { %v5899_v32 = vcombine.high %v141_v16, %v145_v14  ;;  %v8118_v7 = vld [vmem:[#allocation41_spill] sm:$0xff] }
  0x80   :  { %601 = vmatpush1.bf16.msra.mxu0 %v5869_v40  ;;  %642 = vmatpush1.bf16.msra.mxu1 %v5873_v41 }
  0x81   :  { %602 = vmatprep.subr.bf16.mxu0 %v5875_v48  ;;  %643 = vmatprep.subr.bf16.mxu1 %v5878_v49  ;;  %v5905_v49 = vcombine.low %v141_v16, %v145_v14  ;;  %v8120_v14 = vld [vmem:[#allocation43_spill] sm:$0xff]  ;;  %v8121_v16 = vld [vmem:[#allocation44_spill] sm:$0xff] }
  0x84   :  { %603 = vmatpush1.bf16.msra.mxu0 %v5881_v55  ;;  %644 = vmatpush1.bf16.msra.mxu1 %v5885_v56 }
  0x85   :  { %604 = vmatprep.subr.bf16.mxu0 %v5887_v61  ;;  %645 = vmatprep.subr.bf16.mxu1 %v5890_v2 }
  0x88   :  { %605 = vmatpush1.bf16.msra.mxu0 %v5893_v24  ;;  %646 = vmatpush1.bf16.msra.mxu1 %v5897_v25 }
  0x89   :  { %606 = vmatprep.subr.bf16.mxu0 %v5899_v32  ;;  %647 = vmatprep.subr.bf16.mxu1 %v5902_v33 }
  0x8c   :  { %607 = vmatpush1.bf16.msra.mxu0 %v5905_v49  ;;  %648 = vmatpush1.bf16.msra.mxu1 %v5909_v0 }
  0x8d   :  { %722 = vmatprep.subr.bf16.mxu0 %v5716_v4  ;;  %763 = vmatprep.subr.bf16.mxu1 %v5720_v9 }
  0x8f   :  { %625 = vmatmul.mubr.bf16.vlgmr.msra.gmra.mrb[4].mxu0 %v5812_v17  ;;  %666 = vmatmul.mubr.bf16.vlgmr.msra.gmra.mrb[4].mxu1 %v5812_v17  ;;  %v721_v17 = vld [vmem:[#allocation7 + $0x1] sm:$0x1] }
  0x90   :  { %723 = vmatpush1.bf16.msra.mxu0 %v5718_v6  ;;  %764 = vmatpush1.bf16.msra.mxu1 %v5722_v10 }
  0x91   :  { %724 = vmatprep.subr.bf16.mxu0 %v5724_v11  ;;  %765 = vmatprep.subr.bf16.mxu1 %v5727_v15 }
  0x92   :  { %754 = vmatprep.mubr.bf16.mxu0 %v8115_v57  ;;  %795 = vmatprep.mubr.bf16.mxu1 %v8115_v57 }
  0x94   :  { %725 = vmatpush1.bf16.msra.mxu0 %v5731_v19  ;;  %766 = vmatpush1.bf16.msra.mxu1 %v5735_v20 }
  0x95   :  { %726 = vmatprep.subr.bf16.mxu0 %v5737_v21  ;;  %767 = vmatprep.subr.bf16.mxu1 %v5740_v22 }
  0x98   :  { %727 = vmatpush1.bf16.msra.mxu0 %v5743_v27  ;;  %768 = vmatpush1.bf16.msra.mxu1 %v5747_v28 }
  0x99   :  { %728 = vmatprep.subr.bf16.mxu0 %v5749_v29  ;;  %769 = vmatprep.subr.bf16.mxu1 %v5752_v30 }
  0x9c   :  { %729 = vmatpush1.bf16.msra.mxu0 %v5755_v35  ;;  %770 = vmatpush1.bf16.msra.mxu1 %v5759_v36 }
  0x9d   :  { %730 = vmatprep.subr.bf16.mxu0 %v5761_v37  ;;  %771 = vmatprep.subr.bf16.mxu1 %v5764_v38 }
  0xa0   :  { %731 = vmatpush1.bf16.msra.mxu0 %v5767_v43  ;;  %772 = vmatpush1.bf16.msra.mxu1 %v5771_v44 }
  0xa1   :  { %732 = vmatprep.subr.bf16.mxu0 %v5773_v45  ;;  %773 = vmatprep.subr.bf16.mxu1 %v5776_v46 }
  0xa4   :  { %733 = vmatpush1.bf16.msra.mxu0 %v5779_v51  ;;  %774 = vmatpush1.bf16.msra.mxu1 %v5783_v53 }
  0xa5   :  { %734 = vmatprep.subr.bf16.mxu0 %v5785_v54  ;;  %775 = vmatprep.subr.bf16.mxu1 %v5788_v58 }
  0xa8   :  { %735 = vmatpush1.bf16.msra.mxu0 %v5791_v59  ;;  %776 = vmatpush1.bf16.msra.mxu1 %v5795_v62 }
  0xa9   :  { %736 = vmatprep.subr.bf16.mxu0 %v5797_v63  ;;  %777 = vmatprep.subr.bf16.mxu1 %v5800_v3 }
  0xac   :  { %737 = vmatpush1.bf16.msra.mxu0 %v5803_v5  ;;  %778 = vmatpush1.bf16.msra.mxu1 %v5807_v12 }
  0xad   :  { %804 = vmatprep.subr.bf16.mxu0 %v5809_v13  ;;  %845 = vmatprep.subr.bf16.mxu1 %v5814_v18 }
  0xaf   :  { %755 = vmatmul.mubr.bf16.vlgmr.msra.gmra.mrb[8].mxu0 %v721_v17  ;;  %796 = vmatmul.mubr.bf16.vlgmr.msra.gmra.mrb[8].mxu1 %v721_v17 }
  0xb0   :  { %805 = vmatpush1.bf16.msra.mxu0 %v5817_v23  ;;  %846 = vmatpush1.bf16.msra.mxu1 %v5821_v26 }
  0xb1   :  { %806 = vmatprep.subr.bf16.mxu0 %v5823_v31  ;;  %847 = vmatprep.subr.bf16.mxu1 %v5826_v34 }
  0xb2   :  { %836 = vmatprep.mubr.bf16.mxu0 %v8115_v57  ;;  %877 = vmatprep.mubr.bf16.mxu1 %v8115_v57 }
  0xb4   :  { %807 = vmatpush1.bf16.msra.mxu0 %v5831_v39  ;;  %848 = vmatpush1.bf16.msra.mxu1 %v5835_v42  ;;  %v8122_v39 = vld [vmem:[#allocation45_spill] sm:$0xff] }
  0xb5   :  { %808 = vmatprep.subr.bf16.mxu0 %v5837_v47  ;;  %849 = vmatprep.subr.bf16.mxu1 %v5840_v50 }
  0xb8   :  { %809 = vmatpush1.bf16.msra.mxu0 %v5845_v52  ;;  %850 = vmatpush1.bf16.msra.mxu1 %v8116_v60  ;;  %v8123_v52 = vld [vmem:[#allocation49_spill] sm:$0xff] }
  0xb9   :  { %810 = vmatprep.subr.bf16.mxu0 %v8117_v1  ;;  %851 = vmatprep.subr.bf16.mxu1 %v8118_v7 }
  0xbc   :  { %811 = vmatpush1.bf16.msra.mxu0 %v8119_v8  ;;  %852 = vmatpush1.bf16.msra.mxu1 %v8120_v14 }
  0xbd   :  { %812 = vmatprep.subr.bf16.mxu0 %v8121_v16  ;;  %853 = vmatprep.subr.bf16.mxu1 %v8122_v39 }
  0xc0   :  { %813 = vmatpush1.bf16.msra.mxu0 %v5869_v40  ;;  %854 = vmatpush1.bf16.msra.mxu1 %v5873_v41 }
  0xc1   :  { %814 = vmatprep.subr.bf16.mxu0 %v5875_v48  ;;  %855 = vmatprep.subr.bf16.mxu1 %v8123_v52 }
  0xc4   :  { %815 = vmatpush1.bf16.msra.mxu0 %v5881_v55  ;;  %856 = vmatpush1.bf16.msra.mxu1 %v5885_v56 }
  0xc5   :  { %816 = vmatprep.subr.bf16.mxu0 %v5887_v61  ;;  %857 = vmatprep.subr.bf16.mxu1 %v5890_v2 }
  0xc8   :  { %817 = vmatpush1.bf16.msra.mxu0 %v5893_v24  ;;  %858 = vmatpush1.bf16.msra.mxu1 %v5897_v25 }
  0xc9   :  { %818 = vmatprep.subr.bf16.mxu0 %v5899_v32  ;;  %859 = vmatprep.subr.bf16.mxu1 %v5902_v33 }
  0xcc   :  { %819 = vmatpush1.bf16.msra.mxu0 %v5905_v49  ;;  %860 = vmatpush1.bf16.msra.mxu1 %v5909_v0 }
  0xcd   :  { %935 = vmatprep.subr.bf16.mxu0 %v5716_v4  ;;  %976 = vmatprep.subr.bf16.mxu1 %v5720_v9 }
  0xcf   :  { %837 = vmatmul.mubr.bf16.vlgmr.msra.gmra.mrb[12].mxu0 %v721_v17  ;;  %878 = vmatmul.mubr.bf16.vlgmr.msra.gmra.mrb[12].mxu1 %v721_v17  ;;  %v934_v17 = vld [vmem:[#allocation7 + $0x2] sm:$0x1] }
  0xd0   :  { %936 = vmatpush1.bf16.msra.mxu0 %v5718_v6  ;;  %977 = vmatpush1.bf16.msra.mxu1 %v5722_v10 }
  0xd1   :  { %937 = vmatprep.subr.bf16.mxu0 %v5724_v11  ;;  %978 = vmatprep.subr.bf16.mxu1 %v5727_v15 }
  0xd2   :  { %967 = vmatprep.mubr.bf16.mxu0 %v8115_v57  ;;  %1008 = vmatprep.mubr.bf16.mxu1 %v8115_v57 }
  0xd4   :  { %938 = vmatpush1.bf16.msra.mxu0 %v5731_v19  ;;  %979 = vmatpush1.bf16.msra.mxu1 %v5735_v20 }
  0xd5   :  { %939 = vmatprep.subr.bf16.mxu0 %v5737_v21  ;;  %980 = vmatprep.subr.bf16.mxu1 %v5740_v22 }
  0xd8   :  { %940 = vmatpush1.bf16.msra.mxu0 %v5743_v27  ;;  %981 = vmatpush1.bf16.msra.mxu1 %v5747_v28 }
  0xd9   :  { %941 = vmatprep.subr.bf16.mxu0 %v5749_v29  ;;  %982 = vmatprep.subr.bf16.mxu1 %v5752_v30 }
  0xdc   :  { %942 = vmatpush1.bf16.msra.mxu0 %v5755_v35  ;;  %983 = vmatpush1.bf16.msra.mxu1 %v5759_v36 }
  0xdd   :  { %943 = vmatprep.subr.bf16.mxu0 %v5761_v37  ;;  %984 = vmatprep.subr.bf16.mxu1 %v5764_v38 }
  0xe0   :  { %944 = vmatpush1.bf16.msra.mxu0 %v5767_v43  ;;  %985 = vmatpush1.bf16.msra.mxu1 %v5771_v44 }
  0xe1   :  { %945 = vmatprep.subr.bf16.mxu0 %v5773_v45  ;;  %986 = vmatprep.subr.bf16.mxu1 %v5776_v46 }
  0xe4   :  { %946 = vmatpush1.bf16.msra.mxu0 %v5779_v51  ;;  %987 = vmatpush1.bf16.msra.mxu1 %v5783_v53 }
  0xe5   :  { %947 = vmatprep.subr.bf16.mxu0 %v5785_v54  ;;  %988 = vmatprep.subr.bf16.mxu1 %v5788_v58 }
  0xe8   :  { %948 = vmatpush1.bf16.msra.mxu0 %v5791_v59  ;;  %989 = vmatpush1.bf16.msra.mxu1 %v5795_v62 }
  0xe9   :  { %949 = vmatprep.subr.bf16.mxu0 %v5797_v63  ;;  %990 = vmatprep.subr.bf16.mxu1 %v5800_v3 }
  0xec   :  { %950 = vmatpush1.bf16.msra.mxu0 %v5803_v5  ;;  %991 = vmatpush1.bf16.msra.mxu1 %v5807_v12  ;;  %v8124_v5 = vld [vmem:[#allocation34_spill] sm:$0xff] }
  0xed   :  { %1017 = vmatprep.subr.bf16.mxu0 %v5809_v13  ;;  %1058 = vmatprep.subr.bf16.mxu1 %v5814_v18  ;;  %v8125_v18 = vld [vmem:[#allocation38_spill] sm:$0xff] }
  0xef   :  { %968 = vmatmul.mubr.bf16.vlgmr.msra.gmra.mrb[16].mxu0 %v934_v17  ;;  %1009 = vmatmul.mubr.bf16.vlgmr.msra.gmra.mrb[16].mxu1 %v934_v17 }
  0xf0   :  { %1018 = vmatpush1.bf16.msra.mxu0 %v5817_v23  ;;  %1059 = vmatpush1.bf16.msra.mxu1 %v5821_v26 }
  0xf1   :  { %1019 = vmatprep.subr.bf16.mxu0 %v5823_v31  ;;  %1060 = vmatprep.subr.bf16.mxu1 %v5826_v34 }
  0xf2   :  { %1049 = vmatprep.mubr.bf16.mxu0 %v8115_v57  ;;  %1090 = vmatprep.mubr.bf16.mxu1 %v8115_v57 }
  0xf4   :  { %1020 = vmatpush1.bf16.msra.mxu0 %v8124_v5  ;;  %1061 = vmatpush1.bf16.msra.mxu1 %v5835_v42 }
  0xf5   :  { %1021 = vmatprep.subr.bf16.mxu0 %v5837_v47  ;;  %1062 = vmatprep.subr.bf16.mxu1 %v5840_v50 }
  0xf8   :  { %1022 = vmatpush1.bf16.msra.mxu0 %v8125_v18  ;;  %1063 = vmatpush1.bf16.msra.mxu1 %v8116_v60 }
  0xf9   :  { %1023 = vmatprep.subr.bf16.mxu0 %v8117_v1  ;;  %1064 = vmatprep.subr.bf16.mxu1 %v8118_v7 }
  0xfc   :  { %1024 = vmatpush1.bf16.msra.mxu0 %v8119_v8  ;;  %1065 = vmatpush1.bf16.msra.mxu1 %v8120_v14 }
  0xfd   :  { %1025 = vmatprep.subr.bf16.mxu0 %v8121_v16  ;;  %1066 = vmatprep.subr.bf16.mxu1 %v8122_v39 }
 0x100   :  { %1026 = vmatpush1.bf16.msra.mxu0 %v5869_v40  ;;  %1067 = vmatpush1.bf16.msra.mxu1 %v5873_v41 }
 0x101   :  { %1027 = vmatprep.subr.bf16.mxu0 %v5875_v48  ;;  %1068 = vmatprep.subr.bf16.mxu1 %v8123_v52 }
 0x104   :  { %1028 = vmatpush1.bf16.msra.mxu0 %v5881_v55  ;;  %1069 = vmatpush1.bf16.msra.mxu1 %v5885_v56 }
 0x105   :  { %1029 = vmatprep.subr.bf16.mxu0 %v5887_v61  ;;  %1070 = vmatprep.subr.bf16.mxu1 %v5890_v2 }
 0x108   :  { %1030 = vmatpush1.bf16.msra.mxu0 %v5893_v24  ;;  %1071 = vmatpush1.bf16.msra.mxu1 %v5897_v25 }
 0x109   :  { %1031 = vmatprep.subr.bf16.mxu0 %v5899_v32  ;;  %1072 = vmatprep.subr.bf16.mxu1 %v5902_v33 }
 0x10c   :  { %1032 = vmatpush1.bf16.msra.mxu0 %v5905_v49  ;;  %1073 = vmatpush1.bf16.msra.mxu1 %v5909_v0 }
 0x10d   :  { %1148 = vmatprep.subr.bf16.mxu0 %v5716_v4  ;;  %1189 = vmatprep.subr.bf16.mxu1 %v5720_v9 }
 0x10f   :  { %1050 = vmatmul.mubr.bf16.vlgmr.msra.gmra.mrb[20].mxu0 %v934_v17  ;;  %1091 = vmatmul.mubr.bf16.vlgmr.msra.gmra.mrb[20].mxu1 %v934_v17  ;;  %v8126_v17 = vld [vmem:[#allocation26_spill] sm:$0xff] }
 0x110   :  { %1149 = vmatpush1.bf16.msra.mxu0 %v5718_v6  ;;  %1190 = vmatpush1.bf16.msra.mxu1 %v5722_v10 }
 0x111   :  { %1150 = vmatprep.subr.bf16.mxu0 %v5724_v11  ;;  %1191 = vmatprep.subr.bf16.mxu1 %v5727_v15 }
 0x112   :  { %1180 = vmatprep.mubr.bf16.mxu0 %v8115_v57  ;;  %1221 = vmatprep.mubr.bf16.mxu1 %v8115_v57 }
 0x114   :  { %1151 = vmatpush1.bf16.msra.mxu0 %v5731_v19  ;;  %1192 = vmatpush1.bf16.msra.mxu1 %v5735_v20 }
 0x115   :  { %1152 = vmatprep.subr.bf16.mxu0 %v5737_v21  ;;  %1193 = vmatprep.subr.bf16.mxu1 %v5740_v22 }
 0x118   :  { %1153 = vmatpush1.bf16.msra.mxu0 %v5743_v27  ;;  %1194 = vmatpush1.bf16.msra.mxu1 %v5747_v28 }
 0x119   :  { %1154 = vmatprep.subr.bf16.mxu0 %v5749_v29  ;;  %1195 = vmatprep.subr.bf16.mxu1 %v5752_v30 }
 0x11c   :  { %1155 = vmatpush1.bf16.msra.mxu0 %v5755_v35  ;;  %1196 = vmatpush1.bf16.msra.mxu1 %v5759_v36 }
 0x11d   :  { %1156 = vmatprep.subr.bf16.mxu0 %v5761_v37  ;;  %1197 = vmatprep.subr.bf16.mxu1 %v5764_v38 }
 0x120   :  { %1157 = vmatpush1.bf16.msra.mxu0 %v5767_v43  ;;  %1198 = vmatpush1.bf16.msra.mxu1 %v5771_v44 }
 0x121   :  { %1158 = vmatprep.subr.bf16.mxu0 %v5773_v45  ;;  %1199 = vmatprep.subr.bf16.mxu1 %v5776_v46  ;;  %v6085_v45 = vld [vmem:[#allocation7 + $0x3] sm:$0x1] }
 0x124   :  { %1159 = vmatpush1.bf16.msra.mxu0 %v5779_v51  ;;  %1200 = vmatpush1.bf16.msra.mxu1 %v5783_v53  ;;  %v8127_v53 = vld [vmem:[#allocation29_spill] sm:$0xff] }
 0x125   :  { %1160 = vmatprep.subr.bf16.mxu0 %v5785_v54  ;;  %1201 = vmatprep.subr.bf16.mxu1 %v5788_v58 }
 0x128   :  { %1161 = vmatpush1.bf16.msra.mxu0 %v5791_v59  ;;  %1202 = vmatpush1.bf16.msra.mxu1 %v5795_v62 }
 0x129   :  { %1162 = vmatprep.subr.bf16.mxu0 %v5797_v63  ;;  %1203 = vmatprep.subr.bf16.mxu1 %v5800_v3 }
 0x12c   :  { %1163 = vmatpush1.bf16.msra.mxu0 %v8126_v17  ;;  %1204 = vmatpush1.bf16.msra.mxu1 %v5807_v12  ;;  %v150_v17 = vlaneseq }
 0x12d   :  { %1230 = vmatprep.subr.bf16.mxu0 %v5809_v13  ;;  %1271 = vmatprep.subr.bf16.mxu1 %v8127_v53 }
 0x12f   :  { %1181 = vmatmul.mubr.bf16.vlgmr.msra.gmra.mrb[24].mxu0 %v6085_v45  ;;  %1222 = vmatmul.mubr.bf16.vlgmr.msra.gmra.mrb[24].mxu1 %v6085_v45 }
 0x130   :  { %1231 = vmatpush1.bf16.msra.mxu0 %v5817_v23  ;;  %1272 = vmatpush1.bf16.msra.mxu1 %v5821_v26  ;;  %v6102_v23 = vshrl.u32 %v150_v17, 7 }
 0x131   :  { %1232 = vmatprep.subr.bf16.mxu0 %v5823_v31  ;;  %1273 = vmatprep.subr.bf16.mxu1 %v5826_v34 }
 0x132   :  { %1262 = vmatprep.mubr.bf16.mxu0 %v8115_v57  ;;  %1303 = vmatprep.mubr.bf16.mxu1 %v8115_v57  ;;  %v152_v34 = vsub.s32 0, %v6102_v23  ;;  %v160_v17 = vsub.s32 2, %v6102_v23 }
 0x134   :  { %1233 = vmatpush1.bf16.msra.mxu0 %v8124_v5  ;;  %1274 = vmatpush1.bf16.msra.mxu1 %v5835_v42 }
 0x135   :  { %1234 = vmatprep.subr.bf16.mxu0 %v5837_v47  ;;  %1275 = vmatprep.subr.bf16.mxu1 %v5840_v50  ;;  %v6113_v47 = vld [vmem:[%s7884_s2] sm:$0xff]  ;;  %v156_v50 = vsub.s32 1, %v6102_v23 }
 0x138   :  { %1235 = vmatpush1.bf16.msra.mxu0 %v8125_v18  ;;  %1276 = vmatpush1.bf16.msra.mxu1 %v8116_v60  ;;  %v5614_v18 = vmov 1983009808   ;;  %v6129_v60 = vrot.slane %v6113_v47, %v156_v50 }
 0x139   :  { %1236 = vmatprep.subr.bf16.mxu0 %v8117_v1  ;;  %1277 = vmatprep.subr.bf16.mxu1 %v8118_v7  ;;  %v685_v42 = vunpack.c.l.s4 %v5614_v18  ;;  %v164_v7 = vsub.s32 3, %v6102_v23  ;;  %v6126_v1 = vrot.slane %v6113_v47, %v160_v17 }
 0x13b   :  { %v686_v18 = vunpack.c.0.s8 %v685_v42 }
 0x13c   :  { %1237 = vmatpush1.bf16.msra.mxu0 %v8119_v8  ;;  %1278 = vmatpush1.bf16.msra.mxu1 %v8120_v14  ;;  %v6122_v8 = vrot.slane %v6113_v47, %v152_v34 }
 0x13d   :  { %1238 = vmatprep.subr.bf16.mxu0 %v8121_v16  ;;  %1279 = vmatprep.subr.bf16.mxu1 %v8122_v39  ;;  %v6133_v16 = vrot.slane %v6113_v47, %v164_v7  ;;  %v6141_v42 = vsub.s32 %v686_v18, %v6102_v23 }
 0x13e   :  { %8128 = vst [vmem:[#allocation50_spill] sm:$0xff] %v6122_v8 }
 0x140   :  { %1239 = vmatpush1.bf16.msra.mxu0 %v5869_v40  ;;  %1280 = vmatpush1.bf16.msra.mxu1 %v5873_v41 }
 0x141   :  { %1240 = vmatprep.subr.bf16.mxu0 %v5875_v48  ;;  %1281 = vmatprep.subr.bf16.mxu1 %v8123_v52 }
 0x142   :  { %v544_v39 = vpop.f32.mrb[0].mxu0  ;;  %v585_v40 = vpop.f32.mrb[0].mxu1 }
 0x143   :  { %v545_v34 = vadd.f32 %v544_v39, %v6122_v8  ;;  %v546_v14 = vpop.f32.mrb[1].mxu0  ;;  %v586_v17 = vadd.f32 %v585_v40, %v6126_v1  ;;  %v587_v41 = vpop.f32.mrb[1].mxu1 }
 0x144   :  { %v547_v50 = vadd.f32 %v546_v14, %v6129_v60  ;;  %v548_v5 = vpop.f32.mrb[2].mxu0  ;;  %1241 = vmatpush1.bf16.msra.mxu0 %v5881_v55  ;;  %v588_v7 = vadd.f32 %v587_v41, %v6133_v16  ;;  %v589_v48 = vpop.f32.mrb[2].mxu1  ;;  %1282 = vmatpush1.bf16.msra.mxu1 %v5885_v56  ;;  %v176_v41 = vsub.s32 6, %v6102_v23 }
 0x145   :  { %v549_v52 = vpop.f32.mrb[3].mxu0  ;;  %1242 = vmatprep.subr.bf16.mxu0 %v5887_v61  ;;  %v590_v8 = vpop.f32.mrb[3].mxu1  ;;  %1283 = vmatprep.subr.bf16.mxu1 %v5890_v2  ;;  %v172_v48 = vsub.s32 5, %v6102_v23 }
 0x146   :  { %v682_v39 = vcombine.low %v545_v34, %v547_v50  ;;  %v683_v40 = vcombine.low %v586_v17, %v588_v7  ;;  %v180_v8 = vsub.s32 7, %v6102_v23  ;;  %v6193_v34 = vrot.slane %v6113_v47, %v176_v41  ;;  %v8132_v7 = vld [vmem:[#allocation23_spill] sm:$0xff] }
 0x147   :  { %v6196_v17 = vrot.slane %v6113_v47, %v172_v48 }
 0x148   :  { %v6149_v14 = vrot.slane %v682_v39, %v6141_v42  ;;  %1243 = vmatpush1.bf16.msra.mxu0 %v5893_v24  ;;  %v6153_v5 = vrot.slane %v683_v40, %v6141_v42  ;;  %1284 = vmatpush1.bf16.msra.mxu1 %v5897_v25  ;;  %v6200_v50 = vrot.slane %v6113_v47, %v180_v8 }
 0x149   :  { %1244 = vmatprep.subr.bf16.mxu0 %v5899_v32  ;;  %1285 = vmatprep.subr.bf16.mxu1 %v5902_v33 }
 0x14a   :  { %8129 = vst [vmem:[#allocation51_spill] sm:$0xff] %v6149_v14  ;;  %8130 = vst [vmem:[#allocation52_spill] sm:$0xff] %v6153_v5  ;;  %v8133_v14 = vld [vmem:[#allocation25_spill] sm:$0xff] }
 0x14c   :  { %1245 = vmatpush1.bf16.msra.mxu0 %v5905_v49  ;;  %1286 = vmatpush1.bf16.msra.mxu1 %v5909_v0 }
 0x14d   :  { %1361 = vmatprep.subr.bf16.mxu0 %v5716_v4  ;;  %1402 = vmatprep.subr.bf16.mxu1 %v5720_v9 }
 0x14f   :  { %1263 = vmatmul.mubr.bf16.vlgmr.msra.gmra.mrb[28].mxu0 %v6085_v45  ;;  %1304 = vmatmul.mubr.bf16.vlgmr.msra.gmra.mrb[28].mxu1 %v6085_v45  ;;  %v168_v45 = vsub.s32 4, %v6102_v23 }
 0x150   :  { %1362 = vmatpush1.bf16.msra.mxu0 %v5718_v6  ;;  %1403 = vmatpush1.bf16.msra.mxu1 %v5722_v10 }
 0x151   :  { %1363 = vmatprep.subr.bf16.mxu0 %v5724_v11  ;;  %1404 = vmatprep.subr.bf16.mxu1 %v5727_v15  ;;  %v6189_v18 = vrot.slane %v6113_v47, %v168_v45 }
 0x152   :  { %1393 = vmatprep.mubr.bf16.mxu0 %v8115_v57  ;;  %1434 = vmatprep.mubr.bf16.mxu1 %v8115_v57 }
 0x153   :  { %8131 = vst [vmem:[#allocation53_spill] sm:$0xff] %v6189_v18 }
 0x154   :  { %1364 = vmatpush1.bf16.msra.mxu0 %v5731_v19  ;;  %1405 = vmatpush1.bf16.msra.mxu1 %v5735_v20 }
 0x155   :  { %1365 = vmatprep.subr.bf16.mxu0 %v5737_v21  ;;  %1406 = vmatprep.subr.bf16.mxu1 %v5740_v22 }
 0x158   :  { %1366 = vmatpush1.bf16.msra.mxu0 %v5743_v27  ;;  %1407 = vmatpush1.bf16.msra.mxu1 %v5747_v28 }
 0x159   :  { %1367 = vmatprep.subr.bf16.mxu0 %v5749_v29  ;;  %1408 = vmatprep.subr.bf16.mxu1 %v5752_v30 }
 0x15c   :  { %1368 = vmatpush1.bf16.msra.mxu0 %v5755_v35  ;;  %1409 = vmatpush1.bf16.msra.mxu1 %v5759_v36 }
 0x15d   :  { %1369 = vmatprep.subr.bf16.mxu0 %v5761_v37  ;;  %1410 = vmatprep.subr.bf16.mxu1 %v5764_v38 }
 0x160   :  { %1370 = vmatpush1.bf16.msra.mxu0 %v5767_v43  ;;  %1411 = vmatpush1.bf16.msra.mxu1 %v5771_v44 }
 0x161   :  { %1371 = vmatprep.subr.bf16.mxu0 %v8132_v7  ;;  %1412 = vmatprep.subr.bf16.mxu1 %v5776_v46 }
 0x162   :  { %v626_v23 = vpop.f32.mrb[4].mxu0  ;;  %v667_v40 = vpop.f32.mrb[4].mxu1 }
 0x163   :  { %v627_v39 = vadd.f32 %v626_v23, %v6189_v18  ;;  %v628_v45 = vpop.f32.mrb[5].mxu0  ;;  %v668_v41 = vadd.f32 %v667_v40, %v6193_v34  ;;  %v669_v48 = vpop.f32.mrb[5].mxu1 }
 0x164   :  { %v629_v52 = vadd.f32 %v628_v45, %v6196_v17  ;;  %v630_v5 = vpop.f32.mrb[6].mxu0  ;;  %1372 = vmatpush1.bf16.msra.mxu0 %v5779_v51  ;;  %v670_v47 = vadd.f32 %v669_v48, %v6200_v50  ;;  %v671_v8 = vpop.f32.mrb[6].mxu1  ;;  %1413 = vmatpush1.bf16.msra.mxu1 %v8133_v14  ;;  %v8139_v45 = vld [vmem:[#allocation34_spill] sm:$0xff]  ;;  %v8141_v48 = vld [vmem:[#allocation36_spill] sm:$0xff] }
 0x165   :  { %v631_v7 = vpop.f32.mrb[7].mxu0  ;;  %1373 = vmatprep.subr.bf16.mxu0 %v5785_v54  ;;  %v672_v23 = vpop.f32.mrb[7].mxu1  ;;  %1414 = vmatprep.subr.bf16.mxu1 %v5788_v58  ;;  %v8143_v8 = vld [vmem:[#allocation38_spill] sm:$0xff] }
 0x166   :  { %v699_v46 = vcombine.low %v627_v39, %v629_v52  ;;  %v700_v18 = vcombine.low %v668_v41, %v670_v47  ;;  %v8136_v7 = vld [vmem:[#allocation26_spill] sm:$0xff]  ;;  %v8140_v41 = vld [vmem:[#allocation35_spill] sm:$0xff]  ;;  %v8142_v47 = vld [vmem:[#allocation37_spill] sm:$0xff] }
 0x167   :  { %v1360_v39 = vld [vmem:[#allocation7 + $0x4] sm:$0x1]  ;;  %v8144_v23 = vld [vmem:[#allocation39_spill] sm:$0xff]  ;;  %v8145_v52 = vld [vmem:[#allocation40_spill] sm:$0xff] }
 0x168   :  { %v6213_v40 = vrot.slane %v699_v46, %v6141_v42  ;;  %1374 = vmatpush1.bf16.msra.mxu0 %v5791_v59  ;;  %v6217_v5 = vrot.slane %v700_v18, %v6141_v42  ;;  %1415 = vmatpush1.bf16.msra.mxu1 %v5795_v62  ;;  %v8137_v46 = vld [vmem:[#allocation30_spill] sm:$0xff]  ;;  %v8138_v18 = vld [vmem:[#allocation33_spill] sm:$0xff] }
 0x169   :  { %1375 = vmatprep.subr.bf16.mxu0 %v5797_v63  ;;  %1416 = vmatprep.subr.bf16.mxu1 %v5800_v3 }
 0x16a   :  { %8134 = vst [vmem:[#allocation25_spill] sm:$0xff] %v6213_v40  ;;  %8135 = vst [vmem:[#allocation54_spill] sm:$0xff] %v6217_v5  ;;  %v8146_v5 = vld [vmem:[#allocation41_spill] sm:$0xff]  ;;  %v8147_v40 = vld [vmem:[#allocation42_spill] sm:$0xff] }
 0x16c   :  { %1376 = vmatpush1.bf16.msra.mxu0 %v8136_v7  ;;  %1417 = vmatpush1.bf16.msra.mxu1 %v5807_v12 }
 0x16d   :  { %1443 = vmatprep.subr.bf16.mxu0 %v5809_v13  ;;  %1484 = vmatprep.subr.bf16.mxu1 %v8127_v53 }
 0x16f   :  { %1394 = vmatmul.mubr.bf16.vlgmr.msra.gmra.mrb[32].mxu0 %v1360_v39  ;;  %1435 = vmatmul.mubr.bf16.vlgmr.msra.gmra.mrb[32].mxu1 %v1360_v39 }
 0x170   :  { %1444 = vmatpush1.bf16.msra.mxu0 %v8137_v46  ;;  %1485 = vmatpush1.bf16.msra.mxu1 %v5821_v26 }
 0x171   :  { %1445 = vmatprep.subr.bf16.mxu0 %v5823_v31  ;;  %1486 = vmatprep.subr.bf16.mxu1 %v8138_v18  ;;  %v8148_v18 = vld [vmem:[#allocation43_spill] sm:$0xff]  ;;  %v8149_v31 = vld [vmem:[#allocation44_spill] sm:$0xff] }
 0x172   :  { %1475 = vmatprep.mubr.bf16.mxu0 %v8115_v57  ;;  %1516 = vmatprep.mubr.bf16.mxu1 %v8115_v57 }
 0x174   :  { %1446 = vmatpush1.bf16.msra.mxu0 %v8139_v45  ;;  %1487 = vmatpush1.bf16.msra.mxu1 %v8140_v41  ;;  %v8150_v45 = vld [vmem:[#allocation45_spill] sm:$0xff]  ;;  %v8151_v41 = vld [vmem:[#allocation46_spill] sm:$0xff] }
 0x175   :  { %1447 = vmatprep.subr.bf16.mxu0 %v8141_v48  ;;  %1488 = vmatprep.subr.bf16.mxu1 %v8142_v47  ;;  %v8152_v48 = vld [vmem:[#allocation47_spill] sm:$0xff]  ;;  %v8153_v47 = vld [vmem:[#allocation48_spill] sm:$0xff] }
 0x178   :  { %1448 = vmatpush1.bf16.msra.mxu0 %v8143_v8  ;;  %1489 = vmatpush1.bf16.msra.mxu1 %v8144_v23  ;;  %v8154_v23 = vld [vmem:[#allocation49_spill] sm:$0xff] }
 0x179   :  { %1449 = vmatprep.subr.bf16.mxu0 %v8145_v52  ;;  %1490 = vmatprep.subr.bf16.mxu1 %v8146_v5  ;;  %v8155_v52 = vld [vmem:[#allocation50_spill] sm:$0xff] }
 0x17c   :  { %1450 = vmatpush1.bf16.msra.mxu0 %v8147_v40  ;;  %1491 = vmatpush1.bf16.msra.mxu1 %v8148_v18 }
 0x17d   :  { %1451 = vmatprep.subr.bf16.mxu0 %v8149_v31  ;;  %1492 = vmatprep.subr.bf16.mxu1 %v8150_v45 }
 0x180   :  { %1452 = vmatpush1.bf16.msra.mxu0 %v8151_v41  ;;  %1493 = vmatpush1.bf16.msra.mxu1 %v8152_v48 }
 0x181   :  { %1453 = vmatprep.subr.bf16.mxu0 %v8153_v47  ;;  %1494 = vmatprep.subr.bf16.mxu1 %v8154_v23 }
 0x182   :  { %v756_v8 = vpop.f32.mrb[8].mxu0  ;;  %v797_v5 = vpop.f32.mrb[8].mxu1 }
 0x183   :  { %v757_v26 = vadd.f32 %v756_v8, %v8155_v52  ;;  %v758_v46 = vpop.f32.mrb[9].mxu0  ;;  %v798_v40 = vadd.f32 %v797_v5, %v6126_v1  ;;  %v799_v31 = vpop.f32.mrb[9].mxu1 }
 0x184   :  { %v759_v18 = vadd.f32 %v758_v46, %v6129_v60  ;;  %v760_v53 = vpop.f32.mrb[10].mxu0  ;;  %1454 = vmatpush1.bf16.msra.mxu0 %v5881_v55  ;;  %v800_v41 = vadd.f32 %v799_v31, %v6133_v16  ;;  %v801_v48 = vpop.f32.mrb[10].mxu1  ;;  %1495 = vmatpush1.bf16.msra.mxu1 %v5885_v56  ;;  %v8158_v31 = vld [vmem:[#allocation23_spill] sm:$0xff] }
 0x185   :  { %v761_v47 = vpop.f32.mrb[11].mxu0  ;;  %1455 = vmatprep.subr.bf16.mxu0 %v5887_v61  ;;  %v802_v8 = vpop.f32.mrb[11].mxu1  ;;  %1496 = vmatprep.subr.bf16.mxu1 %v5890_v2 }
 0x186   :  { %v894_v23 = vcombine.low %v757_v26, %v759_v18  ;;  %v895_v52 = vcombine.low %v798_v40, %v800_v41 }
 0x188   :  { %v6259_v5 = vrot.slane %v894_v23, %v6141_v42  ;;  %1456 = vmatpush1.bf16.msra.mxu0 %v5893_v24  ;;  %v6263_v53 = vrot.slane %v895_v52, %v6141_v42  ;;  %1497 = vmatpush1.bf16.msra.mxu1 %v5897_v25  ;;  %v8159_v52 = vld [vmem:[#allocation24_spill] sm:$0xff] }
 0x189   :  { %1457 = vmatprep.subr.bf16.mxu0 %v5899_v32  ;;  %1498 = vmatprep.subr.bf16.mxu1 %v5902_v33 }
 0x18a   :  { %8156 = vst [vmem:[#allocation26_spill] sm:$0xff] %v6259_v5  ;;  %8157 = vst [vmem:[#allocation45_spill] sm:$0xff] %v6263_v53 }
 0x18c   :  { %1458 = vmatpush1.bf16.msra.mxu0 %v5905_v49  ;;  %1499 = vmatpush1.bf16.msra.mxu1 %v5909_v0 }
 0x18d   :  { %1574 = vmatprep.subr.bf16.mxu0 %v5716_v4  ;;  %1615 = vmatprep.subr.bf16.mxu1 %v5720_v9 }
 0x18f   :  { %1476 = vmatmul.mubr.bf16.vlgmr.msra.gmra.mrb[36].mxu0 %v1360_v39  ;;  %1517 = vmatmul.mubr.bf16.vlgmr.msra.gmra.mrb[36].mxu1 %v1360_v39  ;;  %v8160_v39 = vld [vmem:[#allocation53_spill] sm:$0xff] }
 0x190   :  { %1575 = vmatpush1.bf16.msra.mxu0 %v5718_v6  ;;  %1616 = vmatpush1.bf16.msra.mxu1 %v5722_v10 }
 0x191   :  { %1576 = vmatprep.subr.bf16.mxu0 %v5724_v11  ;;  %1617 = vmatprep.subr.bf16.mxu1 %v5727_v15 }
 0x192   :  { %1606 = vmatprep.mubr.bf16.mxu0 %v8115_v57  ;;  %1647 = vmatprep.mubr.bf16.mxu1 %v8115_v57 }
 0x194   :  { %1577 = vmatpush1.bf16.msra.mxu0 %v5731_v19  ;;  %1618 = vmatpush1.bf16.msra.mxu1 %v5735_v20 }
 0x195   :  { %1578 = vmatprep.subr.bf16.mxu0 %v5737_v21  ;;  %1619 = vmatprep.subr.bf16.mxu1 %v5740_v22 }
 0x198   :  { %1579 = vmatpush1.bf16.msra.mxu0 %v5743_v27  ;;  %1620 = vmatpush1.bf16.msra.mxu1 %v5747_v28 }
 0x199   :  { %1580 = vmatprep.subr.bf16.mxu0 %v5749_v29  ;;  %1621 = vmatprep.subr.bf16.mxu1 %v5752_v30 }
 0x19c   :  { %1581 = vmatpush1.bf16.msra.mxu0 %v5755_v35  ;;  %1622 = vmatpush1.bf16.msra.mxu1 %v5759_v36 }
 0x19d   :  { %1582 = vmatprep.subr.bf16.mxu0 %v5761_v37  ;;  %1623 = vmatprep.subr.bf16.mxu1 %v5764_v38 }
 0x1a0   :  { %1583 = vmatpush1.bf16.msra.mxu0 %v5767_v43  ;;  %1624 = vmatpush1.bf16.msra.mxu1 %v5771_v44 }
 0x1a1   :  { %1584 = vmatprep.subr.bf16.mxu0 %v8158_v31  ;;  %1625 = vmatprep.subr.bf16.mxu1 %v8159_v52 }
 0x1a2   :  { %v838_v40 = vpop.f32.mrb[12].mxu0  ;;  %v879_v18 = vpop.f32.mrb[12].mxu1 }
 0x1a3   :  { %v839_v46 = vadd.f32 %v838_v40, %v8160_v39  ;;  %v840_v41 = vpop.f32.mrb[13].mxu0  ;;  %v880_v48 = vadd.f32 %v879_v18, %v6193_v34  ;;  %v881_v23 = vpop.f32.mrb[13].mxu1 }
 0x1a4   :  { %v841_v47 = vadd.f32 %v840_v41, %v6196_v17  ;;  %v842_v8 = vpop.f32.mrb[14].mxu0  ;;  %1585 = vmatpush1.bf16.msra.mxu0 %v5779_v51  ;;  %v882_v26 = vadd.f32 %v881_v23, %v6200_v50  ;;  %v883_v53 = vpop.f32.mrb[14].mxu1  ;;  %1626 = vmatpush1.bf16.msra.mxu1 %v8133_v14  ;;  %v8169_v23 = vld [vmem:[#allocation35_spill] sm:$0xff] }
 0x1a5   :  { %v843_v5 = vpop.f32.mrb[15].mxu0  ;;  %1586 = vmatprep.subr.bf16.mxu0 %v5785_v54  ;;  %v884_v40 = vpop.f32.mrb[15].mxu1  ;;  %1627 = vmatprep.subr.bf16.mxu1 %v5788_v58  ;;  %v1573_v53 = vld [vmem:[#allocation7 + $0x5] sm:$0x1]  ;;  %v8170_v8 = vld [vmem:[#allocation36_spill] sm:$0xff] }
 0x1a6   :  { %v911_v52 = vcombine.low %v839_v46, %v841_v47  ;;  %v912_v39 = vcombine.low %v880_v48, %v882_v26  ;;  %v8163_v26 = vld [vmem:[#allocation29_spill] sm:$0xff]  ;;  %v8166_v46 = vld [vmem:[#allocation32_spill] sm:$0xff]  ;;  %v8168_v47 = vld [vmem:[#allocation34_spill] sm:$0xff] }
 0x1a7   :  { %v8167_v48 = vld [vmem:[#allocation33_spill] sm:$0xff]  ;;  %v8172_v5 = vld [vmem:[#allocation38_spill] sm:$0xff] }
 0x1a8   :  { %v6305_v18 = vrot.slane %v911_v52, %v6141_v42  ;;  %1587 = vmatpush1.bf16.msra.mxu0 %v5791_v59  ;;  %v6309_v41 = vrot.slane %v912_v39, %v6141_v42  ;;  %1628 = vmatpush1.bf16.msra.mxu1 %v5795_v62  ;;  %v8164_v52 = vld [vmem:[#allocation30_spill] sm:$0xff]  ;;  %v8165_v39 = vld [vmem:[#allocation31_spill] sm:$0xff]  ;;  %v8171_v40 = vld [vmem:[#allocation37_spill] sm:$0xff] }
 0x1a9   :  { %1588 = vmatprep.subr.bf16.mxu0 %v5797_v63  ;;  %1629 = vmatprep.subr.bf16.mxu1 %v5800_v3 }
 0x1aa   :  { %8161 = vst [vmem:[#allocation23_spill] sm:$0xff] %v6305_v18  ;;  %8162 = vst [vmem:[#allocation55_spill] sm:$0xff] %v6309_v41  ;;  %v8173_v41 = vld [vmem:[#allocation39_spill] sm:$0xff]  ;;  %v8174_v18 = vld [vmem:[#allocation40_spill] sm:$0xff] }
 0x1ac   :  { %1589 = vmatpush1.bf16.msra.mxu0 %v8136_v7  ;;  %1630 = vmatpush1.bf16.msra.mxu1 %v5807_v12 }
 0x1ad   :  { %1656 = vmatprep.subr.bf16.mxu0 %v5809_v13  ;;  %1697 = vmatprep.subr.bf16.mxu1 %v8163_v26 }
 0x1af   :  { %1607 = vmatmul.mubr.bf16.vlgmr.msra.gmra.mrb[40].mxu0 %v1573_v53  ;;  %1648 = vmatmul.mubr.bf16.vlgmr.msra.gmra.mrb[40].mxu1 %v1573_v53 }
 0x1b0   :  { %1657 = vmatpush1.bf16.msra.mxu0 %v8164_v52  ;;  %1698 = vmatpush1.bf16.msra.mxu1 %v8165_v39  ;;  %v8177_v39 = vld [vmem:[#allocation43_spill] sm:$0xff]  ;;  %v8178_v52 = vld [vmem:[#allocation44_spill] sm:$0xff] }
 0x1b1   :  { %1658 = vmatprep.subr.bf16.mxu0 %v8166_v46  ;;  %1699 = vmatprep.subr.bf16.mxu1 %v8167_v48  ;;  %v8175_v46 = vld [vmem:[#allocation41_spill] sm:$0xff]  ;;  %v8176_v48 = vld [vmem:[#allocation42_spill] sm:$0xff] }
 0x1b2   :  { %1688 = vmatprep.mubr.bf16.mxu0 %v8115_v57  ;;  %1729 = vmatprep.mubr.bf16.mxu1 %v8115_v57 }
 0x1b4   :  { %1659 = vmatpush1.bf16.msra.mxu0 %v8168_v47  ;;  %1700 = vmatpush1.bf16.msra.mxu1 %v8169_v23  ;;  %v8179_v23 = vld [vmem:[#allocation46_spill] sm:$0xff] }
 0x1b5   :  { %1660 = vmatprep.subr.bf16.mxu0 %v8170_v8  ;;  %1701 = vmatprep.subr.bf16.mxu1 %v8171_v40  ;;  %v8180_v8 = vld [vmem:[#allocation47_spill] sm:$0xff]  ;;  %v8181_v40 = vld [vmem:[#allocation48_spill] sm:$0xff] }
 0x1b8   :  { %1661 = vmatpush1.bf16.msra.mxu0 %v8172_v5  ;;  %1702 = vmatpush1.bf16.msra.mxu1 %v8173_v41  ;;  %v8182_v41 = vld [vmem:[#allocation49_spill] sm:$0xff] }
 0x1b9   :  { %1662 = vmatprep.subr.bf16.mxu0 %v8174_v18  ;;  %1703 = vmatprep.subr.bf16.mxu1 %v8175_v46  ;;  %v8183_v18 = vld [vmem:[#allocation50_spill] sm:$0xff] }
 0x1bc   :  { %1663 = vmatpush1.bf16.msra.mxu0 %v8176_v48  ;;  %1704 = vmatpush1.bf16.msra.mxu1 %v8177_v39 }
 0x1bd   :  { %1664 = vmatprep.subr.bf16.mxu0 %v8178_v52  ;;  %1705 = vmatprep.subr.bf16.mxu1 %v8150_v45 }
 0x1c0   :  { %1665 = vmatpush1.bf16.msra.mxu0 %v8179_v23  ;;  %1706 = vmatpush1.bf16.msra.mxu1 %v8180_v8 }
 0x1c1   :  { %1666 = vmatprep.subr.bf16.mxu0 %v8181_v40  ;;  %1707 = vmatprep.subr.bf16.mxu1 %v8182_v41 }
 0x1c2   :  { %v969_v5 = vpop.f32.mrb[16].mxu0  ;;  %v1010_v46 = vpop.f32.mrb[16].mxu1 }
 0x1c3   :  { %v970_v47 = vadd.f32 %v969_v5, %v8183_v18  ;;  %v971_v26 = vpop.f32.mrb[17].mxu0  ;;  %v1011_v48 = vadd.f32 %v1010_v46, %v6126_v1  ;;  %v1012_v52 = vpop.f32.mrb[17].mxu1 }
 0x1c4   :  { %v972_v39 = vadd.f32 %v971_v26, %v6129_v60  ;;  %v973_v13 = vpop.f32.mrb[18].mxu0  ;;  %1667 = vmatpush1.bf16.msra.mxu0 %v5881_v55  ;;  %v1013_v23 = vadd.f32 %v1012_v52, %v6133_v16  ;;  %v1014_v8 = vpop.f32.mrb[18].mxu1  ;;  %1708 = vmatpush1.bf16.msra.mxu1 %v5885_v56 }
 0x1c5   :  { %v974_v40 = vpop.f32.mrb[19].mxu0  ;;  %1668 = vmatprep.subr.bf16.mxu0 %v5887_v61  ;;  %v1015_v5 = vpop.f32.mrb[19].mxu1  ;;  %1709 = vmatprep.subr.bf16.mxu1 %v5890_v2 }
 0x1c6   :  { %v1107_v41 = vcombine.low %v970_v47, %v972_v39  ;;  %v1108_v18 = vcombine.low %v1011_v48, %v1013_v23 }
 0x1c8   :  { %v6351_v46 = vrot.slane %v1107_v41, %v6141_v42  ;;  %1669 = vmatpush1.bf16.msra.mxu0 %v5893_v24  ;;  %v6355_v13 = vrot.slane %v1108_v18, %v6141_v42  ;;  %1710 = vmatpush1.bf16.msra.mxu1 %v5897_v25  ;;  %v8186_v41 = vld [vmem:[#allocation24_spill] sm:$0xff] }
 0x1c9   :  { %1670 = vmatprep.subr.bf16.mxu0 %v5899_v32  ;;  %1711 = vmatprep.subr.bf16.mxu1 %v5902_v33 }
 0x1ca   :  { %8184 = vst [vmem:[#allocation56_spill] sm:$0xff] %v6351_v46  ;;  %8185 = vst [vmem:[#allocation57_spill] sm:$0xff] %v6355_v13 }
 0x1cc   :  { %1671 = vmatpush1.bf16.msra.mxu0 %v5905_v49  ;;  %1712 = vmatpush1.bf16.msra.mxu1 %v5909_v0 }
 0x1cd   :  { %1787 = vmatprep.subr.bf16.mxu0 %v5716_v4  ;;  %1828 = vmatprep.subr.bf16.mxu1 %v5720_v9 }
 0x1cf   :  { %1689 = vmatmul.mubr.bf16.vlgmr.msra.gmra.mrb[44].mxu0 %v1573_v53  ;;  %1730 = vmatmul.mubr.bf16.vlgmr.msra.gmra.mrb[44].mxu1 %v1573_v53  ;;  %v8187_v53 = vld [vmem:[#allocation53_spill] sm:$0xff] }
 0x1d0   :  { %1788 = vmatpush1.bf16.msra.mxu0 %v5718_v6  ;;  %1829 = vmatpush1.bf16.msra.mxu1 %v5722_v10 }
 0x1d1   :  { %1789 = vmatprep.subr.bf16.mxu0 %v5724_v11  ;;  %1830 = vmatprep.subr.bf16.mxu1 %v5727_v15 }
 0x1d2   :  { %1819 = vmatprep.mubr.bf16.mxu0 %v8115_v57  ;;  %1860 = vmatprep.mubr.bf16.mxu1 %v8115_v57 }
 0x1d4   :  { %1790 = vmatpush1.bf16.msra.mxu0 %v5731_v19  ;;  %1831 = vmatpush1.bf16.msra.mxu1 %v5735_v20 }
 0x1d5   :  { %1791 = vmatprep.subr.bf16.mxu0 %v5737_v21  ;;  %1832 = vmatprep.subr.bf16.mxu1 %v5740_v22 }
 0x1d8   :  { %1792 = vmatpush1.bf16.msra.mxu0 %v5743_v27  ;;  %1833 = vmatpush1.bf16.msra.mxu1 %v5747_v28 }
 0x1d9   :  { %1793 = vmatprep.subr.bf16.mxu0 %v5749_v29  ;;  %1834 = vmatprep.subr.bf16.mxu1 %v5752_v30 }
 0x1dc   :  { %1794 = vmatpush1.bf16.msra.mxu0 %v5755_v35  ;;  %1835 = vmatpush1.bf16.msra.mxu1 %v5759_v36 }
 0x1dd   :  { %1795 = vmatprep.subr.bf16.mxu0 %v5761_v37  ;;  %1836 = vmatprep.subr.bf16.mxu1 %v5764_v38 }
 0x1e0   :  { %1796 = vmatpush1.bf16.msra.mxu0 %v5767_v43  ;;  %1837 = vmatpush1.bf16.msra.mxu1 %v5771_v44 }
 0x1e1   :  { %1797 = vmatprep.subr.bf16.mxu0 %v8158_v31  ;;  %1838 = vmatprep.subr.bf16.mxu1 %v8186_v41 }
 0x1e2   :  { %v1051_v18 = vpop.f32.mrb[20].mxu0  ;;  %v1092_v39 = vpop.f32.mrb[20].mxu1 }
 0x1e3   :  { %v1052_v52 = vadd.f32 %v1051_v18, %v8187_v53  ;;  %v1053_v48 = vpop.f32.mrb[21].mxu0  ;;  %v1093_v47 = vadd.f32 %v1092_v39, %v6193_v34  ;;  %v1094_v8 = vpop.f32.mrb[21].mxu1  ;;  %v5615_v53 = vmov 0.0  }
 0x1e4   :  { %v1054_v23 = vadd.f32 %v1053_v48, %v6196_v17  ;;  %v1055_v40 = vpop.f32.mrb[22].mxu0  ;;  %1798 = vmatpush1.bf16.msra.mxu0 %v5779_v51  ;;  %v1095_v5 = vadd.f32 %v1094_v8, %v6200_v50  ;;  %v1096_v26 = vpop.f32.mrb[22].mxu1  ;;  %1839 = vmatpush1.bf16.msra.mxu1 %v8133_v14  ;;  %2211 = vst [vmem:[#allocation3] sm:$0x3] %v5615_v53  ;;  %2212 = vst [vmem:[#allocation4] sm:$0x3] %v5615_v53 }
 0x1e5   :  { %v1056_v13 = vpop.f32.mrb[23].mxu0  ;;  %1799 = vmatprep.subr.bf16.mxu0 %v5785_v54  ;;  %v1097_v18 = vpop.f32.mrb[23].mxu1  ;;  %1840 = vmatprep.subr.bf16.mxu1 %v5788_v58  ;;  %2213 = vst [vmem:[#allocation5] sm:$0x3] %v5615_v53  ;;  %2214 = vst [vmem:[#allocation6] sm:$0x3] %v5615_v53 }
 0x1e6   :  { %v1124_v46 = vcombine.low %v1052_v52, %v1054_v23  ;;  %v1125_v39 = vcombine.low %v1093_v47, %v1095_v5  ;;  %v1786_v53 = vld [vmem:[#allocation7 + $0x6] sm:$0x1]  ;;  %v8191_v52 = vld [vmem:[#allocation29_spill] sm:$0xff]  ;;  %v8193_v23 = vld [vmem:[#allocation31_spill] sm:$0xff] }
 0x1e7   :  { %v8192_v47 = vld [vmem:[#allocation30_spill] sm:$0xff]  ;;  %v8194_v8 = vld [vmem:[#allocation32_spill] sm:$0xff]  ;;  %v8195_v40 = vld [vmem:[#allocation33_spill] sm:$0xff] }
 0x1e8   :  { %v6397_v48 = vrot.slane %v1124_v46, %v6141_v42  ;;  %1800 = vmatpush1.bf16.msra.mxu0 %v5791_v59  ;;  %v6401_v26 = vrot.slane %v1125_v39, %v6141_v42  ;;  %1841 = vmatpush1.bf16.msra.mxu1 %v5795_v62  ;;  %v8190_v46 = vld [vmem:[#allocation28_spill] sm:$0xff]  ;;  %v8196_v5 = vld [vmem:[#allocation34_spill] sm:$0xff]  ;;  %v8197_v18 = vld [vmem:[#allocation35_spill] sm:$0xff] }
 0x1e9   :  { %1801 = vmatprep.subr.bf16.mxu0 %v5797_v63  ;;  %1842 = vmatprep.subr.bf16.mxu1 %v5800_v3  ;;  %v8198_v39 = vld [vmem:[#allocation36_spill] sm:$0xff]  ;;  %v8199_v13 = vld [vmem:[#allocation37_spill] sm:$0xff] }
 0x1ea   :  { %8188 = vst [vmem:[#allocation24_spill] sm:$0xff] %v6397_v48  ;;  %8189 = vst [vmem:[#allocation58_spill] sm:$0xff] %v6401_v26  ;;  %v8200_v26 = vld [vmem:[#allocation38_spill] sm:$0xff]  ;;  %v8201_v48 = vld [vmem:[#allocation39_spill] sm:$0xff] }
 0x1ec   :  { %1802 = vmatpush1.bf16.msra.mxu0 %v8136_v7  ;;  %1843 = vmatpush1.bf16.msra.mxu1 %v5807_v12 }
 0x1ed   :  { %1869 = vmatprep.subr.bf16.mxu0 %v8190_v46  ;;  %1910 = vmatprep.subr.bf16.mxu1 %v8191_v52  ;;  %v8206_v52 = vld [vmem:[#allocation44_spill] sm:$0xff] }
 0x1ef   :  { %1820 = vmatmul.mubr.bf16.vlgmr.msra.gmra.mrb[48].mxu0 %v1786_v53  ;;  %1861 = vmatmul.mubr.bf16.vlgmr.msra.gmra.mrb[48].mxu1 %v1786_v53 }
 0x1f0   :  { %1870 = vmatpush1.bf16.msra.mxu0 %v8192_v47  ;;  %1911 = vmatpush1.bf16.msra.mxu1 %v8193_v23  ;;  %v8202_v23 = vld [vmem:[#allocation40_spill] sm:$0xff]  ;;  %v8205_v47 = vld [vmem:[#allocation43_spill] sm:$0xff] }
 0x1f1   :  { %1871 = vmatprep.subr.bf16.mxu0 %v8194_v8  ;;  %1912 = vmatprep.subr.bf16.mxu1 %v8195_v40  ;;  %v8203_v8 = vld [vmem:[#allocation41_spill] sm:$0xff]  ;;  %v8204_v40 = vld [vmem:[#allocation42_spill] sm:$0xff] }
 0x1f2   :  { %1901 = vmatprep.mubr.bf16.mxu0 %v8115_v57  ;;  %1942 = vmatprep.mubr.bf16.mxu1 %v8115_v57 }
 0x1f4   :  { %1872 = vmatpush1.bf16.msra.mxu0 %v8196_v5  ;;  %1913 = vmatpush1.bf16.msra.mxu1 %v8197_v18  ;;  %v8207_v18 = vld [vmem:[#allocation46_spill] sm:$0xff] }
 0x1f5   :  { %1873 = vmatprep.subr.bf16.mxu0 %v8198_v39  ;;  %1914 = vmatprep.subr.bf16.mxu1 %v8199_v13  ;;  %v8208_v39 = vld [vmem:[#allocation47_spill] sm:$0xff]  ;;  %v8209_v13 = vld [vmem:[#allocation48_spill] sm:$0xff] }
 0x1f8   :  { %1874 = vmatpush1.bf16.msra.mxu0 %v8200_v26  ;;  %1915 = vmatpush1.bf16.msra.mxu1 %v8201_v48  ;;  %v8210_v48 = vld [vmem:[#allocation49_spill] sm:$0xff] }
 0x1f9   :  { %1875 = vmatprep.subr.bf16.mxu0 %v8202_v23  ;;  %1916 = vmatprep.subr.bf16.mxu1 %v8203_v8  ;;  %v8211_v23 = vld [vmem:[#allocation50_spill] sm:$0xff] }
 0x1fc   :  { %1876 = vmatpush1.bf16.msra.mxu0 %v8204_v40  ;;  %1917 = vmatpush1.bf16.msra.mxu1 %v8205_v47 }
 0x1fd   :  { %1877 = vmatprep.subr.bf16.mxu0 %v8206_v52  ;;  %1918 = vmatprep.subr.bf16.mxu1 %v8150_v45 }
 0x200   :  { %1878 = vmatpush1.bf16.msra.mxu0 %v8207_v18  ;;  %1919 = vmatpush1.bf16.msra.mxu1 %v8208_v39 }
 0x201   :  { %1879 = vmatprep.subr.bf16.mxu0 %v8209_v13  ;;  %1920 = vmatprep.subr.bf16.mxu1 %v8210_v48 }
 0x202   :  { %v1182_v26 = vpop.f32.mrb[24].mxu0  ;;  %v1223_v8 = vpop.f32.mrb[24].mxu1 }
 0x203   :  { %v1183_v5 = vadd.f32 %v1182_v26, %v8211_v23  ;;  %v1184_v46 = vpop.f32.mrb[25].mxu0  ;;  %v1224_v40 = vadd.f32 %v1223_v8, %v6126_v1  ;;  %v1225_v52 = vpop.f32.mrb[25].mxu1 }
 0x204   :  { %v1185_v47 = vadd.f32 %v1184_v46, %v6129_v60  ;;  %v1186_v12 = vpop.f32.mrb[26].mxu0  ;;  %1880 = vmatpush1.bf16.msra.mxu0 %v5881_v55  ;;  %v1226_v18 = vadd.f32 %v1225_v52, %v6133_v16  ;;  %v1227_v39 = vpop.f32.mrb[26].mxu1  ;;  %1921 = vmatpush1.bf16.msra.mxu1 %v5885_v56  ;;  %v8231_v46 = vld [vmem:[#allocation41_spill] sm:$0xff]  ;;  %v8232_v52 = vld [vmem:[#allocation42_spill] sm:$0xff] }
 0x205   :  { %v1187_v13 = vpop.f32.mrb[27].mxu0  ;;  %1881 = vmatprep.subr.bf16.mxu0 %v5887_v61  ;;  %v1228_v26 = vpop.f32.mrb[27].mxu1  ;;  %1922 = vmatprep.subr.bf16.mxu1 %v5890_v2 }
 0x206   :  { %v1320_v48 = vcombine.low %v1183_v5, %v1185_v47  ;;  %v1321_v23 = vcombine.low %v1224_v40, %v1226_v18  ;;  %v8233_v47 = vld [vmem:[#allocation43_spill] sm:$0xff]  ;;  %v8235_v40 = vld [vmem:[#allocation46_spill] sm:$0xff]  ;;  %v8237_v18 = vld [vmem:[#allocation48_spill] sm:$0xff] }
 0x207   :  { %v8236_v5 = vld [vmem:[#allocation47_spill] sm:$0xff]  ;;  %v8238_v26 = vld [vmem:[#allocation49_spill] sm:$0xff] }
 0x208   :  { %v6443_v8 = vrot.slane %v1320_v48, %v6141_v42  ;;  %1882 = vmatpush1.bf16.msra.mxu0 %v5893_v24  ;;  %v6447_v12 = vrot.slane %v1321_v23, %v6141_v42  ;;  %1923 = vmatpush1.bf16.msra.mxu1 %v5897_v25  ;;  %v8229_v48 = vld [vmem:[#allocation39_spill] sm:$0xff]  ;;  %v8234_v23 = vld [vmem:[#allocation44_spill] sm:$0xff] }
 0x209   :  { %1883 = vmatprep.subr.bf16.mxu0 %v5899_v32  ;;  %1924 = vmatprep.subr.bf16.mxu1 %v5902_v33  ;;  %v6702_v13 = vld [vmem:[#allocation13 + $0x44] ss:$16 sps:$4 sm:$0xff]  }
 0x20a   :  { %8212 = vst [vmem:[#allocation59_spill] sm:$0xff] %v6443_v8  ;;  %8213 = vst [vmem:[#allocation60_spill] sm:$0xff] %v6447_v12  ;;  %v6734_v12 = vld [vmem:[#allocation13 + $0x80] ss:$16 sps:$4 sm:$0xff]   ;;  %v6738_v8 = vld [vmem:[#allocation13 + $0x88] ss:$16 sps:$4 sm:$0xff]  }
 0x20b   :  { %8259 = vst [vmem:[#allocation47_spill] sm:$0xff] %v6702_v13  ;;  %8269 = vst [vmem:[#allocation68_spill] sm:$0xff] %v6734_v12 }
 0x20c   :  { %1884 = vmatpush1.bf16.msra.mxu0 %v5905_v49  ;;  %1925 = vmatpush1.bf16.msra.mxu1 %v5909_v0  ;;  %8270 = vst [vmem:[#allocation69_spill] sm:$0xff] %v6738_v8 }
 0x20d   :  { %2000 = vmatprep.subr.bf16.mxu0 %v5716_v4  ;;  %2041 = vmatprep.subr.bf16.mxu1 %v5720_v9 }
 0x20f   :  { %1902 = vmatmul.mubr.bf16.vlgmr.msra.gmra.mrb[52].mxu0 %v1786_v53  ;;  %1943 = vmatmul.mubr.bf16.vlgmr.msra.gmra.mrb[52].mxu1 %v1786_v53  ;;  %v8230_v53 = vld [vmem:[#allocation40_spill] sm:$0xff] }
 0x210   :  { %2001 = vmatpush1.bf16.msra.mxu0 %v5718_v6  ;;  %2042 = vmatpush1.bf16.msra.mxu1 %v5722_v10  ;;  %v8214_v6 = vld [vmem:[#allocation53_spill] sm:$0xff] }
 0x211   :  { %2002 = vmatprep.subr.bf16.mxu0 %v5724_v11  ;;  %2043 = vmatprep.subr.bf16.mxu1 %v5727_v15 }
 0x212   :  { %2032 = vmatprep.mubr.bf16.mxu0 %v8115_v57  ;;  %2073 = vmatprep.mubr.bf16.mxu1 %v8115_v57 }
 0x214   :  { %2003 = vmatpush1.bf16.msra.mxu0 %v5731_v19  ;;  %2044 = vmatpush1.bf16.msra.mxu1 %v5735_v20 }
 0x215   :  { %2004 = vmatprep.subr.bf16.mxu0 %v5737_v21  ;;  %2045 = vmatprep.subr.bf16.mxu1 %v5740_v22 }
 0x218   :  { %2005 = vmatpush1.bf16.msra.mxu0 %v5743_v27  ;;  %2046 = vmatpush1.bf16.msra.mxu1 %v5747_v28 }
 0x219   :  { %2006 = vmatprep.subr.bf16.mxu0 %v5749_v29  ;;  %2047 = vmatprep.subr.bf16.mxu1 %v5752_v30 }
 0x21c   :  { %2007 = vmatpush1.bf16.msra.mxu0 %v5755_v35  ;;  %2048 = vmatpush1.bf16.msra.mxu1 %v5759_v36 }
 0x21d   :  { %2008 = vmatprep.subr.bf16.mxu0 %v5761_v37  ;;  %2049 = vmatprep.subr.bf16.mxu1 %v5764_v38  ;;  %v6695_v38 = vld [vmem:[#allocation13 + $0x20] ss:$16 sps:$4 sm:$0xff]  }
 0x21e   :  { %8257 = vst [vmem:[#allocation44_spill] sm:$0xff] %v6695_v38 }
 0x220   :  { %2009 = vmatpush1.bf16.msra.mxu0 %v5767_v43  ;;  %2050 = vmatpush1.bf16.msra.mxu1 %v5771_v44  ;;  %v6501_v43 = vld [vmem:[#allocation7 + $0x7] sm:$0x1]  ;;  %v8217_v44 = vld [vmem:[#allocation27_spill] sm:$0xff] }
 0x221   :  { %2010 = vmatprep.subr.bf16.mxu0 %v8158_v31  ;;  %2051 = vmatprep.subr.bf16.mxu1 %v8186_v41  ;;  %v8227_v31 = vld [vmem:[#allocation37_spill] sm:$0xff]  ;;  %v8228_v41 = vld [vmem:[#allocation38_spill] sm:$0xff] }
 0x222   :  { %v1264_v4 = vpop.f32.mrb[28].mxu0  ;;  %v1305_v10 = vpop.f32.mrb[28].mxu1 }
 0x223   :  { %v1265_v9 = vadd.f32 %v1264_v4, %v8214_v6  ;;  %v1266_v11 = vpop.f32.mrb[29].mxu0  ;;  %v1306_v15 = vadd.f32 %v1305_v10, %v6193_v34  ;;  %v1307_v20 = vpop.f32.mrb[29].mxu1  ;;  %v8239_v4 = vld [vmem:[#allocation50_spill] sm:$0xff] }
 0x224   :  { %v1267_v19 = vadd.f32 %v1266_v11, %v6196_v17  ;;  %v1268_v21 = vpop.f32.mrb[30].mxu0  ;;  %2011 = vmatpush1.bf16.msra.mxu0 %v5779_v51  ;;  %v1308_v22 = vadd.f32 %v1307_v20, %v6200_v50  ;;  %v1309_v27 = vpop.f32.mrb[30].mxu1  ;;  %2052 = vmatpush1.bf16.msra.mxu1 %v8133_v14  ;;  %v8218_v51 = vld [vmem:[#allocation28_spill] sm:$0xff]  ;;  %v8225_v14 = vld [vmem:[#allocation35_spill] sm:$0xff] }
 0x225   :  { %v1269_v28 = vpop.f32.mrb[31].mxu0  ;;  %2012 = vmatprep.subr.bf16.mxu0 %v5785_v54  ;;  %v1310_v30 = vpop.f32.mrb[31].mxu1  ;;  %2053 = vmatprep.subr.bf16.mxu1 %v5788_v58  ;;  %v8219_v54 = vld [vmem:[#allocation29_spill] sm:$0xff]  ;;  %v8220_v58 = vld [vmem:[#allocation30_spill] sm:$0xff] }
 0x226   :  { %v1337_v29 = vcombine.low %v1265_v9, %v1267_v19  ;;  %v1338_v35 = vcombine.low %v1306_v15, %v1308_v22 }
 0x228   :  { %v6489_v36 = vrot.slane %v1337_v29, %v6141_v42  ;;  %2013 = vmatpush1.bf16.msra.mxu0 %v5791_v59  ;;  %v6493_v37 = vrot.slane %v1338_v35, %v6141_v42  ;;  %2054 = vmatpush1.bf16.msra.mxu1 %v5795_v62  ;;  %v8221_v59 = vld [vmem:[#allocation31_spill] sm:$0xff]  ;;  %v8222_v62 = vld [vmem:[#allocation32_spill] sm:$0xff] }
 0x229   :  { %2014 = vmatprep.subr.bf16.mxu0 %v5797_v63  ;;  %2055 = vmatprep.subr.bf16.mxu1 %v5800_v3  ;;  %v8223_v63 = vld [vmem:[#allocation33_spill] sm:$0xff]  ;;  %v8224_v3 = vld [vmem:[#allocation34_spill] sm:$0xff] }
 0x22a   :  { %8215 = vst [vmem:[#allocation53_spill] sm:$0xff] %v6489_v36  ;;  %8216 = vst [vmem:[#allocation61_spill] sm:$0xff] %v6493_v37  ;;  %v6705_v37 = vld [vmem:[#allocation13 + $0x4c] ss:$16 sps:$4 sm:$0xff]   ;;  %v6716_v36 = vld [vmem:[#allocation13 + $0x64] ss:$16 sps:$4 sm:$0xff]  }
 0x22b   :  { %8260 = vst [vmem:[#allocation48_spill] sm:$0xff] %v6705_v37  ;;  %8263 = vst [vmem:[#allocation62_spill] sm:$0xff] %v6716_v36 }
 0x22c   :  { %2015 = vmatpush1.bf16.msra.mxu0 %v8136_v7  ;;  %2056 = vmatpush1.bf16.msra.mxu1 %v8217_v44  ;;  %v8226_v7 = vld [vmem:[#allocation36_spill] sm:$0xff] }
 0x22d   :  { %2082 = vmatprep.subr.bf16.mxu0 %v8218_v51  ;;  %2123 = vmatprep.subr.bf16.mxu1 %v8219_v54  ;;  %v6560_v44 = vld [vmem:[#allocation12] ss:$16 sps:$4 sm:$0xff]   ;;  %v6571_v51 = vld [vmem:[#allocation12 + $0x2c] ss:$16 sps:$4 sm:$0xff]   ;;  %v6582_v54 = vld [vmem:[#allocation12 + $0x44] ss:$16 sps:$4 sm:$0xff]  }
 0x22f   :  { %2033 = vmatmul.mubr.bf16.vlgmr.msra.gmra.mrb[56].mxu0 %v6501_v43  ;;  %2074 = vmatmul.mubr.bf16.vlgmr.msra.gmra.mrb[56].mxu1 %v6501_v43 }
 0x230   :  { %2083 = vmatpush1.bf16.msra.mxu0 %v8220_v58  ;;  %2124 = vmatpush1.bf16.msra.mxu1 %v8221_v59  ;;  %v6585_v58 = vld [vmem:[#allocation12 + $0x4c] ss:$16 sps:$4 sm:$0xff]   ;;  %v6594_v59 = vld [vmem:[#allocation12 + $0x48] ss:$16 sps:$4 sm:$0xff]  }
 0x231   :  { %2084 = vmatprep.subr.bf16.mxu0 %v8222_v62  ;;  %2125 = vmatprep.subr.bf16.mxu1 %v8223_v63  ;;  %v6596_v62 = vld [vmem:[#allocation12 + $0x64] ss:$16 sps:$4 sm:$0xff]   ;;  %v6599_v63 = vld [vmem:[#allocation12 + $0x6c] ss:$16 sps:$4 sm:$0xff]  }
 0x232   :  { %2114 = vmatprep.mubr.bf16.mxu0 %v8115_v57  ;;  %2155 = vmatprep.mubr.bf16.mxu1 %v8115_v57 }
 0x234   :  { %2085 = vmatpush1.bf16.msra.mxu0 %v8224_v3  ;;  %2126 = vmatpush1.bf16.msra.mxu1 %v8225_v14  ;;  %v6602_v3 = vld [vmem:[#allocation12 + $0x60] ss:$16 sps:$4 sm:$0xff]   ;;  %v6606_v14 = vld [vmem:[#allocation12 + $0x68] ss:$16 sps:$4 sm:$0xff]  }
 0x235   :  { %2086 = vmatprep.subr.bf16.mxu0 %v8226_v7  ;;  %2127 = vmatprep.subr.bf16.mxu1 %v8227_v31  ;;  %v6608_v7 = vld [vmem:[#allocation12 + $0x84] ss:$16 sps:$4 sm:$0xff]   ;;  %v6611_v31 = vld [vmem:[#allocation12 + $0x8c] ss:$16 sps:$4 sm:$0xff]  }
 0x236   :  { %8242 = vst [vmem:[#allocation29_spill] sm:$0xff] %v6611_v31 }
 0x238   :  { %2087 = vmatpush1.bf16.msra.mxu0 %v8228_v41  ;;  %2128 = vmatpush1.bf16.msra.mxu1 %v8229_v48  ;;  %v6614_v41 = vld [vmem:[#allocation12 + $0x80] ss:$16 sps:$4 sm:$0xff]   ;;  %v6618_v48 = vld [vmem:[#allocation12 + $0x88] ss:$16 sps:$4 sm:$0xff]  }
 0x239   :  { %2088 = vmatprep.subr.bf16.mxu0 %v8230_v53  ;;  %2129 = vmatprep.subr.bf16.mxu1 %v8231_v46  ;;  %8243 = vst [vmem:[#allocation30_spill] sm:$0xff] %v6614_v41  ;;  %8244 = vst [vmem:[#allocation31_spill] sm:$0xff] %v6618_v48  ;;  %v6620_v53 = vld [vmem:[#allocation12 + $0xa4] ss:$16 sps:$4 sm:$0xff]   ;;  %v6623_v46 = vld [vmem:[#allocation12 + $0xac] ss:$16 sps:$4 sm:$0xff]  }
 0x23a   :  { %8245 = vst [vmem:[#allocation32_spill] sm:$0xff] %v6620_v53  ;;  %8246 = vst [vmem:[#allocation33_spill] sm:$0xff] %v6623_v46 }
 0x23c   :  { %2089 = vmatpush1.bf16.msra.mxu0 %v8232_v52  ;;  %2130 = vmatpush1.bf16.msra.mxu1 %v8233_v47  ;;  %v6626_v52 = vld [vmem:[#allocation12 + $0xa0] ss:$16 sps:$4 sm:$0xff]   ;;  %v6630_v47 = vld [vmem:[#allocation12 + $0xa8] ss:$16 sps:$4 sm:$0xff]  }
 0x23d   :  { %2090 = vmatprep.subr.bf16.mxu0 %v8234_v23  ;;  %2131 = vmatprep.subr.bf16.mxu1 %v8150_v45  ;;  %v6632_v23 = vld [vmem:[#allocation12 + $0xc4] ss:$16 sps:$4 sm:$0xff]  }
 0x240   :  { %2091 = vmatpush1.bf16.msra.mxu0 %v8235_v40  ;;  %2132 = vmatpush1.bf16.msra.mxu1 %v8236_v5  ;;  %v6635_v5 = vld [vmem:[#allocation12 + $0xcc] ss:$16 sps:$4 sm:$0xff]  }
 0x241   :  { %2092 = vmatprep.subr.bf16.mxu0 %v8237_v18  ;;  %2133 = vmatprep.subr.bf16.mxu1 %v8238_v26 }
 0x242   :  { %v1395_v39 = vpop.f32.mrb[32].mxu0  ;;  %v1436_v10 = vpop.f32.mrb[32].mxu1 }
 0x243   :  { %v1396_v9 = vadd.f32 %v1395_v39, %v8239_v4  ;;  %v1397_v11 = vpop.f32.mrb[33].mxu0  ;;  %v1437_v15 = vadd.f32 %v1436_v10, %v6126_v1  ;;  %v1438_v20 = vpop.f32.mrb[33].mxu1 }
 0x244   :  { %v1398_v19 = vadd.f32 %v1397_v11, %v6129_v60  ;;  %v1399_v21 = vpop.f32.mrb[34].mxu0  ;;  %2093 = vmatpush1.bf16.msra.mxu0 %v5881_v55  ;;  %v1439_v45 = vadd.f32 %v1438_v20, %v6133_v16  ;;  %v1440_v22 = vpop.f32.mrb[34].mxu1  ;;  %2134 = vmatpush1.bf16.msra.mxu1 %v5885_v56  ;;  %v6547_v56 = vld [vmem:[#allocation12 + $0x4] ss:$16 sps:$4 sm:$0xff]  }
 0x245   :  { %v1400_v27 = vpop.f32.mrb[35].mxu0  ;;  %2094 = vmatprep.subr.bf16.mxu0 %v5887_v61  ;;  %v1441_v29 = vpop.f32.mrb[35].mxu1  ;;  %2135 = vmatprep.subr.bf16.mxu1 %v5890_v2  ;;  %v6550_v61 = vld [vmem:[#allocation12 + $0xc] ss:$16 sps:$4 sm:$0xff]   ;;  %v6646_v22 = vld [vmem:[#allocation12 + $0xc8] ss:$16 sps:$4 sm:$0xff]  }
 0x246   :  { %v1533_v28 = vcombine.low %v1396_v9, %v1398_v19  ;;  %v1534_v30 = vcombine.low %v1437_v15, %v1439_v45  ;;  %v6641_v19 = vld [vmem:[#allocation12 + $0xc0] ss:$16 sps:$4 sm:$0xff]   ;;  %v6648_v27 = vld [vmem:[#allocation12 + $0xe4] ss:$16 sps:$4 sm:$0xff]  }
 0x248   :  { %v6539_v35 = vrot.slane %v1533_v28, %v6141_v42  ;;  %2095 = vmatpush1.bf16.msra.mxu0 %v5893_v24  ;;  %v6543_v55 = vrot.slane %v1534_v30, %v6141_v42  ;;  %2136 = vmatpush1.bf16.msra.mxu1 %v5897_v25  ;;  %v6557_v24 = vld [vmem:[%s7887_s5] sm:$0x3]  ;;  %v6565_v25 = vld [vmem:[#allocation12 + $0x8] ss:$16 sps:$4 sm:$0xff]   ;;  %v6651_v30 = vld [vmem:[#allocation12 + $0xec] ss:$16 sps:$4 sm:$0xff]  }
 0x249   :  { %2096 = vmatprep.subr.bf16.mxu0 %v5899_v32  ;;  %2137 = vmatprep.subr.bf16.mxu1 %v5902_v33  ;;  %vm2868_vm0 = vcmp.gt.s32.totalorder %v6557_v24, 0  ;;  %v6567_v32 = vld [vmem:[#allocation12 + $0x24] ss:$16 sps:$4 sm:$0xff]   ;;  %vm2869_vm1 = vcmp.gt.s32.totalorder %v6557_v24, 7  ;;  %vm3455_vm2 = vcmp.gt.s32.totalorder %v6557_v24, 2  ;;  %vm3749_vm3 = vcmp.gt.s32.totalorder %v6557_v24, 3 }
 0x24a   :  { %8240 = vst [vmem:[#allocation27_spill] sm:$0xff] %v6539_v35  ;;  %8241 = vst [vmem:[#allocation28_spill] sm:$0xff] %v6543_v55  ;;  %v2870_v33 = vsel %vm2868_vm0, 1, %v8115_v57  ;;  %v3751_v2 = vsel %vm3749_vm3, 1, %v8115_v57  ;;  %v6719_v55 = vld [vmem:[#allocation13 + $0x6c] ss:$16 sps:$4 sm:$0xff]  }
 0x24b   :  { %2872 = vperm.xlu0 %5076, %v2870_v33   ;;  %8264 = vst [vmem:[#allocation63_spill] sm:$0xff] %v6719_v55  ;;  %v6722_v35 = vld [vmem:[#allocation13 + $0x60] ss:$16 sps:$4 sm:$0xff]   ;;  %vm3161_vm4 = vcmp.gt.s32.totalorder %v6557_v24, 1  ;;  %vm3162_vm5 = vcmp.gt.s32.totalorder %v6557_v24, 6  ;;  %vm3456_vm6 = vcmp.gt.s32.totalorder %v6557_v24, 5 }
 0x24c   :  { %2097 = vmatpush1.bf16.msra.mxu0 %v5905_v49  ;;  %2138 = vmatpush1.bf16.msra.mxu1 %v5909_v0  ;;  %v6576_v49 = vld [vmem:[#allocation12 + $0x20] ss:$16 sps:$4 sm:$0xff]   ;;  %v6580_v0 = vld [vmem:[#allocation12 + $0x28] ss:$16 sps:$4 sm:$0xff]   ;;  %8265 = vst [vmem:[#allocation64_spill] sm:$0xff] %v6722_v35  ;;  %vm3750_vm7 = vcmp.gt.s32.totalorder %v6557_v24, 4 }
 0x24d   :  { %2446 = vmatprep.subr.bf16.mxu0 %v6547_v56  ;;  %2487 = vmatprep.subr.bf16.mxu1 %v6550_v61  ;;  %s5616_s5 = smov [#allocation15]  }
 0x24e   :  { %s4904_s29 = sshll.u32 %s5616_s5, 4  ;;  %s4905_s29 = int_to_ptr.vmem [resolvable:$true] %s4904_s29 }
 0x24f   :  { %2115 = vmatmul.mubr.bf16.vlgmr.msra.gmra.mrb[60].mxu0 %v6501_v43  ;;  %2156 = vmatmul.mubr.bf16.vlgmr.msra.gmra.mrb[60].mxu1 %v6501_v43  ;;  %v6590_v43 = vld [vmem:[#allocation12 + $0x40] ss:$16 sps:$4 sm:$0xff]   ;;  %s5550_s30 = scalar_lea.vmem %s4905_s29, 512  ;;  %p5555_p5 = scmp.lt.s32.totalorder %s4905_s29, %s4905_s29 }
 0x250   :  { %2447 = vmatpush1.bf16.msra.mxu0 %v6560_v44  ;;  %2488 = vmatpush1.bf16.msra.mxu1 %v6565_v25  ;;  %p5551_p4 = scmp.ne.s32.totalorder %s4905_s29, %s5550_s30  ;;  %p5556_p6 = scmp.lt.s32.totalorder %s5550_s30, %s5550_s30 }
 0x251   :  { %2448 = vmatprep.subr.bf16.mxu0 %v6567_v32  ;;  %2489 = vmatprep.subr.bf16.mxu1 %v6571_v51 }
 0x252   :  { %2478 = vmatprep.mubr.bf16.mxu0 %v8115_v57  ;;  %2519 = vmatprep.mubr.bf16.mxu1 %v8115_v57  ;;  %p5557_p7 = por %p5556_p6, %p5555_p5 }
 0x254   :  { %2449 = vmatpush1.bf16.msra.mxu0 %v6576_v49  ;;  %2490 = vmatpush1.bf16.msra.mxu1 %v6580_v0  ;;  %p5558_p8 = pnand %p5557_p7, %p5551_p4 }
 0x255   :  { %2450 = vmatprep.subr.bf16.mxu0 %v6582_v54  ;;  %2491 = vmatprep.subr.bf16.mxu1 %v6585_v58 }
 0x258   :  { %2451 = vmatpush1.bf16.msra.mxu0 %v6590_v43  ;;  %2492 = vmatpush1.bf16.msra.mxu1 %v6594_v59 }
 0x259   :  { %2452 = vmatprep.subr.bf16.mxu0 %v6596_v62  ;;  %2493 = vmatprep.subr.bf16.mxu1 %v6599_v63 }
 0x25c   :  { %2453 = vmatpush1.bf16.msra.mxu0 %v6602_v3  ;;  %2494 = vmatpush1.bf16.msra.mxu1 %v6606_v14 }
 0x25d   :  { %2454 = vmatprep.subr.bf16.mxu0 %v6608_v7  ;;  %2495 = vmatprep.subr.bf16.mxu1 %v6611_v31 }
 0x260   :  { %2455 = vmatpush1.bf16.msra.mxu0 %v6614_v41  ;;  %2496 = vmatpush1.bf16.msra.mxu1 %v6618_v48 }
 0x261   :  { %2456 = vmatprep.subr.bf16.mxu0 %v6620_v53  ;;  %2497 = vmatprep.subr.bf16.mxu1 %v6623_v46 }
 0x262   :  { %v1477_v40 = vpop.f32.mrb[36].mxu0  ;;  %v1518_v39 = vpop.f32.mrb[36].mxu1 }
 0x263   :  { %v1478_v18 = vadd.f32 %v1477_v40, %v8214_v6  ;;  %v1479_v26 = vpop.f32.mrb[37].mxu0  ;;  %v1519_v9 = vadd.f32 %v1518_v39, %v6193_v34  ;;  %v1520_v11 = vpop.f32.mrb[37].mxu1  ;;  %v6658_v39 = vld [vmem:[#allocation12 + $0xe0] ss:$16 sps:$4 sm:$0xff]  }
 0x264   :  { %v1480_v10 = vadd.f32 %v1479_v26, %v6196_v17  ;;  %v1481_v15 = vpop.f32.mrb[38].mxu0  ;;  %2457 = vmatpush1.bf16.msra.mxu0 %v6626_v52  ;;  %v1521_v20 = vadd.f32 %v1520_v11, %v6200_v50  ;;  %v1522_v21 = vpop.f32.mrb[38].mxu1  ;;  %2498 = vmatpush1.bf16.msra.mxu1 %v6630_v47  ;;  %8248 = vst [vmem:[#allocation35_spill] sm:$0xff] %v6658_v39  ;;  %v6660_v26 = vld [vmem:[#allocation3] sm:$0x3]  ;;  %v2879_v11 = vsel %vm2869_vm1, 1, %v8115_v57 }
 0x265   :  { %v1482_v45 = vpop.f32.mrb[39].mxu0  ;;  %2458 = vmatprep.subr.bf16.mxu0 %v6632_v23  ;;  %v1523_v29 = vpop.f32.mrb[39].mxu1  ;;  %2499 = vmatprep.subr.bf16.mxu1 %v6635_v5  ;;  %v6673_v15 = vld [vmem:[#allocation13 + $0xc] ss:$16 sps:$4 sm:$0xff]   ;;  %v2285_v21 = vpack.c.bf16 %v6660_v26, %v6660_v26 }
 0x266   :  { %v1550_v28 = vcombine.low %v1478_v18, %v1480_v10  ;;  %v1551_v33 = vcombine.low %v1519_v9, %v1521_v20  ;;  %v6668_v9 = vld [vmem:[#allocation12 + $0xe8] ss:$16 sps:$4 sm:$0xff]   ;;  %v6670_v10 = vld [vmem:[#allocation13 + $0x4] ss:$16 sps:$4 sm:$0xff]   ;;  %8252 = vst [vmem:[#allocation39_spill] sm:$0xff] %v6673_v15  ;;  %2881 = vperm.xlu0 %5076, %v2879_v11  }
 0x267   :  { %8250 = vst [vmem:[#allocation37_spill] sm:$0xff] %v6668_v9  ;;  %8251 = vst [vmem:[#allocation38_spill] sm:$0xff] %v6670_v10  ;;  %v6681_v45 = vld [vmem:[#allocation13] ss:$16 sps:$4 sm:$0xff]   ;;  %v6686_v29 = vld [vmem:[#allocation13 + $0x8] ss:$16 sps:$4 sm:$0xff]  }
 0x268   :  { %v6655_v40 = vrot.slane %v1550_v28, %v6141_v42  ;;  %2459 = vmatpush1.bf16.msra.mxu0 %v6641_v19  ;;  %v6664_v18 = vrot.slane %v1551_v33, %v6141_v42  ;;  %2500 = vmatpush1.bf16.msra.mxu1 %v6646_v22  ;;  %8253 = vst [vmem:[#allocation40_spill] sm:$0xff] %v6681_v45  ;;  %v3457_v28 = vsel %vm3455_vm2, 1, %v8115_v57  ;;  %8254 = vst [vmem:[#allocation41_spill] sm:$0xff] %v6686_v29  ;;  %v6688_v33 = vld [vmem:[#allocation13 + $0x24] ss:$16 sps:$4 sm:$0xff]  }
 0x269   :  { %2460 = vmatprep.subr.bf16.mxu0 %v6648_v27  ;;  %2501 = vmatprep.subr.bf16.mxu1 %v6651_v30  ;;  %8255 = vst [vmem:[#allocation42_spill] sm:$0xff] %v6688_v33  ;;  %v6692_v11 = vld [vmem:[#allocation13 + $0x2c] ss:$16 sps:$4 sm:$0xff]   ;;  %v6700_v20 = vld [vmem:[#allocation13 + $0x28] ss:$16 sps:$4 sm:$0xff]  }
 0x26a   :  { %8247 = vst [vmem:[#allocation34_spill] sm:$0xff] %v6655_v40  ;;  %8249 = vst [vmem:[#allocation36_spill] sm:$0xff] %v6664_v18  ;;  %3459 = vperm.xlu0 %5076, %v3457_v28   ;;  %v6714_v28 = vld [vmem:[#allocation13 + $0x48] ss:$16 sps:$4 sm:$0xff]   ;;  %v6728_v18 = vld [vmem:[#allocation13 + $0x84] ss:$16 sps:$4 sm:$0xff]  }
 0x26b   :  { %8256 = vst [vmem:[#allocation43_spill] sm:$0xff] %v6692_v11  ;;  %8258 = vst [vmem:[#allocation46_spill] sm:$0xff] %v6700_v20  ;;  %v6731_v40 = vld [vmem:[#allocation13 + $0x8c] ss:$16 sps:$4 sm:$0xff]  }
 0x26c   :  { %2461 = vmatpush1.bf16.msra.mxu0 %v6658_v39  ;;  %2502 = vmatpush1.bf16.msra.mxu1 %v6668_v9  ;;  %8262 = vst [vmem:[#allocation50_spill] sm:$0xff] %v6714_v28  ;;  %8267 = vst [vmem:[#allocation66_spill] sm:$0xff] %v6728_v18 }
 0x26d   :  { %2713 = vmatprep.subr.bf16.mxu0 %v6670_v10  ;;  %2754 = vmatprep.subr.bf16.mxu1 %v6673_v15  ;;  %8268 = vst [vmem:[#allocation67_spill] sm:$0xff] %v6731_v40 }
 0x26e   :  { %3753 = vperm.xlu0 %5076, %v3751_v2   ;;  %v6726_v2 = vld [vmem:[#allocation13 + $0x68] ss:$16 sps:$4 sm:$0xff]  }
 0x26f   :  { %2479 = vmatmul.mubr.bf16.vlgmr.msra.gmra.mrb[64].mxu0 %v2285_v21  ;;  %2520 = vmatmul.mubr.bf16.vlgmr.msra.gmra.mrb[64].mxu1 %v2285_v21  ;;  %v6710_v21 = vld [vmem:[#allocation13 + $0x40] ss:$16 sps:$4 sm:$0xff]   ;;  %8266 = vst [vmem:[#allocation65_spill] sm:$0xff] %v6726_v2 }
 0x270   :  { %2714 = vmatpush1.bf16.msra.mxu0 %v6681_v45  ;;  %2755 = vmatpush1.bf16.msra.mxu1 %v6686_v29  ;;  %8261 = vst [vmem:[#allocation49_spill] sm:$0xff] %v6710_v21  ;;  %v6768_v29 = vld [vmem:[#allocation13 + $0xe4] ss:$16 sps:$4 sm:$0xff]  }
 0x271   :  { %2715 = vmatprep.subr.bf16.mxu0 %v6688_v33  ;;  %2756 = vmatprep.subr.bf16.mxu1 %v6692_v11 }
 0x272   :  { %2745 = vmatprep.mubr.bf16.mxu0 %v8115_v57  ;;  %2786 = vmatprep.mubr.bf16.mxu1 %v8115_v57 }
 0x274   :  { %2716 = vmatpush1.bf16.msra.mxu0 %v6695_v38  ;;  %2757 = vmatpush1.bf16.msra.mxu1 %v6700_v20 }
 0x275   :  { %2717 = vmatprep.subr.bf16.mxu0 %v6702_v13  ;;  %2758 = vmatprep.subr.bf16.mxu1 %v6705_v37 }
 0x278   :  { %2718 = vmatpush1.bf16.msra.mxu0 %v6710_v21  ;;  %2759 = vmatpush1.bf16.msra.mxu1 %v6714_v28  ;;  %v6740_v28 = vld [vmem:[#allocation13 + $0xa4] ss:$16 sps:$4 sm:$0xff]   ;;  %v6755_v21 = vld [vmem:[#allocation13 + $0xcc] ss:$16 sps:$4 sm:$0xff]  }
 0x279   :  { %2719 = vmatprep.subr.bf16.mxu0 %v6716_v36  ;;  %2760 = vmatprep.subr.bf16.mxu1 %v6719_v55  ;;  %8271 = vst [vmem:[#allocation70_spill] sm:$0xff] %v6740_v28  ;;  %v6743_v36 = vld [vmem:[#allocation13 + $0xac] ss:$16 sps:$4 sm:$0xff]   ;;  %v6746_v55 = vld [vmem:[#allocation13 + $0xa0] ss:$16 sps:$4 sm:$0xff]  }
 0x27a   :  { %8272 = vst [vmem:[#allocation71_spill] sm:$0xff] %v6743_v36  ;;  %8273 = vst [vmem:[#allocation72_spill] sm:$0xff] %v6746_v55 }
 0x27c   :  { %2720 = vmatpush1.bf16.msra.mxu0 %v6722_v35  ;;  %2761 = vmatpush1.bf16.msra.mxu1 %v6726_v2  ;;  %v6750_v35 = vld [vmem:[#allocation13 + $0xa8] ss:$16 sps:$4 sm:$0xff]   ;;  %v6752_v2 = vld [vmem:[#allocation13 + $0xc4] ss:$16 sps:$4 sm:$0xff]  }
 0x27d   :  { %2721 = vmatprep.subr.bf16.mxu0 %v6728_v18  ;;  %2762 = vmatprep.subr.bf16.mxu1 %v6731_v40 }
 0x280   :  { %2722 = vmatpush1.bf16.msra.mxu0 %v6734_v12  ;;  %2763 = vmatpush1.bf16.msra.mxu1 %v6738_v8 }
 0x281   :  { %2723 = vmatprep.subr.bf16.mxu0 %v6740_v28  ;;  %2764 = vmatprep.subr.bf16.mxu1 %v6743_v36  ;;  %v6761_v28 = vld [vmem:[#allocation13 + $0xc0] ss:$16 sps:$4 sm:$0xff]  }
 0x282   :  { %v1608_v18 = vpop.f32.mrb[40].mxu0  ;;  %v1649_v37 = vpop.f32.mrb[40].mxu1 }
 0x283   :  { %v1609_v40 = vadd.f32 %v1608_v18, %v8239_v4  ;;  %v1610_v13 = vpop.f32.mrb[41].mxu0  ;;  %v1650_v12 = vadd.f32 %v1649_v37, %v6126_v1  ;;  %v1651_v8 = vpop.f32.mrb[41].mxu1  ;;  %v6766_v18 = vld [vmem:[#allocation13 + $0xc8] ss:$16 sps:$4 sm:$0xff]  }
 0x284   :  { %v1611_v20 = vadd.f32 %v1610_v13, %v6129_v60  ;;  %v1612_v38 = vpop.f32.mrb[42].mxu0  ;;  %2724 = vmatpush1.bf16.msra.mxu0 %v6746_v55  ;;  %v1652_v11 = vadd.f32 %v1651_v8, %v6133_v16  ;;  %v1653_v33 = vpop.f32.mrb[42].mxu1  ;;  %2765 = vmatpush1.bf16.msra.mxu1 %v6750_v35  ;;  %v6777_v8 = vld [vmem:[#allocation13 + $0xe0] ss:$16 sps:$4 sm:$0xff]  }
 0x285   :  { %v1613_v36 = vpop.f32.mrb[43].mxu0  ;;  %2725 = vmatprep.subr.bf16.mxu0 %v6752_v2  ;;  %v1654_v13 = vpop.f32.mrb[43].mxu1  ;;  %2766 = vmatprep.subr.bf16.mxu1 %v6755_v21  ;;  %v6771_v38 = vld [vmem:[#allocation13 + $0xec] ss:$16 sps:$4 sm:$0xff]  }
 0x286   :  { %v1746_v37 = vcombine.low %v1609_v40, %v1611_v20  ;;  %v1747_v55 = vcombine.low %v1650_v12, %v1652_v11  ;;  %v6779_v36 = vld [vmem:[#allocation5] sm:$0x3]  ;;  %v6786_v40 = vld [vmem:[#allocation13 + $0xe8] ss:$16 sps:$4 sm:$0xff]  }
 0x287   :  { %v2552_v20 = vpack.c.bf16 %v6779_v36, %v6779_v36 }
 0x288   :  { %v6774_v45 = vrot.slane %v1746_v37, %v6141_v42  ;;  %2726 = vmatpush1.bf16.msra.mxu0 %v6761_v28  ;;  %v6782_v33 = vrot.slane %v1747_v55, %v6141_v42  ;;  %2767 = vmatpush1.bf16.msra.mxu1 %v6766_v18 }
 0x289   :  { %2727 = vmatprep.subr.bf16.mxu0 %v6768_v29  ;;  %2768 = vmatprep.subr.bf16.mxu1 %v6771_v38 }
 0x28a   :  { %8274 = vst [vmem:[#allocation73_spill] sm:$0xff] %v6774_v45  ;;  %8275 = vst [vmem:[#allocation74_spill] sm:$0xff] %v6782_v33 }
 0x28c   :  { %2728 = vmatpush1.bf16.msra.mxu0 %v6777_v8  ;;  %2769 = vmatpush1.bf16.msra.mxu1 %v6786_v40 }
 0x28d   :  { %2899 = vmatprep.subr.bf16.mxu0 %v6547_v56  ;;  %2940 = vmatprep.subr.bf16.mxu1 %v6550_v61 }
 0x28f   :  { %2746 = vmatmul.mubr.bf16.vlgmr.msra.gmra.mrb[68].mxu0 %v2552_v20  ;;  %2787 = vmatmul.mubr.bf16.vlgmr.msra.gmra.mrb[68].mxu1 %v2552_v20 }
 0x290   :  { %2900 = vmatpush1.bf16.msra.mxu0 %v6560_v44  ;;  %2941 = vmatpush1.bf16.msra.mxu1 %v6565_v25 }
 0x291   :  { %2901 = vmatprep.subr.bf16.mxu0 %v6567_v32  ;;  %2942 = vmatprep.subr.bf16.mxu1 %v6571_v51 }
 0x292   :  { %2931 = vmatprep.mubr.bf16.mxu0 %v8115_v57  ;;  %2972 = vmatprep.mubr.bf16.mxu1 %v8115_v57 }
 0x294   :  { %2902 = vmatpush1.bf16.msra.mxu0 %v6576_v49  ;;  %2943 = vmatpush1.bf16.msra.mxu1 %v6580_v0 }
 0x295   :  { %2903 = vmatprep.subr.bf16.mxu0 %v6582_v54  ;;  %2944 = vmatprep.subr.bf16.mxu1 %v6585_v58 }
 0x298   :  { %2904 = vmatpush1.bf16.msra.mxu0 %v6590_v43  ;;  %2945 = vmatpush1.bf16.msra.mxu1 %v6594_v59 }
 0x299   :  { %2905 = vmatprep.subr.bf16.mxu0 %v6596_v62  ;;  %2946 = vmatprep.subr.bf16.mxu1 %v6599_v63 }
 0x29c   :  { %2906 = vmatpush1.bf16.msra.mxu0 %v6602_v3  ;;  %2947 = vmatpush1.bf16.msra.mxu1 %v6606_v14 }
 0x29d   :  { %2907 = vmatprep.subr.bf16.mxu0 %v6608_v7  ;;  %2948 = vmatprep.subr.bf16.mxu1 %v6611_v31 }
 0x2a0   :  { %2908 = vmatpush1.bf16.msra.mxu0 %v6614_v41  ;;  %2949 = vmatpush1.bf16.msra.mxu1 %v6618_v48 }
 0x2a1   :  { %2909 = vmatprep.subr.bf16.mxu0 %v6620_v53  ;;  %2950 = vmatprep.subr.bf16.mxu1 %v6623_v46 }
 0x2a2   :  { %v1690_v55 = vpop.f32.mrb[44].mxu0  ;;  %v1731_v37 = vpop.f32.mrb[44].mxu1 }
 0x2a3   :  { %v1691_v11 = vadd.f32 %v1690_v55, %v8214_v6  ;;  %v1692_v13 = vpop.f32.mrb[45].mxu0  ;;  %v1732_v20 = vadd.f32 %v1731_v37, %v6193_v34  ;;  %v1733_v33 = vpop.f32.mrb[45].mxu1 }
 0x2a4   :  { %v1693_v12 = vadd.f32 %v1692_v13, %v6196_v17  ;;  %v1694_v45 = vpop.f32.mrb[46].mxu0  ;;  %2910 = vmatpush1.bf16.msra.mxu0 %v6626_v52  ;;  %v1734_v41 = vadd.f32 %v1733_v33, %v6200_v50  ;;  %v1735_v48 = vpop.f32.mrb[46].mxu1  ;;  %2951 = vmatpush1.bf16.msra.mxu1 %v6630_v47 }
 0x2a5   :  { %v1695_v31 = vpop.f32.mrb[47].mxu0  ;;  %2911 = vmatprep.subr.bf16.mxu0 %v6632_v23  ;;  %v1736_v55 = vpop.f32.mrb[47].mxu1  ;;  %2952 = vmatprep.subr.bf16.mxu1 %v6635_v5 }
 0x2a6   :  { %v1763_v46 = vcombine.low %v1691_v11, %v1693_v12  ;;  %v1764_v53 = vcombine.low %v1732_v20, %v1734_v41 }
 0x2a8   :  { %v6828_v37 = vrot.slane %v1763_v46, %v6141_v42  ;;  %2912 = vmatpush1.bf16.msra.mxu0 %v6641_v19  ;;  %v6832_v45 = vrot.slane %v1764_v53, %v6141_v42  ;;  %2953 = vmatpush1.bf16.msra.mxu1 %v6646_v22 }
 0x2a9   :  { %2913 = vmatprep.subr.bf16.mxu0 %v6648_v27  ;;  %2954 = vmatprep.subr.bf16.mxu1 %v6651_v30 }
 0x2aa   :  { %8276 = vst [vmem:[#allocation75_spill] sm:$0xff] %v6828_v37  ;;  %8277 = vst [vmem:[#allocation76_spill] sm:$0xff] %v6832_v45 }
 0x2ac   :  { %2914 = vmatpush1.bf16.msra.mxu0 %v6658_v39  ;;  %2955 = vmatpush1.bf16.msra.mxu1 %v6668_v9 }
 0x2ad   :  { %3006 = vmatprep.subr.bf16.mxu0 %v6670_v10  ;;  %3047 = vmatprep.subr.bf16.mxu1 %v6673_v15 }
 0x2c2   :  { %v1821_v41 = vpop.f32.mrb[48].mxu0  ;;  %v1862_v53 = vpop.f32.mrb[48].mxu1 }
 0x2c3   :  { %v1822_v48 = vadd.f32 %v1821_v41, %v8239_v4  ;;  %v1823_v46 = vpop.f32.mrb[49].mxu0  ;;  %v1863_v33 = vadd.f32 %v1862_v53, %v6126_v1  ;;  %v1864_v11 = vpop.f32.mrb[49].mxu1 }
 0x2c4   :  { %v1824_v12 = vadd.f32 %v1823_v46, %v6129_v60  ;;  %v1825_v13 = vpop.f32.mrb[50].mxu0  ;;  %v1865_v20 = vadd.f32 %v1864_v11, %v6133_v16  ;;  %v1866_v55 = vpop.f32.mrb[50].mxu1 }
 0x2c5   :  { %v1826_v31 = vpop.f32.mrb[51].mxu0  ;;  %v1867_v37 = vpop.f32.mrb[51].mxu1 }
 0x2c6   :  { %v1959_v45 = vcombine.low %v1822_v48, %v1824_v12  ;;  %v1960_v10 = vcombine.low %v1863_v33, %v1865_v20 }
 0x2c8   :  { %v6848_v15 = vrot.slane %v1959_v45, %v6141_v42  ;;  %v6851_v41 = vrot.slane %v1960_v10, %v6141_v42 }
 0x2ca   :  { %8278 = vst [vmem:[#allocation77_spill] sm:$0xff] %v6848_v15  ;;  %8279 = vst [vmem:[#allocation78_spill] sm:$0xff] %v6851_v41 }
 0x2e2   :  { %v1903_v9 = vpop.f32.mrb[52].mxu0  ;;  %v1944_v13 = vpop.f32.mrb[52].mxu1 }
 0x2e3   :  { %v1904_v46 = vadd.f32 %v1903_v9, %v8214_v6  ;;  %v1905_v39 = vpop.f32.mrb[53].mxu0  ;;  %v1945_v11 = vadd.f32 %v1944_v13, %v6193_v34  ;;  %v1946_v37 = vpop.f32.mrb[53].mxu1 }
 0x2e4   :  { %v1906_v31 = vadd.f32 %v1905_v39, %v6196_v17  ;;  %v1907_v48 = vpop.f32.mrb[54].mxu0  ;;  %v1947_v45 = vadd.f32 %v1946_v37, %v6200_v50  ;;  %v1948_v33 = vpop.f32.mrb[54].mxu1 }
 0x2e5   :  { %v1908_v12 = vpop.f32.mrb[55].mxu0  ;;  %v1949_v20 = vpop.f32.mrb[55].mxu1 }
 0x2e6   :  { %v1976_v10 = vcombine.low %v1904_v46, %v1906_v31  ;;  %v1977_v55 = vcombine.low %v1945_v11, %v1947_v45 }
 0x2e8   :  { %v6860_v53 = vrot.slane %v1976_v10, %v6141_v42  ;;  %v6863_v9 = vrot.slane %v1977_v55, %v6141_v42 }
 0x302   :  { %v2034_v41 = vpop.f32.mrb[56].mxu0  ;;  %v2075_v48 = vpop.f32.mrb[56].mxu1 }
 0x303   :  { %v2035_v39 = vadd.f32 %v2034_v41, %v8239_v4  ;;  %v2036_v15 = vpop.f32.mrb[57].mxu0  ;;  %v2076_v37 = vadd.f32 %v2075_v48, %v6126_v1  ;;  %v2077_v31 = vpop.f32.mrb[57].mxu1 }
 0x304   :  { %v2037_v46 = vadd.f32 %v2036_v15, %v6129_v60  ;;  %v2038_v11 = vpop.f32.mrb[58].mxu0  ;;  %v2078_v45 = vadd.f32 %v2077_v31, %v6133_v16  ;;  %v2079_v33 = vpop.f32.mrb[58].mxu1  ;;  %v3163_v60 = vsel %vm3161_vm4, 1, %v8115_v57  ;;  %v3172_v16 = vsel %vm3162_vm5, 1, %v8115_v57 }
 0x305   :  { %v2039_v12 = vpop.f32.mrb[59].mxu0  ;;  %v2080_v20 = vpop.f32.mrb[59].mxu1  ;;  %3165 = vperm.xlu1 %5077, %v3163_v60   ;;  %v3760_v60 = vsel %vm3750_vm7, 1, %v8115_v57 }
 0x306   :  { %v2172_v10 = vcombine.low %v2035_v39, %v2037_v46  ;;  %v2173_v55 = vcombine.low %v2076_v37, %v2078_v45  ;;  %v3466_v37 = vsel %vm3456_vm6, 1, %v8115_v57 }
 0x308   :  { %v6872_v13 = vrot.slane %v2172_v10, %v6141_v42  ;;  %v6875_v4 = vrot.slane %v2173_v55, %v6141_v42 }
 0x309   :  { %3174 = vperm.xlu1 %5077, %v3172_v16  }
 0x30a   :  { %8280 = vst [vmem:[#allocation79_spill] sm:$0xff] %v6872_v13  ;;  %8281 = vst [vmem:[#allocation80_spill] sm:$0xff] %v6875_v4 }
 0x30d   :  { %3468 = vperm.xlu1 %5077, %v3466_v37  }
 0x311   :  { %3762 = vperm.xlu1 %5077, %v3760_v60  }
 0x322   :  { %v2116_v15 = vpop.f32.mrb[60].mxu0  ;;  %v2157_v39 = vpop.f32.mrb[60].mxu1 }
 0x323   :  { %v2117_v41 = vadd.f32 %v2116_v15, %v8214_v6  ;;  %v2118_v48 = vpop.f32.mrb[61].mxu0  ;;  %v2158_v46 = vadd.f32 %v2157_v39, %v6193_v34  ;;  %v2159_v11 = vpop.f32.mrb[61].mxu1 }
 0x324   :  { %v2119_v31 = vadd.f32 %v2118_v48, %v6196_v17  ;;  %v2120_v45 = vpop.f32.mrb[62].mxu0  ;;  %v2160_v33 = vadd.f32 %v2159_v11, %v6200_v50  ;;  %v2161_v12 = vpop.f32.mrb[62].mxu1 }
 0x325   :  { %v2121_v10 = vpop.f32.mrb[63].mxu0  ;;  %v2162_v55 = vpop.f32.mrb[63].mxu1 }
 0x326   :  { %v2189_v20 = vcombine.low %v2117_v41, %v2119_v31  ;;  %v2190_v6 = vcombine.low %v2158_v46, %v2160_v33  ;;  %v8282_v10 = vld [vmem:[#allocation51_spill] sm:$0xff] }
 0x328   :  { %v2197_v16 = vrot.slane %v2189_v20, %v6141_v42  ;;  %v2204_v34 = vrot.slane %v2190_v6, %v6141_v42  ;;  %v8283_v20 = vld [vmem:[#allocation52_spill] sm:$0xff] }
 0x329   :  { %v8284_v55 = vcombine.low %v8282_v10, %v8283_v20 }
 0x32a   :  { %v2205_v17 = vcombine.low %v2197_v16, %v2204_v34 }
 0x342   :  { %v2480_v15 = vpop.f32.mrb[64].mxu0  ;;  %v2521_v39 = vpop.f32.mrb[64].mxu1 }
 0x343   :  { %v2482_v48 = vpop.f32.mrb[65].mxu0  ;;  %v2523_v45 = vpop.f32.mrb[65].mxu1 }
 0x344   :  { %v2532_v24 = vcombine.low %v2480_v15, %v2482_v48  ;;  %v2484_v50 = vpop.f32.mrb[66].mxu0  ;;  %v2533_v11 = vcombine.low %v2521_v39, %v2523_v45  ;;  %v2525_v12 = vpop.f32.mrb[66].mxu1 }
 0x345   :  { %v2485_v41 = vpop.f32.mrb[67].mxu0  ;;  %v2526_v46 = vpop.f32.mrb[67].mxu1 }
 0x346   :  { %v2540_v37 = vrot.slane %v2532_v24, %v6141_v42  ;;  %v2547_v31 = vrot.slane %v2533_v11, %v6141_v42  ;;  %v2281_v41 = vld [vmem:[#allocation4] sm:$0x3] }
 0x348   :  { %v2548_v33 = vcombine.low %v2540_v37, %v2547_v31  ;;  %v6898_v37 = vpop.permute.xlu0 %2872 }
 0x349   :  { %8285 = vst [vmem:[#allocation51_spill] sm:$0xff] %v6898_v37  ;;  %vm2874_vm8 = vcmp.eq.s32.totalorder %v6898_v37, 1  ;;  %v8305_v37 = vld [vmem:[#allocation70_spill] sm:$0xff] }
 0x34a   :  { %v2550_v6 = vadd.f32 %v2548_v33, %v8284_v55 }
 0x34c   :  { %v2818_v60 = vmul.f32 0.5, %v2550_v6  ;;  %v2823_v16 = vrot.slane %v2550_v6, 2  ;;  %v2829_v15 = vrot.slane %v2550_v6, 4  ;;  %v2832_v48 = vrot.slane %v2550_v6, 6 }
 0x34e   :  { %5174 = vtanh.f32 %v2818_v60  ;;  %v2825_v34 = vmul.f32 0.5, %v2823_v16  ;;  %v2834_v39 = vmul.f32 0.5, %v2832_v48 }
 0x350   :  { %5176 = vtanh.f32 %v2825_v34 }
 0x351   :  { %5178 = vtanh.f32 %v2829_v15 }
 0x352   :  { %5180 = vtanh.f32 %v2834_v39 }
 0x358   :  { %v5175_v45 = vpop.eup %5174 }
 0x359   :  { %v2820_v50 = vmul.f32 0.5, %v5175_v45 }
 0x35a   :  { %v5177_v24 = vpop.eup %5176 }
 0x35b   :  { %v2827_v12 = vmul.f32 0.5, %v5177_v24  ;;  %v2821_v11 = vadd.f32 0.5, %v2820_v50  ;;  %v5179_v31 = vpop.eup %5178 }
 0x35c   :  { %v5181_v24 = vpop.eup %5180 }
 0x35d   :  { %v2828_v46 = vadd.f32 0.5, %v2827_v12  ;;  %v2839_v10 = vmul.f32 %v5179_v31, %v2821_v11  ;;  %v2836_v31 = vmul.f32 0.5, %v5181_v24  ;;  %v8287_v24 = vld [vmem:[#allocation41_spill] sm:$0xff] }
 0x35f   :  { %v2838_v33 = vmul.f32 %v2828_v46, %v2281_v41  ;;  %v2837_v1 = vadd.f32 0.5, %v2836_v31 }
 0x361   :  { %v2840_v20 = vadd.f32 %v2839_v10, %v2838_v33 }
 0x362   :  { %v2747_v55 = vpop.f32.mrb[68].mxu0  ;;  %v2788_v6 = vpop.f32.mrb[68].mxu1 }
 0x363   :  { %v2749_v60 = vpop.f32.mrb[69].mxu0  ;;  %5182 = vtanh.f32 %v2840_v20  ;;  %v2875_v16 = vsel %vm2874_vm8, %v2840_v20, %v2281_v41  ;;  %v2790_v15 = vpop.f32.mrb[69].mxu1 }
 0x364   :  { %v2799_v34 = vcombine.low %v2747_v55, %v2749_v60  ;;  %v2751_v48 = vpop.f32.mrb[70].mxu0  ;;  %2876 = vst [vmem:[#allocation4] sm:$0x3] %v2875_v16  ;;  %v2800_v39 = vcombine.low %v2788_v6, %v2790_v15  ;;  %v2792_v45 = vpop.f32.mrb[70].mxu1 }
 0x365   :  { %v2752_v50 = vpop.f32.mrb[71].mxu0  ;;  %v2793_v11 = vpop.f32.mrb[71].mxu1  ;;  %v2283_v45 = vld [vmem:[#allocation6] sm:$0x3] }
 0x366   :  { %v2807_v12 = vrot.slane %v2799_v34, %v6141_v42  ;;  %v2814_v46 = vrot.slane %v2800_v39, %v6141_v42  ;;  %v8286_v50 = vld [vmem:[#allocation40_spill] sm:$0xff]  ;;  %v8288_v11 = vld [vmem:[#allocation42_spill] sm:$0xff] }
 0x368   :  { %v2815_v33 = vcombine.low %v2807_v12, %v2814_v46  ;;  %v8289_v46 = vld [vmem:[#allocation43_spill] sm:$0xff] }
 0x36a   :  { %v2817_v10 = vadd.f32 %v2815_v33, %v2205_v17 }
 0x36c   :  { %v2843_v4 = vmul.f32 0.5, %v2817_v10  ;;  %v2848_v13 = vrot.slane %v2817_v10, 2  ;;  %v2854_v16 = vrot.slane %v2817_v10, 4  ;;  %v2857_v34 = vrot.slane %v2817_v10, 6 }
 0x36d   :  { %v5183_v41 = vpop.eup %5182 }
 0x36e   :  { %v2842_v20 = vmul.f32 %v5183_v41, %v2837_v1  ;;  %5184 = vtanh.f32 %v2843_v4  ;;  %v2850_v55 = vmul.f32 0.5, %v2848_v13  ;;  %v2859_v17 = vmul.f32 0.5, %v2857_v34  ;;  %v8290_v41 = vld [vmem:[#allocation44_spill] sm:$0xff] }
 0x370   :  { %v2877_v6 = vsel %vm2874_vm8, %v2842_v20, %v6660_v26  ;;  %v2888_v60 = vsel %vm2874_vm8, %v2842_v20, 0.0  ;;  %5186 = vtanh.f32 %v2850_v55  ;;  %v8291_v20 = vld [vmem:[#allocation46_spill] sm:$0xff]  ;;  %v6922_v55 = vpop.permute.xlu0 %2881 }
 0x371   :  { %2878 = vst [vmem:[#allocation3] sm:$0x3] %v2877_v6  ;;  %2889 = vst [vmem:[#allocation15] sm:$0x3] %v2888_v60  ;;  %5188 = vtanh.f32 %v2854_v16  ;;  %v8293_v60 = vld [vmem:[#allocation47_spill] sm:$0xff]  ;;  %v8294_v16 = vld [vmem:[#allocation48_spill] sm:$0xff] }
 0x372   :  { %5190 = vtanh.f32 %v2859_v17  ;;  %8292 = vst [vmem:[#allocation52_spill] sm:$0xff] %v6922_v55  ;;  %vm2883_vm9 = vcmp.eq.s32.totalorder %v6922_v55, 1  ;;  %v8295_v17 = vld [vmem:[#allocation49_spill] sm:$0xff] }
 0x373   :  { %v7255_v55 = vld [vmem:[#allocation13 + $0xa4] ss:$16 sps:$4 sm:$0xff]  }
 0x378   :  { %v5185_v15 = vpop.eup %5184  ;;  %v6910_v48 = vld [vmem:[#allocation3] sm:$0x3] }
 0x379   :  { %v2845_v1 = vmul.f32 0.5, %v5185_v15  ;;  %v2898_v13 = vpack.c.bf16 %v6910_v48, %v6910_v48  ;;  %v8296_v15 = vld [vmem:[#allocation50_spill] sm:$0xff] }
 0x37a   :  { %v5187_v4 = vpop.eup %5186 }
 0x37b   :  { %v2852_v39 = vmul.f32 0.5, %v5187_v4  ;;  %v2846_v26 = vadd.f32 0.5, %v2845_v1  ;;  %2932 = vmatmul.mubr.bf16.vlgmr.msra.gmra.mrb[72].mxu0 %v2898_v13  ;;  %2973 = vmatmul.mubr.bf16.vlgmr.msra.gmra.mrb[72].mxu1 %v2898_v13  ;;  %v5189_v31 = vpop.eup %5188  ;;  %v8297_v13 = vld [vmem:[#allocation62_spill] sm:$0xff]  ;;  %v8298_v4 = vld [vmem:[#allocation63_spill] sm:$0xff] }
 0x37c   :  { %3007 = vmatpush1.bf16.msra.mxu0 %v8286_v50  ;;  %3048 = vmatpush1.bf16.msra.mxu1 %v8287_v24  ;;  %v5191_v1 = vpop.eup %5190 }
 0x37d   :  { %v2853_v12 = vadd.f32 0.5, %v2852_v39  ;;  %3008 = vmatprep.subr.bf16.mxu0 %v8288_v11  ;;  %3049 = vmatprep.subr.bf16.mxu1 %v8289_v46  ;;  %v2864_v10 = vmul.f32 %v5189_v31, %v2846_v26  ;;  %v2861_v39 = vmul.f32 0.5, %v5191_v1  ;;  %v8299_v26 = vld [vmem:[#allocation64_spill] sm:$0xff]  ;;  %v8301_v31 = vld [vmem:[#allocation66_spill] sm:$0xff] }
 0x37e   :  { %3038 = vmatprep.mubr.bf16.mxu0 %v8115_v57  ;;  %3079 = vmatprep.mubr.bf16.mxu1 %v8115_v57 }
 0x37f   :  { %v2863_v33 = vmul.f32 %v2853_v12, %v2283_v45  ;;  %v8300_v12 = vld [vmem:[#allocation65_spill] sm:$0xff] }
 0x380   :  { %3009 = vmatpush1.bf16.msra.mxu0 %v8290_v41  ;;  %3050 = vmatpush1.bf16.msra.mxu1 %v8291_v20 }
 0x381   :  { %v2865_v6 = vadd.f32 %v2864_v10, %v2863_v33  ;;  %3010 = vmatprep.subr.bf16.mxu0 %v8293_v60  ;;  %3051 = vmatprep.subr.bf16.mxu1 %v8294_v16  ;;  %v8302_v33 = vld [vmem:[#allocation67_spill] sm:$0xff]  ;;  %v8303_v10 = vld [vmem:[#allocation68_spill] sm:$0xff] }
 0x383   :  { %5192 = vtanh.f32 %v2865_v6  ;;  %v2884_v34 = vsel %vm2883_vm9, %v2865_v6, %v2283_v45  ;;  %v2862_v45 = vadd.f32 0.5, %v2861_v39  ;;  %v8304_v6 = vld [vmem:[#allocation69_spill] sm:$0xff] }
 0x384   :  { %2885 = vst [vmem:[#allocation6] sm:$0x3] %v2884_v34  ;;  %3011 = vmatpush1.bf16.msra.mxu0 %v8295_v17  ;;  %3052 = vmatpush1.bf16.msra.mxu1 %v8296_v15 }
 0x385   :  { %3012 = vmatprep.subr.bf16.mxu0 %v8297_v13  ;;  %3053 = vmatprep.subr.bf16.mxu1 %v8298_v4  ;;  %v8306_v13 = vld [vmem:[#allocation71_spill] sm:$0xff] }
 0x388   :  { %3013 = vmatpush1.bf16.msra.mxu0 %v8299_v26  ;;  %3054 = vmatpush1.bf16.msra.mxu1 %v8300_v12  ;;  %v8307_v12 = vld [vmem:[#allocation72_spill] sm:$0xff] }
 0x389   :  { %3014 = vmatprep.subr.bf16.mxu0 %v8301_v31  ;;  %3055 = vmatprep.subr.bf16.mxu1 %v8302_v33 }
 0x38c   :  { %3015 = vmatpush1.bf16.msra.mxu0 %v8303_v10  ;;  %3056 = vmatpush1.bf16.msra.mxu1 %v8304_v6 }
 0x38d   :  { %v5193_v34 = vpop.eup %5192  ;;  %3016 = vmatprep.subr.bf16.mxu0 %v8305_v37  ;;  %3057 = vmatprep.subr.bf16.mxu1 %v8306_v13 }
 0x38e   :  { %v2867_v4 = vmul.f32 %v5193_v34, %v2862_v45 }
 0x390   :  { %v2886_v1 = vsel %vm2883_vm9, %v2867_v4, %v6779_v36  ;;  %v2890_v31 = vsel %vm2883_vm9, %v2867_v4, 0.0  ;;  %3017 = vmatpush1.bf16.msra.mxu0 %v8307_v12  ;;  %3058 = vmatpush1.bf16.msra.mxu1 %v6750_v35 }
 0x391   :  { %2887 = vst [vmem:[#allocation5] sm:$0x3] %v2886_v1  ;;  %2892 = vst [vmem:[#allocation15 + $0x1e] sm:$0x3] %v2890_v31  ;;  %3018 = vmatprep.subr.bf16.mxu0 %v6752_v2  ;;  %3059 = vmatprep.subr.bf16.mxu1 %v6755_v21 }
 0x394   :  { %3019 = vmatpush1.bf16.msra.mxu0 %v6761_v28  ;;  %3060 = vmatpush1.bf16.msra.mxu1 %v6766_v18 }
 0x395   :  { %3020 = vmatprep.subr.bf16.mxu0 %v6768_v29  ;;  %3061 = vmatprep.subr.bf16.mxu1 %v6771_v38 }
 0x398   :  { %3021 = vmatpush1.bf16.msra.mxu0 %v6777_v8  ;;  %3062 = vmatpush1.bf16.msra.mxu1 %v6786_v40  ;;  %v6956_v36 = vld [vmem:[#allocation5] sm:$0x3] }
 0x399   :  { %v3005_v4 = vpack.c.bf16 %v6956_v36, %v6956_v36  ;;  %3193 = vmatprep.subr.bf16.mxu0 %v6547_v56  ;;  %3234 = vmatprep.subr.bf16.mxu1 %v6550_v61  ;;  %v8308_v56 = vld [vmem:[#allocation29_spill] sm:$0xff]  ;;  %v8309_v61 = vld [vmem:[#allocation30_spill] sm:$0xff] }
 0x39b   :  { %3039 = vmatmul.mubr.bf16.vlgmr.msra.gmra.mrb[76].mxu0 %v3005_v4  ;;  %3080 = vmatmul.mubr.bf16.vlgmr.msra.gmra.mrb[76].mxu1 %v3005_v4 }
 0x39c   :  { %3194 = vmatpush1.bf16.msra.mxu0 %v6560_v44  ;;  %3235 = vmatpush1.bf16.msra.mxu1 %v6565_v25  ;;  %v8310_v44 = vld [vmem:[#allocation31_spill] sm:$0xff]  ;;  %v8311_v25 = vld [vmem:[#allocation32_spill] sm:$0xff] }
 0x39d   :  { %3195 = vmatprep.subr.bf16.mxu0 %v6567_v32  ;;  %3236 = vmatprep.subr.bf16.mxu1 %v6571_v51  ;;  %v8312_v32 = vld [vmem:[#allocation33_spill] sm:$0xff]  ;;  %v8313_v51 = vld [vmem:[#allocation35_spill] sm:$0xff] }
 0x39e   :  { %3225 = vmatprep.mubr.bf16.mxu0 %v8115_v57  ;;  %3266 = vmatprep.mubr.bf16.mxu1 %v8115_v57 }
 0x3a0   :  { %3196 = vmatpush1.bf16.msra.mxu0 %v6576_v49  ;;  %3237 = vmatpush1.bf16.msra.mxu1 %v6580_v0  ;;  %v8314_v49 = vld [vmem:[#allocation37_spill] sm:$0xff]  ;;  %v8315_v0 = vld [vmem:[#allocation38_spill] sm:$0xff] }
 0x3a1   :  { %3197 = vmatprep.subr.bf16.mxu0 %v6582_v54  ;;  %3238 = vmatprep.subr.bf16.mxu1 %v6585_v58  ;;  %v8316_v54 = vld [vmem:[#allocation39_spill] sm:$0xff] }
 0x3a4   :  { %3198 = vmatpush1.bf16.msra.mxu0 %v6590_v43  ;;  %3239 = vmatpush1.bf16.msra.mxu1 %v6594_v59 }
 0x3a5   :  { %3199 = vmatprep.subr.bf16.mxu0 %v6596_v62  ;;  %3240 = vmatprep.subr.bf16.mxu1 %v6599_v63 }
 0x3a8   :  { %3200 = vmatpush1.bf16.msra.mxu0 %v6602_v3  ;;  %3241 = vmatpush1.bf16.msra.mxu1 %v6606_v14 }
 0x3a9   :  { %3201 = vmatprep.subr.bf16.mxu0 %v6608_v7  ;;  %3242 = vmatprep.subr.bf16.mxu1 %v8308_v56 }
 0x3ac   :  { %3202 = vmatpush1.bf16.msra.mxu0 %v8309_v61  ;;  %3243 = vmatpush1.bf16.msra.mxu1 %v8310_v44 }
 0x3ad   :  { %3203 = vmatprep.subr.bf16.mxu0 %v8311_v25  ;;  %3244 = vmatprep.subr.bf16.mxu1 %v8312_v32 }
 0x3b0   :  { %3204 = vmatpush1.bf16.msra.mxu0 %v6626_v52  ;;  %3245 = vmatpush1.bf16.msra.mxu1 %v6630_v47 }
 0x3b1   :  { %3205 = vmatprep.subr.bf16.mxu0 %v6632_v23  ;;  %3246 = vmatprep.subr.bf16.mxu1 %v6635_v5 }
 0x3b4   :  { %3206 = vmatpush1.bf16.msra.mxu0 %v6641_v19  ;;  %3247 = vmatpush1.bf16.msra.mxu1 %v6646_v22  ;;  %v8317_v22 = vld [vmem:[#allocation26_spill] sm:$0xff] }
 0x3b5   :  { %3207 = vmatprep.subr.bf16.mxu0 %v6648_v27  ;;  %3248 = vmatprep.subr.bf16.mxu1 %v6651_v30  ;;  %v8318_v27 = vld [vmem:[#allocation45_spill] sm:$0xff] }
 0x3b6   :  { %v8319_v30 = vcombine.low %v8317_v22, %v8318_v27 }
 0x3b8   :  { %3208 = vmatpush1.bf16.msra.mxu0 %v8313_v51  ;;  %3249 = vmatpush1.bf16.msra.mxu1 %v8314_v49  ;;  %v7001_v49 = vpop.permute.xlu1 %3165 }
 0x3b9   :  { %3300 = vmatprep.subr.bf16.mxu0 %v8315_v0  ;;  %3341 = vmatprep.subr.bf16.mxu1 %v8316_v54  ;;  %8320 = vst [vmem:[#allocation40_spill] sm:$0xff] %v7001_v49  ;;  %vm3167_vm10 = vcmp.eq.s32.totalorder %v7001_v49, 1  ;;  %v7258_v49 = vld [vmem:[#allocation13 + $0xac] ss:$16 sps:$4 sm:$0xff]  }
 0x44e   :  { %v2933_v58 = vpop.f32.mrb[72].mxu0  ;;  %v2974_v43 = vpop.f32.mrb[72].mxu1 }
 0x44f   :  { %v2935_v59 = vpop.f32.mrb[73].mxu0  ;;  %v2976_v62 = vpop.f32.mrb[73].mxu1 }
 0x450   :  { %v2985_v63 = vcombine.low %v2933_v58, %v2935_v59  ;;  %v2986_v3 = vcombine.low %v2974_v43, %v2976_v62  ;;  %v2937_v14 = vpop.f32.mrb[74].mxu0  ;;  %v2978_v7 = vpop.f32.mrb[74].mxu1  ;;  %v2894_v58 = vld [vmem:[#allocation4] sm:$0x3] }
 0x451   :  { %v2938_v52 = vpop.f32.mrb[75].mxu0  ;;  %v2979_v47 = vpop.f32.mrb[75].mxu1 }
 0x452   :  { %v2993_v23 = vrot.slane %v2985_v63, %v6141_v42  ;;  %v3000_v5 = vrot.slane %v2986_v3, %v6141_v42 }
 0x454   :  { %v3001_v19 = vcombine.low %v2993_v23, %v3000_v5 }
 0x456   :  { %v3003_v39 = vadd.f32 %v3001_v19, %v8319_v30 }
 0x458   :  { %v3111_v31 = vmul.f32 0.5, %v3003_v39  ;;  %v3116_v45 = vrot.slane %v3003_v39, 2  ;;  %v3122_v1 = vrot.slane %v3003_v39, 4  ;;  %v3125_v4 = vrot.slane %v3003_v39, 6 }
 0x45a   :  { %5194 = vtanh.f32 %v3111_v31  ;;  %v3118_v34 = vmul.f32 0.5, %v3116_v45  ;;  %v3127_v56 = vmul.f32 0.5, %v3125_v4 }
 0x45c   :  { %5196 = vtanh.f32 %v3118_v34 }
 0x45d   :  { %5198 = vtanh.f32 %v3122_v1  ;;  %v8321_v1 = vcombine.low %v6860_v53, %v6863_v9 }
 0x45e   :  { %5200 = vtanh.f32 %v3127_v56 }
 0x464   :  { %v5195_v61 = vpop.eup %5194 }
 0x465   :  { %v3113_v44 = vmul.f32 0.5, %v5195_v61 }
 0x466   :  { %v5197_v25 = vpop.eup %5196 }
 0x467   :  { %v3120_v32 = vmul.f32 0.5, %v5197_v25  ;;  %v3114_v51 = vadd.f32 0.5, %v3113_v44  ;;  %v5199_v54 = vpop.eup %5198 }
 0x468   :  { %v5201_v22 = vpop.eup %5200 }
 0x469   :  { %v3121_v0 = vadd.f32 0.5, %v3120_v32  ;;  %v3132_v59 = vmul.f32 %v5199_v54, %v3114_v51  ;;  %v3129_v45 = vmul.f32 0.5, %v5201_v22 }
 0x46b   :  { %v3131_v43 = vmul.f32 %v3121_v0, %v2894_v58  ;;  %v3130_v56 = vadd.f32 0.5, %v3129_v45  ;;  %v7119_v45 = vld [vmem:[#allocation12 + $0x8c] ss:$16 sps:$4 sm:$0xff]  }
 0x46c   :  { %8332 = vst [vmem:[#allocation48_spill] sm:$0xff] %v7119_v45 }
 0x46d   :  { %v3133_v62 = vadd.f32 %v3132_v59, %v3131_v43 }
 0x46e   :  { %v3040_v63 = vpop.f32.mrb[76].mxu0  ;;  %v3081_v3 = vpop.f32.mrb[76].mxu1 }
 0x46f   :  { %5202 = vtanh.f32 %v3133_v62  ;;  %v3168_v14 = vsel %vm3167_vm10, %v3133_v62, %v2894_v58  ;;  %v3042_v7 = vpop.f32.mrb[77].mxu0  ;;  %v3083_v52 = vpop.f32.mrb[77].mxu1 }
 0x470   :  { %3169 = vst [vmem:[#allocation4] sm:$0x3] %v3168_v14  ;;  %v3092_v47 = vcombine.low %v3040_v63, %v3042_v7  ;;  %v3093_v23 = vcombine.low %v3081_v3, %v3083_v52  ;;  %v3044_v5 = vpop.f32.mrb[78].mxu0  ;;  %v3085_v19 = vpop.f32.mrb[78].mxu1 }
 0x471   :  { %v3045_v27 = vpop.f32.mrb[79].mxu0  ;;  %v3086_v30 = vpop.f32.mrb[79].mxu1 }
 0x472   :  { %v3100_v39 = vrot.slane %v3092_v47, %v6141_v42  ;;  %v3107_v31 = vrot.slane %v3093_v23, %v6141_v42  ;;  %v2896_v47 = vld [vmem:[#allocation6] sm:$0x3]  ;;  %v7110_v30 = vld [vmem:[#allocation12 + $0x60] ss:$16 sps:$4 sm:$0xff]  }
 0x473   :  { %8329 = vst [vmem:[#allocation44_spill] sm:$0xff] %v7110_v30 }
 0x474   :  { %v3108_v34 = vcombine.low %v3100_v39, %v3107_v31  ;;  %v7113_v39 = vld [vmem:[#allocation12 + $0x68] ss:$16 sps:$4 sm:$0xff]   ;;  %v7116_v31 = vld [vmem:[#allocation12 + $0x84] ss:$16 sps:$4 sm:$0xff]  }
 0x475   :  { %8330 = vst [vmem:[#allocation46_spill] sm:$0xff] %v7113_v39  ;;  %8331 = vst [vmem:[#allocation47_spill] sm:$0xff] %v7116_v31 }
 0x476   :  { %v3110_v4 = vadd.f32 %v3108_v34, %v8321_v1  ;;  %v7122_v34 = vld [vmem:[#allocation12 + $0x80] ss:$16 sps:$4 sm:$0xff]   ;;  %v7125_v1 = vld [vmem:[#allocation12 + $0x88] ss:$16 sps:$4 sm:$0xff]  }
 0x477   :  { %8333 = vst [vmem:[#allocation49_spill] sm:$0xff] %v7122_v34  ;;  %8334 = vst [vmem:[#allocation50_spill] sm:$0xff] %v7125_v1 }
 0x478   :  { %v3136_v61 = vmul.f32 0.5, %v3110_v4  ;;  %v3141_v44 = vrot.slane %v3110_v4, 2  ;;  %v3147_v58 = vrot.slane %v3110_v4, 4  ;;  %v3150_v53 = vrot.slane %v3110_v4, 6  ;;  %v7128_v4 = vld [vmem:[#allocation12 + $0xa4] ss:$16 sps:$4 sm:$0xff]  }
 0x479   :  { %v5203_v25 = vpop.eup %5202  ;;  %8335 = vst [vmem:[#allocation64_spill] sm:$0xff] %v7128_v4 }
 0x47a   :  { %v3135_v32 = vmul.f32 %v5203_v25, %v3130_v56  ;;  %5204 = vtanh.f32 %v3136_v61  ;;  %v3143_v51 = vmul.f32 0.5, %v3141_v44  ;;  %v3152_v9 = vmul.f32 0.5, %v3150_v53  ;;  %v7131_v56 = vld [vmem:[#allocation12 + $0xac] ss:$16 sps:$4 sm:$0xff]   ;;  %v7134_v61 = vld [vmem:[#allocation12 + $0xa0] ss:$16 sps:$4 sm:$0xff]  }
 0x47b   :  { %8336 = vst [vmem:[#allocation67_spill] sm:$0xff] %v7131_v56  ;;  %8337 = vst [vmem:[#allocation68_spill] sm:$0xff] %v7134_v61  ;;  %v7137_v44 = vld [vmem:[#allocation12 + $0xa8] ss:$16 sps:$4 sm:$0xff]   ;;  %v7140_v25 = vld [vmem:[#allocation12 + $0xc4] ss:$16 sps:$4 sm:$0xff]  }
 0x47c   :  { %v3170_v0 = vsel %vm3167_vm10, %v3135_v32, %v6910_v48  ;;  %v3181_v54 = vsel %vm3167_vm10, %v3135_v32, 0.0  ;;  %5206 = vtanh.f32 %v3143_v51  ;;  %8338 = vst [vmem:[#allocation69_spill] sm:$0xff] %v7137_v44  ;;  %8339 = vst [vmem:[#allocation70_spill] sm:$0xff] %v7140_v25  ;;  %v7143_v32 = vld [vmem:[#allocation12 + $0xcc] ss:$16 sps:$4 sm:$0xff]  }
 0x47d   :  { %3171 = vst [vmem:[#allocation3] sm:$0x3] %v3170_v0  ;;  %3183 = vst [vmem:[#allocation15 + $0x4] sm:$0x3] %v3181_v54  ;;  %5208 = vtanh.f32 %v3147_v58  ;;  %v7146_v51 = vld [vmem:[#allocation12 + $0xc0] ss:$16 sps:$4 sm:$0xff]  }
 0x47e   :  { %5210 = vtanh.f32 %v3152_v9  ;;  %8340 = vst [vmem:[#allocation71_spill] sm:$0xff] %v7143_v32  ;;  %8341 = vst [vmem:[#allocation72_spill] sm:$0xff] %v7146_v51  ;;  %v7149_v0 = vld [vmem:[#allocation12 + $0xc8] ss:$16 sps:$4 sm:$0xff]   ;;  %v7152_v54 = vld [vmem:[#allocation12 + $0xe4] ss:$16 sps:$4 sm:$0xff]  }
 0x47f   :  { %8342 = vst [vmem:[#allocation29_spill] sm:$0xff] %v7149_v0  ;;  %8343 = vst [vmem:[#allocation30_spill] sm:$0xff] %v7152_v54  ;;  %v7155_v58 = vld [vmem:[#allocation12 + $0xec] ss:$16 sps:$4 sm:$0xff]   ;;  %v7158_v53 = vld [vmem:[#allocation12 + $0xe0] ss:$16 sps:$4 sm:$0xff]  }
 0x480   :  { %8344 = vst [vmem:[#allocation31_spill] sm:$0xff] %v7155_v58  ;;  %8345 = vst [vmem:[#allocation32_spill] sm:$0xff] %v7158_v53  ;;  %v7161_v9 = vld [vmem:[#allocation12 + $0xe8] ss:$16 sps:$4 sm:$0xff]  }
 0x481   :  { %8346 = vst [vmem:[#allocation33_spill] sm:$0xff] %v7161_v9 }
 0x484   :  { %v5205_v43 = vpop.eup %5204  ;;  %v7016_v59 = vld [vmem:[#allocation3] sm:$0x3] }
 0x485   :  { %v3138_v62 = vmul.f32 0.5, %v5205_v43  ;;  %v3192_v63 = vpack.c.bf16 %v7016_v59, %v7016_v59  ;;  %v7164_v43 = vld [vmem:[#allocation13 + $0x4] ss:$16 sps:$4 sm:$0xff]  }
 0x486   :  { %v5207_v3 = vpop.eup %5206  ;;  %8347 = vst [vmem:[#allocation35_spill] sm:$0xff] %v7164_v43 }
 0x487   :  { %v3145_v14 = vmul.f32 0.5, %v5207_v3  ;;  %v3139_v48 = vadd.f32 0.5, %v3138_v62  ;;  %3226 = vmatmul.mubr.bf16.vlgmr.msra.gmra.mrb[80].mxu0 %v3192_v63  ;;  %3267 = vmatmul.mubr.bf16.vlgmr.msra.gmra.mrb[80].mxu1 %v3192_v63  ;;  %v5209_v52 = vpop.eup %5208  ;;  %v7167_v62 = vld [vmem:[#allocation13 + $0xc] ss:$16 sps:$4 sm:$0xff]  }
 0x488   :  { %3301 = vmatpush1.bf16.msra.mxu0 %v8286_v50  ;;  %3342 = vmatpush1.bf16.msra.mxu1 %v8287_v24  ;;  %v7028_v50 = vpop.permute.xlu1 %3174  ;;  %8348 = vst [vmem:[#allocation37_spill] sm:$0xff] %v7167_v62 }
 0x489   :  { %v3146_v7 = vadd.f32 0.5, %v3145_v14  ;;  %3302 = vmatprep.subr.bf16.mxu0 %v8288_v11  ;;  %3343 = vmatprep.subr.bf16.mxu1 %v8289_v46  ;;  %v3157_v5 = vmul.f32 %v5209_v52, %v3139_v48  ;;  %8322 = vst [vmem:[#allocation41_spill] sm:$0xff] %v7028_v50  ;;  %vm3176_vm11 = vcmp.eq.s32.totalorder %v7028_v50, 1  ;;  %v5211_v46 = vpop.eup %5210 }
 0x48a   :  { %3332 = vmatprep.mubr.bf16.mxu0 %v8115_v57  ;;  %3373 = vmatprep.mubr.bf16.mxu1 %v8115_v57  ;;  %v3154_v19 = vmul.f32 0.5, %v5211_v46 }
 0x48b   :  { %v3156_v23 = vmul.f32 %v3146_v7, %v2896_v47 }
 0x48c   :  { %3303 = vmatpush1.bf16.msra.mxu0 %v8290_v41  ;;  %3344 = vmatpush1.bf16.msra.mxu1 %v8291_v20  ;;  %v8323_v41 = vld [vmem:[#allocation62_spill] sm:$0xff]  ;;  %v8324_v20 = vld [vmem:[#allocation63_spill] sm:$0xff]  ;;  %v3155_v22 = vadd.f32 0.5, %v3154_v19  ;;  %v8350_v19 = vld [vmem:[#allocation57_spill] sm:$0xff] }
 0x48d   :  { %v3158_v24 = vadd.f32 %v3157_v5, %v3156_v23  ;;  %3304 = vmatprep.subr.bf16.mxu0 %v8293_v60  ;;  %3345 = vmatprep.subr.bf16.mxu1 %v8294_v16  ;;  %v8325_v60 = vld [vmem:[#allocation65_spill] sm:$0xff]  ;;  %v8326_v16 = vld [vmem:[#allocation66_spill] sm:$0xff]  ;;  %8359 = vst [vmem:[#allocation62_spill] sm:$0xff] %v7255_v55 }
 0x48f   :  { %5212 = vtanh.f32 %v3158_v24  ;;  %v3177_v11 = vsel %vm3176_vm11, %v3158_v24, %v2896_v47 }
 0x490   :  { %3178 = vst [vmem:[#allocation6] sm:$0x3] %v3177_v11  ;;  %3305 = vmatpush1.bf16.msra.mxu0 %v8295_v17  ;;  %3346 = vmatpush1.bf16.msra.mxu1 %v8296_v15 }
 0x491   :  { %3306 = vmatprep.subr.bf16.mxu0 %v8323_v41  ;;  %3347 = vmatprep.subr.bf16.mxu1 %v8324_v20  ;;  %v8349_v20 = vld [vmem:[#allocation56_spill] sm:$0xff] }
 0x494   :  { %3307 = vmatpush1.bf16.msra.mxu0 %v8299_v26  ;;  %3348 = vmatpush1.bf16.msra.mxu1 %v8325_v60  ;;  %v8351_v60 = vcombine.low %v8349_v20, %v8350_v19 }
 0x495   :  { %3308 = vmatprep.subr.bf16.mxu0 %v8326_v16  ;;  %3349 = vmatprep.subr.bf16.mxu1 %v8302_v33  ;;  %v7098_v33 = vld [vmem:[#allocation12 + $0x40] ss:$16 sps:$4 sm:$0xff]  }
 0x498   :  { %3309 = vmatpush1.bf16.msra.mxu0 %v8303_v10  ;;  %3350 = vmatpush1.bf16.msra.mxu1 %v8304_v6  ;;  %v7101_v10 = vld [vmem:[#allocation12 + $0x48] ss:$16 sps:$4 sm:$0xff]   ;;  %v7104_v6 = vld [vmem:[#allocation12 + $0x64] ss:$16 sps:$4 sm:$0xff]  }
 0x499   :  { %v5213_v17 = vpop.eup %5212  ;;  %3310 = vmatprep.subr.bf16.mxu0 %v8305_v37  ;;  %3351 = vmatprep.subr.bf16.mxu1 %v8306_v13  ;;  %v7092_v13 = vld [vmem:[#allocation12 + $0x44] ss:$16 sps:$4 sm:$0xff]   ;;  %8327 = vst [vmem:[#allocation42_spill] sm:$0xff] %v7104_v6 }
 0x49a   :  { %v3160_v15 = vmul.f32 %v5213_v17, %v3155_v22 }
 0x49c   :  { %v3179_v26 = vsel %vm3176_vm11, %v3160_v15, %v6956_v36  ;;  %v3184_v27 = vsel %vm3176_vm11, %v3160_v15, 0.0  ;;  %3311 = vmatpush1.bf16.msra.mxu0 %v8307_v12  ;;  %3352 = vmatpush1.bf16.msra.mxu1 %v6750_v35  ;;  %v7095_v12 = vld [vmem:[#allocation12 + $0x4c] ss:$16 sps:$4 sm:$0xff]  }
 0x49d   :  { %3180 = vst [vmem:[#allocation5] sm:$0x3] %v3179_v26  ;;  %3186 = vst [vmem:[#allocation15 + $0x1a] sm:$0x3] %v3184_v27  ;;  %3312 = vmatprep.subr.bf16.mxu0 %v6752_v2  ;;  %3353 = vmatprep.subr.bf16.mxu1 %v6755_v21  ;;  %v7066_v2 = vld [vmem:[#allocation12 + $0x4] ss:$16 sps:$4 sm:$0xff]  }
 0x49e   :  { %v7069_v21 = vld [vmem:[#allocation12 + $0xc] ss:$16 sps:$4 sm:$0xff]  }
 0x49f   :  { %v7107_v36 = vld [vmem:[#allocation12 + $0x6c] ss:$16 sps:$4 sm:$0xff]  }
 0x4a0   :  { %3313 = vmatpush1.bf16.msra.mxu0 %v6761_v28  ;;  %3354 = vmatpush1.bf16.msra.mxu1 %v6766_v18  ;;  %v7075_v28 = vld [vmem:[#allocation12 + $0x8] ss:$16 sps:$4 sm:$0xff]   ;;  %v7078_v18 = vld [vmem:[#allocation12 + $0x24] ss:$16 sps:$4 sm:$0xff]   ;;  %8328 = vst [vmem:[#allocation43_spill] sm:$0xff] %v7107_v36 }
 0x4a1   :  { %3314 = vmatprep.subr.bf16.mxu0 %v6768_v29  ;;  %3355 = vmatprep.subr.bf16.mxu1 %v6771_v38  ;;  %v7072_v29 = vld [vmem:[#allocation12] ss:$16 sps:$4 sm:$0xff]   ;;  %v7081_v38 = vld [vmem:[#allocation12 + $0x2c] ss:$16 sps:$4 sm:$0xff]  }
 0x4a4   :  { %3315 = vmatpush1.bf16.msra.mxu0 %v6777_v8  ;;  %3356 = vmatpush1.bf16.msra.mxu1 %v6786_v40  ;;  %v7062_v37 = vld [vmem:[#allocation5] sm:$0x3]  ;;  %v7086_v8 = vld [vmem:[#allocation12 + $0x20] ss:$16 sps:$4 sm:$0xff]   ;;  %v7089_v40 = vld [vmem:[#allocation12 + $0x28] ss:$16 sps:$4 sm:$0xff]  }
 0x4a5   :  { %v3299_v35 = vpack.c.bf16 %v7062_v37, %v7062_v37  ;;  %3487 = vmatprep.subr.bf16.mxu0 %v7066_v2  ;;  %3528 = vmatprep.subr.bf16.mxu1 %v7069_v21 }
 0x4a7   :  { %3333 = vmatmul.mubr.bf16.vlgmr.msra.gmra.mrb[84].mxu0 %v3299_v35  ;;  %3374 = vmatmul.mubr.bf16.vlgmr.msra.gmra.mrb[84].mxu1 %v3299_v35 }
 0x4a8   :  { %3488 = vmatpush1.bf16.msra.mxu0 %v7072_v29  ;;  %3529 = vmatpush1.bf16.msra.mxu1 %v7075_v28 }
 0x4a9   :  { %3489 = vmatprep.subr.bf16.mxu0 %v7078_v18  ;;  %3530 = vmatprep.subr.bf16.mxu1 %v7081_v38 }
 0x4aa   :  { %3519 = vmatprep.mubr.bf16.mxu0 %v8115_v57  ;;  %3560 = vmatprep.mubr.bf16.mxu1 %v8115_v57 }
 0x4ac   :  { %3490 = vmatpush1.bf16.msra.mxu0 %v7086_v8  ;;  %3531 = vmatpush1.bf16.msra.mxu1 %v7089_v40 }
 0x4ad   :  { %3491 = vmatprep.subr.bf16.mxu0 %v7092_v13  ;;  %3532 = vmatprep.subr.bf16.mxu1 %v7095_v12 }
 0x4b0   :  { %3492 = vmatpush1.bf16.msra.mxu0 %v7098_v33  ;;  %3533 = vmatpush1.bf16.msra.mxu1 %v7101_v10 }
 0x4b1   :  { %3493 = vmatprep.subr.bf16.mxu0 %v7104_v6  ;;  %3534 = vmatprep.subr.bf16.mxu1 %v7107_v36 }
 0x4b4   :  { %3494 = vmatpush1.bf16.msra.mxu0 %v7110_v30  ;;  %3535 = vmatpush1.bf16.msra.mxu1 %v7113_v39 }
 0x4b5   :  { %3495 = vmatprep.subr.bf16.mxu0 %v7116_v31  ;;  %3536 = vmatprep.subr.bf16.mxu1 %v7119_v45 }
 0x4b8   :  { %3496 = vmatpush1.bf16.msra.mxu0 %v7122_v34  ;;  %3537 = vmatpush1.bf16.msra.mxu1 %v7125_v1 }
 0x4b9   :  { %3497 = vmatprep.subr.bf16.mxu0 %v7128_v4  ;;  %3538 = vmatprep.subr.bf16.mxu1 %v7131_v56 }
 0x4bc   :  { %3498 = vmatpush1.bf16.msra.mxu0 %v7134_v61  ;;  %3539 = vmatpush1.bf16.msra.mxu1 %v7137_v44 }
 0x4bd   :  { %3499 = vmatprep.subr.bf16.mxu0 %v7140_v25  ;;  %3540 = vmatprep.subr.bf16.mxu1 %v7143_v32 }
 0x4c0   :  { %3500 = vmatpush1.bf16.msra.mxu0 %v7146_v51  ;;  %3541 = vmatpush1.bf16.msra.mxu1 %v7149_v0 }
 0x4c1   :  { %3501 = vmatprep.subr.bf16.mxu0 %v7152_v54  ;;  %3542 = vmatprep.subr.bf16.mxu1 %v7155_v58 }
 0x4c4   :  { %3502 = vmatpush1.bf16.msra.mxu0 %v7158_v53  ;;  %3543 = vmatpush1.bf16.msra.mxu1 %v7161_v9 }
 0x4c5   :  { %3594 = vmatprep.subr.bf16.mxu0 %v7164_v43  ;;  %3635 = vmatprep.subr.bf16.mxu1 %v7167_v62 }
 0x55a   :  { %v3227_v63 = vpop.f32.mrb[80].mxu0  ;;  %v3268_v3 = vpop.f32.mrb[80].mxu1 }
 0x55b   :  { %v3229_v14 = vpop.f32.mrb[81].mxu0  ;;  %v3270_v48 = vpop.f32.mrb[81].mxu1 }
 0x55c   :  { %v3279_v7 = vcombine.low %v3227_v63, %v3229_v14  ;;  %v3280_v52 = vcombine.low %v3268_v3, %v3270_v48  ;;  %v3231_v47 = vpop.f32.mrb[82].mxu0  ;;  %v3272_v23 = vpop.f32.mrb[82].mxu1 }
 0x55d   :  { %v3232_v5 = vpop.f32.mrb[83].mxu0  ;;  %v3273_v24 = vpop.f32.mrb[83].mxu1  ;;  %v3188_v23 = vld [vmem:[#allocation4] sm:$0x3] }
 0x55e   :  { %v3287_v11 = vrot.slane %v3279_v7, %v6141_v42  ;;  %v3294_v46 = vrot.slane %v3280_v52, %v6141_v42 }
 0x560   :  { %v3295_v41 = vcombine.low %v3287_v11, %v3294_v46  ;;  %v7175_v11 = vpop.permute.xlu0 %3459 }
 0x561   :  { %8352 = vst [vmem:[#allocation38_spill] sm:$0xff] %v7175_v11  ;;  %vm3461_vm12 = vcmp.eq.s32.totalorder %v7175_v11, 1 }
 0x562   :  { %v3297_v16 = vadd.f32 %v3295_v41, %v8351_v60 }
 0x564   :  { %v3405_v22 = vmul.f32 0.5, %v3297_v16  ;;  %v3410_v17 = vrot.slane %v3297_v16, 2  ;;  %v3416_v26 = vrot.slane %v3297_v16, 4  ;;  %v3419_v27 = vrot.slane %v3297_v16, 6 }
 0x566   :  { %5214 = vtanh.f32 %v3405_v22  ;;  %v3412_v15 = vmul.f32 0.5, %v3410_v17  ;;  %v3421_v35 = vmul.f32 0.5, %v3419_v27 }
 0x568   :  { %5216 = vtanh.f32 %v3412_v15 }
 0x569   :  { %5218 = vtanh.f32 %v3416_v26 }
 0x56a   :  { %5220 = vtanh.f32 %v3421_v35 }
 0x570   :  { %v5215_v63 = vpop.eup %5214 }
 0x571   :  { %v3407_v3 = vmul.f32 0.5, %v5215_v63 }
 0x572   :  { %v5217_v14 = vpop.eup %5216 }
 0x573   :  { %v3408_v48 = vadd.f32 0.5, %v3407_v3  ;;  %v3414_v7 = vmul.f32 0.5, %v5217_v14  ;;  %v5219_v47 = vpop.eup %5218 }
 0x574   :  { %v5221_v27 = vpop.eup %5220 }
 0x575   :  { %v3415_v52 = vadd.f32 0.5, %v3414_v7  ;;  %v3426_v24 = vmul.f32 %v5219_v47, %v3408_v48  ;;  %v3423_v48 = vmul.f32 0.5, %v5221_v27  ;;  %v8354_v47 = vld [vmem:[#allocation76_spill] sm:$0xff] }
 0x577   :  { %v3425_v5 = vmul.f32 %v3415_v52, %v3188_v23  ;;  %v8353_v52 = vld [vmem:[#allocation75_spill] sm:$0xff] }
 0x579   :  { %v3427_v46 = vadd.f32 %v3426_v24, %v3425_v5  ;;  %v8355_v5 = vcombine.low %v8353_v52, %v8354_v47  ;;  %v3424_v24 = vadd.f32 0.5, %v3423_v48  ;;  %v7197_v52 = vld [vmem:[#allocation13 + $0x8] ss:$16 sps:$4 sm:$0xff]  }
 0x57a   :  { %v3334_v41 = vpop.f32.mrb[84].mxu0  ;;  %v3375_v20 = vpop.f32.mrb[84].mxu1 }
 0x57b   :  { %5222 = vtanh.f32 %v3427_v46  ;;  %v3462_v19 = vsel %vm3461_vm12, %v3427_v46, %v3188_v23  ;;  %v3336_v60 = vpop.f32.mrb[85].mxu0  ;;  %v3377_v16 = vpop.f32.mrb[85].mxu1 }
 0x57c   :  { %3463 = vst [vmem:[#allocation4] sm:$0x3] %v3462_v19  ;;  %v3386_v22 = vcombine.low %v3334_v41, %v3336_v60  ;;  %v3387_v17 = vcombine.low %v3375_v20, %v3377_v16  ;;  %v3338_v15 = vpop.f32.mrb[86].mxu0  ;;  %v3379_v26 = vpop.f32.mrb[86].mxu1 }
 0x57d   :  { %v3339_v35 = vpop.f32.mrb[87].mxu0  ;;  %v3380_v63 = vpop.f32.mrb[87].mxu1 }
 0x57e   :  { %v3394_v3 = vrot.slane %v3386_v22, %v6141_v42  ;;  %v3401_v14 = vrot.slane %v3387_v17, %v6141_v42 }
 0x580   :  { %v3402_v7 = vcombine.low %v3394_v3, %v3401_v14 }
 0x582   :  { %v3404_v23 = vadd.f32 %v3402_v7, %v8355_v5  ;;  %v7194_v7 = vld [vmem:[#allocation13] ss:$16 sps:$4 sm:$0xff]   ;;  %v7200_v5 = vld [vmem:[#allocation13 + $0x24] ss:$16 sps:$4 sm:$0xff]  }
 0x584   :  { %v3430_v46 = vmul.f32 0.5, %v3404_v23  ;;  %v3435_v19 = vrot.slane %v3404_v23, 2  ;;  %v3441_v17 = vrot.slane %v3404_v23, 4  ;;  %v3444_v15 = vrot.slane %v3404_v23, 6  ;;  %v7203_v23 = vld [vmem:[#allocation13 + $0x2c] ss:$16 sps:$4 sm:$0xff]  }
 0x585   :  { %v5223_v41 = vpop.eup %5222 }
 0x586   :  { %v3429_v20 = vmul.f32 %v5223_v41, %v3424_v24  ;;  %5224 = vtanh.f32 %v3430_v46  ;;  %v3437_v60 = vmul.f32 0.5, %v3435_v19  ;;  %v3446_v26 = vmul.f32 0.5, %v3444_v15  ;;  %v3190_v46 = vld [vmem:[#allocation6] sm:$0x3]  ;;  %v7219_v15 = vld [vmem:[#allocation13 + $0x4c] ss:$16 sps:$4 sm:$0xff]  }
 0x588   :  { %v3464_v16 = vsel %vm3461_vm12, %v3429_v20, %v7016_v59  ;;  %v3475_v22 = vsel %vm3461_vm12, %v3429_v20, 0.0  ;;  %5226 = vtanh.f32 %v3437_v60  ;;  %v7208_v20 = vld [vmem:[#allocation13 + $0x20] ss:$16 sps:$4 sm:$0xff]   ;;  %v7211_v60 = vld [vmem:[#allocation13 + $0x28] ss:$16 sps:$4 sm:$0xff]  }
 0x589   :  { %3465 = vst [vmem:[#allocation3] sm:$0x3] %v3464_v16  ;;  %3477 = vst [vmem:[#allocation15 + $0x8] sm:$0x3] %v3475_v22  ;;  %5228 = vtanh.f32 %v3441_v17  ;;  %v7214_v16 = vpop.permute.xlu1 %3468  ;;  %v7216_v17 = vld [vmem:[#allocation13 + $0x44] ss:$16 sps:$4 sm:$0xff]  }
 0x58a   :  { %5230 = vtanh.f32 %v3446_v26  ;;  %8356 = vst [vmem:[#allocation39_spill] sm:$0xff] %v7214_v16  ;;  %vm3470_vm13 = vcmp.eq.s32.totalorder %v7214_v16, 1  ;;  %v7293_v16 = vld [vmem:[#allocation13 + $0xe8] ss:$16 sps:$4 sm:$0xff]  }
 0x590   :  { %v5225_v27 = vpop.eup %5224  ;;  %v7190_v35 = vld [vmem:[#allocation3] sm:$0x3] }
 0x591   :  { %v3432_v63 = vmul.f32 0.5, %v5225_v27  ;;  %v3486_v3 = vpack.c.bf16 %v7190_v35, %v7190_v35  ;;  %v7225_v27 = vld [vmem:[#allocation13 + $0x40] ss:$16 sps:$4 sm:$0xff]  }
 0x592   :  { %v5227_v14 = vpop.eup %5226 }
 0x593   :  { %v3433_v48 = vadd.f32 0.5, %v3432_v63  ;;  %v3439_v59 = vmul.f32 0.5, %v5227_v14  ;;  %3520 = vmatmul.mubr.bf16.vlgmr.msra.gmra.mrb[88].mxu0 %v3486_v3  ;;  %3561 = vmatmul.mubr.bf16.vlgmr.msra.gmra.mrb[88].mxu1 %v3486_v3  ;;  %v5229_v24 = vpop.eup %5228  ;;  %v7228_v63 = vld [vmem:[#allocation13 + $0x48] ss:$16 sps:$4 sm:$0xff]   ;;  %v7231_v14 = vld [vmem:[#allocation13 + $0x64] ss:$16 sps:$4 sm:$0xff]  }
 0x594   :  { %3595 = vmatpush1.bf16.msra.mxu0 %v7194_v7  ;;  %3636 = vmatpush1.bf16.msra.mxu1 %v7197_v52  ;;  %v5231_v3 = vpop.eup %5230 }
 0x595   :  { %v3440_v47 = vadd.f32 0.5, %v3439_v59  ;;  %3596 = vmatprep.subr.bf16.mxu0 %v7200_v5  ;;  %3637 = vmatprep.subr.bf16.mxu1 %v7203_v23  ;;  %v3451_v41 = vmul.f32 %v5229_v24, %v3433_v48  ;;  %v7234_v48 = vld [vmem:[#allocation13 + $0x6c] ss:$16 sps:$4 sm:$0xff]   ;;  %v3448_v59 = vmul.f32 0.5, %v5231_v3  ;;  %v7240_v24 = vld [vmem:[#allocation13 + $0x68] ss:$16 sps:$4 sm:$0xff]  }
 0x596   :  { %3626 = vmatprep.mubr.bf16.mxu0 %v8115_v57  ;;  %3667 = vmatprep.mubr.bf16.mxu1 %v8115_v57 }
 0x597   :  { %v3450_v19 = vmul.f32 %v3440_v47, %v3190_v46  ;;  %v7237_v47 = vld [vmem:[#allocation13 + $0x60] ss:$16 sps:$4 sm:$0xff]  }
 0x598   :  { %3597 = vmatpush1.bf16.msra.mxu0 %v7208_v20  ;;  %3638 = vmatpush1.bf16.msra.mxu1 %v7211_v60 }
 0x599   :  { %v3452_v22 = vadd.f32 %v3451_v41, %v3450_v19  ;;  %3598 = vmatprep.subr.bf16.mxu0 %v7216_v17  ;;  %3639 = vmatprep.subr.bf16.mxu1 %v7219_v15  ;;  %v7246_v19 = vld [vmem:[#allocation13 + $0x8c] ss:$16 sps:$4 sm:$0xff]   ;;  %v3449_v41 = vadd.f32 0.5, %v3448_v59 }
 0x59b   :  { %5232 = vtanh.f32 %v3452_v22  ;;  %v3471_v26 = vsel %vm3470_vm13, %v3452_v22, %v3190_v46  ;;  %v7243_v46 = vld [vmem:[#allocation13 + $0x84] ss:$16 sps:$4 sm:$0xff]   ;;  %v7249_v22 = vld [vmem:[#allocation13 + $0x80] ss:$16 sps:$4 sm:$0xff]  }
 0x59c   :  { %3472 = vst [vmem:[#allocation6] sm:$0x3] %v3471_v26  ;;  %3599 = vmatpush1.bf16.msra.mxu0 %v7225_v27  ;;  %3640 = vmatpush1.bf16.msra.mxu1 %v7228_v63  ;;  %8357 = vst [vmem:[#allocation26_spill] sm:$0xff] %v7249_v22  ;;  %v7252_v26 = vld [vmem:[#allocation13 + $0x88] ss:$16 sps:$4 sm:$0xff]  }
 0x59d   :  { %3600 = vmatprep.subr.bf16.mxu0 %v7231_v14  ;;  %3641 = vmatprep.subr.bf16.mxu1 %v7234_v48  ;;  %8358 = vst [vmem:[#allocation45_spill] sm:$0xff] %v7252_v26 }
 0x5a0   :  { %3601 = vmatpush1.bf16.msra.mxu0 %v7237_v47  ;;  %3642 = vmatpush1.bf16.msra.mxu1 %v7240_v24 }
 0x5a1   :  { %3602 = vmatprep.subr.bf16.mxu0 %v7243_v46  ;;  %3643 = vmatprep.subr.bf16.mxu1 %v7246_v19 }
 0x5a4   :  { %3603 = vmatpush1.bf16.msra.mxu0 %v7249_v22  ;;  %3644 = vmatpush1.bf16.msra.mxu1 %v7252_v26  ;;  %v7266_v22 = vld [vmem:[#allocation13 + $0xa0] ss:$16 sps:$4 sm:$0xff]   ;;  %v7269_v26 = vld [vmem:[#allocation13 + $0xa8] ss:$16 sps:$4 sm:$0xff]  }
 0x5a5   :  { %v5233_v3 = vpop.eup %5232  ;;  %3604 = vmatprep.subr.bf16.mxu0 %v7255_v55  ;;  %3645 = vmatprep.subr.bf16.mxu1 %v7258_v49  ;;  %v7272_v55 = vld [vmem:[#allocation13 + $0xc4] ss:$16 sps:$4 sm:$0xff]  }
 0x5a6   :  { %v3454_v50 = vmul.f32 %v5233_v3, %v3449_v41  ;;  %v7275_v41 = vld [vmem:[#allocation13 + $0xcc] ss:$16 sps:$4 sm:$0xff]   ;;  %v7284_v3 = vld [vmem:[#allocation13 + $0xe4] ss:$16 sps:$4 sm:$0xff]  }
 0x5a8   :  { %v3473_v59 = vsel %vm3470_vm13, %v3454_v50, %v7062_v37  ;;  %v3478_v11 = vsel %vm3470_vm13, %v3454_v50, 0.0  ;;  %3605 = vmatpush1.bf16.msra.mxu0 %v7266_v22  ;;  %3646 = vmatpush1.bf16.msra.mxu1 %v7269_v26  ;;  %v7278_v37 = vld [vmem:[#allocation13 + $0xc0] ss:$16 sps:$4 sm:$0xff]   ;;  %v7281_v50 = vld [vmem:[#allocation13 + $0xc8] ss:$16 sps:$4 sm:$0xff]  }
 0x5a9   :  { %3474 = vst [vmem:[#allocation5] sm:$0x3] %v3473_v59  ;;  %3480 = vst [vmem:[#allocation15 + $0x16] sm:$0x3] %v3478_v11  ;;  %3606 = vmatprep.subr.bf16.mxu0 %v7272_v55  ;;  %3647 = vmatprep.subr.bf16.mxu1 %v7275_v41  ;;  %v7287_v11 = vld [vmem:[#allocation13 + $0xec] ss:$16 sps:$4 sm:$0xff]  }
 0x5aa   :  { %8360 = vst [vmem:[#allocation63_spill] sm:$0xff] %v7278_v37  ;;  %8361 = vst [vmem:[#allocation65_spill] sm:$0xff] %v7281_v50  ;;  %v7290_v59 = vld [vmem:[#allocation13 + $0xe0] ss:$16 sps:$4 sm:$0xff]  }
 0x5ac   :  { %3607 = vmatpush1.bf16.msra.mxu0 %v7278_v37  ;;  %3648 = vmatpush1.bf16.msra.mxu1 %v7281_v50 }
 0x5ad   :  { %3608 = vmatprep.subr.bf16.mxu0 %v7284_v3  ;;  %3649 = vmatprep.subr.bf16.mxu1 %v7287_v11 }
 0x5b0   :  { %3609 = vmatpush1.bf16.msra.mxu0 %v7290_v59  ;;  %3650 = vmatpush1.bf16.msra.mxu1 %v7293_v16  ;;  %v7296_v37 = vld [vmem:[#allocation5] sm:$0x3] }
 0x5b1   :  { %v3593_v50 = vpack.c.bf16 %v7296_v37, %v7296_v37  ;;  %3781 = vmatprep.subr.bf16.mxu0 %v7066_v2  ;;  %3822 = vmatprep.subr.bf16.mxu1 %v7069_v21 }
 0x5b3   :  { %3627 = vmatmul.mubr.bf16.vlgmr.msra.gmra.mrb[92].mxu0 %v3593_v50  ;;  %3668 = vmatmul.mubr.bf16.vlgmr.msra.gmra.mrb[92].mxu1 %v3593_v50 }
 0x5b4   :  { %3782 = vmatpush1.bf16.msra.mxu0 %v7072_v29  ;;  %3823 = vmatpush1.bf16.msra.mxu1 %v7075_v28 }
 0x5b5   :  { %3783 = vmatprep.subr.bf16.mxu0 %v7078_v18  ;;  %3824 = vmatprep.subr.bf16.mxu1 %v7081_v38 }
 0x5b6   :  { %3813 = vmatprep.mubr.bf16.mxu0 %v8115_v57  ;;  %3854 = vmatprep.mubr.bf16.mxu1 %v8115_v57 }
 0x5b8   :  { %3784 = vmatpush1.bf16.msra.mxu0 %v7086_v8  ;;  %3825 = vmatpush1.bf16.msra.mxu1 %v7089_v40 }
 0x5b9   :  { %3785 = vmatprep.subr.bf16.mxu0 %v7092_v13  ;;  %3826 = vmatprep.subr.bf16.mxu1 %v7095_v12 }
 0x5bc   :  { %3786 = vmatpush1.bf16.msra.mxu0 %v7098_v33  ;;  %3827 = vmatpush1.bf16.msra.mxu1 %v7101_v10 }
 0x5bd   :  { %3787 = vmatprep.subr.bf16.mxu0 %v7104_v6  ;;  %3828 = vmatprep.subr.bf16.mxu1 %v7107_v36 }
 0x5c0   :  { %3788 = vmatpush1.bf16.msra.mxu0 %v7110_v30  ;;  %3829 = vmatpush1.bf16.msra.mxu1 %v7113_v39  ;;  %v8366_v30 = vld [vmem:[#allocation36_spill] sm:$0xff] }
 0x5c1   :  { %3789 = vmatprep.subr.bf16.mxu0 %v7116_v31  ;;  %3830 = vmatprep.subr.bf16.mxu1 %v7119_v45 }
 0x5c4   :  { %3790 = vmatpush1.bf16.msra.mxu0 %v7122_v34  ;;  %3831 = vmatpush1.bf16.msra.mxu1 %v7125_v1  ;;  %v8363_v34 = vld [vmem:[#allocation60_spill] sm:$0xff] }
 0x5c5   :  { %3791 = vmatprep.subr.bf16.mxu0 %v7128_v4  ;;  %3832 = vmatprep.subr.bf16.mxu1 %v7131_v56 }
 0x5c8   :  { %3792 = vmatpush1.bf16.msra.mxu0 %v7134_v61  ;;  %3833 = vmatpush1.bf16.msra.mxu1 %v7137_v44 }
 0x5c9   :  { %3793 = vmatprep.subr.bf16.mxu0 %v7140_v25  ;;  %3834 = vmatprep.subr.bf16.mxu1 %v7143_v32 }
 0x5cc   :  { %3794 = vmatpush1.bf16.msra.mxu0 %v7146_v51  ;;  %3835 = vmatpush1.bf16.msra.mxu1 %v7149_v0 }
 0x5cd   :  { %3795 = vmatprep.subr.bf16.mxu0 %v7152_v54  ;;  %3836 = vmatprep.subr.bf16.mxu1 %v7155_v58 }
 0x5d0   :  { %3796 = vmatpush1.bf16.msra.mxu0 %v7158_v53  ;;  %3837 = vmatpush1.bf16.msra.mxu1 %v7161_v9  ;;  %v8362_v9 = vld [vmem:[#allocation59_spill] sm:$0xff] }
 0x5d1   :  { %3888 = vmatprep.subr.bf16.mxu0 %v7164_v43  ;;  %3929 = vmatprep.subr.bf16.mxu1 %v7167_v62  ;;  %v8364_v43 = vcombine.low %v8362_v9, %v8363_v34  ;;  %v7341_v34 = vpop.permute.xlu0 %3753 }
 0x5d2   :  { %vm3755_vm14 = vcmp.eq.s32.totalorder %v7341_v34, 1  ;;  %v7550_v34 = vld [vmem:[#allocation12 + $0x60] ss:$16 sps:$4 sm:$0xff]  }
 0x666   :  { %v3521_v50 = vpop.f32.mrb[88].mxu0  ;;  %v3562_v25 = vpop.f32.mrb[88].mxu1 }
 0x667   :  { %v3523_v44 = vpop.f32.mrb[89].mxu0  ;;  %v3564_v32 = vpop.f32.mrb[89].mxu1 }
 0x668   :  { %v3573_v61 = vcombine.low %v3521_v50, %v3523_v44  ;;  %v3574_v51 = vcombine.low %v3562_v25, %v3564_v32  ;;  %v3525_v56 = vpop.f32.mrb[90].mxu0  ;;  %v3566_v0 = vpop.f32.mrb[90].mxu1 }
 0x669   :  { %v3526_v4 = vpop.f32.mrb[91].mxu0  ;;  %v3567_v54 = vpop.f32.mrb[91].mxu1 }
 0x66a   :  { %v3581_v58 = vrot.slane %v3573_v61, %v6141_v42  ;;  %v3588_v53 = vrot.slane %v3574_v51, %v6141_v42 }
 0x66c   :  { %v3589_v1 = vcombine.low %v3581_v58, %v3588_v53  ;;  %v3482_v53 = vld [vmem:[#allocation4] sm:$0x3] }
 0x66e   :  { %v3591_v45 = vadd.f32 %v3589_v1, %v8364_v43 }
 0x670   :  { %v3699_v62 = vmul.f32 0.5, %v3591_v45  ;;  %v3704_v31 = vrot.slane %v3591_v45, 2  ;;  %v3710_v44 = vrot.slane %v3591_v45, 4  ;;  %v3713_v25 = vrot.slane %v3591_v45, 6 }
 0x672   :  { %5234 = vtanh.f32 %v3699_v62  ;;  %v3706_v39 = vmul.f32 0.5, %v3704_v31  ;;  %v3715_v56 = vmul.f32 0.5, %v3713_v25 }
 0x674   :  { %5236 = vtanh.f32 %v3706_v39 }
 0x675   :  { %5238 = vtanh.f32 %v3710_v44 }
 0x676   :  { %5240 = vtanh.f32 %v3715_v56 }
 0x67c   :  { %v5235_v4 = vpop.eup %5234 }
 0x67d   :  { %v3701_v32 = vmul.f32 0.5, %v5235_v4 }
 0x67e   :  { %v5237_v0 = vpop.eup %5236 }
 0x67f   :  { %v3702_v61 = vadd.f32 0.5, %v3701_v32  ;;  %v3708_v54 = vmul.f32 0.5, %v5237_v0  ;;  %v5239_v58 = vpop.eup %5238 }
 0x680   :  { %v5241_v32 = vpop.eup %5240 }
 0x681   :  { %v3709_v51 = vadd.f32 0.5, %v3708_v54  ;;  %v3720_v9 = vmul.f32 %v5239_v58, %v3702_v61  ;;  %v3717_v58 = vmul.f32 0.5, %v5241_v32 }
 0x683   :  { %v3719_v1 = vmul.f32 %v3709_v51, %v3482_v53 }
 0x685   :  { %v3721_v43 = vadd.f32 %v3720_v9, %v3719_v1  ;;  %v8365_v9 = vld [vmem:[#allocation34_spill] sm:$0xff] }
 0x686   :  { %v3628_v39 = vpop.f32.mrb[92].mxu0  ;;  %v3669_v31 = vpop.f32.mrb[92].mxu1  ;;  %v8367_v36 = vcombine.low %v8365_v9, %v8366_v30 }
 0x687   :  { %5242 = vtanh.f32 %v3721_v43  ;;  %v3756_v45 = vsel %vm3755_vm14, %v3721_v43, %v3482_v53  ;;  %v3630_v62 = vpop.f32.mrb[93].mxu0  ;;  %v3671_v50 = vpop.f32.mrb[93].mxu1  ;;  %v3718_v43 = vadd.f32 0.5, %v3717_v58  ;;  %v3484_v58 = vld [vmem:[#allocation6] sm:$0x3] }
 0x688   :  { %3757 = vst [vmem:[#allocation4] sm:$0x3] %v3756_v45  ;;  %v3680_v44 = vcombine.low %v3628_v39, %v3630_v62  ;;  %v3681_v25 = vcombine.low %v3669_v31, %v3671_v50  ;;  %v3632_v56 = vpop.f32.mrb[94].mxu0  ;;  %v3673_v4 = vpop.f32.mrb[94].mxu1 }
 0x689   :  { %v3633_v0 = vpop.f32.mrb[95].mxu0  ;;  %v3674_v54 = vpop.f32.mrb[95].mxu1 }
 0x68a   :  { %v3688_v61 = vrot.slane %v3680_v44, %v6141_v42  ;;  %v3695_v51 = vrot.slane %v3681_v25, %v6141_v42 }
 0x68c   :  { %v3696_v1 = vcombine.low %v3688_v61, %v3695_v51 }
 0x68e   :  { %v3698_v53 = vadd.f32 %v3696_v1, %v8367_v36  ;;  %v7366_v1 = vpop.permute.xlu1 %3762 }
 0x68f   :  { %vm3764_vm15 = vcmp.eq.s32.totalorder %v7366_v1, 1 }
 0x690   :  { %v3724_v6 = vmul.f32 0.5, %v3698_v53  ;;  %v3729_v45 = vrot.slane %v3698_v53, 2  ;;  %v3735_v25 = vrot.slane %v3698_v53, 4  ;;  %v3738_v30 = vrot.slane %v3698_v53, 6 }
 0x691   :  { %v5243_v39 = vpop.eup %5242 }
 0x692   :  { %v3723_v31 = vmul.f32 %v5243_v39, %v3718_v43  ;;  %5244 = vtanh.f32 %v3724_v6  ;;  %v3731_v62 = vmul.f32 0.5, %v3729_v45  ;;  %v3740_v36 = vmul.f32 0.5, %v3738_v30  ;;  %v8370_v30 = vld [vmem:[#allocation62_spill] sm:$0xff] }
 0x694   :  { %v3758_v50 = vsel %vm3755_vm14, %v3723_v31, %v7190_v35  ;;  %v3769_v44 = vsel %vm3755_vm14, %v3723_v31, 0.0  ;;  %5246 = vtanh.f32 %v3731_v62 }
 0x695   :  { %3759 = vst [vmem:[#allocation3] sm:$0x3] %v3758_v50  ;;  %3771 = vst [vmem:[#allocation15 + $0xc] sm:$0x3] %v3769_v44  ;;  %5248 = vtanh.f32 %v3735_v25  ;;  %v8368_v50 = vld [vmem:[#allocation26_spill] sm:$0xff]  ;;  %v8369_v44 = vld [vmem:[#allocation45_spill] sm:$0xff] }
 0x696   :  { %5250 = vtanh.f32 %v3740_v36 }
 0x69c   :  { %v5245_v56 = vpop.eup %5244  ;;  %v7356_v4 = vld [vmem:[#allocation3] sm:$0x3] }
 0x69d   :  { %v3726_v32 = vmul.f32 0.5, %v5245_v56  ;;  %v3780_v6 = vpack.c.bf16 %v7356_v4, %v7356_v4 }
 0x69e   :  { %v5247_v0 = vpop.eup %5246 }
 0x69f   :  { %v3727_v54 = vadd.f32 0.5, %v3726_v32  ;;  %v3733_v35 = vmul.f32 0.5, %v5247_v0  ;;  %3814 = vmatmul.mubr.bf16.vlgmr.msra.gmra.mrb[96].mxu0 %v3780_v6  ;;  %3855 = vmatmul.mubr.bf16.vlgmr.msra.gmra.mrb[96].mxu1 %v3780_v6  ;;  %v5249_v51 = vpop.eup %5248  ;;  %v8371_v6 = vld [vmem:[#allocation63_spill] sm:$0xff]  ;;  %v8372_v0 = vld [vmem:[#allocation65_spill] sm:$0xff] }
 0x6a0   :  { %3889 = vmatpush1.bf16.msra.mxu0 %v7194_v7  ;;  %3930 = vmatpush1.bf16.msra.mxu1 %v7197_v52  ;;  %v5251_v39 = vpop.eup %5250 }
 0x6a1   :  { %v3734_v61 = vadd.f32 0.5, %v3733_v35  ;;  %3890 = vmatprep.subr.bf16.mxu0 %v7200_v5  ;;  %3931 = vmatprep.subr.bf16.mxu1 %v7203_v23  ;;  %v3745_v53 = vmul.f32 %v5249_v51, %v3727_v54  ;;  %v3742_v31 = vmul.f32 0.5, %v5251_v39  ;;  %v8385_v35 = vld [vmem:[#allocation70_spill] sm:$0xff]  ;;  %v8387_v51 = vld [vmem:[#allocation72_spill] sm:$0xff]  ;;  %v8393_v39 = vld [vmem:[#allocation35_spill] sm:$0xff] }
 0x6a2   :  { %3920 = vmatprep.mubr.bf16.mxu0 %v8115_v57  ;;  %3961 = vmatprep.mubr.bf16.mxu1 %v8115_v57 }
 0x6a3   :  { %v3744_v9 = vmul.f32 %v3734_v61, %v3484_v58  ;;  %v3743_v62 = vadd.f32 0.5, %v3742_v31  ;;  %v8386_v61 = vld [vmem:[#allocation71_spill] sm:$0xff]  ;;  %v8394_v31 = vld [vmem:[#allocation37_spill] sm:$0xff] }
 0x6a4   :  { %3891 = vmatpush1.bf16.msra.mxu0 %v7208_v20  ;;  %3932 = vmatpush1.bf16.msra.mxu1 %v7211_v60 }
 0x6a5   :  { %v3746_v43 = vadd.f32 %v3745_v53, %v3744_v9  ;;  %3892 = vmatprep.subr.bf16.mxu0 %v7216_v17  ;;  %3933 = vmatprep.subr.bf16.mxu1 %v7219_v15  ;;  %v8389_v9 = vld [vmem:[#allocation30_spill] sm:$0xff]  ;;  %v8390_v53 = vld [vmem:[#allocation31_spill] sm:$0xff] }
 0x6a7   :  { %5252 = vtanh.f32 %v3746_v43  ;;  %v3765_v45 = vsel %vm3764_vm15, %v3746_v43, %v3484_v58  ;;  %v8388_v58 = vld [vmem:[#allocation29_spill] sm:$0xff]  ;;  %v8391_v43 = vld [vmem:[#allocation32_spill] sm:$0xff] }
 0x6a8   :  { %3766 = vst [vmem:[#allocation6] sm:$0x3] %v3765_v45  ;;  %3893 = vmatpush1.bf16.msra.mxu0 %v7225_v27  ;;  %3934 = vmatpush1.bf16.msra.mxu1 %v7228_v63  ;;  %v8392_v45 = vld [vmem:[#allocation33_spill] sm:$0xff] }
 0x6a9   :  { %3894 = vmatprep.subr.bf16.mxu0 %v7231_v14  ;;  %3935 = vmatprep.subr.bf16.mxu1 %v7234_v48 }
 0x6ac   :  { %3895 = vmatpush1.bf16.msra.mxu0 %v7237_v47  ;;  %3936 = vmatpush1.bf16.msra.mxu1 %v7240_v24 }
 0x6ad   :  { %3896 = vmatprep.subr.bf16.mxu0 %v7243_v46  ;;  %3937 = vmatprep.subr.bf16.mxu1 %v7246_v19 }
 0x6b0   :  { %3897 = vmatpush1.bf16.msra.mxu0 %v8368_v50  ;;  %3938 = vmatpush1.bf16.msra.mxu1 %v8369_v44 }
 0x6b1   :  { %v5253_v25 = vpop.eup %5252  ;;  %3898 = vmatprep.subr.bf16.mxu0 %v8370_v30  ;;  %3939 = vmatprep.subr.bf16.mxu1 %v7258_v49 }
 0x6b2   :  { %v3748_v36 = vmul.f32 %v5253_v25, %v3743_v62 }
 0x6b4   :  { %v3767_v56 = vsel %vm3764_vm15, %v3748_v36, %v7296_v37  ;;  %v3772_v32 = vsel %vm3764_vm15, %v3748_v36, 0.0  ;;  %3899 = vmatpush1.bf16.msra.mxu0 %v7266_v22  ;;  %3940 = vmatpush1.bf16.msra.mxu1 %v7269_v26 }
 0x6b5   :  { %3768 = vst [vmem:[#allocation5] sm:$0x3] %v3767_v56  ;;  %3774 = vst [vmem:[#allocation15 + $0x12] sm:$0x3] %v3772_v32  ;;  %3900 = vmatprep.subr.bf16.mxu0 %v7272_v55  ;;  %3941 = vmatprep.subr.bf16.mxu1 %v7275_v41 }
 0x6b8   :  { %3901 = vmatpush1.bf16.msra.mxu0 %v8371_v6  ;;  %3942 = vmatpush1.bf16.msra.mxu1 %v8372_v0 }
 0x6b9   :  { %3902 = vmatprep.subr.bf16.mxu0 %v7284_v3  ;;  %3943 = vmatprep.subr.bf16.mxu1 %v7287_v11 }
 0x6bc   :  { %3903 = vmatpush1.bf16.msra.mxu0 %v7290_v59  ;;  %3944 = vmatpush1.bf16.msra.mxu1 %v7293_v16  ;;  %v7402_v37 = vld [vmem:[#allocation5] sm:$0x3] }
 0x6bd   :  { %v3887_v54 = vpack.c.bf16 %v7402_v37, %v7402_v37  ;;  %4061 = vmatprep.subr.bf16.mxu0 %v7066_v2  ;;  %4102 = vmatprep.subr.bf16.mxu1 %v7069_v21  ;;  %v8373_v2 = vld [vmem:[#allocation42_spill] sm:$0xff]  ;;  %v8374_v21 = vld [vmem:[#allocation43_spill] sm:$0xff] }
 0x6bf   :  { %3921 = vmatmul.mubr.bf16.vlgmr.msra.gmra.mrb[100].mxu0 %v3887_v54  ;;  %3962 = vmatmul.mubr.bf16.vlgmr.msra.gmra.mrb[100].mxu1 %v3887_v54 }
 0x6c0   :  { %4062 = vmatpush1.bf16.msra.mxu0 %v7072_v29  ;;  %4103 = vmatpush1.bf16.msra.mxu1 %v7075_v28  ;;  %v8375_v29 = vld [vmem:[#allocation44_spill] sm:$0xff]  ;;  %v8376_v28 = vld [vmem:[#allocation46_spill] sm:$0xff] }
 0x6c1   :  { %4063 = vmatprep.subr.bf16.mxu0 %v7078_v18  ;;  %4104 = vmatprep.subr.bf16.mxu1 %v7081_v38  ;;  %v8377_v18 = vld [vmem:[#allocation47_spill] sm:$0xff]  ;;  %v8378_v38 = vld [vmem:[#allocation48_spill] sm:$0xff] }
 0x6c2   :  { %4093 = vmatprep.mubr.bf16.mxu0 %v8115_v57  ;;  %4134 = vmatprep.mubr.bf16.mxu1 %v8115_v57 }
 0x6c4   :  { %4064 = vmatpush1.bf16.msra.mxu0 %v7086_v8  ;;  %4105 = vmatpush1.bf16.msra.mxu1 %v7089_v40  ;;  %v8379_v8 = vld [vmem:[#allocation49_spill] sm:$0xff]  ;;  %v8380_v40 = vld [vmem:[#allocation50_spill] sm:$0xff] }
 0x6c5   :  { %4065 = vmatprep.subr.bf16.mxu0 %v7092_v13  ;;  %4106 = vmatprep.subr.bf16.mxu1 %v7095_v12  ;;  %v8381_v13 = vld [vmem:[#allocation64_spill] sm:$0xff]  ;;  %v8382_v12 = vld [vmem:[#allocation67_spill] sm:$0xff] }
 0x6c8   :  { %4066 = vmatpush1.bf16.msra.mxu0 %v7098_v33  ;;  %4107 = vmatpush1.bf16.msra.mxu1 %v7101_v10  ;;  %v8383_v33 = vld [vmem:[#allocation68_spill] sm:$0xff]  ;;  %v8384_v10 = vld [vmem:[#allocation69_spill] sm:$0xff] }
 0x6c9   :  { %4067 = vmatprep.subr.bf16.mxu0 %v8373_v2  ;;  %4108 = vmatprep.subr.bf16.mxu1 %v8374_v21 }
 0x6cc   :  { %4068 = vmatpush1.bf16.msra.mxu0 %v8375_v29  ;;  %4109 = vmatpush1.bf16.msra.mxu1 %v8376_v28 }
 0x6cd   :  { %4069 = vmatprep.subr.bf16.mxu0 %v8377_v18  ;;  %4110 = vmatprep.subr.bf16.mxu1 %v8378_v38 }
 0x6d0   :  { %4070 = vmatpush1.bf16.msra.mxu0 %v8379_v8  ;;  %4111 = vmatpush1.bf16.msra.mxu1 %v8380_v40  ;;  %v8395_v40 = vld [vmem:[#allocation27_spill] sm:$0xff] }
 0x6d1   :  { %4071 = vmatprep.subr.bf16.mxu0 %v8381_v13  ;;  %4112 = vmatprep.subr.bf16.mxu1 %v8382_v12  ;;  %v8396_v13 = vld [vmem:[#allocation28_spill] sm:$0xff] }
 0x6d2   :  { %v8397_v12 = vcombine.low %v8395_v40, %v8396_v13 }
 0x6d4   :  { %4072 = vmatpush1.bf16.msra.mxu0 %v8383_v33  ;;  %4113 = vmatpush1.bf16.msra.mxu1 %v8384_v10 }
 0x6d5   :  { %4073 = vmatprep.subr.bf16.mxu0 %v8385_v35  ;;  %4114 = vmatprep.subr.bf16.mxu1 %v8386_v61 }
 0x6d8   :  { %4074 = vmatpush1.bf16.msra.mxu0 %v8387_v51  ;;  %4115 = vmatpush1.bf16.msra.mxu1 %v8388_v58 }
 0x6d9   :  { %4075 = vmatprep.subr.bf16.mxu0 %v8389_v9  ;;  %4116 = vmatprep.subr.bf16.mxu1 %v8390_v53 }
 0x6dc   :  { %4076 = vmatpush1.bf16.msra.mxu0 %v8391_v43  ;;  %4117 = vmatpush1.bf16.msra.mxu1 %v8392_v45 }
 0x6dd   :  { %4168 = vmatprep.subr.bf16.mxu0 %v8393_v39  ;;  %4209 = vmatprep.subr.bf16.mxu1 %v8394_v31 }
 0x772   :  { %v3815_v62 = vpop.f32.mrb[96].mxu0  ;;  %v3856_v25 = vpop.f32.mrb[96].mxu1 }
 0x773   :  { %v3817_v36 = vpop.f32.mrb[97].mxu0  ;;  %v3858_v56 = vpop.f32.mrb[97].mxu1 }
 0x774   :  { %v3867_v32 = vcombine.low %v3815_v62, %v3817_v36  ;;  %v3868_v54 = vcombine.low %v3856_v25, %v3858_v56  ;;  %v3819_v2 = vpop.f32.mrb[98].mxu0  ;;  %v3860_v21 = vpop.f32.mrb[98].mxu1  ;;  %v3776_v36 = vld [vmem:[#allocation4] sm:$0x3] }
 0x775   :  { %v3820_v29 = vpop.f32.mrb[99].mxu0  ;;  %v3861_v28 = vpop.f32.mrb[99].mxu1 }
 0x776   :  { %v3875_v18 = vrot.slane %v3867_v32, %v6141_v42  ;;  %v3882_v38 = vrot.slane %v3868_v54, %v6141_v42 }
 0x778   :  { %v3883_v8 = vcombine.low %v3875_v18, %v3882_v38 }
 0x77a   :  { %v3885_v33 = vadd.f32 %v3883_v8, %v8397_v12 }
 0x77c   :  { %v3993_v10 = vmul.f32 0.5, %v3885_v33  ;;  %v3998_v35 = vrot.slane %v3885_v33, 2  ;;  %v4004_v51 = vrot.slane %v3885_v33, 4  ;;  %v4007_v58 = vrot.slane %v3885_v33, 6 }
 0x77e   :  { %5254 = vtanh.f32 %v3993_v10  ;;  %v4000_v61 = vmul.f32 0.5, %v3998_v35  ;;  %v4009_v9 = vmul.f32 0.5, %v4007_v58 }
 0x780   :  { %5256 = vtanh.f32 %v4000_v61 }
 0x781   :  { %5258 = vtanh.f32 %v4004_v51 }
 0x782   :  { %5260 = vtanh.f32 %v4009_v9  ;;  %v8398_v9 = vld [vmem:[#allocation53_spill] sm:$0xff] }
 0x788   :  { %v5255_v53 = vpop.eup %5254 }
 0x789   :  { %v3995_v43 = vmul.f32 0.5, %v5255_v53  ;;  %v8399_v53 = vld [vmem:[#allocation61_spill] sm:$0xff] }
 0x78a   :  { %v5257_v45 = vpop.eup %5256 }
 0x78b   :  { %v3996_v39 = vadd.f32 0.5, %v3995_v43  ;;  %v4002_v31 = vmul.f32 0.5, %v5257_v45  ;;  %v5259_v25 = vpop.eup %5258  ;;  %v8400_v43 = vcombine.low %v8398_v9, %v8399_v53  ;;  %v7580_v9 = vld [vmem:[#allocation12 + $0xc4] ss:$16 sps:$4 sm:$0xff]   ;;  %v7583_v53 = vld [vmem:[#allocation12 + $0xcc] ss:$16 sps:$4 sm:$0xff]  }
 0x78c   :  { %v5261_v12 = vpop.eup %5260 }
 0x78d   :  { %v4003_v62 = vadd.f32 0.5, %v4002_v31  ;;  %v4014_v32 = vmul.f32 %v5259_v25, %v3996_v39  ;;  %v4011_v51 = vmul.f32 0.5, %v5261_v12 }
 0x78f   :  { %v4013_v56 = vmul.f32 %v4003_v62, %v3776_v36  ;;  %v4012_v39 = vadd.f32 0.5, %v4011_v51  ;;  %v7574_v51 = vld [vmem:[#allocation12 + $0xa0] ss:$16 sps:$4 sm:$0xff]  }
 0x791   :  { %v4015_v54 = vadd.f32 %v4014_v32, %v4013_v56 }
 0x792   :  { %v3922_v2 = vpop.f32.mrb[100].mxu0  ;;  %v3963_v21 = vpop.f32.mrb[100].mxu1 }
 0x793   :  { %5262 = vtanh.f32 %v4015_v54  ;;  %v4043_v29 = vsel %vm3764_vm15, %v4015_v54, %v3776_v36  ;;  %v3924_v28 = vpop.f32.mrb[101].mxu0  ;;  %v3965_v18 = vpop.f32.mrb[101].mxu1 }
 0x794   :  { %4044 = vst [vmem:[#allocation4] sm:$0x3] %v4043_v29  ;;  %v3974_v38 = vcombine.low %v3922_v2, %v3924_v28  ;;  %v3975_v8 = vcombine.low %v3963_v21, %v3965_v18  ;;  %v3926_v40 = vpop.f32.mrb[102].mxu0  ;;  %v3967_v13 = vpop.f32.mrb[102].mxu1 }
 0x795   :  { %v3927_v33 = vpop.f32.mrb[103].mxu0  ;;  %v3968_v10 = vpop.f32.mrb[103].mxu1 }
 0x796   :  { %v3982_v35 = vrot.slane %v3974_v38, %v6141_v42  ;;  %v3989_v61 = vrot.slane %v3975_v8, %v6141_v42  ;;  %v3778_v33 = vld [vmem:[#allocation6] sm:$0x3] }
 0x798   :  { %v3990_v58 = vcombine.low %v3982_v35, %v3989_v61  ;;  %v7571_v61 = vld [vmem:[#allocation12 + $0xac] ss:$16 sps:$4 sm:$0xff]  }
 0x79a   :  { %v3992_v45 = vadd.f32 %v3990_v58, %v8400_v43  ;;  %v7577_v58 = vld [vmem:[#allocation12 + $0xa8] ss:$16 sps:$4 sm:$0xff]   ;;  %v7586_v43 = vld [vmem:[#allocation12 + $0xc0] ss:$16 sps:$4 sm:$0xff]  }
 0x79c   :  { %v4018_v31 = vmul.f32 0.5, %v3992_v45  ;;  %v4023_v62 = vrot.slane %v3992_v45, 2  ;;  %v4029_v2 = vrot.slane %v3992_v45, 4  ;;  %v4032_v21 = vrot.slane %v3992_v45, 6  ;;  %v7589_v45 = vld [vmem:[#allocation12 + $0xc8] ss:$16 sps:$4 sm:$0xff]  }
 0x79d   :  { %v5263_v25 = vpop.eup %5262 }
 0x79e   :  { %v4017_v36 = vmul.f32 %v5263_v25, %v4012_v39  ;;  %5264 = vtanh.f32 %v4018_v31  ;;  %v4025_v56 = vmul.f32 0.5, %v4023_v62  ;;  %v4034_v29 = vmul.f32 0.5, %v4032_v21  ;;  %v7592_v39 = vld [vmem:[#allocation12 + $0xe4] ss:$16 sps:$4 sm:$0xff]   ;;  %v7595_v31 = vld [vmem:[#allocation12 + $0xec] ss:$16 sps:$4 sm:$0xff]  }
 0x79f   :  { %v7598_v62 = vld [vmem:[#allocation12 + $0xe0] ss:$16 sps:$4 sm:$0xff]   ;;  %v7601_v25 = vld [vmem:[#allocation12 + $0xe8] ss:$16 sps:$4 sm:$0xff]  }
 0x7a0   :  { %v4045_v32 = vsel %vm3764_vm15, %v4017_v36, %v7356_v4  ;;  %v4051_v54 = vsel %vm3764_vm15, %v4017_v36, 0.0  ;;  %5266 = vtanh.f32 %v4025_v56  ;;  %v7604_v36 = vld [vmem:[#allocation13 + $0x4] ss:$16 sps:$4 sm:$0xff]   ;;  %v7607_v56 = vld [vmem:[#allocation13 + $0xc] ss:$16 sps:$4 sm:$0xff]  }
 0x7a1   :  { %4046 = vst [vmem:[#allocation3] sm:$0x3] %v4045_v32  ;;  %4052 = vst [vmem:[#allocation15 + $0x10] sm:$0x3] %v4051_v54  ;;  %5268 = vtanh.f32 %v4029_v2 }
 0x7a2   :  { %5270 = vtanh.f32 %v4034_v29 }
 0x7a8   :  { %v5265_v28 = vpop.eup %5264  ;;  %v7459_v18 = vld [vmem:[#allocation3] sm:$0x3] }
 0x7a9   :  { %v4020_v38 = vmul.f32 0.5, %v5265_v28  ;;  %v4060_v8 = vpack.c.bf16 %v7459_v18, %v7459_v18 }
 0x7aa   :  { %v5267_v40 = vpop.eup %5266 }
 0x7ab   :  { %v4021_v13 = vadd.f32 0.5, %v4020_v38  ;;  %v4027_v4 = vmul.f32 0.5, %v5267_v40  ;;  %4094 = vmatmul.mubr.bf16.vlgmr.msra.gmra.mrb[104].mxu0 %v4060_v8  ;;  %4135 = vmatmul.mubr.bf16.vlgmr.msra.gmra.mrb[104].mxu1 %v4060_v8  ;;  %v5269_v12 = vpop.eup %5268 }
 0x7ac   :  { %4169 = vmatpush1.bf16.msra.mxu0 %v7194_v7  ;;  %4210 = vmatpush1.bf16.msra.mxu1 %v7197_v52 }
 0x7ad   :  { %v4028_v1 = vadd.f32 0.5, %v4027_v4  ;;  %4170 = vmatprep.subr.bf16.mxu0 %v7200_v5  ;;  %4211 = vmatprep.subr.bf16.mxu1 %v7203_v23  ;;  %v4039_v35 = vmul.f32 %v5269_v12, %v4021_v13  ;;  %v5271_v5 = vpop.eup %5270 }
 0x7ae   :  { %4200 = vmatprep.mubr.bf16.mxu0 %v8115_v57  ;;  %4241 = vmatprep.mubr.bf16.mxu1 %v8115_v57  ;;  %v4036_v23 = vmul.f32 0.5, %v5271_v5 }
 0x7af   :  { %v4038_v10 = vmul.f32 %v4028_v1, %v3778_v33 }
 0x7b0   :  { %4171 = vmatpush1.bf16.msra.mxu0 %v7208_v20  ;;  %4212 = vmatpush1.bf16.msra.mxu1 %v7211_v60  ;;  %v4037_v20 = vadd.f32 0.5, %v4036_v23 }
 0x7b1   :  { %v4040_v7 = vadd.f32 %v4039_v35, %v4038_v10  ;;  %4172 = vmatprep.subr.bf16.mxu0 %v7216_v17  ;;  %4213 = vmatprep.subr.bf16.mxu1 %v7219_v15  ;;  %v8402_v10 = vld [vmem:[#allocation74_spill] sm:$0xff] }
 0x7b3   :  { %5272 = vtanh.f32 %v4040_v7  ;;  %v4047_v52 = vsel %vm3755_vm14, %v4040_v7, %v3778_v33  ;;  %v8401_v33 = vld [vmem:[#allocation73_spill] sm:$0xff] }
 0x7b4   :  { %4048 = vst [vmem:[#allocation6] sm:$0x3] %v4047_v52  ;;  %4173 = vmatpush1.bf16.msra.mxu0 %v7225_v27  ;;  %4214 = vmatpush1.bf16.msra.mxu1 %v7228_v63  ;;  %v8403_v35 = vcombine.low %v8401_v33, %v8402_v10 }
 0x7b5   :  { %4174 = vmatprep.subr.bf16.mxu0 %v7231_v14  ;;  %4215 = vmatprep.subr.bf16.mxu1 %v7234_v48  ;;  %v7509_v14 = vld [vmem:[#allocation12 + $0xc] ss:$16 sps:$4 sm:$0xff]   ;;  %v7512_v48 = vld [vmem:[#allocation12] ss:$16 sps:$4 sm:$0xff]  }
 0x7b8   :  { %4175 = vmatpush1.bf16.msra.mxu0 %v7237_v47  ;;  %4216 = vmatpush1.bf16.msra.mxu1 %v7240_v24  ;;  %v7518_v47 = vld [vmem:[#allocation12 + $0x24] ss:$16 sps:$4 sm:$0xff]   ;;  %v7521_v24 = vld [vmem:[#allocation12 + $0x2c] ss:$16 sps:$4 sm:$0xff]  }
 0x7b9   :  { %4176 = vmatprep.subr.bf16.mxu0 %v7243_v46  ;;  %4217 = vmatprep.subr.bf16.mxu1 %v7246_v19  ;;  %v7526_v46 = vld [vmem:[#allocation12 + $0x20] ss:$16 sps:$4 sm:$0xff]   ;;  %v7529_v19 = vld [vmem:[#allocation12 + $0x28] ss:$16 sps:$4 sm:$0xff]  }
 0x7bc   :  { %4177 = vmatpush1.bf16.msra.mxu0 %v8368_v50  ;;  %4218 = vmatpush1.bf16.msra.mxu1 %v8369_v44  ;;  %v7553_v50 = vld [vmem:[#allocation12 + $0x68] ss:$16 sps:$4 sm:$0xff]   ;;  %v7556_v44 = vld [vmem:[#allocation12 + $0x84] ss:$16 sps:$4 sm:$0xff]  }
 0x7bd   :  { %v5273_v60 = vpop.eup %5272  ;;  %4178 = vmatprep.subr.bf16.mxu0 %v8370_v30  ;;  %4219 = vmatprep.subr.bf16.mxu1 %v7258_v49  ;;  %v7559_v30 = vld [vmem:[#allocation12 + $0x8c] ss:$16 sps:$4 sm:$0xff]  }
 0x7be   :  { %v4042_v17 = vmul.f32 %v5273_v60, %v4037_v20 }
 0x7c0   :  { %v4049_v15 = vsel %vm3755_vm14, %v4042_v17, %v7402_v37  ;;  %v4053_v27 = vsel %vm3755_vm14, %v4042_v17, 0.0  ;;  %4179 = vmatpush1.bf16.msra.mxu0 %v7266_v22  ;;  %4220 = vmatpush1.bf16.msra.mxu1 %v7269_v26  ;;  %v7532_v22 = vld [vmem:[#allocation12 + $0x44] ss:$16 sps:$4 sm:$0xff]   ;;  %v7535_v26 = vld [vmem:[#allocation12 + $0x4c] ss:$16 sps:$4 sm:$0xff]  }
 0x7c1   :  { %4050 = vst [vmem:[#allocation5] sm:$0x3] %v4049_v15  ;;  %4054 = vst [vmem:[#allocation15 + $0xe] sm:$0x3] %v4053_v27  ;;  %4180 = vmatprep.subr.bf16.mxu0 %v7272_v55  ;;  %4221 = vmatprep.subr.bf16.mxu1 %v7275_v41  ;;  %v7506_v55 = vld [vmem:[#allocation12 + $0x4] ss:$16 sps:$4 sm:$0xff]  }
 0x7c2   :  { %v7538_v41 = vld [vmem:[#allocation12 + $0x40] ss:$16 sps:$4 sm:$0xff]   ;;  %v7568_v37 = vld [vmem:[#allocation12 + $0xa4] ss:$16 sps:$4 sm:$0xff]  }
 0x7c4   :  { %4181 = vmatpush1.bf16.msra.mxu0 %v8371_v6  ;;  %4222 = vmatpush1.bf16.msra.mxu1 %v8372_v0  ;;  %v7562_v6 = vld [vmem:[#allocation12 + $0x80] ss:$16 sps:$4 sm:$0xff]   ;;  %v7565_v0 = vld [vmem:[#allocation12 + $0x88] ss:$16 sps:$4 sm:$0xff]  }
 0x7c5   :  { %4182 = vmatprep.subr.bf16.mxu0 %v7284_v3  ;;  %4223 = vmatprep.subr.bf16.mxu1 %v7287_v11  ;;  %v7541_v3 = vld [vmem:[#allocation12 + $0x48] ss:$16 sps:$4 sm:$0xff]   ;;  %v7544_v11 = vld [vmem:[#allocation12 + $0x64] ss:$16 sps:$4 sm:$0xff]  }
 0x7c8   :  { %4183 = vmatpush1.bf16.msra.mxu0 %v7290_v59  ;;  %4224 = vmatpush1.bf16.msra.mxu1 %v7293_v16  ;;  %v7502_v49 = vld [vmem:[#allocation5] sm:$0x3]  ;;  %v7515_v16 = vld [vmem:[#allocation12 + $0x8] ss:$16 sps:$4 sm:$0xff]   ;;  %v7547_v59 = vld [vmem:[#allocation12 + $0x6c] ss:$16 sps:$4 sm:$0xff]  }
 0x7c9   :  { %v4167_v63 = vpack.c.bf16 %v7502_v49, %v7502_v49  ;;  %4341 = vmatprep.subr.bf16.mxu0 %v7506_v55  ;;  %4382 = vmatprep.subr.bf16.mxu1 %v7509_v14 }
 0x7cb   :  { %4201 = vmatmul.mubr.bf16.vlgmr.msra.gmra.mrb[108].mxu0 %v4167_v63  ;;  %4242 = vmatmul.mubr.bf16.vlgmr.msra.gmra.mrb[108].mxu1 %v4167_v63 }
 0x7cc   :  { %4342 = vmatpush1.bf16.msra.mxu0 %v7512_v48  ;;  %4383 = vmatpush1.bf16.msra.mxu1 %v7515_v16 }
 0x7cd   :  { %4343 = vmatprep.subr.bf16.mxu0 %v7518_v47  ;;  %4384 = vmatprep.subr.bf16.mxu1 %v7521_v24 }
 0x7ce   :  { %4373 = vmatprep.mubr.bf16.mxu0 %v8115_v57  ;;  %4414 = vmatprep.mubr.bf16.mxu1 %v8115_v57 }
 0x7d0   :  { %4344 = vmatpush1.bf16.msra.mxu0 %v7526_v46  ;;  %4385 = vmatpush1.bf16.msra.mxu1 %v7529_v19 }
 0x7d1   :  { %4345 = vmatprep.subr.bf16.mxu0 %v7532_v22  ;;  %4386 = vmatprep.subr.bf16.mxu1 %v7535_v26 }
 0x7d4   :  { %4346 = vmatpush1.bf16.msra.mxu0 %v7538_v41  ;;  %4387 = vmatpush1.bf16.msra.mxu1 %v7541_v3 }
 0x7d5   :  { %4347 = vmatprep.subr.bf16.mxu0 %v7544_v11  ;;  %4388 = vmatprep.subr.bf16.mxu1 %v7547_v59 }
 0x7d8   :  { %4348 = vmatpush1.bf16.msra.mxu0 %v7550_v34  ;;  %4389 = vmatpush1.bf16.msra.mxu1 %v7553_v50 }
 0x7d9   :  { %4349 = vmatprep.subr.bf16.mxu0 %v7556_v44  ;;  %4390 = vmatprep.subr.bf16.mxu1 %v7559_v30 }
 0x7dc   :  { %4350 = vmatpush1.bf16.msra.mxu0 %v7562_v6  ;;  %4391 = vmatpush1.bf16.msra.mxu1 %v7565_v0 }
 0x7dd   :  { %4351 = vmatprep.subr.bf16.mxu0 %v7568_v37  ;;  %4392 = vmatprep.subr.bf16.mxu1 %v7571_v61 }
 0x7e0   :  { %4352 = vmatpush1.bf16.msra.mxu0 %v7574_v51  ;;  %4393 = vmatpush1.bf16.msra.mxu1 %v7577_v58 }
 0x7e1   :  { %4353 = vmatprep.subr.bf16.mxu0 %v7580_v9  ;;  %4394 = vmatprep.subr.bf16.mxu1 %v7583_v53 }
 0x7e4   :  { %4354 = vmatpush1.bf16.msra.mxu0 %v7586_v43  ;;  %4395 = vmatpush1.bf16.msra.mxu1 %v7589_v45 }
 0x7e5   :  { %4355 = vmatprep.subr.bf16.mxu0 %v7592_v39  ;;  %4396 = vmatprep.subr.bf16.mxu1 %v7595_v31 }
 0x7e8   :  { %4356 = vmatpush1.bf16.msra.mxu0 %v7598_v62  ;;  %4397 = vmatpush1.bf16.msra.mxu1 %v7601_v25 }
 0x7e9   :  { %4448 = vmatprep.subr.bf16.mxu0 %v7604_v36  ;;  %4489 = vmatprep.subr.bf16.mxu1 %v7607_v56 }
 0x87e   :  { %v4095_v32 = vpop.f32.mrb[104].mxu0  ;;  %v4136_v54 = vpop.f32.mrb[104].mxu1 }
 0x87f   :  { %v4097_v2 = vpop.f32.mrb[105].mxu0  ;;  %v4138_v21 = vpop.f32.mrb[105].mxu1 }
 0x880   :  { %v4147_v29 = vcombine.low %v4095_v32, %v4097_v2  ;;  %v4148_v28 = vcombine.low %v4136_v54, %v4138_v21  ;;  %v4099_v38 = vpop.f32.mrb[106].mxu0  ;;  %v4140_v8 = vpop.f32.mrb[106].mxu1 }
 0x881   :  { %v4100_v40 = vpop.f32.mrb[107].mxu0  ;;  %v4141_v13 = vpop.f32.mrb[107].mxu1 }
 0x882   :  { %v4155_v4 = vrot.slane %v4147_v29, %v6141_v42  ;;  %v4162_v1 = vrot.slane %v4148_v28, %v6141_v42  ;;  %v4056_v29 = vld [vmem:[#allocation4] sm:$0x3] }
 0x884   :  { %v4163_v12 = vcombine.low %v4155_v4, %v4162_v1  ;;  %v7631_v4 = vld [vmem:[#allocation13] ss:$16 sps:$4 sm:$0xff]  }
 0x886   :  { %v4165_v7 = vadd.f32 %v4163_v12, %v8403_v35 }
 0x888   :  { %v4273_v52 = vmul.f32 0.5, %v4165_v7  ;;  %v4278_v5 = vrot.slane %v4165_v7, 2  ;;  %v4284_v20 = vrot.slane %v4165_v7, 4  ;;  %v4287_v60 = vrot.slane %v4165_v7, 6 }
 0x88a   :  { %5274 = vtanh.f32 %v4273_v52  ;;  %v4280_v23 = vmul.f32 0.5, %v4278_v5  ;;  %v4289_v17 = vmul.f32 0.5, %v4287_v60 }
 0x88c   :  { %5276 = vtanh.f32 %v4280_v23 }
 0x88d   :  { %5278 = vtanh.f32 %v4284_v20 }
 0x88e   :  { %5280 = vtanh.f32 %v4289_v17 }
 0x894   :  { %v5275_v15 = vpop.eup %5274 }
 0x895   :  { %v4275_v27 = vmul.f32 0.5, %v5275_v15 }
 0x896   :  { %v5277_v63 = vpop.eup %5276 }
 0x897   :  { %v4276_v32 = vadd.f32 0.5, %v4275_v27  ;;  %v4282_v54 = vmul.f32 0.5, %v5277_v63  ;;  %v5279_v21 = vpop.eup %5278  ;;  %v8405_v63 = vld [vmem:[#allocation24_spill] sm:$0xff] }
 0x898   :  { %v5281_v5 = vpop.eup %5280 }
 0x899   :  { %v4283_v2 = vadd.f32 0.5, %v4282_v54  ;;  %v4294_v38 = vmul.f32 %v5279_v21, %v4276_v32  ;;  %v4291_v15 = vmul.f32 0.5, %v5281_v5  ;;  %v8406_v32 = vld [vmem:[#allocation58_spill] sm:$0xff] }
 0x89a   :  { %v8407_v54 = vcombine.low %v8405_v63, %v8406_v32  ;;  %v4058_v32 = vld [vmem:[#allocation6] sm:$0x3] }
 0x89b   :  { %v4293_v28 = vmul.f32 %v4283_v2, %v4056_v29  ;;  %v4292_v21 = vadd.f32 0.5, %v4291_v15  ;;  %v7637_v15 = vld [vmem:[#allocation13 + $0x24] ss:$16 sps:$4 sm:$0xff]  }
 0x89d   :  { %v4295_v8 = vadd.f32 %v4294_v38, %v4293_v28 }
 0x89e   :  { %v4202_v40 = vpop.f32.mrb[108].mxu0  ;;  %v4243_v13 = vpop.f32.mrb[108].mxu1 }
 0x89f   :  { %5282 = vtanh.f32 %v4295_v8  ;;  %v4323_v1 = vsel %vm3470_vm13, %v4295_v8, %v4056_v29  ;;  %v4204_v12 = vpop.f32.mrb[109].mxu0  ;;  %v4245_v33 = vpop.f32.mrb[109].mxu1 }
 0x8a0   :  { %4324 = vst [vmem:[#allocation4] sm:$0x3] %v4323_v1  ;;  %v4254_v10 = vcombine.low %v4202_v40, %v4204_v12  ;;  %v4255_v35 = vcombine.low %v4243_v13, %v4245_v33  ;;  %v4206_v7 = vpop.f32.mrb[110].mxu0  ;;  %v4247_v52 = vpop.f32.mrb[110].mxu1 }
 0x8a1   :  { %v4207_v23 = vpop.f32.mrb[111].mxu0  ;;  %v4248_v20 = vpop.f32.mrb[111].mxu1 }
 0x8a2   :  { %v4262_v60 = vrot.slane %v4254_v10, %v6141_v42  ;;  %v4269_v17 = vrot.slane %v4255_v35, %v6141_v42 }
 0x8a4   :  { %v4270_v27 = vcombine.low %v4262_v60, %v4269_v17  ;;  %v7634_v60 = vld [vmem:[#allocation13 + $0x8] ss:$16 sps:$4 sm:$0xff]  }
 0x8a6   :  { %v4272_v2 = vadd.f32 %v4270_v27, %v8407_v54  ;;  %v7640_v27 = vld [vmem:[#allocation13 + $0x2c] ss:$16 sps:$4 sm:$0xff]  }
 0x8a8   :  { %v4298_v29 = vmul.f32 0.5, %v4272_v2  ;;  %v4303_v28 = vrot.slane %v4272_v2, 2  ;;  %v4309_v12 = vrot.slane %v4272_v2, 4  ;;  %v4312_v33 = vrot.slane %v4272_v2, 6 }
 0x8a9   :  { %v5283_v38 = vpop.eup %5282 }
 0x8aa   :  { %v4297_v8 = vmul.f32 %v5283_v38, %v4292_v21  ;;  %5284 = vtanh.f32 %v4298_v29  ;;  %v4305_v40 = vmul.f32 0.5, %v4303_v28  ;;  %v4314_v10 = vmul.f32 0.5, %v4312_v33  ;;  %v7645_v21 = vld [vmem:[#allocation13 + $0x20] ss:$16 sps:$4 sm:$0xff]   ;;  %v7648_v29 = vld [vmem:[#allocation13 + $0x28] ss:$16 sps:$4 sm:$0xff]  }
 0x8ab   :  { %v7651_v38 = vld [vmem:[#allocation13 + $0x44] ss:$16 sps:$4 sm:$0xff]  }
 0x8ac   :  { %v4325_v13 = vsel %vm3470_vm13, %v4297_v8, %v7459_v18  ;;  %v4331_v1 = vsel %vm3470_vm13, %v4297_v8, 0.0  ;;  %5286 = vtanh.f32 %v4305_v40  ;;  %v7654_v8 = vld [vmem:[#allocation13 + $0x4c] ss:$16 sps:$4 sm:$0xff]   ;;  %v7715_v40 = vld [vmem:[#allocation13 + $0xc8] ss:$16 sps:$4 sm:$0xff]  }
 0x8ad   :  { %4332 = vst [vmem:[#allocation15 + $0x14] sm:$0x3] %v4331_v1  ;;  %4326 = vst [vmem:[#allocation3] sm:$0x3] %v4325_v13  ;;  %5288 = vtanh.f32 %v4309_v12  ;;  %v7659_v1 = vld [vmem:[#allocation13 + $0x40] ss:$16 sps:$4 sm:$0xff]  }
 0x8ae   :  { %5290 = vtanh.f32 %v4314_v10  ;;  %v7662_v12 = vld [vmem:[#allocation13 + $0x48] ss:$16 sps:$4 sm:$0xff]   ;;  %v7665_v10 = vld [vmem:[#allocation13 + $0x64] ss:$16 sps:$4 sm:$0xff]   ;;  %8413 = vst [vmem:[#allocation76_spill] sm:$0xff] %v7715_v40 }
 0x8b4   :  { %v5285_v35 = vpop.eup %5284  ;;  %v7627_v7 = vld [vmem:[#allocation3] sm:$0x3] }
 0x8b5   :  { %v4300_v52 = vmul.f32 0.5, %v5285_v35  ;;  %v4340_v5 = vpack.c.bf16 %v7627_v7, %v7627_v7  ;;  %v7668_v35 = vld [vmem:[#allocation13 + $0x6c] ss:$16 sps:$4 sm:$0xff]  }
 0x8b6   :  { %v5287_v23 = vpop.eup %5286 }
 0x8b7   :  { %v4301_v20 = vadd.f32 0.5, %v4300_v52  ;;  %v4307_v18 = vmul.f32 0.5, %v5287_v23  ;;  %4374 = vmatmul.mubr.bf16.vlgmr.msra.gmra.mrb[112].mxu0 %v4340_v5  ;;  %4415 = vmatmul.mubr.bf16.vlgmr.msra.gmra.mrb[112].mxu1 %v4340_v5  ;;  %v5289_v63 = vpop.eup %5288  ;;  %v7671_v5 = vld [vmem:[#allocation13 + $0x60] ss:$16 sps:$4 sm:$0xff]   ;;  %v7674_v23 = vld [vmem:[#allocation13 + $0x68] ss:$16 sps:$4 sm:$0xff]  }
 0x8b8   :  { %4449 = vmatpush1.bf16.msra.mxu0 %v7631_v4  ;;  %4490 = vmatpush1.bf16.msra.mxu1 %v7634_v60  ;;  %v5291_v33 = vpop.eup %5290 }
 0x8b9   :  { %v4308_v17 = vadd.f32 0.5, %v4307_v18  ;;  %4450 = vmatprep.subr.bf16.mxu0 %v7637_v15  ;;  %4491 = vmatprep.subr.bf16.mxu1 %v7640_v27  ;;  %v4319_v2 = vmul.f32 %v5289_v63, %v4301_v20  ;;  %v4316_v52 = vmul.f32 0.5, %v5291_v33  ;;  %v7677_v20 = vld [vmem:[#allocation13 + $0x84] ss:$16 sps:$4 sm:$0xff]   ;;  %v7680_v18 = vld [vmem:[#allocation13 + $0x8c] ss:$16 sps:$4 sm:$0xff]  }
 0x8ba   :  { %4480 = vmatprep.mubr.bf16.mxu0 %v8115_v57  ;;  %4521 = vmatprep.mubr.bf16.mxu1 %v8115_v57  ;;  %v7683_v63 = vld [vmem:[#allocation13 + $0x80] ss:$16 sps:$4 sm:$0xff]  }
 0x8bb   :  { %v4318_v54 = vmul.f32 %v4308_v17, %v4058_v32  ;;  %v4317_v17 = vadd.f32 0.5, %v4316_v52  ;;  %8409 = vst [vmem:[#allocation66_spill] sm:$0xff] %v7683_v63 }
 0x8bc   :  { %4451 = vmatpush1.bf16.msra.mxu0 %v7645_v21  ;;  %4492 = vmatpush1.bf16.msra.mxu1 %v7648_v29 }
 0x8bd   :  { %v4320_v28 = vadd.f32 %v4319_v2, %v4318_v54  ;;  %4452 = vmatprep.subr.bf16.mxu0 %v7651_v38  ;;  %4493 = vmatprep.subr.bf16.mxu1 %v7654_v8  ;;  %v7689_v2 = vld [vmem:[#allocation13 + $0xa4] ss:$16 sps:$4 sm:$0xff]  }
 0x8be   :  { %8411 = vst [vmem:[#allocation57_spill] sm:$0xff] %v7689_v2 }
 0x8bf   :  { %5292 = vtanh.f32 %v4320_v28  ;;  %v4327_v13 = vsel %vm3461_vm12, %v4320_v28, %v4058_v32  ;;  %v7686_v32 = vld [vmem:[#allocation13 + $0x88] ss:$16 sps:$4 sm:$0xff]   ;;  %v7692_v28 = vld [vmem:[#allocation13 + $0xac] ss:$16 sps:$4 sm:$0xff]  }
 0x8c0   :  { %4328 = vst [vmem:[#allocation6] sm:$0x3] %v4327_v13  ;;  %4453 = vmatpush1.bf16.msra.mxu0 %v7659_v1  ;;  %4494 = vmatpush1.bf16.msra.mxu1 %v7662_v12  ;;  %8410 = vst [vmem:[#allocation56_spill] sm:$0xff] %v7686_v32 }
 0x8c1   :  { %4454 = vmatprep.subr.bf16.mxu0 %v7665_v10  ;;  %4495 = vmatprep.subr.bf16.mxu1 %v7668_v35 }
 0x8c4   :  { %4455 = vmatpush1.bf16.msra.mxu0 %v7671_v5  ;;  %4496 = vmatpush1.bf16.msra.mxu1 %v7674_v23 }
 0x8c5   :  { %4456 = vmatprep.subr.bf16.mxu0 %v7677_v20  ;;  %4497 = vmatprep.subr.bf16.mxu1 %v7680_v18 }
 0x8c8   :  { %4457 = vmatpush1.bf16.msra.mxu0 %v7683_v63  ;;  %4498 = vmatpush1.bf16.msra.mxu1 %v7686_v32  ;;  %v7700_v63 = vld [vmem:[#allocation13 + $0xa0] ss:$16 sps:$4 sm:$0xff]   ;;  %v7703_v32 = vld [vmem:[#allocation13 + $0xa8] ss:$16 sps:$4 sm:$0xff]  }
 0x8c9   :  { %v5293_v54 = vpop.eup %5292  ;;  %4458 = vmatprep.subr.bf16.mxu0 %v7689_v2  ;;  %4499 = vmatprep.subr.bf16.mxu1 %v7692_v28  ;;  %v7706_v2 = vld [vmem:[#allocation13 + $0xc4] ss:$16 sps:$4 sm:$0xff]  }
 0x8ca   :  { %v4322_v13 = vmul.f32 %v5293_v54, %v4317_v17  ;;  %v7709_v17 = vld [vmem:[#allocation13 + $0xcc] ss:$16 sps:$4 sm:$0xff]   ;;  %v7718_v54 = vld [vmem:[#allocation13 + $0xe4] ss:$16 sps:$4 sm:$0xff]  }
 0x8cc   :  { %v4329_v33 = vsel %vm3461_vm12, %v4322_v13, %v7502_v49  ;;  %v4333_v52 = vsel %vm3461_vm12, %v4322_v13, 0.0  ;;  %4459 = vmatpush1.bf16.msra.mxu0 %v7700_v63  ;;  %4500 = vmatpush1.bf16.msra.mxu1 %v7703_v32  ;;  %v7712_v49 = vld [vmem:[#allocation13 + $0xc0] ss:$16 sps:$4 sm:$0xff]   ;;  %v7721_v13 = vld [vmem:[#allocation13 + $0xec] ss:$16 sps:$4 sm:$0xff]  }
 0x8cd   :  { %4334 = vst [vmem:[#allocation15 + $0xa] sm:$0x3] %v4333_v52  ;;  %4330 = vst [vmem:[#allocation5] sm:$0x3] %v4329_v33  ;;  %4460 = vmatprep.subr.bf16.mxu0 %v7706_v2  ;;  %4501 = vmatprep.subr.bf16.mxu1 %v7709_v17  ;;  %v7724_v33 = vld [vmem:[#allocation13 + $0xe0] ss:$16 sps:$4 sm:$0xff]  }
 0x8ce   :  { %8412 = vst [vmem:[#allocation75_spill] sm:$0xff] %v7712_v49  ;;  %v7727_v52 = vld [vmem:[#allocation13 + $0xe8] ss:$16 sps:$4 sm:$0xff]  }
 0x8d0   :  { %4461 = vmatpush1.bf16.msra.mxu0 %v7712_v49  ;;  %4502 = vmatpush1.bf16.msra.mxu1 %v7715_v40 }
 0x8d1   :  { %4462 = vmatprep.subr.bf16.mxu0 %v7718_v54  ;;  %4503 = vmatprep.subr.bf16.mxu1 %v7721_v13 }
 0x8d4   :  { %4463 = vmatpush1.bf16.msra.mxu0 %v7724_v33  ;;  %4504 = vmatpush1.bf16.msra.mxu1 %v7727_v52  ;;  %v7730_v49 = vld [vmem:[#allocation5] sm:$0x3] }
 0x8d5   :  { %v4447_v40 = vpack.c.bf16 %v7730_v49, %v7730_v49  ;;  %4621 = vmatprep.subr.bf16.mxu0 %v7506_v55  ;;  %4662 = vmatprep.subr.bf16.mxu1 %v7509_v14 }
 0x8d7   :  { %4481 = vmatmul.mubr.bf16.vlgmr.msra.gmra.mrb[116].mxu0 %v4447_v40  ;;  %4522 = vmatmul.mubr.bf16.vlgmr.msra.gmra.mrb[116].mxu1 %v4447_v40 }
 0x8d8   :  { %4622 = vmatpush1.bf16.msra.mxu0 %v7512_v48  ;;  %4663 = vmatpush1.bf16.msra.mxu1 %v7515_v16 }
 0x8d9   :  { %4623 = vmatprep.subr.bf16.mxu0 %v7518_v47  ;;  %4664 = vmatprep.subr.bf16.mxu1 %v7521_v24 }
 0x8da   :  { %4653 = vmatprep.mubr.bf16.mxu0 %v8115_v57  ;;  %4694 = vmatprep.mubr.bf16.mxu1 %v8115_v57 }
 0x8dc   :  { %4624 = vmatpush1.bf16.msra.mxu0 %v7526_v46  ;;  %4665 = vmatpush1.bf16.msra.mxu1 %v7529_v19 }
 0x8dd   :  { %4625 = vmatprep.subr.bf16.mxu0 %v7532_v22  ;;  %4666 = vmatprep.subr.bf16.mxu1 %v7535_v26 }
 0x8e0   :  { %4626 = vmatpush1.bf16.msra.mxu0 %v7538_v41  ;;  %4667 = vmatpush1.bf16.msra.mxu1 %v7541_v3 }
 0x8e1   :  { %4627 = vmatprep.subr.bf16.mxu0 %v7544_v11  ;;  %4668 = vmatprep.subr.bf16.mxu1 %v7547_v59  ;;  %v8414_v59 = vld [vmem:[#allocation77_spill] sm:$0xff] }
 0x8e4   :  { %4628 = vmatpush1.bf16.msra.mxu0 %v7550_v34  ;;  %4669 = vmatpush1.bf16.msra.mxu1 %v7553_v50  ;;  %v8415_v34 = vld [vmem:[#allocation78_spill] sm:$0xff] }
 0x8e5   :  { %4629 = vmatprep.subr.bf16.mxu0 %v7556_v44  ;;  %4670 = vmatprep.subr.bf16.mxu1 %v7559_v30  ;;  %v8416_v50 = vcombine.low %v8414_v59, %v8415_v34 }
 0x8e8   :  { %4630 = vmatpush1.bf16.msra.mxu0 %v7562_v6  ;;  %4671 = vmatpush1.bf16.msra.mxu1 %v7565_v0 }
 0x8e9   :  { %4631 = vmatprep.subr.bf16.mxu0 %v7568_v37  ;;  %4672 = vmatprep.subr.bf16.mxu1 %v7571_v61 }
 0x8ec   :  { %4632 = vmatpush1.bf16.msra.mxu0 %v7574_v51  ;;  %4673 = vmatpush1.bf16.msra.mxu1 %v7577_v58 }
 0x8ed   :  { %4633 = vmatprep.subr.bf16.mxu0 %v7580_v9  ;;  %4674 = vmatprep.subr.bf16.mxu1 %v7583_v53 }
 0x8f0   :  { %4634 = vmatpush1.bf16.msra.mxu0 %v7586_v43  ;;  %4675 = vmatpush1.bf16.msra.mxu1 %v7589_v45 }
 0x8f1   :  { %4635 = vmatprep.subr.bf16.mxu0 %v7592_v39  ;;  %4676 = vmatprep.subr.bf16.mxu1 %v7595_v31 }
 0x8f4   :  { %4636 = vmatpush1.bf16.msra.mxu0 %v7598_v62  ;;  %4677 = vmatpush1.bf16.msra.mxu1 %v7601_v25  ;;  %v4336_v62 = vld [vmem:[#allocation4] sm:$0x3] }
 0x8f5   :  { %4728 = vmatprep.subr.bf16.mxu0 %v7604_v36  ;;  %4769 = vmatprep.subr.bf16.mxu1 %v7607_v56 }
 0x98a   :  { %v4375_v55 = vpop.f32.mrb[112].mxu0  ;;  %v4416_v14 = vpop.f32.mrb[112].mxu1 }
 0x98b   :  { %v4377_v48 = vpop.f32.mrb[113].mxu0  ;;  %v4418_v16 = vpop.f32.mrb[113].mxu1 }
 0x98c   :  { %v4427_v47 = vcombine.low %v4375_v55, %v4377_v48  ;;  %v4428_v24 = vcombine.low %v4416_v14, %v4418_v16  ;;  %v4379_v46 = vpop.f32.mrb[114].mxu0  ;;  %v4420_v19 = vpop.f32.mrb[114].mxu1 }
 0x98d   :  { %v4380_v22 = vpop.f32.mrb[115].mxu0  ;;  %v4421_v26 = vpop.f32.mrb[115].mxu1 }
 0x98e   :  { %v4435_v41 = vrot.slane %v4427_v47, %v6141_v42  ;;  %v4442_v3 = vrot.slane %v4428_v24, %v6141_v42 }
 0x990   :  { %v4443_v11 = vcombine.low %v4435_v41, %v4442_v3 }
 0x992   :  { %v4445_v44 = vadd.f32 %v4443_v11, %v8416_v50 }
 0x994   :  { %v4553_v30 = vmul.f32 0.5, %v4445_v44  ;;  %v4558_v6 = vrot.slane %v4445_v44, 2  ;;  %v4564_v37 = vrot.slane %v4445_v44, 4  ;;  %v4567_v61 = vrot.slane %v4445_v44, 6  ;;  %v8418_v44 = vld [vmem:[#allocation23_spill] sm:$0xff] }
 0x996   :  { %5294 = vtanh.f32 %v4553_v30  ;;  %v4560_v0 = vmul.f32 0.5, %v4558_v6  ;;  %v4569_v51 = vmul.f32 0.5, %v4567_v61  ;;  %v8419_v30 = vld [vmem:[#allocation55_spill] sm:$0xff] }
 0x997   :  { %v8420_v6 = vcombine.low %v8418_v44, %v8419_v30 }
 0x998   :  { %5296 = vtanh.f32 %v4560_v0 }
 0x999   :  { %5298 = vtanh.f32 %v4564_v37 }
 0x99a   :  { %5300 = vtanh.f32 %v4569_v51 }
 0x9a0   :  { %v5295_v58 = vpop.eup %5294 }
 0x9a1   :  { %v4555_v9 = vmul.f32 0.5, %v5295_v58 }
 0x9a2   :  { %v5297_v53 = vpop.eup %5296 }
 0x9a3   :  { %v4556_v43 = vadd.f32 0.5, %v4555_v9  ;;  %v4562_v45 = vmul.f32 0.5, %v5297_v53  ;;  %v5299_v31 = vpop.eup %5298 }
 0x9a4   :  { %v5301_v26 = vpop.eup %5300 }
 0x9a5   :  { %v4563_v39 = vadd.f32 0.5, %v4562_v45  ;;  %v4574_v36 = vmul.f32 %v5299_v31, %v4556_v43  ;;  %v4571_v34 = vmul.f32 0.5, %v5301_v26 }
 0x9a7   :  { %v4573_v25 = vmul.f32 %v4563_v39, %v4336_v62  ;;  %v4572_v37 = vadd.f32 0.5, %v4571_v34 }
 0x9a9   :  { %v4575_v56 = vadd.f32 %v4574_v36, %v4573_v25 }
 0x9aa   :  { %v4482_v40 = vpop.f32.mrb[116].mxu0  ;;  %v4523_v55 = vpop.f32.mrb[116].mxu1 }
 0x9ab   :  { %5302 = vtanh.f32 %v4575_v56  ;;  %v4603_v48 = vsel %vm3176_vm11, %v4575_v56, %v4336_v62  ;;  %v4484_v16 = vpop.f32.mrb[117].mxu0  ;;  %v4525_v47 = vpop.f32.mrb[117].mxu1 }
 0x9ac   :  { %4604 = vst [vmem:[#allocation4] sm:$0x3] %v4603_v48  ;;  %v4534_v24 = vcombine.low %v4482_v40, %v4484_v16  ;;  %v4535_v46 = vcombine.low %v4523_v55, %v4525_v47  ;;  %v4486_v19 = vpop.f32.mrb[118].mxu0  ;;  %v4527_v22 = vpop.f32.mrb[118].mxu1  ;;  %v4338_v47 = vld [vmem:[#allocation6] sm:$0x3] }
 0x9ad   :  { %v4487_v41 = vpop.f32.mrb[119].mxu0  ;;  %v4528_v3 = vpop.f32.mrb[119].mxu1 }
 0x9ae   :  { %v4542_v11 = vrot.slane %v4534_v24, %v6141_v42  ;;  %v4549_v59 = vrot.slane %v4535_v46, %v6141_v42  ;;  %v8427_v41 = vld [vmem:[#allocation79_spill] sm:$0xff]  ;;  %v8428_v3 = vld [vmem:[#allocation80_spill] sm:$0xff] }
 0x9b0   :  { %v4550_v50 = vcombine.low %v4542_v11, %v4549_v59  ;;  %v8429_v11 = vcombine.low %v8427_v41, %v8428_v3 }
 0x9b2   :  { %v4552_v0 = vadd.f32 %v4550_v50, %v8420_v6 }
 0x9b4   :  { %v4578_v61 = vmul.f32 0.5, %v4552_v0  ;;  %v4583_v51 = vrot.slane %v4552_v0, 2  ;;  %v4589_v39 = vrot.slane %v4552_v0, 4  ;;  %v4592_v31 = vrot.slane %v4552_v0, 6 }
 0x9b5   :  { %v5303_v58 = vpop.eup %5302 }
 0x9b6   :  { %v4577_v9 = vmul.f32 %v5303_v58, %v4572_v37  ;;  %5304 = vtanh.f32 %v4578_v61  ;;  %v4585_v53 = vmul.f32 0.5, %v4583_v51  ;;  %v4594_v62 = vmul.f32 0.5, %v4592_v31 }
 0x9b8   :  { %v4605_v43 = vsel %vm3176_vm11, %v4577_v9, %v7627_v7  ;;  %v4611_v45 = vsel %vm3176_vm11, %v4577_v9, 0.0  ;;  %5306 = vtanh.f32 %v4585_v53 }
 0x9b9   :  { %4612 = vst [vmem:[#allocation15 + $0x18] sm:$0x3] %v4611_v45  ;;  %4606 = vst [vmem:[#allocation3] sm:$0x3] %v4605_v43  ;;  %5308 = vtanh.f32 %v4589_v39  ;;  %v4616_v45 = vld [vmem:[#allocation4] sm:$0x3] }
 0x9ba   :  { %5310 = vtanh.f32 %v4594_v62 }
 0x9c0   :  { %v5305_v25 = vpop.eup %5304  ;;  %v7787_v36 = vld [vmem:[#allocation3] sm:$0x3] }
 0x9c1   :  { %v4580_v56 = vmul.f32 0.5, %v5305_v25  ;;  %v4620_v40 = vpack.c.bf16 %v7787_v36, %v7787_v36 }
 0x9c2   :  { %v5307_v55 = vpop.eup %5306 }
 0x9c3   :  { %v4581_v48 = vadd.f32 0.5, %v4580_v56  ;;  %v4587_v7 = vmul.f32 0.5, %v5307_v55  ;;  %4654 = vmatmul.mubr.bf16.vlgmr.msra.gmra.mrb[120].mxu0 %v4620_v40  ;;  %4695 = vmatmul.mubr.bf16.vlgmr.msra.gmra.mrb[120].mxu1 %v4620_v40  ;;  %v5309_v16 = vpop.eup %5308 }
 0x9c4   :  { %4729 = vmatpush1.bf16.msra.mxu0 %v7631_v4  ;;  %4770 = vmatpush1.bf16.msra.mxu1 %v7634_v60 }
 0x9c5   :  { %v4588_v14 = vadd.f32 0.5, %v4587_v7  ;;  %4730 = vmatprep.subr.bf16.mxu0 %v7637_v15  ;;  %4771 = vmatprep.subr.bf16.mxu1 %v7640_v27  ;;  %v4599_v46 = vmul.f32 %v5309_v16, %v4581_v48 }
 0x9c6   :  { %4760 = vmatprep.mubr.bf16.mxu0 %v8115_v57  ;;  %4801 = vmatprep.mubr.bf16.mxu1 %v8115_v57  ;;  %v5311_v57 = vpop.eup %5310 }
 0x9c7   :  { %v4598_v24 = vmul.f32 %v4588_v14, %v4338_v47  ;;  %v4596_v27 = vmul.f32 0.5, %v5311_v57 }
 0x9c8   :  { %4731 = vmatpush1.bf16.msra.mxu0 %v7645_v21  ;;  %4772 = vmatpush1.bf16.msra.mxu1 %v7648_v29  ;;  %v8422_v29 = vld [vmem:[#allocation66_spill] sm:$0xff] }
 0x9c9   :  { %v4600_v4 = vadd.f32 %v4599_v46, %v4598_v24  ;;  %4732 = vmatprep.subr.bf16.mxu0 %v7651_v38  ;;  %4773 = vmatprep.subr.bf16.mxu1 %v7654_v8  ;;  %v4597_v21 = vadd.f32 0.5, %v4596_v27  ;;  %v8423_v38 = vld [vmem:[#allocation56_spill] sm:$0xff] }
 0x9cb   :  { %5312 = vtanh.f32 %v4600_v4  ;;  %v4607_v15 = vsel %vm3167_vm10, %v4600_v4, %v4338_v47 }
 0x9cc   :  { %4608 = vst [vmem:[#allocation6] sm:$0x3] %v4607_v15  ;;  %4733 = vmatpush1.bf16.msra.mxu0 %v7659_v1  ;;  %4774 = vmatpush1.bf16.msra.mxu1 %v7662_v12  ;;  %v8424_v1 = vld [vmem:[#allocation57_spill] sm:$0xff] }
 0x9cd   :  { %4734 = vmatprep.subr.bf16.mxu0 %v7665_v10  ;;  %4775 = vmatprep.subr.bf16.mxu1 %v7668_v35 }
 0x9d0   :  { %4735 = vmatpush1.bf16.msra.mxu0 %v7671_v5  ;;  %4776 = vmatpush1.bf16.msra.mxu1 %v7674_v23  ;;  %v8425_v5 = vld [vmem:[#allocation75_spill] sm:$0xff]  ;;  %v8426_v23 = vld [vmem:[#allocation76_spill] sm:$0xff] }
 0x9d1   :  { %4736 = vmatprep.subr.bf16.mxu0 %v7677_v20  ;;  %4777 = vmatprep.subr.bf16.mxu1 %v7680_v18 }
 0x9d4   :  { %4737 = vmatpush1.bf16.msra.mxu0 %v8422_v29  ;;  %4778 = vmatpush1.bf16.msra.mxu1 %v8423_v38  ;;  %v8431_v29 = vld [vmem:[#allocation25_spill] sm:$0xff]  ;;  %v8432_v38 = vld [vmem:[#allocation54_spill] sm:$0xff] }
 0x9d5   :  { %v5313_v8 = vpop.eup %5312  ;;  %4738 = vmatprep.subr.bf16.mxu0 %v8424_v1  ;;  %4779 = vmatprep.subr.bf16.mxu1 %v7692_v28 }
 0x9d6   :  { %v4602_v12 = vmul.f32 %v5313_v8, %v4597_v21  ;;  %v8433_v8 = vcombine.low %v8431_v29, %v8432_v38 }
 0x9d8   :  { %v4609_v10 = vsel %vm3167_vm10, %v4602_v12, %v7730_v49  ;;  %v4613_v35 = vsel %vm3167_vm10, %v4602_v12, 0.0  ;;  %4739 = vmatpush1.bf16.msra.mxu0 %v7700_v63  ;;  %4780 = vmatpush1.bf16.msra.mxu1 %v7703_v32 }
 0x9d9   :  { %4614 = vst [vmem:[#allocation15 + $0x6] sm:$0x3] %v4613_v35  ;;  %4610 = vst [vmem:[#allocation5] sm:$0x3] %v4609_v10  ;;  %4740 = vmatprep.subr.bf16.mxu0 %v7706_v2  ;;  %4781 = vmatprep.subr.bf16.mxu1 %v7709_v17 }
 0x9dc   :  { %4741 = vmatpush1.bf16.msra.mxu0 %v8425_v5  ;;  %4782 = vmatpush1.bf16.msra.mxu1 %v8426_v23 }
 0x9dd   :  { %4742 = vmatprep.subr.bf16.mxu0 %v7718_v54  ;;  %4783 = vmatprep.subr.bf16.mxu1 %v7721_v13 }
 0x9e0   :  { %4743 = vmatpush1.bf16.msra.mxu0 %v7724_v33  ;;  %4784 = vmatpush1.bf16.msra.mxu1 %v7727_v52  ;;  %v7830_v20 = vld [vmem:[#allocation5] sm:$0x3] }
 0x9e1   :  { %v4727_v18 = vpack.c.bf16 %v7830_v20, %v7830_v20 }
 0x9e3   :  { %4761 = vmatmul.mubr.bf16.vlgmr.msra.gmra.mrb[124].mxu0 %v4727_v18  ;;  %4802 = vmatmul.mubr.bf16.vlgmr.msra.gmra.mrb[124].mxu1 %v4727_v18 }
 0xa96   :  { %v4655_v63 = vpop.f32.mrb[120].mxu0  ;;  %v4696_v32 = vpop.f32.mrb[120].mxu1 }
 0xa97   :  { %v4657_v2 = vpop.f32.mrb[121].mxu0  ;;  %v4698_v28 = vpop.f32.mrb[121].mxu1 }
 0xa98   :  { %v4707_v17 = vcombine.low %v4655_v63, %v4657_v2  ;;  %v4708_v49 = vcombine.low %v4696_v32, %v4698_v28  ;;  %v4659_v54 = vpop.f32.mrb[122].mxu0  ;;  %v4700_v19 = vpop.f32.mrb[122].mxu1 }
 0xa99   :  { %v4660_v13 = vpop.f32.mrb[123].mxu0  ;;  %v4701_v22 = vpop.f32.mrb[123].mxu1 }
 0xa9a   :  { %v4715_v33 = vrot.slane %v4707_v17, %v6141_v42  ;;  %v4722_v52 = vrot.slane %v4708_v49, %v6141_v42 }
 0xa9c   :  { %v4723_v26 = vcombine.low %v4715_v33, %v4722_v52  ;;  %v4618_v52 = vld [vmem:[#allocation6] sm:$0x3] }
 0xa9e   :  { %v4725_v59 = vadd.f32 %v4723_v26, %v8429_v11 }
 0xaa0   :  { %v4833_v34 = vmul.f32 0.5, %v4725_v59  ;;  %v4838_v50 = vrot.slane %v4725_v59, 2  ;;  %v4844_v30 = vrot.slane %v4725_v59, 4  ;;  %v4847_v6 = vrot.slane %v4725_v59, 6 }
 0xaa2   :  { %5314 = vtanh.f32 %v4833_v34  ;;  %v4840_v44 = vmul.f32 0.5, %v4838_v50  ;;  %v4849_v0 = vmul.f32 0.5, %v4847_v6 }
 0xaa4   :  { %5316 = vtanh.f32 %v4840_v44 }
 0xaa5   :  { %5318 = vtanh.f32 %v4844_v30 }
 0xaa6   :  { %5320 = vtanh.f32 %v4849_v0 }
 0xaac   :  { %v5315_v37 = vpop.eup %5314 }
 0xaad   :  { %v4835_v61 = vmul.f32 0.5, %v5315_v37 }
 0xaae   :  { %v5317_v51 = vpop.eup %5316 }
 0xaaf   :  { %v4836_v58 = vadd.f32 0.5, %v4835_v61  ;;  %v4842_v9 = vmul.f32 0.5, %v5317_v51  ;;  %v5319_v43 = vpop.eup %5318 }
 0xab0   :  { %v5321_v46 = vpop.eup %5320 }
 0xab1   :  { %v4843_v53 = vadd.f32 0.5, %v4842_v9  ;;  %v4854_v31 = vmul.f32 %v5319_v43, %v4836_v58  ;;  %v4851_v27 = vmul.f32 0.5, %v5321_v46 }
 0xab3   :  { %v4853_v39 = vmul.f32 %v4843_v53, %v4616_v45  ;;  %v4852_v12 = vadd.f32 0.5, %v4851_v27 }
 0xab5   :  { %v4855_v62 = vadd.f32 %v4854_v31, %v4853_v39 }
 0xab6   :  { %v4762_v25 = vpop.f32.mrb[124].mxu0  ;;  %v4803_v56 = vpop.f32.mrb[124].mxu1 }
 0xab7   :  { %5322 = vtanh.f32 %v4855_v62  ;;  %v4883_v55 = vsel %vm2883_vm9, %v4855_v62, %v4616_v45  ;;  %v4764_v48 = vpop.f32.mrb[125].mxu0  ;;  %v4805_v7 = vpop.f32.mrb[125].mxu1 }
 0xab8   :  { %4884 = vst [vmem:[#allocation4] sm:$0x3] %v4883_v55  ;;  %v4814_v14 = vcombine.low %v4762_v25, %v4764_v48  ;;  %v4815_v16 = vcombine.low %v4803_v56, %v4805_v7  ;;  %v4766_v47 = vpop.f32.mrb[126].mxu0  ;;  %v4807_v24 = vpop.f32.mrb[126].mxu1 }
 0xab9   :  { %v4767_v4 = vpop.f32.mrb[127].mxu0  ;;  %v4808_v60 = vpop.f32.mrb[127].mxu1 }
 0xaba   :  { %v4822_v15 = vrot.slane %v4814_v14, %v6141_v42  ;;  %v4829_v57 = vrot.slane %v4815_v16, %v6141_v42 }
 0xabc   :  { %v4830_v21 = vcombine.low %v4822_v15, %v4829_v57 }
 0xabe   :  { %v4832_v1 = vadd.f32 %v4830_v21, %v8433_v8 }
 0xac0   :  { %v4858_v10 = vmul.f32 0.5, %v4832_v1  ;;  %v4863_v35 = vrot.slane %v4832_v1, 2  ;;  %v4869_v32 = vrot.slane %v4832_v1, 4  ;;  %v4872_v2 = vrot.slane %v4832_v1, 6 }
 0xac1   :  { %v5323_v5 = vpop.eup %5322 }
 0xac2   :  { %v4857_v23 = vmul.f32 %v5323_v5, %v4852_v12  ;;  %5324 = vtanh.f32 %v4858_v10  ;;  %v4865_v18 = vmul.f32 0.5, %v4863_v35  ;;  %v4874_v28 = vmul.f32 0.5, %v4872_v2 }
 0xac4   :  { %v4885_v63 = vsel %vm2883_vm9, %v4857_v23, %v7787_v36  ;;  %v4891_v42 = vsel %vm2883_vm9, %v4857_v23, 0.0  ;;  %5326 = vtanh.f32 %v4865_v18 }
 0xac5   :  { %4892 = vst [vmem:[#allocation15 + $0x1c] sm:$0x3] %v4891_v42  ;;  %4886 = vst [vmem:[#allocation3] sm:$0x3] %v4885_v63  ;;  %5328 = vtanh.f32 %v4869_v32 }
 0xac6   :  { %5330 = vtanh.f32 %v4874_v28 }
 0xacc   :  { %v5325_v17 = vpop.eup %5324  ;;  %v4895_v49 = vld [vmem:[#allocation3] sm:$0x3] }
 0xacd   :  { %v4860_v54 = vmul.f32 0.5, %v5325_v17  ;;  %4896 = vst [vmem:[#allocation16] sm:$0x3] %v4895_v49 }
 0xace   :  { %v5327_v19 = vpop.eup %5326 }
 0xacf   :  { %v4861_v13 = vadd.f32 0.5, %v4860_v54  ;;  %v4867_v22 = vmul.f32 0.5, %v5327_v19  ;;  %v5329_v36 = vpop.eup %5328 }
 0xad0   :  { %v5331_v34 = vpop.eup %5330 }
 0xad1   :  { %v4868_v33 = vadd.f32 0.5, %v4867_v22  ;;  %v4879_v41 = vmul.f32 %v5329_v36, %v4861_v13  ;;  %v4876_v50 = vmul.f32 0.5, %v5331_v34 }
 0xad3   :  { %v4878_v26 = vmul.f32 %v4868_v33, %v4618_v52  ;;  %v4877_v44 = vadd.f32 0.5, %v4876_v50 }
 0xad5   :  { %v4880_v3 = vadd.f32 %v4879_v41, %v4878_v26 }
 0xad7   :  { %5332 = vtanh.f32 %v4880_v3  ;;  %v4887_v59 = vsel %vm2874_vm8, %v4880_v3, %v4618_v52 }
 0xad8   :  { %4888 = vst [vmem:[#allocation6] sm:$0x3] %v4887_v59 }
 0xae1   :  { %v5333_v30 = vpop.eup %5332 }
 0xae2   :  { %v4882_v6 = vmul.f32 %v5333_v30, %v4877_v44 }
 0xae4   :  { %v4889_v0 = vsel %vm2874_vm8, %v4882_v6, %v7830_v20  ;;  %v4893_v37 = vsel %vm2874_vm8, %v4882_v6, 0.0 }
 0xae5   :  { %4894 = vst [vmem:[#allocation15 + $0x2] sm:$0x3] %v4893_v37  ;;  %4890 = vst [vmem:[#allocation5] sm:$0x3] %v4889_v0 }
 0xae6   :  { %5561 = shalt.err (!%p5558_p8)
}
 0xae7   :  { %s5562_s10 = scalar_lea.hbm %s7888_s6, 512 }
 0xae8   :  { %p5563_p9 = scmp.ne.s32.totalorder %s7888_s6, %s5562_s10  ;;  %p5566_p10 = scmp.lt.u32.totalorder %s5562_s10, %s7888_s6 }
 0xaea   :  { %p5568_p11 = pnand %p5566_p10, %p5563_p9 }
 0xaec   :  { %5571 = shalt.err (!%p5568_p11)
}
 0xaed   :  { %s5617_s15 = smov 64   ;;  %s5618_s0 = smov 4   ;;  %v4897_v20 = vld [vmem:[#allocation5] sm:$0x3] }
 0xaee   :  { %4910 = dma.vmem_to_hbm [thread:$0]  %s4905_s29, 512, %s7888_s6, [#allocation9], %s5617_s15, %s5617_s15, %s5618_s0   ;;  %4898 = vst [vmem:[#allocation16 + $0x2] sm:$0x3] %v4897_v20 }
 0xaef   :  { %s5619_s18 = smov [#allocation16]  }
 0xaf0   :  { %s4917_s19 = sshll.u32 %s5619_s18, 4  ;;  %s4918_s19 = int_to_ptr.vmem [resolvable:$true] %s4917_s19 }
 0xaf1   :  { %s5572_s20 = scalar_lea.vmem %s4918_s19, 64  ;;  %p5577_p13 = scmp.lt.s32.totalorder %s4918_s19, %s4918_s19 }
 0xaf2   :  { %p5573_p12 = scmp.ne.s32.totalorder %s4918_s19, %s5572_s20  ;;  %p5578_p0 = scmp.lt.s32.totalorder %s5572_s20, %s5572_s20 }
 0xaf4   :  { %p5579_p1 = por %p5578_p0, %p5577_p13 }
 0xaf6   :  { %p5580_p2 = pnand %p5579_p1, %p5573_p12 }
 0xaf8   :  { %5583 = shalt.err (!%p5580_p2)
}
 0xaf9   :  { %s5584_s23 = scalar_lea.hbm %s7889_s7, 64 }
 0xafa   :  { %p5585_p3 = scmp.ne.s32.totalorder %s7889_s7, %s5584_s23  ;;  %p5588_p4 = scmp.lt.u32.totalorder %s5584_s23, %s7889_s7 }
 0xafc   :  { %p5590_p5 = pnand %p5588_p4, %p5585_p3 }
 0xafe   :  { %5593 = shalt.err (!%p5590_p5)
}
 0xaff   :  { %4920 = dma.vmem_to_hbm [thread:$0]  %s4918_s19, 64, %s7889_s7, [#allocation17]  }
 0xb00   :  { %5600 = dma.done.wait [#allocation9], 512  }
 0xb01   :  { %5601 = vsyncadd [#allocation9], 4294966784 }
 0xb02   :  { %5602 = dma.done.wait [#allocation17], 64  }
 0xb03   :  { %5603 = vsyncadd [#allocation17], 4294967232 }
 0xb04   :  { %4927 = vsyncpa [#allocation8], 1 }
 0xb05   :  { %4928 = vsyncpa [#allocation11], 1 }
 0xb06   :  { %4929 = vsyncpa [#allocation14], 1 }
 0xb07   :  { %4930 = vsyncpa [#allocation9], 1 }
 0xb08   :  { %4931 = vsyncpa [#allocation17], 1 }

</bundles_post_ra>
